<compile_context>
chip_gen: v6e
topology: v6e:2x2x1
jax: 0.10.0
libtpu: 0.0.40
codegen_flags: <defaults>
</compile_context>

<pallas_src>
import functools

import jax
import jax.numpy as jnp
from jax.experimental import pallas as pl
from jax.experimental.pallas import tpu as pltpu


# ----------------------------------------------------------------------------
# Fused kernel: whole forward pass for a batch block of Bt images.
# ----------------------------------------------------------------------------
def _fused_forward_kernel(x_ref, t1_ref, b1_ref, t2_ref, b2_ref,
                          wf1_ref, bf1_ref, wf2_ref, bf2_ref,
                          o_ref, pad1_ref, pad2_ref):
    f32 = jnp.float32
    bf16 = jnp.bfloat16
    Bt = x_ref.shape[0]
    W1 = x_ref.shape[2]                       # 32
    H1 = pad1_ref.shape[1] - 2                # 32
    L1 = pad1_ref.shape[2]                    # 96  = Cin * W1
    C0 = L1 // W1                             # 3
    H2 = pad2_ref.shape[1] - 2                # 16
    L2 = pad2_ref.shape[2]                    # 256 = C1 * W1/2
    N1 = t1_ref.shape[2]                      # 512 = C1 * W1
    N2 = t2_ref.shape[2]                      # 256 = C2 * W1/2
    NH = wf1_ref.shape[0]                     # 8   (pooled rows feeding fc1)

    # Stage 0: scatter the NCHW input block into channel-major padded rows.
    # Only the two H-halo rows need zeroing (the W halo is folded into the
    # banded conv weights, and the interior is fully rewritten every step).
    zrow1 = jnp.zeros((Bt, 1, L1), f32)
    pad1_ref[:, 0:1, :] = zrow1
    pad1_ref[:, H1 + 1:H1 + 2, :] = zrow1
    for c in range(C0):
        pad1_ref[:, 1:H1 + 1, c * W1:(c + 1) * W1] = \
            x_ref[:, c * H1:(c + 1) * H1, :]

    def conv_relu_pool(pad_ref, t_ref, b_ref, H, Lin, N):
        # 3x3 conv (padding=1) as 3 banded row-matmuls (bf16 in, f32 accum).
        # Output columns are parity-major, so both directions of the 2x2
        # maxpool reduce to lane-half maxima (no strided slices / concats).
        acc = jnp.zeros((Bt * H, N), f32)
        for dy in range(3):
            win = pad_ref[:, dy:dy + H, :].reshape(Bt * H, Lin).astype(bf16)
            acc = acc + jnp.dot(win, t_ref[dy], preferred_element_type=f32)
        y = jnp.maximum(acc + b_ref[...], 0.0).reshape(Bt, H, N)
        q = jnp.maximum(y[..., :N // 2], y[..., N // 2:])       # pool along W
        z = q.reshape(Bt, H // 2, N)                            # merge row pairs
        return jnp.maximum(z[..., :N // 2], z[..., N // 2:])    # pool along H

    p1 = conv_relu_pool(pad1_ref, t1_ref, b1_ref, H1, L1, N1)   # (Bt, 16, 256)

    zrow2 = jnp.zeros((Bt, 1, L2), f32)
    pad2_ref[:, 0:1, :] = zrow2
    pad2_ref[:, H2 + 1:H2 + 2, :] = zrow2
    pad2_ref[:, 1:H2 + 1, :] = p1

    p2 = conv_relu_pool(pad2_ref, t2_ref, b2_ref, H2, L2, N2)   # (Bt, 8, 128)

    # Classifier.  torch.flatten(x,1)'s (C,H,W) order is folded into wf1,
    # stored per pooled row -> NH accumulated MXU matmuls, no relayout.
    h1 = jnp.zeros((Bt, wf1_ref.shape[2]), f32)
    for r in range(NH):
        h1 = h1 + jnp.dot(p2[:, r, :].astype(bf16), wf1_ref[r],
                          preferred_element_type=f32)
    h1 = jnp.maximum(h1 + bf1_ref[...], 0.0)
    # Dropout(0.1): identity at inference time.
    logits = jnp.dot(h1.astype(bf16), wf2_ref[...],
                     preferred_element_type=f32) + bf2_ref[...]
    o_ref[...] = logits.astype(o_ref.dtype)


# ----------------------------------------------------------------------------
# Wrapper
# ----------------------------------------------------------------------------
@functools.partial(jax.jit, static_argnames=("batch_block", "n_classes"))
def distil_forward(kparams, x_nchw, *, batch_block=8, n_classes=10):
    """x_nchw: (B, 3, 32, 32) float32.  Returns (B, n_classes) float32 logits."""
    B, C, H, W = x_nchw.shape
    assert H % 4 == 0 and W % 4 == 0
    Bt = batch_block
    Bp = pl.cdiv(B, Bt) * Bt

    N1 = kparams["t1"].shape[2]            # C1 * W
    L2 = N1 // 2                           # C1 * W/2  (conv2 input lanes)
    N2 = kparams["t2"].shape[2]            # C2 * W/2
    NCLS = kparams["wf2"].shape[1]         # classes padded to 128 lanes
    C1, C2 = N1 // W, N2 // (W // 2)

    # Free contiguous reshape (no HBM transpose): NCHW -> (B, C*H, W).
    x = x_nchw.reshape(B, C * H, W)
    if Bp != B:
        x = jnp.concatenate([x, jnp.zeros((Bp - B, C * H, W), x.dtype)], axis=0)

    flops = 2 * Bp * (H * W * 9 * C * C1
                      + (H // 2) * (W // 2) * 9 * C1 * C2
                      + kparams["wf1"].shape[0] * kparams["wf1"].shape[1]
                      * kparams["wf1"].shape[2]
                      + kparams["wf2"].shape[0] * NCLS)
    bytes_accessed = (Bp * C * H * W * 4 + Bp * NCLS * 4
                      + sum(int(v.size) * v.dtype.itemsize
                            for v in kparams.values()))

    def wspec(a):
        return pl.BlockSpec(a.shape, lambda b: (0,) * a.ndim)

    out = pl.pallas_call(
        _fused_forward_kernel,
        out_shape=jax.ShapeDtypeStruct((Bp, NCLS), jnp.float32),
        grid=(Bp // Bt,),
        in_specs=[
            pl.BlockSpec((Bt, C * H, W), lambda b: (b, 0, 0)),
            wspec(kparams["t1"]), wspec(kparams["b1"]),
            wspec(kparams["t2"]), wspec(kparams["b2"]),
            wspec(kparams["wf1"]), wspec(kparams["bf1"]),
            wspec(kparams["wf2"]), wspec(kparams["bf2"]),
        ],
        out_specs=pl.BlockSpec((Bt, NCLS), lambda b: (b, 0)),
        scratch_shapes=[
            pltpu.VMEM((Bt, H + 2, C * W), jnp.float32),       # conv1 padded rows
            pltpu.VMEM((Bt, H // 2 + 2, L2), jnp.float32),     # conv2 padded rows
        ],
        compiler_params=pltpu.CompilerParams(
            dimension_semantics=("parallel",),
            vmem_limit_bytes=48 * 1024 * 1024),
        cost_estimate=pl.CostEstimate(
            flops=flops, transcendentals=0, bytes_accessed=bytes_accessed),
    )(x, kparams["t1"], kparams["b1"], kparams["t2"], kparams["b2"],
      kparams["wf1"], kparams["bf1"], kparams["wf2"], kparams["bf2"])
    return out[:B, :n_classes]


# ----------------------------------------------------------------------------
# Parameters: PyTorch-layout init + one-time kernel-layout prep
# ----------------------------------------------------------------------------
def init_params(key, n_classes=10):
    """Random parameters in the PyTorch layouts of DistilModel."""
    ks = jax.random.split(key, 8)
    return {
        "w_conv1": 0.1 * jax.random.normal(ks[0], (16, 3, 3, 3), jnp.float32),
        "b_conv1": 0.01 * jax.random.normal(ks[1], (16,), jnp.float32),
        "w_conv2": 0.1 * jax.random.normal(ks[2], (16, 16, 3, 3), jnp.float32),
        "b_conv2": 0.01 * jax.random.normal(ks[3], (16,), jnp.float32),
        "w_fc1": 0.05 * jax.random.normal(ks[4], (256, 1024), jnp.float32),
        "b_fc1": 0.01 * jax.random.normal(ks[5], (256,), jnp.float32),
        "w_fc2": 0.05 * jax.random.normal(ks[6], (n_classes, 256), jnp.float32),
        "b_fc2": 0.01 * jax.random.normal(ks[7], (n_classes,), jnp.float32),
    }


def prepare_params(p):
    """One-time transform of PyTorch-layout params into kernel layouts."""
    f32 = jnp.float32

    def toeplitz(w, w_in):
        # (Cout, Cin, 3, 3) -> (3, Cin*w_in, Cout*w_in) bf16 banded matrices.
        # Row layout: ci*w_in + wi (channel-major rows, W zero-padding folded in).
        # Column layout (parity-major): (wo%2)*(Cout*w_in/2) + co*(w_in/2) + wo//2,
        # so the 2x2 maxpool becomes lane-half maxima in the kernel.
        cout, cin, kh, kw = w.shape
        half = w_in // 2
        wo = jnp.arange(w_in)
        mats = []
        for dy in range(kh):
            t4 = jnp.zeros((cin, w_in, cout, w_in), f32)
            for dx in range(kw):
                wi = wo + dx - 1
                valid = ((wi >= 0) & (wi < w_in)).astype(f32)
                sel = jnp.zeros((w_in, w_in), f32).at[
                    jnp.clip(wi, 0, w_in - 1), wo].set(valid)
                t4 = t4 + jnp.einsum("oc,ij->cioj",
                                     w[:, :, dy, dx].astype(f32), sel)
            t4 = t4.reshape(cin, w_in, cout, half, 2)        # wo -> (wo//2, parity)
            t4 = jnp.transpose(t4, (0, 1, 4, 2, 3))          # (ci, wi, par, co, w2)
            mats.append(t4.reshape(cin * w_in, cout * w_in))
        return jnp.stack(mats).astype(jnp.bfloat16)

    # fc1: fold torch's (C,H,W) flatten and the kernel's (h2, co*8+w2) feature
    # layout into the weight -> (8, 128, 256), one slice per pooled row.
    wf1 = p["w_fc1"].reshape(256, 16, 8, 8)                  # (n, co, h2, w2)
    wf1 = jnp.transpose(wf1, (2, 1, 3, 0)).reshape(8, 128, 256)

    n_cls = p["w_fc2"].shape[0]
    wf2 = jnp.zeros((256, 128), f32).at[:, :n_cls].set(p["w_fc2"].T)
    bf2 = jnp.zeros((128,), f32).at[:n_cls].set(p["b_fc2"])

    return {
        "t1": toeplitz(p["w_conv1"], 32),                              # (3, 96, 512) bf16
        "b1": jnp.tile(jnp.repeat(p["b_conv1"], 16), 2).reshape(1, 512).astype(f32),
        "t2": toeplitz(p["w_conv2"], 16),                              # (3, 256, 256) bf16
        "b2": jnp.tile(jnp.repeat(p["b_conv2"], 8), 2).reshape(1, 256).astype(f32),
        "wf1": wf1.astype(jnp.bfloat16),                               # (8, 128, 256) bf16
        "bf1": p["b_fc1"].reshape(1, 256).astype(f32),
        "wf2": wf2.astype(jnp.bfloat16),                               # (256, 128) bf16
        "bf2": bf2.reshape(1, 128).astype(f32),
    }


# ----------------------------------------------------------------------------
# Pure-JAX reference (mirrors the kernel's bf16-in / f32-accum numerics)
# ----------------------------------------------------------------------------
def reference_forward(p, x_nchw):
    bf = lambda a: a.astype(jnp.bfloat16)

    def conv_relu_pool(x, w, b):
        y = jax.lax.conv_general_dilated(
            bf(x), bf(w), window_strides=(1, 1), padding=((1, 1), (1, 1)),
            dimension_numbers=("NCHW", "OIHW", "NCHW"),
            preferred_element_type=jnp.float32)
        y = jnp.maximum(y + b[None, :, None, None], 0.0)
        return jax.lax.reduce_window(y, -jnp.inf, jax.lax.max,
                                     (1, 1, 2, 2), (1, 1, 2, 2), "VALID")

    x = conv_relu_pool(x_nchw, p["w_conv1"], p["b_conv1"])
    x = conv_relu_pool(x, p["w_conv2"], p["b_conv2"])
    x = x.reshape(x.shape[0], -1)                                      # NCHW flatten
    h = jnp.maximum(jnp.dot(bf(x), bf(p["w_fc1"].T),
                            preferred_element_type=jnp.float32) + p["b_fc1"], 0.0)
    return jnp.dot(bf(h), bf(p["w_fc2"].T),
                   preferred_element_type=jnp.float32) + p["b_fc2"]


if __name__ == "__main__":
    key = jax.random.PRNGKey(0)
    pkey, xkey = jax.random.split(key)
    params = init_params(pkey, n_classes=10)
    kparams = prepare_params(params)

    # Input must be 3x32x32 so the flattened feature size is 16*8*8 = 1024.
    # B=16 with batch_block=8 -> 2 grid steps (both v7x TensorCores active).
    x = jax.random.normal(xkey, (16, 3, 32, 32), jnp.float32)

    out = distil_forward(kparams, x)          # default batch_block=8
    out = jax.block_until_ready(out)

    assert out.shape == (16, 10), out.shape
    assert bool(jnp.all(jnp.isfinite(out)))

    ref = reference_forward(params, x)
    err = float(jnp.max(jnp.abs(out - ref)))
    assert bool(jnp.allclose(out, ref, atol=2e-2, rtol=2e-2)), err

    print("KERNEL_OK")
</pallas_src>

<mosaic_0001>
module attributes {stable_mosaic.version = 11 : i64} {
  func.func @_fused_forward_kernel(%arg0: i32, %arg1: memref<8x96x32xf32, #tpu.memory_space<vmem>>, %arg2: memref<3x96x512xbf16, #tpu.memory_space<vmem>>, %arg3: memref<1x512xf32, #tpu.memory_space<vmem>>, %arg4: memref<3x256x256xbf16, #tpu.memory_space<vmem>>, %arg5: memref<1x256xf32, #tpu.memory_space<vmem>>, %arg6: memref<8x128x256xbf16, #tpu.memory_space<vmem>>, %arg7: memref<1x256xf32, #tpu.memory_space<vmem>>, %arg8: memref<256x128xbf16, #tpu.memory_space<vmem>>, %arg9: memref<1x128xf32, #tpu.memory_space<vmem>>, %arg10: memref<8x128xf32, #tpu.memory_space<vmem>>, %arg11: memref<8x34x96xf32, #tpu.memory_space<vmem>>, %arg12: memref<8x18x256xf32, #tpu.memory_space<vmem>>) attributes {dimension_semantics = [#tpu.dimension_semantics<parallel>], iteration_bounds = array<i64: 2>, scalar_prefetch = 0 : i64, scratch_operands = 2 : i64, tpu.core_type = #tpu.core_type<tc>, window_params = [{transform_indices = @transform_0, window_bounds = array<i64: 8, 96, 32>}, {pipeline_mode = #tpu.pipeline_mode<synchronous>, transform_indices = @transform_1, window_bounds = array<i64: 3, 96, 512>}, {pipeline_mode = #tpu.pipeline_mode<synchronous>, transform_indices = @transform_2, window_bounds = array<i64: 1, 512>}, {pipeline_mode = #tpu.pipeline_mode<synchronous>, transform_indices = @transform_3, window_bounds = array<i64: 3, 256, 256>}, {pipeline_mode = #tpu.pipeline_mode<synchronous>, transform_indices = @transform_4, window_bounds = array<i64: 1, 256>}, {pipeline_mode = #tpu.pipeline_mode<synchronous>, transform_indices = @transform_5, window_bounds = array<i64: 8, 128, 256>}, {pipeline_mode = #tpu.pipeline_mode<synchronous>, transform_indices = @transform_6, window_bounds = array<i64: 1, 256>}, {pipeline_mode = #tpu.pipeline_mode<synchronous>, transform_indices = @transform_7, window_bounds = array<i64: 256, 128>}, {pipeline_mode = #tpu.pipeline_mode<synchronous>, transform_indices = @transform_8, window_bounds = array<i64: 1, 128>}, {transform_indices = @transform_9, window_bounds = array<i64: 8, 128>}]} {
    %cst = arith.constant 0.000000e+00 : f32
    %0 = vector.broadcast %cst : f32 to vector<8x1x96xf32>
    %c0 = arith.constant 0 : index
    %c0_0 = arith.constant 0 : index
    %c0_1 = arith.constant 0 : index
    %1 = vector.load %arg11[%c0, %c0_0, %c0_1] : memref<8x34x96xf32, #tpu.memory_space<vmem>>, vector<8x1x96xf32>
    tpu.vector_store %arg11[%c0, %c0_0, %c0_1], %0 {strides = array<i32>} : memref<8x34x96xf32, #tpu.memory_space<vmem>>, vector<8x1x96xf32>,
    %c0_2 = arith.constant 0 : index
    %c33 = arith.constant 33 : index
    %c0_3 = arith.constant 0 : index
    %2 = vector.load %arg11[%c0_2, %c33, %c0_3] : memref<8x34x96xf32, #tpu.memory_space<vmem>>, vector<8x1x96xf32>
    tpu.vector_store %arg11[%c0_2, %c33, %c0_3], %0 {strides = array<i32>} : memref<8x34x96xf32, #tpu.memory_space<vmem>>, vector<8x1x96xf32>,
    %c0_4 = arith.constant 0 : index
    %c0_5 = arith.constant 0 : index
    %c0_6 = arith.constant 0 : index
    %3 = vector.load %arg1[%c0_4, %c0_5, %c0_6] : memref<8x96x32xf32, #tpu.memory_space<vmem>>, vector<8x32x32xf32>
    %c0_7 = arith.constant 0 : index
    %c1 = arith.constant 1 : index
    %c0_8 = arith.constant 0 : index
    %4 = vector.load %arg11[%c0_7, %c1, %c0_8] : memref<8x34x96xf32, #tpu.memory_space<vmem>>, vector<8x32x32xf32>
    tpu.vector_store %arg11[%c0_7, %c1, %c0_8], %3 {strides = array<i32>} : memref<8x34x96xf32, #tpu.memory_space<vmem>>, vector<8x32x32xf32>,
    %c0_9 = arith.constant 0 : index
    %c32 = arith.constant 32 : index
    %c0_10 = arith.constant 0 : index
    %5 = vector.load %arg1[%c0_9, %c32, %c0_10] : memref<8x96x32xf32, #tpu.memory_space<vmem>>, vector<8x32x32xf32>
    %c0_11 = arith.constant 0 : index
    %c1_12 = arith.constant 1 : index
    %c32_13 = arith.constant 32 : index
    %6 = vector.load %arg11[%c0_11, %c1_12, %c32_13] : memref<8x34x96xf32, #tpu.memory_space<vmem>>, vector<8x32x32xf32>
    tpu.vector_store %arg11[%c0_11, %c1_12, %c32_13], %5 {strides = array<i32>} : memref<8x34x96xf32, #tpu.memory_space<vmem>>, vector<8x32x32xf32>,
    %c0_14 = arith.constant 0 : index
    %c64 = arith.constant 64 : index
    %c0_15 = arith.constant 0 : index
    %7 = vector.load %arg1[%c0_14, %c64, %c0_15] : memref<8x96x32xf32, #tpu.memory_space<vmem>>, vector<8x32x32xf32>
    %c0_16 = arith.constant 0 : index
    %c1_17 = arith.constant 1 : index
    %c64_18 = arith.constant 64 : index
    %8 = vector.load %arg11[%c0_16, %c1_17, %c64_18] : memref<8x34x96xf32, #tpu.memory_space<vmem>>, vector<8x32x32xf32>
    tpu.vector_store %arg11[%c0_16, %c1_17, %c64_18], %7 {strides = array<i32>} : memref<8x34x96xf32, #tpu.memory_space<vmem>>, vector<8x32x32xf32>,
    %cst_19 = arith.constant 0.000000e+00 : f32
    %9 = vector.broadcast %cst_19 : f32 to vector<256x512xf32>
    %c0_20 = arith.constant 0 : index
    %c0_21 = arith.constant 0 : index
    %c0_22 = arith.constant 0 : index
    %10 = vector.load %arg11[%c0_20, %c0_21, %c0_22] : memref<8x34x96xf32, #tpu.memory_space<vmem>>, vector<8x32x96xf32>
    %11 = vector.shape_cast %10 : vector<8x32x96xf32> to vector<256x96xf32>
    %12 = arith.truncf %11 : vector<256x96xf32> to vector<256x96xbf16>
    %c0_23 = arith.constant 0 : index
    %c0_24 = arith.constant 0 : index
    %c0_25 = arith.constant 0 : index
    %13 = vector.load %arg2[%c0_23, %c0_24, %c0_25] : memref<3x96x512xbf16, #tpu.memory_space<vmem>>, vector<1x96x512xbf16>
    %14 = vector.shape_cast %13 : vector<1x96x512xbf16> to vector<96x512xbf16>
    %cst_26 = arith.constant dense<0.000000e+00> : vector<256x512xf32>
    %15 = tpu.matmul %12, %14, %cst_26 {dimension_numbers = #tpu.dot_dimension_numbers<[1], [0], [0], [1], [0, 0, 1, 1], [], []>} : vector<256x96xbf16>, vector<96x512xbf16>, vector<256x512xf32> -> vector<256x512xf32>
    %16 = arith.addf %9, %15 : vector<256x512xf32>
    %c0_27 = arith.constant 0 : index
    %c1_28 = arith.constant 1 : index
    %c0_29 = arith.constant 0 : index
    %17 = vector.load %arg11[%c0_27, %c1_28, %c0_29] : memref<8x34x96xf32, #tpu.memory_space<vmem>>, vector<8x32x96xf32>
    %18 = vector.shape_cast %17 : vector<8x32x96xf32> to vector<256x96xf32>
    %19 = arith.truncf %18 : vector<256x96xf32> to vector<256x96xbf16>
    %c1_30 = arith.constant 1 : index
    %c0_31 = arith.constant 0 : index
    %c0_32 = arith.constant 0 : index
    %20 = vector.load %arg2[%c1_30, %c0_31, %c0_32] : memref<3x96x512xbf16, #tpu.memory_space<vmem>>, vector<1x96x512xbf16>
    %21 = vector.shape_cast %20 : vector<1x96x512xbf16> to vector<96x512xbf16>
    %cst_33 = arith.constant dense<0.000000e+00> : vector<256x512xf32>
    %22 = tpu.matmul %19, %21, %cst_33 {dimension_numbers = #tpu.dot_dimension_numbers<[1], [0], [0], [1], [0, 0, 1, 1], [], []>} : vector<256x96xbf16>, vector<96x512xbf16>, vector<256x512xf32> -> vector<256x512xf32>
    %23 = arith.addf %16, %22 : vector<256x512xf32>
    %c0_34 = arith.constant 0 : index
    %c2 = arith.constant 2 : index
    %c0_35 = arith.constant 0 : index
    %24 = vector.load %arg11[%c0_34, %c2, %c0_35] : memref<8x34x96xf32, #tpu.memory_space<vmem>>, vector<8x32x96xf32>
    %25 = vector.shape_cast %24 : vector<8x32x96xf32> to vector<256x96xf32>
    %26 = arith.truncf %25 : vector<256x96xf32> to vector<256x96xbf16>
    %c2_36 = arith.constant 2 : index
    %c0_37 = arith.constant 0 : index
    %c0_38 = arith.constant 0 : index
    %27 = vector.load %arg2[%c2_36, %c0_37, %c0_38] : memref<3x96x512xbf16, #tpu.memory_space<vmem>>, vector<1x96x512xbf16>
    %28 = vector.shape_cast %27 : vector<1x96x512xbf16> to vector<96x512xbf16>
    %cst_39 = arith.constant dense<0.000000e+00> : vector<256x512xf32>
    %29 = tpu.matmul %26, %28, %cst_39 {dimension_numbers = #tpu.dot_dimension_numbers<[1], [0], [0], [1], [0, 0, 1, 1], [], []>} : vector<256x96xbf16>, vector<96x512xbf16>, vector<256x512xf32> -> vector<256x512xf32>
    %30 = arith.addf %23, %29 : vector<256x512xf32>
    %c0_40 = arith.constant 0 : index
    %c0_41 = arith.constant 0 : index
    %31 = vector.load %arg3[%c0_40, %c0_41] : memref<1x512xf32, #tpu.memory_space<vmem>>, vector<1x512xf32>
    %32 = vector.broadcast %31 : vector<1x512xf32> to vector<256x512xf32>
    %33 = arith.addf %30, %32 : vector<256x512xf32>
    %cst_42 = arith.constant 0.000000e+00 : f32
    %34 = vector.broadcast %cst_42 : f32 to vector<256x512xf32>
    %35 = arith.maximumf %33, %34 : vector<256x512xf32>
    %36 = vector.shape_cast %35 : vector<256x512xf32> to vector<8x32x512xf32>
    %37 = vector.extract_strided_slice %36 {offsets = [0, 0, 0], sizes = [8, 32, 256], strides = [1, 1, 1]} : vector<8x32x512xf32> to vector<8x32x256xf32>
    %38 = vector.extract_strided_slice %36 {offsets = [0, 0, 256], sizes = [8, 32, 256], strides = [1, 1, 1]} : vector<8x32x512xf32> to vector<8x32x256xf32>
    %39 = arith.maximumf %37, %38 : vector<8x32x256xf32>
    %40 = vector.shape_cast %39 : vector<8x32x256xf32> to vector<8x16x512xf32>
    %41 = vector.extract_strided_slice %40 {offsets = [0, 0, 0], sizes = [8, 16, 256], strides = [1, 1, 1]} : vector<8x16x512xf32> to vector<8x16x256xf32>
    %42 = vector.extract_strided_slice %40 {offsets = [0, 0, 256], sizes = [8, 16, 256], strides = [1, 1, 1]} : vector<8x16x512xf32> to vector<8x16x256xf32>
    %43 = arith.maximumf %41, %42 : vector<8x16x256xf32>
    %cst_43 = arith.constant 0.000000e+00 : f32
    %44 = vector.broadcast %cst_43 : f32 to vector<8x1x256xf32>
    %c0_44 = arith.constant 0 : index
    %c0_45 = arith.constant 0 : index
    %c0_46 = arith.constant 0 : index
    %45 = vector.load %arg12[%c0_44, %c0_45, %c0_46] : memref<8x18x256xf32, #tpu.memory_space<vmem>>, vector<8x1x256xf32>
    tpu.vector_store %arg12[%c0_44, %c0_45, %c0_46], %44 {strides = array<i32>} : memref<8x18x256xf32, #tpu.memory_space<vmem>>, vector<8x1x256xf32>,
    %c0_47 = arith.constant 0 : index
    %c17 = arith.constant 17 : index
    %c0_48 = arith.constant 0 : index
    %46 = vector.load %arg12[%c0_47, %c17, %c0_48] : memref<8x18x256xf32, #tpu.memory_space<vmem>>, vector<8x1x256xf32>
    tpu.vector_store %arg12[%c0_47, %c17, %c0_48], %44 {strides = array<i32>} : memref<8x18x256xf32, #tpu.memory_space<vmem>>, vector<8x1x256xf32>,
    %c0_49 = arith.constant 0 : index
    %c1_50 = arith.constant 1 : index
    %c0_51 = arith.constant 0 : index
    %47 = vector.load %arg12[%c0_49, %c1_50, %c0_51] : memref<8x18x256xf32, #tpu.memory_space<vmem>>, vector<8x16x256xf32>
    tpu.vector_store %arg12[%c0_49, %c1_50, %c0_51], %43 {strides = array<i32>} : memref<8x18x256xf32, #tpu.memory_space<vmem>>, vector<8x16x256xf32>,
    %cst_52 = arith.constant 0.000000e+00 : f32
    %48 = vector.broadcast %cst_52 : f32 to vector<128x256xf32>
    %c0_53 = arith.constant 0 : index
    %c0_54 = arith.constant 0 : index
    %c0_55 = arith.constant 0 : index
    %49 = vector.load %arg12[%c0_53, %c0_54, %c0_55] : memref<8x18x256xf32, #tpu.memory_space<vmem>>, vector<8x16x256xf32>
    %50 = vector.shape_cast %49 : vector<8x16x256xf32> to vector<128x256xf32>
    %51 = arith.truncf %50 : vector<128x256xf32> to vector<128x256xbf16>
    %c0_56 = arith.constant 0 : index
    %c0_57 = arith.constant 0 : index
    %c0_58 = arith.constant 0 : index
    %52 = vector.load %arg4[%c0_56, %c0_57, %c0_58] : memref<3x256x256xbf16, #tpu.memory_space<vmem>>, vector<1x256x256xbf16>
    %53 = vector.shape_cast %52 : vector<1x256x256xbf16> to vector<256x256xbf16>
    %cst_59 = arith.constant dense<0.000000e+00> : vector<128x256xf32>
    %54 = tpu.matmul %51, %53, %cst_59 {dimension_numbers = #tpu.dot_dimension_numbers<[1], [0], [0], [1], [0, 0, 1, 1], [], []>} : vector<128x256xbf16>, vector<256x256xbf16>, vector<128x256xf32> -> vector<128x256xf32>
    %55 = arith.addf %48, %54 : vector<128x256xf32>
    %c0_60 = arith.constant 0 : index
    %c1_61 = arith.constant 1 : index
    %c0_62 = arith.constant 0 : index
    %56 = vector.load %arg12[%c0_60, %c1_61, %c0_62] : memref<8x18x256xf32, #tpu.memory_space<vmem>>, vector<8x16x256xf32>
    %57 = vector.shape_cast %56 : vector<8x16x256xf32> to vector<128x256xf32>
    %58 = arith.truncf %57 : vector<128x256xf32> to vector<128x256xbf16>
    %c1_63 = arith.constant 1 : index
    %c0_64 = arith.constant 0 : index
    %c0_65 = arith.constant 0 : index
    %59 = vector.load %arg4[%c1_63, %c0_64, %c0_65] : memref<3x256x256xbf16, #tpu.memory_space<vmem>>, vector<1x256x256xbf16>
    %60 = vector.shape_cast %59 : vector<1x256x256xbf16> to vector<256x256xbf16>
    %cst_66 = arith.constant dense<0.000000e+00> : vector<128x256xf32>
    %61 = tpu.matmul %58, %60, %cst_66 {dimension_numbers = #tpu.dot_dimension_numbers<[1], [0], [0], [1], [0, 0, 1, 1], [], []>} : vector<128x256xbf16>, vector<256x256xbf16>, vector<128x256xf32> -> vector<128x256xf32>
    %62 = arith.addf %55, %61 : vector<128x256xf32>
    %c0_67 = arith.constant 0 : index
    %c2_68 = arith.constant 2 : index
    %c0_69 = arith.constant 0 : index
    %63 = vector.load %arg12[%c0_67, %c2_68, %c0_69] : memref<8x18x256xf32, #tpu.memory_space<vmem>>, vector<8x16x256xf32>
    %64 = vector.shape_cast %63 : vector<8x16x256xf32> to vector<128x256xf32>
    %65 = arith.truncf %64 : vector<128x256xf32> to vector<128x256xbf16>
    %c2_70 = arith.constant 2 : index
    %c0_71 = arith.constant 0 : index
    %c0_72 = arith.constant 0 : index
    %66 = vector.load %arg4[%c2_70, %c0_71, %c0_72] : memref<3x256x256xbf16, #tpu.memory_space<vmem>>, vector<1x256x256xbf16>
    %67 = vector.shape_cast %66 : vector<1x256x256xbf16> to vector<256x256xbf16>
    %cst_73 = arith.constant dense<0.000000e+00> : vector<128x256xf32>
    %68 = tpu.matmul %65, %67, %cst_73 {dimension_numbers = #tpu.dot_dimension_numbers<[1], [0], [0], [1], [0, 0, 1, 1], [], []>} : vector<128x256xbf16>, vector<256x256xbf16>, vector<128x256xf32> -> vector<128x256xf32>
    %69 = arith.addf %62, %68 : vector<128x256xf32>
    %c0_74 = arith.constant 0 : index
    %c0_75 = arith.constant 0 : index
    %70 = vector.load %arg5[%c0_74, %c0_75] : memref<1x256xf32, #tpu.memory_space<vmem>>, vector<1x256xf32>
    %71 = vector.broadcast %70 : vector<1x256xf32> to vector<128x256xf32>
    %72 = arith.addf %69, %71 : vector<128x256xf32>
    %cst_76 = arith.constant 0.000000e+00 : f32
    %73 = vector.broadcast %cst_76 : f32 to vector<128x256xf32>
    %74 = arith.maximumf %72, %73 : vector<128x256xf32>
    %75 = vector.shape_cast %74 : vector<128x256xf32> to vector<8x16x256xf32>
    %76 = vector.extract_strided_slice %75 {offsets = [0, 0, 0], sizes = [8, 16, 128], strides = [1, 1, 1]} : vector<8x16x256xf32> to vector<8x16x128xf32>
    %77 = vector.extract_strided_slice %75 {offsets = [0, 0, 128], sizes = [8, 16, 128], strides = [1, 1, 1]} : vector<8x16x256xf32> to vector<8x16x128xf32>
    %78 = arith.maximumf %76, %77 : vector<8x16x128xf32>
    %79 = vector.shape_cast %78 : vector<8x16x128xf32> to vector<8x8x256xf32>
    %80 = vector.extract_strided_slice %79 {offsets = [0, 0, 0], sizes = [8, 8, 128], strides = [1, 1, 1]} : vector<8x8x256xf32> to vector<8x8x128xf32>
    %81 = vector.extract_strided_slice %79 {offsets = [0, 0, 128], sizes = [8, 8, 128], strides = [1, 1, 1]} : vector<8x8x256xf32> to vector<8x8x128xf32>
    %82 = arith.maximumf %80, %81 : vector<8x8x128xf32>
    %cst_77 = arith.constant 0.000000e+00 : f32
    %83 = vector.broadcast %cst_77 : f32 to vector<8x256xf32>
    %84 = vector.extract_strided_slice %82 {offsets = [0, 0, 0], sizes = [8, 1, 128], strides = [1, 1, 1]} : vector<8x8x128xf32> to vector<8x1x128xf32>
    %85 = vector.shape_cast %84 : vector<8x1x128xf32> to vector<8x128xf32>
    %86 = arith.truncf %85 : vector<8x128xf32> to vector<8x128xbf16>
    %c0_78 = arith.constant 0 : index
    %c0_79 = arith.constant 0 : index
    %c0_80 = arith.constant 0 : index
    %87 = vector.load %arg6[%c0_78, %c0_79, %c0_80] : memref<8x128x256xbf16, #tpu.memory_space<vmem>>, vector<1x128x256xbf16>
    %88 = vector.shape_cast %87 : vector<1x128x256xbf16> to vector<128x256xbf16>
    %cst_81 = arith.constant dense<0.000000e+00> : vector<8x256xf32>
    %89 = tpu.matmul %86, %88, %cst_81 {dimension_numbers = #tpu.dot_dimension_numbers<[1], [0], [0], [1], [0, 0, 1, 1], [], []>} : vector<8x128xbf16>, vector<128x256xbf16>, vector<8x256xf32> -> vector<8x256xf32>
    %90 = arith.addf %83, %89 : vector<8x256xf32>
    %91 = vector.extract_strided_slice %82 {offsets = [0, 1, 0], sizes = [8, 1, 128], strides = [1, 1, 1]} : vector<8x8x128xf32> to vector<8x1x128xf32>
    %92 = vector.shape_cast %91 : vector<8x1x128xf32> to vector<8x128xf32>
    %93 = arith.truncf %92 : vector<8x128xf32> to vector<8x128xbf16>
    %c1_82 = arith.constant 1 : index
    %c0_83 = arith.constant 0 : index
    %c0_84 = arith.constant 0 : index
    %94 = vector.load %arg6[%c1_82, %c0_83, %c0_84] : memref<8x128x256xbf16, #tpu.memory_space<vmem>>, vector<1x128x256xbf16>
    %95 = vector.shape_cast %94 : vector<1x128x256xbf16> to vector<128x256xbf16>
    %cst_85 = arith.constant dense<0.000000e+00> : vector<8x256xf32>
    %96 = tpu.matmul %93, %95, %cst_85 {dimension_numbers = #tpu.dot_dimension_numbers<[1], [0], [0], [1], [0, 0, 1, 1], [], []>} : vector<8x128xbf16>, vector<128x256xbf16>, vector<8x256xf32> -> vector<8x256xf32>
    %97 = arith.addf %90, %96 : vector<8x256xf32>
    %98 = vector.extract_strided_slice %82 {offsets = [0, 2, 0], sizes = [8, 1, 128], strides = [1, 1, 1]} : vector<8x8x128xf32> to vector<8x1x128xf32>
    %99 = vector.shape_cast %98 : vector<8x1x128xf32> to vector<8x128xf32>
    %100 = arith.truncf %99 : vector<8x128xf32> to vector<8x128xbf16>
    %c2_86 = arith.constant 2 : index
    %c0_87 = arith.constant 0 : index
    %c0_88 = arith.constant 0 : index
    %101 = vector.load %arg6[%c2_86, %c0_87, %c0_88] : memref<8x128x256xbf16, #tpu.memory_space<vmem>>, vector<1x128x256xbf16>
    %102 = vector.shape_cast %101 : vector<1x128x256xbf16> to vector<128x256xbf16>
    %cst_89 = arith.constant dense<0.000000e+00> : vector<8x256xf32>
    %103 = tpu.matmul %100, %102, %cst_89 {dimension_numbers = #tpu.dot_dimension_numbers<[1], [0], [0], [1], [0, 0, 1, 1], [], []>} : vector<8x128xbf16>, vector<128x256xbf16>, vector<8x256xf32> -> vector<8x256xf32>
    %104 = arith.addf %97, %103 : vector<8x256xf32>
    %105 = vector.extract_strided_slice %82 {offsets = [0, 3, 0], sizes = [8, 1, 128], strides = [1, 1, 1]} : vector<8x8x128xf32> to vector<8x1x128xf32>
    %106 = vector.shape_cast %105 : vector<8x1x128xf32> to vector<8x128xf32>
    %107 = arith.truncf %106 : vector<8x128xf32> to vector<8x128xbf16>
    %c3 = arith.constant 3 : index
    %c0_90 = arith.constant 0 : index
    %c0_91 = arith.constant 0 : index
    %108 = vector.load %arg6[%c3, %c0_90, %c0_91] : memref<8x128x256xbf16, #tpu.memory_space<vmem>>, vector<1x128x256xbf16>
    %109 = vector.shape_cast %108 : vector<1x128x256xbf16> to vector<128x256xbf16>
    %cst_92 = arith.constant dense<0.000000e+00> : vector<8x256xf32>
    %110 = tpu.matmul %107, %109, %cst_92 {dimension_numbers = #tpu.dot_dimension_numbers<[1], [0], [0], [1], [0, 0, 1, 1], [], []>} : vector<8x128xbf16>, vector<128x256xbf16>, vector<8x256xf32> -> vector<8x256xf32>
    %111 = arith.addf %104, %110 : vector<8x256xf32>
    %112 = vector.extract_strided_slice %82 {offsets = [0, 4, 0], sizes = [8, 1, 128], strides = [1, 1, 1]} : vector<8x8x128xf32> to vector<8x1x128xf32>
    %113 = vector.shape_cast %112 : vector<8x1x128xf32> to vector<8x128xf32>
    %114 = arith.truncf %113 : vector<8x128xf32> to vector<8x128xbf16>
    %c4 = arith.constant 4 : index
    %c0_93 = arith.constant 0 : index
    %c0_94 = arith.constant 0 : index
    %115 = vector.load %arg6[%c4, %c0_93, %c0_94] : memref<8x128x256xbf16, #tpu.memory_space<vmem>>, vector<1x128x256xbf16>
    %116 = vector.shape_cast %115 : vector<1x128x256xbf16> to vector<128x256xbf16>
    %cst_95 = arith.constant dense<0.000000e+00> : vector<8x256xf32>
    %117 = tpu.matmul %114, %116, %cst_95 {dimension_numbers = #tpu.dot_dimension_numbers<[1], [0], [0], [1], [0, 0, 1, 1], [], []>} : vector<8x128xbf16>, vector<128x256xbf16>, vector<8x256xf32> -> vector<8x256xf32>
    %118 = arith.addf %111, %117 : vector<8x256xf32>
    %119 = vector.extract_strided_slice %82 {offsets = [0, 5, 0], sizes = [8, 1, 128], strides = [1, 1, 1]} : vector<8x8x128xf32> to vector<8x1x128xf32>
    %120 = vector.shape_cast %119 : vector<8x1x128xf32> to vector<8x128xf32>
    %121 = arith.truncf %120 : vector<8x128xf32> to vector<8x128xbf16>
    %c5 = arith.constant 5 : index
    %c0_96 = arith.constant 0 : index
    %c0_97 = arith.constant 0 : index
    %122 = vector.load %arg6[%c5, %c0_96, %c0_97] : memref<8x128x256xbf16, #tpu.memory_space<vmem>>, vector<1x128x256xbf16>
    %123 = vector.shape_cast %122 : vector<1x128x256xbf16> to vector<128x256xbf16>
    %cst_98 = arith.constant dense<0.000000e+00> : vector<8x256xf32>
    %124 = tpu.matmul %121, %123, %cst_98 {dimension_numbers = #tpu.dot_dimension_numbers<[1], [0], [0], [1], [0, 0, 1, 1], [], []>} : vector<8x128xbf16>, vector<128x256xbf16>, vector<8x256xf32> -> vector<8x256xf32>
    %125 = arith.addf %118, %124 : vector<8x256xf32>
    %126 = vector.extract_strided_slice %82 {offsets = [0, 6, 0], sizes = [8, 1, 128], strides = [1, 1, 1]} : vector<8x8x128xf32> to vector<8x1x128xf32>
    %127 = vector.shape_cast %126 : vector<8x1x128xf32> to vector<8x128xf32>
    %128 = arith.truncf %127 : vector<8x128xf32> to vector<8x128xbf16>
    %c6 = arith.constant 6 : index
    %c0_99 = arith.constant 0 : index
    %c0_100 = arith.constant 0 : index
    %129 = vector.load %arg6[%c6, %c0_99, %c0_100] : memref<8x128x256xbf16, #tpu.memory_space<vmem>>, vector<1x128x256xbf16>
    %130 = vector.shape_cast %129 : vector<1x128x256xbf16> to vector<128x256xbf16>
    %cst_101 = arith.constant dense<0.000000e+00> : vector<8x256xf32>
    %131 = tpu.matmul %128, %130, %cst_101 {dimension_numbers = #tpu.dot_dimension_numbers<[1], [0], [0], [1], [0, 0, 1, 1], [], []>} : vector<8x128xbf16>, vector<128x256xbf16>, vector<8x256xf32> -> vector<8x256xf32>
    %132 = arith.addf %125, %131 : vector<8x256xf32>
    %133 = vector.extract_strided_slice %82 {offsets = [0, 7, 0], sizes = [8, 1, 128], strides = [1, 1, 1]} : vector<8x8x128xf32> to vector<8x1x128xf32>
    %134 = vector.shape_cast %133 : vector<8x1x128xf32> to vector<8x128xf32>
    %135 = arith.truncf %134 : vector<8x128xf32> to vector<8x128xbf16>
    %c7 = arith.constant 7 : index
    %c0_102 = arith.constant 0 : index
    %c0_103 = arith.constant 0 : index
    %136 = vector.load %arg6[%c7, %c0_102, %c0_103] : memref<8x128x256xbf16, #tpu.memory_space<vmem>>, vector<1x128x256xbf16>
    %137 = vector.shape_cast %136 : vector<1x128x256xbf16> to vector<128x256xbf16>
    %cst_104 = arith.constant dense<0.000000e+00> : vector<8x256xf32>
    %138 = tpu.matmul %135, %137, %cst_104 {dimension_numbers = #tpu.dot_dimension_numbers<[1], [0], [0], [1], [0, 0, 1, 1], [], []>} : vector<8x128xbf16>, vector<128x256xbf16>, vector<8x256xf32> -> vector<8x256xf32>
    %139 = arith.addf %132, %138 : vector<8x256xf32>
    %c0_105 = arith.constant 0 : index
    %c0_106 = arith.constant 0 : index
    %140 = vector.load %arg7[%c0_105, %c0_106] : memref<1x256xf32, #tpu.memory_space<vmem>>, vector<1x256xf32>
    %141 = vector.broadcast %140 : vector<1x256xf32> to vector<8x256xf32>
    %142 = arith.addf %139, %141 : vector<8x256xf32>
    %cst_107 = arith.constant 0.000000e+00 : f32
    %143 = vector.broadcast %cst_107 : f32 to vector<8x256xf32>
    %144 = arith.maximumf %142, %143 : vector<8x256xf32>
    %145 = arith.truncf %144 : vector<8x256xf32> to vector<8x256xbf16>
    %c0_108 = arith.constant 0 : index
    %c0_109 = arith.constant 0 : index
    %146 = vector.load %arg8[%c0_108, %c0_109] : memref<256x128xbf16, #tpu.memory_space<vmem>>, vector<256x128xbf16>
    %cst_110 = arith.constant dense<0.000000e+00> : vector<8x128xf32>
    %147 = tpu.matmul %145, %146, %cst_110 {dimension_numbers = #tpu.dot_dimension_numbers<[1], [0], [0], [1], [0, 0, 1, 1], [], []>} : vector<8x256xbf16>, vector<256x128xbf16>, vector<8x128xf32> -> vector<8x128xf32>
    %c0_111 = arith.constant 0 : index
    %c0_112 = arith.constant 0 : index
    %148 = vector.load %arg9[%c0_111, %c0_112] : memref<1x128xf32, #tpu.memory_space<vmem>>, vector<1x128xf32>
    %149 = vector.broadcast %148 : vector<1x128xf32> to vector<8x128xf32>
    %150 = arith.addf %147, %149 : vector<8x128xf32>
    %c0_113 = arith.constant 0 : index
    %c0_114 = arith.constant 0 : index
    %151 = vector.load %arg10[%c0_113, %c0_114] : memref<8x128xf32, #tpu.memory_space<vmem>>, vector<8x128xf32>
    tpu.vector_store %arg10[%c0_113, %c0_114], %150 {strides = array<i32>} : memref<8x128xf32, #tpu.memory_space<vmem>>, vector<8x128xf32>,
    return
  }
  func.func @transform_0(%arg0: i32) -> (i32, i32, i32) {
    %c0_i32 = arith.constant 0 : i32
    %c0_i32_0 = arith.constant 0 : i32
    %c0_i32_1 = arith.constant 0 : i32
    return %arg0, %c0_i32, %c0_i32_0 : i32, i32, i32
  }
  func.func @transform_1(%arg0: i32) -> (i32, i32, i32) {
    %c0_i32 = arith.constant 0 : i32
    %c0_i32_0 = arith.constant 0 : i32
    %c0_i32_1 = arith.constant 0 : i32
    %c0_i32_2 = arith.constant 0 : i32
    return %c0_i32, %c0_i32_0, %c0_i32_1 : i32, i32, i32
  }
  func.func @transform_2(%arg0: i32) -> (i32, i32) {
    %c0_i32 = arith.constant 0 : i32
    %c0_i32_0 = arith.constant 0 : i32
    %c0_i32_1 = arith.constant 0 : i32
    return %c0_i32, %c0_i32_0 : i32, i32
  }
  func.func @transform_3(%arg0: i32) -> (i32, i32, i32) {
    %c0_i32 = arith.constant 0 : i32
    %c0_i32_0 = arith.constant 0 : i32
    %c0_i32_1 = arith.constant 0 : i32
    %c0_i32_2 = arith.constant 0 : i32
    return %c0_i32, %c0_i32_0, %c0_i32_1 : i32, i32, i32
  }
  func.func @transform_4(%arg0: i32) -> (i32, i32) {
    %c0_i32 = arith.constant 0 : i32
    %c0_i32_0 = arith.constant 0 : i32
    %c0_i32_1 = arith.constant 0 : i32
    return %c0_i32, %c0_i32_0 : i32, i32
  }
  func.func @transform_5(%arg0: i32) -> (i32, i32, i32) {
    %c0_i32 = arith.constant 0 : i32
    %c0_i32_0 = arith.constant 0 : i32
    %c0_i32_1 = arith.constant 0 : i32
    %c0_i32_2 = arith.constant 0 : i32
    return %c0_i32, %c0_i32_0, %c0_i32_1 : i32, i32, i32
  }
  func.func @transform_6(%arg0: i32) -> (i32, i32) {
    %c0_i32 = arith.constant 0 : i32
    %c0_i32_0 = arith.constant 0 : i32
    %c0_i32_1 = arith.constant 0 : i32
    return %c0_i32, %c0_i32_0 : i32, i32
  }
  func.func @transform_7(%arg0: i32) -> (i32, i32) {
    %c0_i32 = arith.constant 0 : i32
    %c0_i32_0 = arith.constant 0 : i32
    %c0_i32_1 = arith.constant 0 : i32
    return %c0_i32, %c0_i32_0 : i32, i32
  }
  func.func @transform_8(%arg0: i32) -> (i32, i32) {
    %c0_i32 = arith.constant 0 : i32
    %c0_i32_0 = arith.constant 0 : i32
    %c0_i32_1 = arith.constant 0 : i32
    return %c0_i32, %c0_i32_0 : i32, i32
  }
  func.func @transform_9(%arg0: i32) -> (i32, i32) {
    %c0_i32 = arith.constant 0 : i32
    %c0_i32_0 = arith.constant 0 : i32
    return %arg0, %c0_i32 : i32, i32
  }
}

</mosaic_0001>

<bundles_post_ra>
// kernel: distil_forward.1
= control target key start
LH: loop header
LB: loop body
LE: loop exit
PB: predicated region body
PF: predicated region fallthrough
CT: control target
= control target key end

     0   :  { %s12311_s0 = inlined_call_operand.hbm [shape: f32[16,96,32], index: 0, kind: input, shape index: {}]   ;;  %s12312_s1 = inlined_call_operand.hbm [shape: bf16[3,96,512], index: 1, kind: input, shape index: {}]   ;;  %s12313_s2 = inlined_call_operand.hbm [shape: f32[1,512], index: 2, kind: input, shape index: {}]   ;;  %s12314_s3 = inlined_call_operand.hbm [shape: bf16[3,256,256], index: 3, kind: input, shape index: {}]   ;;  %s12315_s4 = inlined_call_operand.vmem [shape: f32[1,256], index: 4, kind: input, shape index: {}]   ;;  %s12316_s5 = inlined_call_operand.hbm [shape: bf16[8,128,256], index: 5, kind: input, shape index: {}]   ;;  %s12317_s6 = inlined_call_operand.vmem [shape: f32[1,256], index: 6, kind: input, shape index: {}]   ;;  %s12318_s7 = inlined_call_operand.hbm [shape: bf16[256,128], index: 7, kind: input, shape index: {}]   ;;  %s12319_s8 = inlined_call_operand.vmem [shape: f32[1,128], index: 8, kind: input, shape index: {}]   ;;  %s12320_s9 = inlined_call_operand.hbm [shape: f32[16,128], index: 9, kind: output, shape index: {}]  }
   0x1   :  { %12338 = sst [smem:[#allocation204_spill]] %s12312_s1 }
   0x2   :  { %12339 = sst [smem:[#allocation205_spill]] %s12313_s2 }
   0x3   :  { %12340 = sst [smem:[#allocation206_spill]] %s12314_s3 }
   0x4   :  { %14 = vsyncpa [#allocation5], 0 }
   0x5   :  { %16 = vsyncpa [#allocation5 + $0x1], 0 }
   0x6   :  { %17 = vsyncpa [#allocation8], 0 }
   0x7   :  { %18 = vsyncpa [#allocation11], 0 }
   0x8   :  { %19 = vsyncpa [#allocation14], 0 }
   0x9   :  { %20 = vsyncpa [#allocation6], 0 }
   0xa   :  { %22 = vsyncpa [#allocation6 + $0x1], 0  ;;  %s9319_s30 = smov 0   ;;  %s9321_s10 = smov 0  }
   0xb   :  { %s9323_s11 = smov 0   ;;  %s9325_s12 = smov 0  }
   0xc LB: > { %s9250_s13 = smov [#allocation7]   ;;  %s9340_s15 = sadd.s32 4294967295, %s9248_s12   ;;  %s9248_s12 = sphi %s9325_s12, %s12940_s12   ;;  %s9244_s11 = sphi %s9323_s11, %s12939_s11   ;;  %s9240_s10 = sphi %s9321_s10, %s12938_s10   ;;  %s9236_s30 = sphi %s9319_s30, %s12937_s30  }
   0xd   : > { %s265_s14 = sshll.u32 %s9250_s13, 4  ;;  %p7980_p0 = scmp.ge.s32.totalorder %s9248_s12, 1  ;;  %s266_s14 = int_to_ptr.vmem [resolvable:$true] %s265_s14 }
   0xe   : > { %p12323_p1 = scmp.eq.s32.totalorder %s9340_s15, 0  ;;  %p253_p2 = scmp.lt.s32.totalorder %s9248_s12, 3 }
   0xf   : > { %s9251_s17 = smov [#allocation10]   ;;  %s9252_s20 = smov [#allocation9]  }
  0x10   : > { %p9345_p3 = pnand %p7980_p0, %p253_p2  ;;  %s289_s18 = sshll.u32 %s9251_s17, 4  ;;  %s9358_s18 = int_to_ptr.vmem [resolvable:$true] %s289_s18 }
  0x11   : > { %s9360_s21 = sshll.u32 %s9252_s20, 4  ;;  %s9025_s23 = scalar_lea.vmem %s266_s14, 9216  ;;  %s280_s21 = int_to_ptr.vmem [resolvable:$true] %s9360_s21 }
  0x12   : > { %s12341_s16 = scalar_select %p9345_p3, 1, 0 }
  0x13   : > { %p8459_p5 = pneg %p9345_p3  ;;  %p9026_p8 = scmp.ne.s32.totalorder %s266_s14, %s9025_s23 }
  0x14   : > { %p9033_p11 = scmp.lt.s32.totalorder %s266_s14, %s266_s14  ;;  %p9034_p12 = scmp.lt.s32.totalorder %s9025_s23, %s9025_s23 }
  0x15   : > { %p9354_p6 = pnand %p8459_p5, %p12323_p1 }
  0x16   : > { %p9035_p13 = por %p9034_p12, %p9033_p11 }
  0x17   : > { %p9364_p7 = pneg %p9354_p6 }
  0x19   : > { %p9028_p9 = pnand %p9026_p8, %p9364_p7 }
  0x1b   : > { %p9029_p10 = pneg %p9028_p9 }
  0x1d   : > { %p9036_p0 = pnand %p9035_p13, %p9029_p10 }
  0x1f   : > { %9039 = shalt.err (!%p9036_p0)
}
  0x20   : > { %s9253_s24 = smov 256   ;;  %s9254_s25 = smov 16  }
  0x21   : > { %s12344_s1 = sld [smem:[#allocation204_spill]]  ;;  %s9051_s28 = scalar_lea.vmem %s9358_s18, 12288 }
  0x22   : > { %p9052_p2 = scmp.ne.s32.totalorder %s9358_s18, %s9051_s28  ;;  %p9059_p9 = scmp.lt.s32.totalorder %s9358_s18, %s9358_s18 }
  0x23   : > { %p9060_p10 = scmp.lt.s32.totalorder %s9051_s28, %s9051_s28 }
  0x24   : > { %p9054_p5 = pnand %p9052_p2, %p9364_p7 }
  0x25   : > { %p9061_p11 = por %p9060_p10, %p9059_p9 }
  0x26   : > { %p9055_p8 = pneg %p9054_p5 }
  0x27   : > { %8462 = dma.hbm_to_vmem [thread:$0]  (!%p9354_p6), %s12344_s1, 9216, %s266_s14, [#allocation8], %s9253_s24, %s9253_s24, %s9254_s25  }
  0x28   : > { %p9062_p12 = pnand %p9061_p11, %p9055_p8 }
  0x2a   : > { %9065 = shalt.err (!%p9062_p12)
}
  0x2b   : > { %s12321_s29 = smov 128   ;;  %s12322_s13 = smov 8  }
  0x2c   : > { %s12345_s3 = sld [smem:[#allocation206_spill]]  ;;  %s9077_s20 = scalar_lea.vmem %s280_s21, 64 }
  0x2d   : > { %p9078_p13 = scmp.ne.s32.totalorder %s280_s21, %s9077_s20  ;;  %p9085_p5 = scmp.lt.s32.totalorder %s280_s21, %s280_s21 }
  0x2e   : > { %p9086_p8 = scmp.lt.s32.totalorder %s9077_s20, %s9077_s20 }
  0x2f   : > { %p9080_p0 = pnand %p9078_p13, %p9364_p7 }
  0x30   : > { %p9087_p9 = por %p9086_p8, %p9085_p5 }
  0x31   : > { %p9081_p2 = pneg %p9080_p0 }
  0x32   : > { %8468 = dma.hbm_to_vmem [thread:$0]  (!%p9354_p6), %s12345_s3, 12288, %s9358_s18, [#allocation11], %s12321_s29, %s12321_s29, %s12322_s13  }
  0x33   : > { %p9088_p10 = pnand %p9087_p9, %p9081_p2 }
  0x35   : > { %9091 = shalt.err (!%p9088_p10)
}
  0x36   : > { %s12346_s2 = sld [smem:[#allocation205_spill]]  ;;  %s9257_s25 = smov [#allocation12]  }
  0x37   : > { %s305_s18 = sshll.u32 %s9257_s25, 4  ;;  %s9258_s26 = smov [#allocation13]   ;;  %s306_s18 = int_to_ptr.vmem [resolvable:$true] %s305_s18 }
  0x38   : > { %s321_s27 = sshll.u32 %s9258_s26, 4  ;;  %s9103_s28 = scalar_lea.vmem %s306_s18, 16384  ;;  %s322_s27 = int_to_ptr.vmem [resolvable:$true] %s321_s27 }
  0x39   : > { %p9104_p11 = scmp.ne.s32.totalorder %s306_s18, %s9103_s28  ;;  %p9111_p0 = scmp.lt.s32.totalorder %s306_s18, %s306_s18 }
  0x3a   : > { %p9112_p2 = scmp.lt.s32.totalorder %s9103_s28, %s9103_s28 }
  0x3b   : > { %p9106_p12 = pnand %p9104_p11, %p9364_p7 }
  0x3c   : > { %8465 = dma.hbm_to_vmem [thread:$0]  (!%p9354_p6), %s12346_s2, 64, %s280_s21, [#allocation8]  }
  0x3d   : > { %p9107_p13 = pneg %p9106_p12  ;;  %p9113_p5 = por %p9112_p2, %p9111_p0 }
  0x3f   : > { %p9114_p8 = pnand %p9113_p5, %p9107_p13 }
  0x41   : > { %9117 = shalt.err (!%p9114_p8)
}
  0x42   : > { %8471 = dma.hbm_to_vmem [thread:$0]  (!%p9354_p6), %s12316_s5, 16384, %s306_s18, [#allocation11], %s12321_s29, %s12321_s29, %s12322_s13  }
  0x43   : > { %s9129_s17 = scalar_lea.vmem %s322_s27, 2048  ;;  %p9137_p12 = scmp.lt.s32.totalorder %s322_s27, %s322_s27 }
  0x44   : > { %p9130_p9 = scmp.ne.s32.totalorder %s322_s27, %s9129_s17  ;;  %p9138_p0 = scmp.lt.s32.totalorder %s9129_s17, %s9129_s17 }
  0x46   : > { %p9132_p10 = pnand %p9130_p9, %p9364_p7  ;;  %p9139_p13 = por %p9138_p0, %p9137_p12 }
  0x48   : > { %p9133_p11 = pneg %p9132_p10 }
  0x4a   : > { %p9140_p2 = pnand %p9139_p13, %p9133_p11 }
  0x4c   : > { %9143 = shalt.err (!%p9140_p2)
}
  0x4d   : > { %s9259_s20 = smov 64   ;;  %s9260_s22 = smov 4  }
  0x4e   : > { %8474 = dma.hbm_to_vmem [thread:$0]  (!%p9354_p6), %s12318_s7, 2048, %s322_s27, [#allocation14], %s9259_s20, %s9259_s20, %s9260_s22  }
  0x4f   : > { %s7979_s25 = sadd.s32 4294967294, %s9248_s12   ;;  %s9417_s18 = sadd.s32 1, %s9248_s12  }
  0x50   : > { %s35_s26 = sadd.s32 1, %s9244_s11  ;;  %s32_s28 = ssub.s32 %s9248_s12, %s9417_s18 }
  0x51   : > { %p42_p7 = scmp.ne.s32.totalorder %s9244_s11, %s9240_s10  ;;  %p33_p5 = scmp.eq.s32.totalorder %s32_s28, 0 }
  0x52   : > { %p43_p8 = scmp.eq.s32.totalorder %s9248_s12, 0  ;;  %p48_p9 = scmp.ne.s32.totalorder %s9240_s10, %s9236_s30 }
  0x53   : > { %p240_p10 = scmp.eq.s32.totalorder %s9340_s15, 1  ;;  %p246_p0 = scmp.eq.s32.totalorder %s7979_s25, 1 }
  0x54   : > { %s9429_s21 = scalar_select %p33_p5, %s9244_s11, %s35_s26  }
  0x55   : > { %p44_p11 = por %p43_p8, %p42_p7  ;;  %p9433_p12 = por %p12323_p1, %p48_p9 }
  0x56   : > { %p9437_p6 = por %p240_p10, %p42_p7  ;;  %p8488_p13 = scmp.lt.s32.totalorder %s9248_s12, 2 }
  0x57   : > { %s12347_s19 = scalar_select %p9433_p12, 1, 0 }
  0x58   : > { %s12348_s27 = scalar_select %p9437_p6, 1, 0 }
  0x59   : > { %s338_s14 = sand.u32 1, %s9244_s11   ;;  %p9443_p2 = por %p246_p0, %p48_p9 }
  0x5a   : > { %s8432_s20 = smul.u32 768, %s338_s14  ;;  %p9447_p5 = pnand %p8488_p13, %p44_p11 }
  0x5b   : > { %s12349_s17 = scalar_select %p9443_p2, 1, 0 }
  0x5c   : > { %s8433_s23 = smul.u32 12288, %s9248_s12  ;;  %s342_s25 = scalar_lea.vmem [#allocation4], %s8432_s20 }
  0x5d   : > { %s350_s29 = sshll.u32 %s342_s25, 4  ;;  %s9459_s13 = scalar_lea.sflag [#allocation5], %s338_s14  ;;  %s9457_s29 = int_to_ptr.vmem [resolvable:$true] %s350_s29 }
  0x5e   : > { %s9455_s28 = scalar_lea.hbm %s12311_s0, %s8433_s23  ;;  %p9146_p8 = pneg %p9447_p5 }
  0x5f   : > { %s9144_s1 = scalar_lea.hbm %s9455_s28, 12288  ;;  %s9149_s23 = scalar_lea.hbm %s12311_s0, 24576 }
  0x60   : > { %p9145_p7 = scmp.ne.s32.totalorder %s9455_s28, %s9144_s1  ;;  %p9150_p11 = scmp.lt.s32.totalorder %s9455_s28, %s12311_s0 }
  0x61   : > { %p9151_p0 = scmp.lt.s32.totalorder %s9149_s23, %s9144_s1 }
  0x62   : > { %p9147_p9 = pnand %p9146_p8, %p9145_p7 }
  0x63   : > { %p9152_p13 = por %p9151_p0, %p9150_p11 }
  0x64   : > { %p9148_p10 = pneg %p9147_p9 }
  0x66   : > { %p9153_p4 = pnand %p9152_p13, %p9148_p10 }
  0x68   : > { %9156 = shalt.err (!%p9153_p4)
}
  0x69   : > { %s9157_s14 = scalar_lea.vmem %s9457_s29, 12288  ;;  %s9261_s20 = smov [#allocation4]  }
  0x6a   : > { %p9158_p1 = scmp.ne.s32.totalorder %s9457_s29, %s9157_s14  ;;  %s9162_s25 = sshll.u32 %s9261_s20, 4  ;;  %s9163_s25 = int_to_ptr.vmem [resolvable:$false] %s9162_s25 }
  0x6b   : > { %s9164_s2 = scalar_lea.vmem %s9163_s25, 24576  ;;  %p9165_p9 = scmp.lt.s32.totalorder %s9457_s29, %s9163_s25 }
  0x6c   : > { %p9160_p2 = pnand %p9158_p1, %p9146_p8  ;;  %p9166_p6 = scmp.lt.s32.totalorder %s9164_s2, %s9157_s14 }
  0x6e   : > { %p9161_p7 = pneg %p9160_p2  ;;  %p9167_p12 = por %p9166_p6, %p9165_p9 }
  0x70   : > { %p9168_p3 = pnand %p9167_p12, %p9161_p7 }
  0x72   : > { %9171 = shalt.err (!%p9168_p3)
}
  0x73   : > { %s12351_s1 = smov 8   ;;  %s12352_s3 = smov 128  }
  0x74   : > { %8478 = dma.hbm_to_vmem [thread:$0]  (!%p9447_p5), %s9455_s28, 12288, %s9457_s29, %s9459_s13, %s12352_s3, %s12352_s3, %s12351_s1  }
  0x75   : > { %p12353_p1 = scmp.ne.s32.totalorder %s12341_s16, 0 }
  0x77   : > { %362 = sbr.rel (%p12353_p1) target bundleno = 1854 (0x73e), region = 56 }
  0x7c   : > { %s9486_s23 = sand.u32 1, %s9240_s10   ;;  %p12354_p3 = scmp.ne.s32.totalorder %s12347_s19, 0 }
  0x7d   : > { %s8434_s24 = smul.u32 768, %s9486_s23  ;;  %s365_s26 = scalar_lea.sflag [#allocation5], %s9486_s23 }
  0x7f   : > { %s9490_s14 = scalar_lea.vmem [#allocation4], %s8434_s24 }
  0x80   : > { %9215 = dma.done.wait (%p12354_p3), %s365_s26, 12288  }
  0x81   : > { %9217 = vsyncadd (%p12354_p3), %s365_s26, 4294955008  ;;  %p12355_p4 = scmp.eq.s32.totalorder %s9340_s15, 0 }
  0x83   : > { %9219 = dma.done.wait (%p12355_p4), [#allocation8], 9280   ;;  %p12356_p12 = pmov %p12355_p4 }
  0x84   : > { %p12357_p6 = pmov %p12355_p4 }
  0x85   : > { %9221 = vsyncadd (%p12356_p12), [#allocation8], 4294958016 }
  0x86   : > { %9223 = dma.done.wait (%p12357_p6), [#allocation11], 28672   ;;  %p12358_p2 = pmov %p12355_p4 }
  0x88   : > { %9225 = vsyncadd (%p12358_p2), [#allocation11], 4294938624  ;;  %p12359_p5 = pmov %p12358_p2 }
  0x89   : > { %p12360_p8 = pmov %p12358_p2 }
  0x8a   : > { %9227 = dma.done.wait (%p12359_p5), [#allocation14], 2048  }
  0x8b   : > { %9229 = vsyncadd (%p12360_p8), [#allocation14], 4294965248  ;;  %vm425_vm0 = vcmask 778240   ;;  %v12327_v0 = vmov 0.0   ;;  %v700_v1 = vld [vmem:[%s9490_s14 + $0x40] sm:$0xff]  ;;  %s9263_s16 = smov 64  }
  0x8c   : > { %426 = vst.msk [vmem:[#allocation2] sm:$0x1] %vm425_vm0, %v12327_v0  ;;  %427 = vst.msk [vmem:[#allocation2 + $0x28] sm:$0x1] %vm425_vm0, %v12327_v0  ;;  %v507_v2 = vld [vmem:[%s9490_s14 + $0x20] sm:$0xff]  ;;  %764 = vrot.lane.b32.xlu1 %v700_v1, %s9263_s16  ;;  %s9264_s29 = smov 32  }
  0x8d   : > { %428 = vst.msk [vmem:[#allocation2 + $0x50] sm:$0x1] %vm425_vm0, %v12327_v0  ;;  %429 = vst.msk [vmem:[#allocation2 + $0x78] sm:$0x1] %vm425_vm0, %v12327_v0  ;;  %571 = vrot.lane.b32.xlu0 %v507_v2, %s9264_s29  ;;  %v701_v3 = vld [vmem:[%s9490_s14 + $0x48] sm:$0xff]  ;;  %v12329_v5 = vmov 0  }
  0x8e   : > { %430 = vst.msk [vmem:[#allocation2 + $0xa0] sm:$0x1] %vm425_vm0, %v12327_v0  ;;  %431 = vst.msk [vmem:[#allocation2 + $0xc8] sm:$0x1] %vm425_vm0, %v12327_v0  ;;  %v508_v4 = vld [vmem:[%s9490_s14 + $0x28] sm:$0xff]  ;;  %1239 = vmatprep.mubr.bf16.mxu0 %v12329_v5  ;;  %1432 = vmatprep.mubr.bf16.mxu1 %v12329_v5  ;;  %v510_v6 = vld [vmem:[%s9490_s14 + $0x38] sm:$0xff] }
  0x8f   : > { %432 = vst.msk [vmem:[#allocation2 + $0xf0] sm:$0x1] %vm425_vm0, %v12327_v0  ;;  %433 = vst.msk [vmem:[#allocation2 + $0x118] sm:$0x1] %vm425_vm0, %v12327_v0  ;;  %v509_v7 = vld [vmem:[%s9490_s14 + $0x30] sm:$0xff]  ;;  %v703_v9 = vld [vmem:[%s9490_s14 + $0x58] sm:$0xff] }
  0x90   : > { %434 = vst.msk [vmem:[#allocation2 + $0x21] sm:$0x1] %vm425_vm0, %v12327_v0  ;;  %435 = vst.msk [vmem:[#allocation2 + $0x49] sm:$0x1] %vm425_vm0, %v12327_v0  ;;  %766 = vrot.lane.b32.xlu1 %v701_v3, %s9263_s16  ;;  %v8544_v8 = vld [vmem:[#allocation7 + $0x164] ss:$16 sps:$4 sm:$0xff]  }
  0x91   : > { %436 = vst.msk [vmem:[#allocation2 + $0x71] sm:$0x1] %vm425_vm0, %v12327_v0  ;;  %437 = vst.msk [vmem:[#allocation2 + $0x99] sm:$0x1] %vm425_vm0, %v12327_v0  ;;  %573 = vrot.lane.b32.xlu0 %v508_v4, %s9264_s29  ;;  %v702_v10 = vld [vmem:[%s9490_s14 + $0x50] sm:$0xff]  ;;  %1211 = vmatprep.subr.bf16.mxu0 %v8544_v8  ;;  %v512_v11 = vld [vmem:[%s9490_s14 + $0x88] sm:$0xff] }
  0x92   : > { %438 = vst.msk [vmem:[#allocation2 + $0xc1] sm:$0x1] %vm425_vm0, %v12327_v0  ;;  %439 = vst.msk [vmem:[#allocation2 + $0xe9] sm:$0x1] %vm425_vm0, %v12327_v0  ;;  %v511_v12 = vld [vmem:[%s9490_s14 + $0x80] sm:$0xff]  ;;  %v705_v13 = vld [vmem:[%s9490_s14 + $0xa8] sm:$0xff] }
  0x93   : > { %440 = vst.msk [vmem:[#allocation2 + $0x111] sm:$0x1] %vm425_vm0, %v12327_v0  ;;  %441 = vst.msk [vmem:[#allocation2 + $0x139] sm:$0x1] %vm425_vm0, %v12327_v0  ;;  %v704_v14 = vld [vmem:[%s9490_s14 + $0xa0] sm:$0xff]  ;;  %v514_v16 = vld [vmem:[%s9490_s14 + $0x98] sm:$0xff] }
  0x94   : > { %577 = vrot.lane.b32.xlu1 %v510_v6, %s9264_s29  ;;  %v8546_v15 = vld [vmem:[#allocation7 + $0x16c] ss:$16 sps:$4 sm:$0xff]   ;;  %v8548_v17 = vld [vmem:[#allocation7 + $0x160] ss:$16 sps:$4 sm:$0xff]   ;;  %v8549_v18 = vld [vmem:[#allocation7 + $0x168] ss:$16 sps:$4 sm:$0xff]  }
  0x95   : > { %575 = vrot.lane.b32.xlu0 %v509_v7, %s9264_s29  ;;  %v513_v19 = vld [vmem:[%s9490_s14 + $0x90] sm:$0xff]  ;;  %1404 = vmatprep.subr.bf16.mxu1 %v8546_v15  ;;  %v8552_v21 = vld [vmem:[#allocation7 + $0x14c] ss:$16 sps:$4 sm:$0xff]   ;;  %v8555_v23 = vld [vmem:[#allocation7 + $0x148] ss:$16 sps:$4 sm:$0xff]   ;;  %vm474_vm1 = vcmask 261120  }
  0x96   : > { %1212 = vmatpush1.bf16.msra.mxu0 %v8548_v17  ;;  %v8550_v20 = vld [vmem:[#allocation7 + $0x144] ss:$16 sps:$4 sm:$0xff]   ;;  %1405 = vmatpush1.bf16.msra.mxu1 %v8549_v18  ;;  %v8554_v22 = vld [vmem:[#allocation7 + $0x140] ss:$16 sps:$4 sm:$0xff]   ;;  %v707_v24 = vld [vmem:[%s9490_s14 + $0xb8] sm:$0xff]  ;;  %vm667_vm2 = vcmask 523520  }
  0x97   : > { %v706_v25 = vld [vmem:[%s9490_s14 + $0xb0] sm:$0xff]  ;;  %1213 = vmatprep.subr.bf16.mxu0 %v8550_v20  ;;  %1406 = vmatprep.subr.bf16.mxu1 %v8552_v21  ;;  %v8558_v27 = vld [vmem:[#allocation7 + $0x12c] ss:$16 sps:$4 sm:$0xff]   ;;  %v8561_v29 = vld [vmem:[#allocation7 + $0x128] ss:$16 sps:$4 sm:$0xff]   ;;  %vm860_vm3 = vcmask 785920  }
  0x98   : > { %770 = vrot.lane.b32.xlu1 %v703_v9, %s9263_s16  ;;  %v8556_v26 = vld [vmem:[#allocation7 + $0x124] ss:$16 sps:$4 sm:$0xff]   ;;  %v8560_v28 = vld [vmem:[#allocation7 + $0x120] ss:$16 sps:$4 sm:$0xff]   ;;  %v516_v31 = vld [vmem:[%s9490_s14 + $0xe8] sm:$0xff]  ;;  %vm1158_vm4 = vcmask 785408  }
  0x99   : > { %768 = vrot.lane.b32.xlu0 %v702_v10, %s9263_s16  ;;  %v442_v30 = vld [vmem:[%s9490_s14] sm:$0xff]  ;;  %v8564_v34 = vld [vmem:[#allocation7 + $0x10c] ss:$16 sps:$4 sm:$0xff]   ;;  %v8567_v36 = vld [vmem:[#allocation7 + $0x108] ss:$16 sps:$4 sm:$0xff]   ;;  %vm4543_vm6 = vcmask 1040384  }
  0x9a   : > { %1214 = vmatpush1.bf16.msra.mxu0 %v8554_v22  ;;  %1407 = vmatpush1.bf16.msra.mxu1 %v8555_v23  ;;  %475 = vst.msk [vmem:[#allocation2 + $0x1] sm:$0xff] %vm474_vm1, %v442_v30  ;;  %v8562_v32 = vld [vmem:[#allocation7 + $0x104] ss:$16 sps:$4 sm:$0xff]   ;;  %v8566_v35 = vld [vmem:[#allocation7 + $0x100] ss:$16 sps:$4 sm:$0xff]   ;;  %v443_v37 = vld [vmem:[%s9490_s14 + $0x8] sm:$0xff] }
  0x9b   : > { %1215 = vmatprep.subr.bf16.mxu0 %v8556_v26  ;;  %1408 = vmatprep.subr.bf16.mxu1 %v8558_v27  ;;  %v515_v33 = vld [vmem:[%s9490_s14 + $0xe0] sm:$0xff]  ;;  %v709_v38 = vld [vmem:[%s9490_s14 + $0x108] sm:$0xff]  ;;  %476 = vst.msk [vmem:[#allocation2 + $0x9] sm:$0xff] %vm474_vm1, %v443_v37  ;;  %v445_v43 = vld [vmem:[%s9490_s14 + $0x18] sm:$0xff]  ;;  %vm4848_vm7 = vcmask 1046528   ;;  %vm5620_vm8 = vcmask 1045504  }
  0x9c   : > { %581 = vrot.lane.b32.xlu1 %v512_v11, %s9264_s29  ;;  %v8568_v39 = vld [vmem:[#allocation7 + $0xe4] ss:$16 sps:$4 sm:$0xff]   ;;  %v8570_v40 = vld [vmem:[#allocation7 + $0xec] ss:$16 sps:$4 sm:$0xff]   ;;  %v8572_v42 = vld [vmem:[#allocation7 + $0xe0] ss:$16 sps:$4 sm:$0xff]  }
  0x9d   : > { %579 = vrot.lane.b32.xlu0 %v511_v12, %s9264_s29  ;;  %v708_v41 = vld [vmem:[%s9490_s14 + $0x100] sm:$0xff]  ;;  %v8573_v44 = vld [vmem:[#allocation7 + $0xe8] ss:$16 sps:$4 sm:$0xff]   ;;  %478 = vst.msk [vmem:[#allocation2 + $0x19] sm:$0xff] %vm474_vm1, %v445_v43  ;;  %v444_v45 = vld [vmem:[%s9490_s14 + $0x10] sm:$0xff]  ;;  %vm6413_vm9 = vcmask 1041409  }
  0x9e   : > { %1216 = vmatpush1.bf16.msra.mxu0 %v8560_v28  ;;  %1409 = vmatpush1.bf16.msra.mxu1 %v8561_v29  ;;  %v518_v46 = vld [vmem:[%s9490_s14 + $0xf8] sm:$0xff]  ;;  %477 = vst.msk [vmem:[#allocation2 + $0x11] sm:$0xff] %vm474_vm1, %v444_v45  ;;  %v8574_v47 = vld [vmem:[#allocation7 + $0xc4] ss:$16 sps:$4 sm:$0xff]   ;;  %v8578_v50 = vld [vmem:[#allocation7 + $0xc0] ss:$16 sps:$4 sm:$0xff]  }
  0x9f   : > { %1217 = vmatprep.subr.bf16.mxu0 %v8562_v32  ;;  %1410 = vmatprep.subr.bf16.mxu1 %v8564_v34  ;;  %v8576_v48 = vld [vmem:[#allocation7 + $0xcc] ss:$16 sps:$4 sm:$0xff]   ;;  %v517_v49 = vld [vmem:[%s9490_s14 + $0xf0] sm:$0xff]  ;;  %v8579_v51 = vld [vmem:[#allocation7 + $0xc8] ss:$16 sps:$4 sm:$0xff]   ;;  %vm6416_vm10 = vcmask 1042434  }
  0xa0   : > { %774 = vrot.lane.b32.xlu1 %v705_v13, %s9263_s16  ;;  %v8582_v52 = vld [vmem:[#allocation7 + $0xa4] ss:$16 sps:$4 sm:$0xff]   ;;  %v711_v53 = vld [vmem:[%s9490_s14 + $0x118] sm:$0xff]  ;;  %v447_v56 = vld [vmem:[%s9490_s14 + $0x68] sm:$0xff]  ;;  %vm6419_vm11 = vcmask 1043459   ;;  %vm6422_vm12 = vcmask 1044484  }
  0xa1   : > { %772 = vrot.lane.b32.xlu0 %v704_v14, %s9263_s16  ;;  %v710_v54 = vld [vmem:[%s9490_s14 + $0x110] sm:$0xff]  ;;  %v8585_v55 = vld [vmem:[#allocation7 + $0xac] ss:$16 sps:$4 sm:$0xff]   ;;  %v446_v57 = vld [vmem:[%s9490_s14 + $0x60] sm:$0xff]  ;;  %480 = vst.msk [vmem:[#allocation2 + $0x31] sm:$0xff] %vm474_vm1, %v447_v56  ;;  %vm6425_vm13 = vcmask 1045509  }
  0xa2   : > { %1218 = vmatpush1.bf16.msra.mxu0 %v8566_v35  ;;  %1411 = vmatpush1.bf16.msra.mxu1 %v8567_v36  ;;  %479 = vst.msk [vmem:[#allocation2 + $0x29] sm:$0xff] %vm474_vm1, %v446_v57  ;;  %v449_v58 = vld [vmem:[%s9490_s14 + $0x78] sm:$0xff]  ;;  %v448_v59 = vld [vmem:[%s9490_s14 + $0x70] sm:$0xff]  ;;  %v451_v60 = vld [vmem:[%s9490_s14 + $0xc8] sm:$0xff]  ;;  %vm6428_vm14 = vcmask 1046534   ;;  %vm6431_vm15 = vcmask 1047559  }
  0xa3   : > { %1219 = vmatprep.subr.bf16.mxu0 %v8568_v39  ;;  %1412 = vmatprep.subr.bf16.mxu1 %v8570_v40  ;;  %482 = vst.msk [vmem:[#allocation2 + $0x41] sm:$0xff] %vm474_vm1, %v449_v58  ;;  %481 = vst.msk [vmem:[#allocation2 + $0x39] sm:$0xff] %vm474_vm1, %v448_v59  ;;  %v450_v61 = vld [vmem:[%s9490_s14 + $0xc0] sm:$0xff]  ;;  %v520_v62 = vld [vmem:[%s9490_s14 + $0x148] sm:$0xff]  ;;  %s7996_s20 = sshll.u32 %s9486_s23, 3  ;;  %s8407_s1 = sshll.u32 %s9340_s15, 7 }
  0xa4   : > { %585 = vrot.lane.b32.xlu1 %v514_v16, %s9264_s29  ;;  %484 = vst.msk [vmem:[#allocation2 + $0x59] sm:$0xff] %vm474_vm1, %v451_v60  ;;  %483 = vst.msk [vmem:[#allocation2 + $0x51] sm:$0xff] %vm474_vm1, %v450_v61  ;;  %v519_v63 = vld [vmem:[%s9490_s14 + $0x140] sm:$0xff]  ;;  %v453_v1 = vld [vmem:[%s9490_s14 + $0xd8] sm:$0xff]  ;;  %s422_s3 = scalar_lea.vmem [#allocation15], %s7996_s20  ;;  %p12934_p11 = scmp.ne.s32.totalorder %s12348_s27, 0 }
  0xa5   : > { %583 = vrot.lane.b32.xlu0 %v513_v19, %s9264_s29  ;;  %v452_v2 = vld [vmem:[%s9490_s14 + $0xd0] sm:$0xff]  ;;  %v455_v3 = vld [vmem:[%s9490_s14 + $0x128] sm:$0xff]  ;;  %486 = vst.msk [vmem:[#allocation2 + $0x69] sm:$0xff] %vm474_vm1, %v453_v1  ;;  %v454_v4 = vld [vmem:[%s9490_s14 + $0x120] sm:$0xff]  ;;  %s7861_s24 = sshll.u32 %s422_s3, 4  ;;  %s9268_s15 = smov [#allocation15]   ;;  %s7862_s24 = int_to_ptr.vmem [resolvable:$true] %s7861_s24 }
  0xa6   : > { %1220 = vmatpush1.bf16.msra.mxu0 %v8572_v42  ;;  %1413 = vmatpush1.bf16.msra.mxu1 %v8573_v44  ;;  %485 = vst.msk [vmem:[#allocation2 + $0x61] sm:$0xff] %vm474_vm1, %v452_v2  ;;  %488 = vst.msk [vmem:[#allocation2 + $0x81] sm:$0xff] %vm474_vm1, %v455_v3  ;;  %v457_v6 = vld [vmem:[%s9490_s14 + $0x138] sm:$0xff]  ;;  %v456_v7 = vld [vmem:[%s9490_s14 + $0x130] sm:$0xff]  ;;  %s9172_s13 = scalar_lea.vmem %s7862_s24, 128  ;;  %s9176_s19 = sshll.u32 %s9268_s15, 4  ;;  %s9177_s19 = int_to_ptr.vmem [resolvable:$false] %s9176_s19 }
  0xa7   : > { %1221 = vmatprep.subr.bf16.mxu0 %v8574_v47  ;;  %1414 = vmatprep.subr.bf16.mxu1 %v8576_v48  ;;  %487 = vst.msk [vmem:[#allocation2 + $0x79] sm:$0xff] %vm474_vm1, %v454_v4  ;;  %490 = vst.msk [vmem:[#allocation2 + $0x91] sm:$0xff] %vm474_vm1, %v457_v6  ;;  %v713_v8 = vld [vmem:[%s9490_s14 + $0x168] sm:$0xff]  ;;  %v712_v9 = vld [vmem:[%s9490_s14 + $0x160] sm:$0xff]  ;;  %p9173_p10 = scmp.ne.s32.totalorder %s7862_s24, %s9172_s13  ;;  %s9178_s22 = scalar_lea.vmem %s9177_s19, 256 }
  0xa8   : > { %778 = vrot.lane.b32.xlu1 %v707_v24, %s9263_s16  ;;  %489 = vst.msk [vmem:[#allocation2 + $0x89] sm:$0xff] %vm474_vm1, %v456_v7  ;;  %v459_v10 = vld [vmem:[%s9490_s14 + $0x188] sm:$0xff]  ;;  %v458_v11 = vld [vmem:[%s9490_s14 + $0x180] sm:$0xff]  ;;  %v522_v12 = vld [vmem:[%s9490_s14 + $0x158] sm:$0xff]  ;;  %p9179_p7 = scmp.lt.s32.totalorder %s7862_s24, %s9177_s19  ;;  %p9180_p9 = scmp.lt.s32.totalorder %s9178_s22, %s9172_s13 }
  0xa9   : > { %776 = vrot.lane.b32.xlu0 %v706_v25, %s9263_s16  ;;  %v521_v13 = vld [vmem:[%s9490_s14 + $0x150] sm:$0xff]  ;;  %492 = vst.msk [vmem:[#allocation2 + $0xa9] sm:$0xff] %vm474_vm1, %v459_v10  ;;  %491 = vst.msk [vmem:[#allocation2 + $0xa1] sm:$0xff] %vm474_vm1, %v458_v11  ;;  %v715_v14 = vld [vmem:[%s9490_s14 + $0x178] sm:$0xff]  ;;  %p9174_p0 = pnand %p9173_p10, %p12934_p11 }
  0xaa   : > { %1222 = vmatpush1.bf16.msra.mxu0 %v8578_v50  ;;  %1415 = vmatpush1.bf16.msra.mxu1 %v8579_v51  ;;  %v714_v15 = vld [vmem:[%s9490_s14 + $0x170] sm:$0xff]  ;;  %v461_v16 = vld [vmem:[%s9490_s14 + $0x198] sm:$0xff]  ;;  %v524_v18 = vld [vmem:[%s9490_s14 + $0x1a8] sm:$0xff]  ;;  %p9181_p1 = por %p9180_p9, %p9179_p7 }
  0xab   : > { %1765 = vmatprep.subr.bf16.mxu0 %v8582_v52  ;;  %1958 = vmatprep.subr.bf16.mxu1 %v8585_v55  ;;  %v460_v17 = vld [vmem:[%s9490_s14 + $0x190] sm:$0xff]  ;;  %v523_v19 = vld [vmem:[%s9490_s14 + $0x1a0] sm:$0xff]  ;;  %494 = vst.msk [vmem:[#allocation2 + $0xb9] sm:$0xff] %vm474_vm1, %v461_v16  ;;  %v717_v20 = vld [vmem:[%s9490_s14 + $0x1c8] sm:$0xff]  ;;  %p9175_p13 = pneg %p9174_p0 }
  0xac   : > { %589 = vrot.lane.b32.xlu1 %v516_v31, %s9264_s29  ;;  %493 = vst.msk [vmem:[#allocation2 + $0xb1] sm:$0xff] %vm474_vm1, %v460_v17  ;;  %v716_v21 = vld [vmem:[%s9490_s14 + $0x1c0] sm:$0xff]  ;;  %v463_v22 = vld [vmem:[%s9490_s14 + $0x1e8] sm:$0xff]  ;;  %v526_v24 = vld [vmem:[%s9490_s14 + $0x1b8] sm:$0xff] }
  0xad   : > { %587 = vrot.lane.b32.xlu0 %v515_v33, %s9264_s29  ;;  %v462_v23 = vld [vmem:[%s9490_s14 + $0x1e0] sm:$0xff]  ;;  %v525_v25 = vld [vmem:[%s9490_s14 + $0x1b0] sm:$0xff]  ;;  %496 = vst.msk [vmem:[#allocation2 + $0xd1] sm:$0xff] %vm474_vm1, %v463_v22  ;;  %v719_v26 = vld [vmem:[%s9490_s14 + $0x1d8] sm:$0xff]  ;;  %p9182_p3 = pnand %p9181_p1, %p9175_p13 }
  0xae   : > { %495 = vst.msk [vmem:[#allocation2 + $0xc9] sm:$0xff] %vm474_vm1, %v462_v23  ;;  %v718_v27 = vld [vmem:[%s9490_s14 + $0x1d0] sm:$0xff]  ;;  %v465_v28 = vld [vmem:[%s9490_s14 + $0x1f8] sm:$0xff]  ;;  %v528_v30 = vld [vmem:[%s9490_s14 + $0x208] sm:$0xff] }
  0xaf   : > { %v464_v29 = vld [vmem:[%s9490_s14 + $0x1f0] sm:$0xff]  ;;  %v527_v31 = vld [vmem:[%s9490_s14 + $0x200] sm:$0xff]  ;;  %498 = vst.msk [vmem:[#allocation2 + $0xe1] sm:$0xff] %vm474_vm1, %v465_v28  ;;  %v721_v32 = vld [vmem:[%s9490_s14 + $0x228] sm:$0xff] }
  0xb0   : > { %782 = vrot.lane.b32.xlu1 %v709_v38, %s9263_s16  ;;  %497 = vst.msk [vmem:[#allocation2 + $0xd9] sm:$0xff] %vm474_vm1, %v464_v29  ;;  %v720_v33 = vld [vmem:[%s9490_s14 + $0x220] sm:$0xff]  ;;  %v467_v34 = vld [vmem:[%s9490_s14 + $0x248] sm:$0xff]  ;;  %v530_v36 = vld [vmem:[%s9490_s14 + $0x218] sm:$0xff] }
  0xb1   : > { %780 = vrot.lane.b32.xlu0 %v708_v41, %s9263_s16  ;;  %v466_v35 = vld [vmem:[%s9490_s14 + $0x240] sm:$0xff]  ;;  %v529_v37 = vld [vmem:[%s9490_s14 + $0x210] sm:$0xff]  ;;  %500 = vst.msk [vmem:[#allocation2 + $0xf9] sm:$0xff] %vm474_vm1, %v467_v34  ;;  %v723_v38 = vld [vmem:[%s9490_s14 + $0x238] sm:$0xff] }
  0xb2   : > { %499 = vst.msk [vmem:[#allocation2 + $0xf1] sm:$0xff] %vm474_vm1, %v466_v35  ;;  %v722_v39 = vld [vmem:[%s9490_s14 + $0x230] sm:$0xff]  ;;  %v469_v40 = vld [vmem:[%s9490_s14 + $0x258] sm:$0xff]  ;;  %v532_v42 = vld [vmem:[%s9490_s14 + $0x268] sm:$0xff] }
  0xb3   : > { %v468_v41 = vld [vmem:[%s9490_s14 + $0x250] sm:$0xff]  ;;  %v531_v43 = vld [vmem:[%s9490_s14 + $0x260] sm:$0xff]  ;;  %502 = vst.msk [vmem:[#allocation2 + $0x109] sm:$0xff] %vm474_vm1, %v469_v40  ;;  %v725_v44 = vld [vmem:[%s9490_s14 + $0x288] sm:$0xff] }
  0xb4   : > { %593 = vrot.lane.b32.xlu1 %v518_v46, %s9264_s29  ;;  %501 = vst.msk [vmem:[#allocation2 + $0x101] sm:$0xff] %vm474_vm1, %v468_v41  ;;  %v724_v45 = vld [vmem:[%s9490_s14 + $0x280] sm:$0xff]  ;;  %v471_v46 = vld [vmem:[%s9490_s14 + $0x2a8] sm:$0xff]  ;;  %v534_v48 = vld [vmem:[%s9490_s14 + $0x278] sm:$0xff] }
  0xb5   : > { %591 = vrot.lane.b32.xlu0 %v517_v49, %s9264_s29  ;;  %v470_v47 = vld [vmem:[%s9490_s14 + $0x2a0] sm:$0xff]  ;;  %v533_v49 = vld [vmem:[%s9490_s14 + $0x270] sm:$0xff]  ;;  %504 = vst.msk [vmem:[#allocation2 + $0x121] sm:$0xff] %vm474_vm1, %v471_v46  ;;  %v727_v50 = vld [vmem:[%s9490_s14 + $0x298] sm:$0xff] }
  0xb6   : > { %503 = vst.msk [vmem:[#allocation2 + $0x119] sm:$0xff] %vm474_vm1, %v470_v47  ;;  %v726_v51 = vld [vmem:[%s9490_s14 + $0x290] sm:$0xff]  ;;  %v473_v52 = vld [vmem:[%s9490_s14 + $0x2b8] sm:$0xff]  ;;  %v535_v55 = vld [vmem:[%s9490_s14 + $0x2c0] sm:$0xff] }
  0xb7   : > { %506 = vst.msk [vmem:[#allocation2 + $0x131] sm:$0xff] %vm474_vm1, %v473_v52  ;;  %v729_v56 = vld [vmem:[%s9490_s14 + $0x2e8] sm:$0xff]  ;;  %v728_v57 = vld [vmem:[%s9490_s14 + $0x2e0] sm:$0xff]  ;;  %v538_v60 = vld [vmem:[%s9490_s14 + $0x2d8] sm:$0xff] }
  0xb8   : > { %786 = vrot.lane.b32.xlu1 %v711_v53, %s9263_s16  ;;  %v472_v53 = vld [vmem:[%s9490_s14 + $0x2b0] sm:$0xff]  ;;  %v731_v1 = vld [vmem:[%s9490_s14 + $0x2f8] sm:$0xff] }
  0xb9   : > { %784 = vrot.lane.b32.xlu0 %v710_v54, %s9263_s16  ;;  %v536_v54 = vld [vmem:[%s9490_s14 + $0x2c8] sm:$0xff]  ;;  %505 = vst.msk [vmem:[#allocation2 + $0x129] sm:$0xff] %vm474_vm1, %v472_v53  ;;  %v537_v61 = vld [vmem:[%s9490_s14 + $0x2d0] sm:$0xff] }
  0xba   : > { %v730_v2 = vld [vmem:[%s9490_s14 + $0x2f0] sm:$0xff]  ;;  %v8583_v7 = vld [vmem:[#allocation7 + $0xa8] ss:$16 sps:$4 sm:$0xff]   ;;  %v8603_v29 = vld [vmem:[#allocation7 + $0x4c] ss:$16 sps:$4 sm:$0xff]  }
  0xbb   : > { %v8580_v6 = vld [vmem:[#allocation7 + $0xa0] ss:$16 sps:$4 sm:$0xff]   ;;  %v8589_v16 = vld [vmem:[#allocation7 + $0x88] ss:$16 sps:$4 sm:$0xff]   ;;  %v8600_v28 = vld [vmem:[#allocation7 + $0x44] ss:$16 sps:$4 sm:$0xff]  }
  0xbc   : > { %597 = vrot.lane.b32.xlu1 %v520_v62, %s9264_s29  ;;  %v8606_v34 = vld [vmem:[#allocation7 + $0x24] ss:$16 sps:$4 sm:$0xff]   ;;  %v8609_v35 = vld [vmem:[#allocation7 + $0x2c] ss:$16 sps:$4 sm:$0xff]   ;;  %v8604_v40 = vld [vmem:[#allocation7 + $0x20] ss:$16 sps:$4 sm:$0xff]  }
  0xbd   : > { %595 = vrot.lane.b32.xlu0 %v519_v63, %s9264_s29  ;;  %v8607_v41 = vld [vmem:[#allocation7 + $0x28] ss:$16 sps:$4 sm:$0xff]   ;;  %v8610_v47 = vld [vmem:[#allocation7] ss:$16 sps:$4 sm:$0xff]  }
  0xc0   : > { %790 = vrot.lane.b32.xlu1 %v713_v8, %s9263_s16 }
  0xc1   : > { %788 = vrot.lane.b32.xlu0 %v712_v9, %s9263_s16 }
  0xc4   : > { %601 = vrot.lane.b32.xlu1 %v522_v12, %s9264_s29  ;;  %v8588_v12 = vld [vmem:[#allocation7 + $0x84] ss:$16 sps:$4 sm:$0xff]  }
  0xc5   : > { %599 = vrot.lane.b32.xlu0 %v521_v13, %s9264_s29  ;;  %v8591_v13 = vld [vmem:[#allocation7 + $0x8c] ss:$16 sps:$4 sm:$0xff]  }
  0xc8   : > { %794 = vrot.lane.b32.xlu1 %v715_v14, %s9263_s16 }
  0xc9   : > { %792 = vrot.lane.b32.xlu0 %v714_v15, %s9263_s16  ;;  %v8586_v15 = vld [vmem:[#allocation7 + $0x80] ss:$16 sps:$4 sm:$0xff]  }
  0xcc   : > { %605 = vrot.lane.b32.xlu1 %v524_v18, %s9264_s29 }
  0xcd   : > { %603 = vrot.lane.b32.xlu0 %v523_v19, %s9264_s29  ;;  %v8594_v19 = vld [vmem:[#allocation7 + $0x64] ss:$16 sps:$4 sm:$0xff]  }
  0xd0   : > { %798 = vrot.lane.b32.xlu1 %v717_v20, %s9263_s16  ;;  %v8597_v20 = vld [vmem:[#allocation7 + $0x6c] ss:$16 sps:$4 sm:$0xff]  }
  0xd1   : > { %796 = vrot.lane.b32.xlu0 %v716_v21, %s9263_s16 }
  0xd4   : > { %609 = vrot.lane.b32.xlu1 %v526_v24, %s9264_s29 }
  0xd5   : > { %607 = vrot.lane.b32.xlu0 %v525_v25, %s9264_s29 }
  0xd8   : > { %802 = vrot.lane.b32.xlu1 %v719_v26, %s9263_s16  ;;  %v8592_v26 = vld [vmem:[#allocation7 + $0x60] ss:$16 sps:$4 sm:$0xff]  }
  0xd9   : > { %800 = vrot.lane.b32.xlu0 %v718_v27, %s9263_s16  ;;  %v8595_v27 = vld [vmem:[#allocation7 + $0x68] ss:$16 sps:$4 sm:$0xff]  }
  0xdc   : > { %613 = vrot.lane.b32.xlu1 %v528_v30, %s9264_s29 }
  0xdd   : > { %611 = vrot.lane.b32.xlu0 %v527_v31, %s9264_s29 }
  0xe0   : > { %806 = vrot.lane.b32.xlu1 %v721_v32, %s9263_s16  ;;  %v8598_v32 = vld [vmem:[#allocation7 + $0x40] ss:$16 sps:$4 sm:$0xff]  }
  0xe1   : > { %804 = vrot.lane.b32.xlu0 %v720_v33, %s9263_s16  ;;  %v8601_v33 = vld [vmem:[#allocation7 + $0x48] ss:$16 sps:$4 sm:$0xff]  }
  0xe4   : > { %617 = vrot.lane.b32.xlu1 %v530_v36, %s9264_s29 }
  0xe5   : > { %615 = vrot.lane.b32.xlu0 %v529_v37, %s9264_s29 }
  0xe8   : > { %810 = vrot.lane.b32.xlu1 %v723_v38, %s9263_s16 }
  0xe9   : > { %808 = vrot.lane.b32.xlu0 %v722_v39, %s9263_s16 }
  0xec   : > { %621 = vrot.lane.b32.xlu1 %v532_v42, %s9264_s29 }
  0xed   : > { %619 = vrot.lane.b32.xlu0 %v531_v43, %s9264_s29  ;;  %v8612_v43 = vld [vmem:[#allocation7 + $0x4] ss:$16 sps:$4 sm:$0xff]  }
  0xf0   : > { %814 = vrot.lane.b32.xlu1 %v725_v44, %s9263_s16  ;;  %v8615_v44 = vld [vmem:[#allocation7 + $0xc] ss:$16 sps:$4 sm:$0xff]  }
  0xf1   : > { %812 = vrot.lane.b32.xlu0 %v724_v45, %s9263_s16 }
  0xf4   : > { %625 = vrot.lane.b32.xlu1 %v534_v48, %s9264_s29  ;;  %v8613_v48 = vld [vmem:[#allocation7 + $0x8] ss:$16 sps:$4 sm:$0xff]  }
  0xf5   : > { %623 = vrot.lane.b32.xlu0 %v533_v49, %s9264_s29  ;;  %v8618_v49 = vld [vmem:[#allocation7 + $0x224] ss:$16 sps:$4 sm:$0xff]  }
  0xf8   : > { %818 = vrot.lane.b32.xlu1 %v727_v50, %s9263_s16  ;;  %v8621_v50 = vld [vmem:[#allocation7 + $0x22c] ss:$16 sps:$4 sm:$0xff]  }
  0xf9   : > { %816 = vrot.lane.b32.xlu0 %v726_v51, %s9263_s16 }
  0xfc   : > { %629 = vrot.lane.b32.xlu1 %v536_v54, %s9264_s29 }
  0xfd   : > { %627 = vrot.lane.b32.xlu0 %v535_v55, %s9264_s29 }
  0xfe   : > { %v765_v58 = vpop.permute.xlu1 %764 }
  0xff   : > { %v572_v59 = vpop.permute.xlu0 %571 }
 0x100   : > { %668 = vst.msk [vmem:[#allocation2 + $0x1] sm:$0xff] %vm667_vm2, %v572_v59  ;;  %822 = vrot.lane.b32.xlu1 %v729_v56, %s9263_s16 }
 0x101   : > { %861 = vst.msk [vmem:[#allocation2 + $0x1] sm:$0xff] %vm860_vm3, %v765_v58  ;;  %820 = vrot.lane.b32.xlu0 %v728_v57, %s9263_s16 }
 0x102   : > { %v767_v62 = vpop.permute.xlu1 %766 }
 0x103   : > { %v574_v63 = vpop.permute.xlu0 %573 }
 0x104   : > { %669 = vst.msk [vmem:[#allocation2 + $0x9] sm:$0xff] %vm667_vm2, %v574_v63  ;;  %633 = vrot.lane.b32.xlu1 %v538_v60, %s9264_s29 }
 0x105   : > { %862 = vst.msk [vmem:[#allocation2 + $0x9] sm:$0xff] %vm860_vm3, %v767_v62  ;;  %631 = vrot.lane.b32.xlu0 %v537_v61, %s9264_s29  ;;  %s7848_s29 = scalar_lea.sflag [#allocation6], %s9486_s23 }
 0x106   : > { %v578_v3 = vpop.permute.xlu1 %577 }
 0x107   : > { %v576_v4 = vpop.permute.xlu0 %575  ;;  %671 = vst.msk [vmem:[#allocation2 + $0x19] sm:$0xff] %vm667_vm2, %v578_v3 }
 0x108   : > { %670 = vst.msk [vmem:[#allocation2 + $0x11] sm:$0xff] %vm667_vm2, %v576_v4  ;;  %826 = vrot.lane.b32.xlu1 %v731_v1, %s9263_s16  ;;  %v965_v10 = vld [vmem:[#allocation2 + $0x1] sm:$0xff] }
 0x109   : > { %824 = vrot.lane.b32.xlu0 %v730_v2, %s9263_s16  ;;  %s12274_s16 = scalar_lea.hbm %s12320_s9, %s8407_s1 }
 0x10a   : > { %v771_v8 = vpop.permute.xlu1 %770 }
 0x10b   : > { %v769_v9 = vpop.permute.xlu0 %768  ;;  %864 = vst.msk [vmem:[#allocation2 + $0x19] sm:$0xff] %vm860_vm3, %v771_v8 }
 0x10c   : > { %863 = vst.msk [vmem:[#allocation2 + $0x11] sm:$0xff] %vm860_vm3, %v769_v9  ;;  %v966_v11 = vld [vmem:[#allocation2 + $0x9] sm:$0xff] }
 0x10d   : > { %v997_v14 = vpack.c.bf16 %v966_v11, %v965_v10 }
 0x10e   : > { %v582_v17 = vpop.permute.xlu1 %581 }
 0x10f   : > { %v580_v18 = vpop.permute.xlu0 %579  ;;  %8021 = vmatmul.mubr.msk.bf16.vlgmr.msra.gmra.mxu0 %vm1158_vm4, %v997_v14  ;;  %8037 = vmatmul.mubr.msk.bf16.vlgmr.msra.gmra.mxu1 %vm1158_vm4, %v997_v14  ;;  %673 = vst.msk [vmem:[#allocation2 + $0x31] sm:$0xff] %vm667_vm2, %v582_v17 }
 0x110   : > { %672 = vst.msk [vmem:[#allocation2 + $0x29] sm:$0xff] %vm667_vm2, %v580_v18  ;;  %1766 = vmatpush1.bf16.msra.mxu0 %v8580_v6  ;;  %1959 = vmatpush1.bf16.msra.mxu1 %v8583_v7 }
 0x111   : > { %1249 = vmatprep.mubr.bf16.mxu0 %v12329_v5  ;;  %1442 = vmatprep.mubr.bf16.mxu1 %v12329_v5 }
 0x112   : > { %1767 = vmatprep.subr.bf16.mxu0 %v8588_v12  ;;  %1960 = vmatprep.subr.bf16.mxu1 %v8591_v13  ;;  %v775_v21 = vpop.permute.xlu1 %774  ;;  %v968_v24 = vld [vmem:[#allocation2 + $0x19] sm:$0xff] }
 0x113   : > { %v773_v22 = vpop.permute.xlu0 %772  ;;  %v967_v23 = vld [vmem:[#allocation2 + $0x11] sm:$0xff]  ;;  %866 = vst.msk [vmem:[#allocation2 + $0x31] sm:$0xff] %vm860_vm3, %v775_v21 }
 0x114   : > { %865 = vst.msk [vmem:[#allocation2 + $0x29] sm:$0xff] %vm860_vm3, %v773_v22  ;;  %v998_v25 = vpack.c.bf16 %v968_v24, %v967_v23  ;;  %1768 = vmatpush1.bf16.msra.mxu0 %v8586_v15  ;;  %1961 = vmatpush1.bf16.msra.mxu1 %v8589_v16 }
 0x115   : > { %1769 = vmatprep.subr.bf16.mxu0 %v8594_v19  ;;  %1962 = vmatprep.subr.bf16.mxu1 %v8597_v20 }
 0x116   : > { %v586_v30 = vpop.permute.xlu1 %585 }
 0x117   : > { %v584_v31 = vpop.permute.xlu0 %583  ;;  %8022 = vmatmul.mubr.msk.bf16.gmra.mxu0 %vm1158_vm4, %v998_v25  ;;  %8038 = vmatmul.mubr.msk.bf16.gmra.mxu1 %vm1158_vm4, %v998_v25  ;;  %675 = vst.msk [vmem:[#allocation2 + $0x41] sm:$0xff] %vm667_vm2, %v586_v30 }
 0x118   : > { %674 = vst.msk [vmem:[#allocation2 + $0x39] sm:$0xff] %vm667_vm2, %v584_v31  ;;  %1259 = vmatprep.mubr.bf16.mxu0 %v12329_v5  ;;  %1452 = vmatprep.mubr.bf16.mxu1 %v12329_v5 }
 0x119   : > { %1770 = vmatpush1.bf16.msra.mxu0 %v8592_v26  ;;  %1963 = vmatpush1.bf16.msra.mxu1 %v8595_v27 }
 0x11a   : > { %1771 = vmatprep.subr.bf16.mxu0 %v8600_v28  ;;  %1964 = vmatprep.subr.bf16.mxu1 %v8603_v29  ;;  %v779_v36 = vpop.permute.xlu1 %778  ;;  %v970_v39 = vld [vmem:[#allocation2 + $0x31] sm:$0xff] }
 0x11b   : > { %v777_v37 = vpop.permute.xlu0 %776  ;;  %v969_v38 = vld [vmem:[#allocation2 + $0x29] sm:$0xff]  ;;  %868 = vst.msk [vmem:[#allocation2 + $0x41] sm:$0xff] %vm860_vm3, %v779_v36 }
 0x11c   : > { %867 = vst.msk [vmem:[#allocation2 + $0x39] sm:$0xff] %vm860_vm3, %v777_v37  ;;  %v999_v42 = vpack.c.bf16 %v970_v39, %v969_v38 }
 0x11d   : > { %1772 = vmatpush1.bf16.msra.mxu0 %v8598_v32  ;;  %1965 = vmatpush1.bf16.msra.mxu1 %v8601_v33 }
 0x11e   : > { %1773 = vmatprep.subr.bf16.mxu0 %v8606_v34  ;;  %1966 = vmatprep.subr.bf16.mxu1 %v8609_v35  ;;  %v590_v45 = vpop.permute.xlu1 %589 }
 0x11f   : > { %v588_v46 = vpop.permute.xlu0 %587  ;;  %8023 = vmatmul.mubr.msk.bf16.gmra.mxu0 %vm1158_vm4, %v999_v42  ;;  %8039 = vmatmul.mubr.msk.bf16.gmra.mxu1 %vm1158_vm4, %v999_v42  ;;  %677 = vst.msk [vmem:[#allocation2 + $0x59] sm:$0xff] %vm667_vm2, %v590_v45 }
 0x120   : > { %676 = vst.msk [vmem:[#allocation2 + $0x51] sm:$0xff] %vm667_vm2, %v588_v46  ;;  %1269 = vmatprep.mubr.bf16.mxu0 %v12329_v5  ;;  %1462 = vmatprep.mubr.bf16.mxu1 %v12329_v5 }
 0x121   : > { %1774 = vmatpush1.bf16.msra.mxu0 %v8604_v40  ;;  %1967 = vmatpush1.bf16.msra.mxu1 %v8607_v41 }
 0x122   : > { %1775 = vmatprep.subr.bf16.mxu0 %v8612_v43  ;;  %1968 = vmatprep.subr.bf16.mxu1 %v8615_v44  ;;  %v783_v51 = vpop.permute.xlu1 %782  ;;  %v972_v54 = vld [vmem:[#allocation2 + $0x41] sm:$0xff] }
 0x123   : > { %v781_v52 = vpop.permute.xlu0 %780  ;;  %v971_v53 = vld [vmem:[#allocation2 + $0x39] sm:$0xff]  ;;  %870 = vst.msk [vmem:[#allocation2 + $0x59] sm:$0xff] %vm860_vm3, %v783_v51 }
 0x124   : > { %869 = vst.msk [vmem:[#allocation2 + $0x51] sm:$0xff] %vm860_vm3, %v781_v52  ;;  %v1000_v55 = vpack.c.bf16 %v972_v54, %v971_v53 }
 0x125   : > { %1776 = vmatpush1.bf16.msra.mxu0 %v8610_v47  ;;  %1969 = vmatpush1.bf16.msra.mxu1 %v8613_v48 }
 0x126   : > { %2392 = vmatprep.subr.bf16.mxu0 %v8618_v49  ;;  %2585 = vmatprep.subr.bf16.mxu1 %v8621_v50  ;;  %v594_v56 = vpop.permute.xlu1 %593 }
 0x127   : > { %v592_v57 = vpop.permute.xlu0 %591  ;;  %8024 = vmatmul.mubr.msk.bf16.gmra.mxu0 %vm1158_vm4, %v1000_v55  ;;  %8040 = vmatmul.mubr.msk.bf16.gmra.mxu1 %vm1158_vm4, %v1000_v55  ;;  %679 = vst.msk [vmem:[#allocation2 + $0x69] sm:$0xff] %vm667_vm2, %v594_v56 }
 0x128   : > { %678 = vst.msk [vmem:[#allocation2 + $0x61] sm:$0xff] %vm667_vm2, %v592_v57  ;;  %1279 = vmatprep.mubr.bf16.mxu0 %v12329_v5  ;;  %1472 = vmatprep.mubr.bf16.mxu1 %v12329_v5 }
 0x12a   : > { %v787_v58 = vpop.permute.xlu1 %786  ;;  %v974_v61 = vld [vmem:[#allocation2 + $0x59] sm:$0xff] }
 0x12b   : > { %v785_v59 = vpop.permute.xlu0 %784  ;;  %v973_v60 = vld [vmem:[#allocation2 + $0x51] sm:$0xff]  ;;  %872 = vst.msk [vmem:[#allocation2 + $0x69] sm:$0xff] %vm860_vm3, %v787_v58 }
 0x12c   : > { %871 = vst.msk [vmem:[#allocation2 + $0x61] sm:$0xff] %vm860_vm3, %v785_v59  ;;  %v1001_v62 = vpack.c.bf16 %v974_v61, %v973_v60 }
 0x12e   : > { %v598_v63 = vpop.permute.xlu1 %597 }
 0x12f   : > { %v596_v1 = vpop.permute.xlu0 %595  ;;  %8025 = vmatmul.mubr.msk.bf16.gmra.mxu0 %vm1158_vm4, %v1001_v62  ;;  %8041 = vmatmul.mubr.msk.bf16.gmra.mxu1 %vm1158_vm4, %v1001_v62  ;;  %681 = vst.msk [vmem:[#allocation2 + $0x81] sm:$0xff] %vm667_vm2, %v598_v63 }
 0x130   : > { %680 = vst.msk [vmem:[#allocation2 + $0x79] sm:$0xff] %vm667_vm2, %v596_v1  ;;  %1289 = vmatprep.mubr.bf16.mxu0 %v12329_v5  ;;  %1482 = vmatprep.mubr.bf16.mxu1 %v12329_v5 }
 0x132   : > { %v791_v2 = vpop.permute.xlu1 %790  ;;  %v976_v6 = vld [vmem:[#allocation2 + $0x69] sm:$0xff] }
 0x133   : > { %v789_v3 = vpop.permute.xlu0 %788  ;;  %v975_v4 = vld [vmem:[#allocation2 + $0x61] sm:$0xff]  ;;  %874 = vst.msk [vmem:[#allocation2 + $0x81] sm:$0xff] %vm860_vm3, %v791_v2 }
 0x134   : > { %873 = vst.msk [vmem:[#allocation2 + $0x79] sm:$0xff] %vm860_vm3, %v789_v3  ;;  %v1002_v7 = vpack.c.bf16 %v976_v6, %v975_v4 }
 0x136   : > { %v602_v8 = vpop.permute.xlu1 %601 }
 0x137   : > { %v600_v9 = vpop.permute.xlu0 %599  ;;  %8026 = vmatmul.mubr.msk.bf16.gmra.mxu0 %vm1158_vm4, %v1002_v7  ;;  %8042 = vmatmul.mubr.msk.bf16.gmra.mxu1 %vm1158_vm4, %v1002_v7  ;;  %683 = vst.msk [vmem:[#allocation2 + $0x91] sm:$0xff] %vm667_vm2, %v602_v8 }
 0x138   : > { %682 = vst.msk [vmem:[#allocation2 + $0x89] sm:$0xff] %vm667_vm2, %v600_v9  ;;  %1299 = vmatprep.mubr.bf16.mxu0 %v12329_v5  ;;  %1492 = vmatprep.mubr.bf16.mxu1 %v12329_v5 }
 0x13a   : > { %v795_v10 = vpop.permute.xlu1 %794  ;;  %v978_v13 = vld [vmem:[#allocation2 + $0x81] sm:$0xff] }
 0x13b   : > { %v793_v11 = vpop.permute.xlu0 %792  ;;  %v977_v12 = vld [vmem:[#allocation2 + $0x79] sm:$0xff]  ;;  %876 = vst.msk [vmem:[#allocation2 + $0x91] sm:$0xff] %vm860_vm3, %v795_v10 }
 0x13c   : > { %875 = vst.msk [vmem:[#allocation2 + $0x89] sm:$0xff] %vm860_vm3, %v793_v11  ;;  %v1003_v14 = vpack.c.bf16 %v978_v13, %v977_v12  ;;  %v894_v12 = vld [vmem:[#allocation2 + $0x8] sm:$0xff]  ;;  %v8616_v13 = vld [vmem:[#allocation7 + $0x220] ss:$16 sps:$4 sm:$0xff]  }
 0x13e   : > { %v606_v15 = vpop.permute.xlu1 %605 }
 0x13f   : > { %v604_v16 = vpop.permute.xlu0 %603  ;;  %8027 = vmatmul.mubr.msk.bf16.gmra.mxu0 %vm1158_vm4, %v1003_v14  ;;  %8043 = vmatmul.mubr.msk.bf16.gmra.mxu1 %vm1158_vm4, %v1003_v14  ;;  %685 = vst.msk [vmem:[#allocation2 + $0xa9] sm:$0xff] %vm667_vm2, %v606_v15  ;;  %v8619_v14 = vld [vmem:[#allocation7 + $0x228] ss:$16 sps:$4 sm:$0xff]   ;;  %v893_v15 = vld [vmem:[#allocation2] sm:$0xff] }
 0x140   : > { %684 = vst.msk [vmem:[#allocation2 + $0xa1] sm:$0xff] %vm667_vm2, %v604_v16  ;;  %1309 = vmatprep.mubr.bf16.mxu0 %v12329_v5  ;;  %1502 = vmatprep.mubr.bf16.mxu1 %v12329_v5  ;;  %v925_v16 = vpack.c.bf16 %v894_v12, %v893_v15 }
 0x142   : > { %v799_v17 = vpop.permute.xlu1 %798  ;;  %v980_v20 = vld [vmem:[#allocation2 + $0x91] sm:$0xff] }
 0x143   : > { %v797_v18 = vpop.permute.xlu0 %796  ;;  %v979_v19 = vld [vmem:[#allocation2 + $0x89] sm:$0xff]  ;;  %878 = vst.msk [vmem:[#allocation2 + $0xa9] sm:$0xff] %vm860_vm3, %v799_v17  ;;  %v8624_v17 = vld [vmem:[#allocation7 + $0x204] ss:$16 sps:$4 sm:$0xff]  }
 0x144   : > { %877 = vst.msk [vmem:[#allocation2 + $0xa1] sm:$0xff] %vm860_vm3, %v797_v18  ;;  %v1004_v21 = vpack.c.bf16 %v980_v20, %v979_v19  ;;  %v8627_v18 = vld [vmem:[#allocation7 + $0x20c] ss:$16 sps:$4 sm:$0xff]   ;;  %v8622_v19 = vld [vmem:[#allocation7 + $0x200] ss:$16 sps:$4 sm:$0xff]  }
 0x145   : > { %v8625_v20 = vld [vmem:[#allocation7 + $0x208] ss:$16 sps:$4 sm:$0xff]  }
 0x146   : > { %v610_v22 = vpop.permute.xlu1 %609 }
 0x147   : > { %v608_v23 = vpop.permute.xlu0 %607  ;;  %8028 = vmatmul.mubr.msk.bf16.gmra.mxu0 %vm1158_vm4, %v1004_v21  ;;  %8044 = vmatmul.mubr.msk.bf16.gmra.mxu1 %vm1158_vm4, %v1004_v21  ;;  %687 = vst.msk [vmem:[#allocation2 + $0xb9] sm:$0xff] %vm667_vm2, %v610_v22  ;;  %v8630_v21 = vld [vmem:[#allocation7 + $0x1e4] ss:$16 sps:$4 sm:$0xff]   ;;  %v8633_v22 = vld [vmem:[#allocation7 + $0x1ec] ss:$16 sps:$4 sm:$0xff]  }
 0x148   : > { %686 = vst.msk [vmem:[#allocation2 + $0xb1] sm:$0xff] %vm667_vm2, %v608_v23  ;;  %1319 = vmatprep.mubr.bf16.mxu0 %v12329_v5  ;;  %1512 = vmatprep.mubr.bf16.mxu1 %v12329_v5  ;;  %v895_v23 = vld [vmem:[#allocation2 + $0x10] sm:$0xff] }
 0x14a   : > { %v803_v24 = vpop.permute.xlu1 %802  ;;  %v982_v27 = vld [vmem:[#allocation2 + $0xa9] sm:$0xff] }
 0x14b   : > { %v801_v25 = vpop.permute.xlu0 %800  ;;  %v981_v26 = vld [vmem:[#allocation2 + $0xa1] sm:$0xff]  ;;  %880 = vst.msk [vmem:[#allocation2 + $0xb9] sm:$0xff] %vm860_vm3, %v803_v24  ;;  %v896_v24 = vld [vmem:[#allocation2 + $0x18] sm:$0xff] }
 0x14c   : > { %879 = vst.msk [vmem:[#allocation2 + $0xb1] sm:$0xff] %vm860_vm3, %v801_v25  ;;  %v1005_v28 = vpack.c.bf16 %v982_v27, %v981_v26  ;;  %v926_v25 = vpack.c.bf16 %v896_v24, %v895_v23  ;;  %v8628_v26 = vld [vmem:[#allocation7 + $0x1e0] ss:$16 sps:$4 sm:$0xff]   ;;  %v8631_v27 = vld [vmem:[#allocation7 + $0x1e8] ss:$16 sps:$4 sm:$0xff]  }
 0x14e   : > { %v614_v29 = vpop.permute.xlu1 %613 }
 0x14f   : > { %v612_v30 = vpop.permute.xlu0 %611  ;;  %8029 = vmatmul.mubr.msk.bf16.gmra.mxu0 %vm1158_vm4, %v1005_v28  ;;  %8045 = vmatmul.mubr.msk.bf16.gmra.mxu1 %vm1158_vm4, %v1005_v28  ;;  %689 = vst.msk [vmem:[#allocation2 + $0xd1] sm:$0xff] %vm667_vm2, %v614_v29  ;;  %v8636_v28 = vld [vmem:[#allocation7 + $0x1c4] ss:$16 sps:$4 sm:$0xff]   ;;  %v8639_v29 = vld [vmem:[#allocation7 + $0x1cc] ss:$16 sps:$4 sm:$0xff]  }
 0x150   : > { %688 = vst.msk [vmem:[#allocation2 + $0xc9] sm:$0xff] %vm667_vm2, %v612_v30  ;;  %1329 = vmatprep.mubr.bf16.mxu0 %v12329_v5  ;;  %1522 = vmatprep.mubr.bf16.mxu1 %v12329_v5  ;;  %v897_v30 = vld [vmem:[#allocation2 + $0x28] sm:$0xff] }
 0x152   : > { %v807_v31 = vpop.permute.xlu1 %806  ;;  %v984_v34 = vld [vmem:[#allocation2 + $0xb9] sm:$0xff] }
 0x153   : > { %v805_v32 = vpop.permute.xlu0 %804  ;;  %v983_v33 = vld [vmem:[#allocation2 + $0xb1] sm:$0xff]  ;;  %882 = vst.msk [vmem:[#allocation2 + $0xd1] sm:$0xff] %vm860_vm3, %v807_v31 }
 0x154   : > { %881 = vst.msk [vmem:[#allocation2 + $0xc9] sm:$0xff] %vm860_vm3, %v805_v32  ;;  %v1006_v35 = vpack.c.bf16 %v984_v34, %v983_v33  ;;  %v8634_v31 = vld [vmem:[#allocation7 + $0x1c0] ss:$16 sps:$4 sm:$0xff]   ;;  %v8637_v32 = vld [vmem:[#allocation7 + $0x1c8] ss:$16 sps:$4 sm:$0xff]  }
 0x155   : > { %v898_v33 = vld [vmem:[#allocation2 + $0x30] sm:$0xff] }
 0x156   : > { %v618_v36 = vpop.permute.xlu1 %617  ;;  %v8642_v34 = vld [vmem:[#allocation7 + $0x1a4] ss:$16 sps:$4 sm:$0xff]  }
 0x157   : > { %v616_v37 = vpop.permute.xlu0 %615  ;;  %8030 = vmatmul.mubr.msk.bf16.gmra.mxu0 %vm1158_vm4, %v1006_v35  ;;  %8046 = vmatmul.mubr.msk.bf16.gmra.mxu1 %vm1158_vm4, %v1006_v35  ;;  %691 = vst.msk [vmem:[#allocation2 + $0xe1] sm:$0xff] %vm667_vm2, %v618_v36  ;;  %v8645_v35 = vld [vmem:[#allocation7 + $0x1ac] ss:$16 sps:$4 sm:$0xff]   ;;  %v927_v36 = vpack.c.bf16 %v898_v33, %v897_v30 }
 0x158   : > { %690 = vst.msk [vmem:[#allocation2 + $0xd9] sm:$0xff] %vm667_vm2, %v616_v37  ;;  %1339 = vmatprep.mubr.bf16.mxu0 %v12329_v5  ;;  %1532 = vmatprep.mubr.bf16.mxu1 %v12329_v5  ;;  %v8640_v37 = vld [vmem:[#allocation7 + $0x1a0] ss:$16 sps:$4 sm:$0xff]  }
 0x15a   : > { %v811_v38 = vpop.permute.xlu1 %810  ;;  %v986_v41 = vld [vmem:[#allocation2 + $0xd1] sm:$0xff] }
 0x15b   : > { %v809_v39 = vpop.permute.xlu0 %808  ;;  %v985_v40 = vld [vmem:[#allocation2 + $0xc9] sm:$0xff]  ;;  %884 = vst.msk [vmem:[#allocation2 + $0xe1] sm:$0xff] %vm860_vm3, %v811_v38 }
 0x15c   : > { %883 = vst.msk [vmem:[#allocation2 + $0xd9] sm:$0xff] %vm860_vm3, %v809_v39  ;;  %v1007_v42 = vpack.c.bf16 %v986_v41, %v985_v40  ;;  %v8643_v38 = vld [vmem:[#allocation7 + $0x1a8] ss:$16 sps:$4 sm:$0xff]   ;;  %v8648_v39 = vld [vmem:[#allocation7 + $0x184] ss:$16 sps:$4 sm:$0xff]  }
 0x15d   : > { %v8651_v40 = vld [vmem:[#allocation7 + $0x18c] ss:$16 sps:$4 sm:$0xff]   ;;  %v8646_v41 = vld [vmem:[#allocation7 + $0x180] ss:$16 sps:$4 sm:$0xff]  }
 0x15e   : > { %v622_v43 = vpop.permute.xlu1 %621  ;;  %v914_v15 = vld [vmem:[#allocation2 + $0xd0] sm:$0xff] }
 0x15f   : > { %v620_v44 = vpop.permute.xlu0 %619  ;;  %8031 = vmatmul.mubr.msk.bf16.gmra.mxu0 %vm1158_vm4, %v1007_v42  ;;  %8047 = vmatmul.mubr.msk.bf16.gmra.mxu1 %vm1158_vm4, %v1007_v42  ;;  %693 = vst.msk [vmem:[#allocation2 + $0xf9] sm:$0xff] %vm667_vm2, %v622_v43  ;;  %v8649_v42 = vld [vmem:[#allocation7 + $0x188] ss:$16 sps:$4 sm:$0xff]  }
 0x160   : > { %692 = vst.msk [vmem:[#allocation2 + $0xf1] sm:$0xff] %vm667_vm2, %v620_v44  ;;  %1349 = vmatprep.mubr.bf16.mxu0 %v12329_v5  ;;  %1542 = vmatprep.mubr.bf16.mxu1 %v12329_v5  ;;  %v899_v43 = vld [vmem:[#allocation2 + $0x38] sm:$0xff]  ;;  %v900_v44 = vld [vmem:[#allocation2 + $0x40] sm:$0xff] }
 0x162   : > { %v815_v45 = vpop.permute.xlu1 %814  ;;  %v988_v48 = vld [vmem:[#allocation2 + $0xe1] sm:$0xff] }
 0x163   : > { %v813_v46 = vpop.permute.xlu0 %812  ;;  %v987_v47 = vld [vmem:[#allocation2 + $0xd9] sm:$0xff]  ;;  %886 = vst.msk [vmem:[#allocation2 + $0xf9] sm:$0xff] %vm860_vm3, %v815_v45  ;;  %v928_v45 = vpack.c.bf16 %v900_v44, %v899_v43 }
 0x164   : > { %885 = vst.msk [vmem:[#allocation2 + $0xf1] sm:$0xff] %vm860_vm3, %v813_v46  ;;  %v1008_v49 = vpack.c.bf16 %v988_v48, %v987_v47  ;;  %v901_v46 = vld [vmem:[#allocation2 + $0x50] sm:$0xff]  ;;  %v902_v47 = vld [vmem:[#allocation2 + $0x58] sm:$0xff] }
 0x165   : > { %v929_v48 = vpack.c.bf16 %v902_v47, %v901_v46 }
 0x166   : > { %v626_v50 = vpop.permute.xlu1 %625 }
 0x167   : > { %v624_v51 = vpop.permute.xlu0 %623  ;;  %8032 = vmatmul.mubr.msk.bf16.gmra.mxu0 %vm1158_vm4, %v1008_v49  ;;  %8048 = vmatmul.mubr.msk.bf16.gmra.mxu1 %vm1158_vm4, %v1008_v49  ;;  %695 = vst.msk [vmem:[#allocation2 + $0x109] sm:$0xff] %vm667_vm2, %v626_v50  ;;  %v903_v49 = vld [vmem:[#allocation2 + $0x60] sm:$0xff]  ;;  %v904_v50 = vld [vmem:[#allocation2 + $0x68] sm:$0xff] }
 0x168   : > { %694 = vst.msk [vmem:[#allocation2 + $0x101] sm:$0xff] %vm667_vm2, %v624_v51  ;;  %1359 = vmatprep.mubr.bf16.mxu0 %v12329_v5  ;;  %1552 = vmatprep.mubr.bf16.mxu1 %v12329_v5  ;;  %v930_v51 = vpack.c.bf16 %v904_v50, %v903_v49 }
 0x16a   : > { %v819_v52 = vpop.permute.xlu1 %818  ;;  %v990_v55 = vld [vmem:[#allocation2 + $0xf9] sm:$0xff] }
 0x16b   : > { %v817_v53 = vpop.permute.xlu0 %816  ;;  %v989_v54 = vld [vmem:[#allocation2 + $0xf1] sm:$0xff]  ;;  %888 = vst.msk [vmem:[#allocation2 + $0x109] sm:$0xff] %vm860_vm3, %v819_v52 }
 0x16c   : > { %887 = vst.msk [vmem:[#allocation2 + $0x101] sm:$0xff] %vm860_vm3, %v817_v53  ;;  %v1009_v56 = vpack.c.bf16 %v990_v55, %v989_v54  ;;  %v905_v52 = vld [vmem:[#allocation2 + $0x78] sm:$0xff]  ;;  %v906_v53 = vld [vmem:[#allocation2 + $0x80] sm:$0xff]  ;;  %v907_v55 = vld [vmem:[#allocation2 + $0x88] sm:$0xff] }
 0x16d   : > { %v931_v54 = vpack.c.bf16 %v906_v53, %v905_v52 }
 0x16e   : > { %v630_v57 = vpop.permute.xlu1 %629 }
 0x16f   : > { %v628_v58 = vpop.permute.xlu0 %627  ;;  %8033 = vmatmul.mubr.msk.bf16.gmra.mxu0 %vm1158_vm4, %v1009_v56  ;;  %8049 = vmatmul.mubr.msk.bf16.gmra.mxu1 %vm1158_vm4, %v1009_v56  ;;  %697 = vst.msk [vmem:[#allocation2 + $0x121] sm:$0xff] %vm667_vm2, %v630_v57  ;;  %v908_v56 = vld [vmem:[#allocation2 + $0x90] sm:$0xff] }
 0x170   : > { %696 = vst.msk [vmem:[#allocation2 + $0x119] sm:$0xff] %vm667_vm2, %v628_v58  ;;  %1369 = vmatprep.mubr.bf16.mxu0 %v12329_v5  ;;  %1562 = vmatprep.mubr.bf16.mxu1 %v12329_v5  ;;  %v932_v57 = vpack.c.bf16 %v908_v56, %v907_v55  ;;  %v909_v58 = vld [vmem:[#allocation2 + $0xa0] sm:$0xff] }
 0x172   : > { %v823_v59 = vpop.permute.xlu1 %822  ;;  %v992_v62 = vld [vmem:[#allocation2 + $0x109] sm:$0xff] }
 0x173   : > { %v821_v60 = vpop.permute.xlu0 %820  ;;  %v991_v61 = vld [vmem:[#allocation2 + $0x101] sm:$0xff]  ;;  %890 = vst.msk [vmem:[#allocation2 + $0x121] sm:$0xff] %vm860_vm3, %v823_v59 }
 0x174   : > { %889 = vst.msk [vmem:[#allocation2 + $0x119] sm:$0xff] %vm860_vm3, %v821_v60  ;;  %v1010_v63 = vpack.c.bf16 %v992_v62, %v991_v61  ;;  %v910_v59 = vld [vmem:[#allocation2 + $0xa8] sm:$0xff]  ;;  %v919_v47 = vld [vmem:[#allocation2 + $0x100] sm:$0xff] }
 0x175   : > { %v933_v60 = vpack.c.bf16 %v910_v59, %v909_v58 }
 0x176   : > { %v634_v1 = vpop.permute.xlu1 %633 }
 0x177   : > { %v632_v2 = vpop.permute.xlu0 %631  ;;  %8034 = vmatmul.mubr.msk.bf16.gmra.mxu0 %vm1158_vm4, %v1010_v63  ;;  %8050 = vmatmul.mubr.msk.bf16.gmra.mxu1 %vm1158_vm4, %v1010_v63  ;;  %699 = vst.msk [vmem:[#allocation2 + $0x131] sm:$0xff] %vm667_vm2, %v634_v1 }
 0x178   : > { %698 = vst.msk [vmem:[#allocation2 + $0x129] sm:$0xff] %vm667_vm2, %v632_v2  ;;  %1379 = vmatprep.mubr.bf16.mxu0 %v12329_v5  ;;  %1572 = vmatprep.mubr.bf16.mxu1 %v12329_v5  ;;  %v911_v2 = vld [vmem:[#allocation2 + $0xb0] sm:$0xff] }
 0x17a   : > { %v827_v3 = vpop.permute.xlu1 %826  ;;  %v994_v7 = vld [vmem:[#allocation2 + $0x121] sm:$0xff] }
 0x17b   : > { %v825_v4 = vpop.permute.xlu0 %824  ;;  %v993_v6 = vld [vmem:[#allocation2 + $0x119] sm:$0xff]  ;;  %892 = vst.msk [vmem:[#allocation2 + $0x131] sm:$0xff] %vm860_vm3, %v827_v3 }
 0x17c   : > { %891 = vst.msk [vmem:[#allocation2 + $0x129] sm:$0xff] %vm860_vm3, %v825_v4  ;;  %v1011_v8 = vpack.c.bf16 %v994_v7, %v993_v6  ;;  %v912_v3 = vld [vmem:[#allocation2 + $0xb8] sm:$0xff]  ;;  %v922_v59 = vld [vmem:[#allocation2 + $0x120] sm:$0xff] }
 0x17d   : > { %v921_v58 = vld [vmem:[#allocation2 + $0x118] sm:$0xff] }
 0x17f   : > { %8035 = vmatmul.mubr.msk.bf16.gmra.mxu0 %vm1158_vm4, %v1011_v8  ;;  %8051 = vmatmul.mubr.msk.bf16.gmra.mxu1 %vm1158_vm4, %v1011_v8 }
 0x180   : > { %1389 = vmatprep.mubr.bf16.mxu0 %v12329_v5  ;;  %1582 = vmatprep.mubr.bf16.mxu1 %v12329_v5 }
 0x182   : > { %v996_v10 = vld [vmem:[#allocation2 + $0x131] sm:$0xff] }
 0x183   : > { %v995_v9 = vld [vmem:[#allocation2 + $0x129] sm:$0xff] }
 0x184   : > { %v1012_v11 = vpack.c.bf16 %v996_v10, %v995_v9  ;;  %v934_v9 = vpack.c.bf16 %v912_v3, %v911_v2 }
 0x187   : > { %8036 = vmatmul.mubr.msk.bf16.gmra.mxu0 %vm1158_vm4, %v1012_v11  ;;  %8052 = vmatmul.mubr.msk.bf16.gmra.mxu1 %vm1158_vm4, %v1012_v11 }
 0x188   : > { %1793 = vmatprep.mubr.bf16.mxu0 %v12329_v5  ;;  %1986 = vmatprep.mubr.bf16.mxu1 %v12329_v5 }
 0x18f   : > { %8077 = vmatmul.mubr.msk.bf16.vlgmr.msra.gmra.mxu0 %vm1158_vm4, %v925_v16  ;;  %8093 = vmatmul.mubr.msk.bf16.vlgmr.msra.gmra.mxu1 %vm1158_vm4, %v925_v16 }
 0x190   : > { %2393 = vmatpush1.bf16.msra.mxu0 %v8616_v13  ;;  %2586 = vmatpush1.bf16.msra.mxu1 %v8619_v14  ;;  %v913_v14 = vld [vmem:[#allocation2 + $0xc8] sm:$0xff] }
 0x191   : > { %1803 = vmatprep.mubr.bf16.mxu0 %v12329_v5  ;;  %1996 = vmatprep.mubr.bf16.mxu1 %v12329_v5 }
 0x192   : > { %2394 = vmatprep.subr.bf16.mxu0 %v8624_v17  ;;  %2587 = vmatprep.subr.bf16.mxu1 %v8627_v18 }
 0x194   : > { %2395 = vmatpush1.bf16.msra.mxu0 %v8622_v19  ;;  %2588 = vmatpush1.bf16.msra.mxu1 %v8625_v20  ;;  %v935_v20 = vpack.c.bf16 %v914_v15, %v913_v14  ;;  %v939_v14 = vpack.c.bf16 %v922_v59, %v921_v58 }
 0x195   : > { %2396 = vmatprep.subr.bf16.mxu0 %v8630_v21  ;;  %2589 = vmatprep.subr.bf16.mxu1 %v8633_v22 }
 0x197   : > { %8078 = vmatmul.mubr.msk.bf16.gmra.mxu0 %vm1158_vm4, %v926_v25  ;;  %8094 = vmatmul.mubr.msk.bf16.gmra.mxu1 %vm1158_vm4, %v926_v25  ;;  %v915_v25 = vld [vmem:[#allocation2 + $0xd8] sm:$0xff] }
 0x198   : > { %1813 = vmatprep.mubr.bf16.mxu0 %v12329_v5  ;;  %2006 = vmatprep.mubr.bf16.mxu1 %v12329_v5 }
 0x199   : > { %2397 = vmatpush1.bf16.msra.mxu0 %v8628_v26  ;;  %2590 = vmatpush1.bf16.msra.mxu1 %v8631_v27  ;;  %v916_v26 = vld [vmem:[#allocation2 + $0xe0] sm:$0xff] }
 0x19a   : > { %2398 = vmatprep.subr.bf16.mxu0 %v8636_v28  ;;  %2591 = vmatprep.subr.bf16.mxu1 %v8639_v29 }
 0x19d   : > { %2399 = vmatpush1.bf16.msra.mxu0 %v8634_v31  ;;  %2592 = vmatpush1.bf16.msra.mxu1 %v8637_v32  ;;  %v936_v31 = vpack.c.bf16 %v916_v26, %v915_v25 }
 0x19e   : > { %2400 = vmatprep.subr.bf16.mxu0 %v8642_v34  ;;  %2593 = vmatprep.subr.bf16.mxu1 %v8645_v35 }
 0x19f   : > { %8079 = vmatmul.mubr.msk.bf16.gmra.mxu0 %vm1158_vm4, %v927_v36  ;;  %8095 = vmatmul.mubr.msk.bf16.gmra.mxu1 %vm1158_vm4, %v927_v36  ;;  %v917_v36 = vld [vmem:[#allocation2 + $0xf0] sm:$0xff] }
 0x1a0   : > { %1823 = vmatprep.mubr.bf16.mxu0 %v12329_v5  ;;  %2016 = vmatprep.mubr.bf16.mxu1 %v12329_v5 }
 0x1a1   : > { %2401 = vmatpush1.bf16.msra.mxu0 %v8640_v37  ;;  %2594 = vmatpush1.bf16.msra.mxu1 %v8643_v38  ;;  %v918_v37 = vld [vmem:[#allocation2 + $0xf8] sm:$0xff] }
 0x1a2   : > { %2402 = vmatprep.subr.bf16.mxu0 %v8648_v39  ;;  %2595 = vmatprep.subr.bf16.mxu1 %v8651_v40 }
 0x1a5   : > { %2403 = vmatpush1.bf16.msra.mxu0 %v8646_v41  ;;  %2596 = vmatpush1.bf16.msra.mxu1 %v8649_v42  ;;  %v937_v42 = vpack.c.bf16 %v918_v37, %v917_v36  ;;  %v924_v36 = vld [vmem:[#allocation2 + $0x130] sm:$0xff] }
 0x1a7   : > { %8080 = vmatmul.mubr.msk.bf16.gmra.mxu0 %vm1158_vm4, %v928_v45  ;;  %8096 = vmatmul.mubr.msk.bf16.gmra.mxu1 %vm1158_vm4, %v928_v45 }
 0x1a8   : > { %1833 = vmatprep.mubr.bf16.mxu0 %v12329_v5  ;;  %2026 = vmatprep.mubr.bf16.mxu1 %v12329_v5 }
 0x1af   : > { %8081 = vmatmul.mubr.msk.bf16.gmra.mxu0 %vm1158_vm4, %v929_v48  ;;  %8097 = vmatmul.mubr.msk.bf16.gmra.mxu1 %vm1158_vm4, %v929_v48  ;;  %v920_v48 = vld [vmem:[#allocation2 + $0x108] sm:$0xff] }
 0x1b0   : > { %1843 = vmatprep.mubr.bf16.mxu0 %v12329_v5  ;;  %2036 = vmatprep.mubr.bf16.mxu1 %v12329_v5  ;;  %v938_v53 = vpack.c.bf16 %v920_v48, %v919_v47 }
 0x1b7   : > { %8082 = vmatmul.mubr.msk.bf16.gmra.mxu0 %vm1158_vm4, %v930_v51  ;;  %8098 = vmatmul.mubr.msk.bf16.gmra.mxu1 %vm1158_vm4, %v930_v51 }
 0x1b8   : > { %1853 = vmatprep.mubr.bf16.mxu0 %v12329_v5  ;;  %2046 = vmatprep.mubr.bf16.mxu1 %v12329_v5 }
 0x1bf   : > { %8083 = vmatmul.mubr.msk.bf16.gmra.mxu0 %vm1158_vm4, %v931_v54  ;;  %8099 = vmatmul.mubr.msk.bf16.gmra.mxu1 %vm1158_vm4, %v931_v54 }
 0x1c0   : > { %1863 = vmatprep.mubr.bf16.mxu0 %v12329_v5  ;;  %2056 = vmatprep.mubr.bf16.mxu1 %v12329_v5 }
 0x1c7   : > { %8084 = vmatmul.mubr.msk.bf16.gmra.mxu0 %vm1158_vm4, %v932_v57  ;;  %8100 = vmatmul.mubr.msk.bf16.gmra.mxu1 %vm1158_vm4, %v932_v57 }
 0x1c8   : > { %1873 = vmatprep.mubr.bf16.mxu0 %v12329_v5  ;;  %2066 = vmatprep.mubr.bf16.mxu1 %v12329_v5 }
 0x1cf   : > { %v9894_v61 = vpop.f32.mrf.mxu0  ;;  %v9896_v62 = vpop.f32.mrf.mxu1  ;;  %8085 = vmatmul.mubr.msk.bf16.gmra.mxu0 %vm1158_vm4, %v933_v60  ;;  %8101 = vmatmul.mubr.msk.bf16.gmra.mxu1 %vm1158_vm4, %v933_v60 }
 0x1d0   : > { %1883 = vmatprep.mubr.bf16.mxu0 %v12329_v5  ;;  %2076 = vmatprep.mubr.bf16.mxu1 %v12329_v5 }
 0x1d1   : > { %v9902_v63 = vpop.f32.mrf.mxu0  ;;  %v9904_v1 = vpop.f32.mrf.mxu1 }
 0x1d3   : > { %v9906_v4 = vpop.f32.mrf.mxu0  ;;  %v9908_v6 = vpop.f32.mrf.mxu1 }
 0x1d5   : > { %v9910_v7 = vpop.f32.mrf.mxu0  ;;  %v9912_v8 = vpop.f32.mrf.mxu1 }
 0x1d7   : > { %v9914_v10 = vpop.f32.mrf.mxu0  ;;  %v9916_v11 = vpop.f32.mrf.mxu1  ;;  %8086 = vmatmul.mubr.msk.bf16.gmra.mxu0 %vm1158_vm4, %v934_v9  ;;  %8102 = vmatmul.mubr.msk.bf16.gmra.mxu1 %vm1158_vm4, %v934_v9 }
 0x1d8   : > { %1893 = vmatprep.mubr.bf16.mxu0 %v12329_v5  ;;  %2086 = vmatprep.mubr.bf16.mxu1 %v12329_v5 }
 0x1d9   : > { %v9922_v12 = vpop.f32.mrf.mxu0  ;;  %v9924_v13 = vpop.f32.mrf.mxu1 }
 0x1db   : > { %v9926_v16 = vpop.f32.mrf.mxu0  ;;  %v9928_v17 = vpop.f32.mrf.mxu1 }
 0x1dd   : > { %v9930_v18 = vpop.f32.mrf.mxu0  ;;  %v9932_v19 = vpop.f32.mrf.mxu1 }
 0x1df   : > { %v9934_v21 = vpop.f32.mrf.mxu0  ;;  %v9936_v22 = vpop.f32.mrf.mxu1  ;;  %8087 = vmatmul.mubr.msk.bf16.gmra.mxu0 %vm1158_vm4, %v935_v20  ;;  %8103 = vmatmul.mubr.msk.bf16.gmra.mxu1 %vm1158_vm4, %v935_v20 }
 0x1e0   : > { %1903 = vmatprep.mubr.bf16.mxu0 %v12329_v5  ;;  %2096 = vmatprep.mubr.bf16.mxu1 %v12329_v5 }
 0x1e1   : > { %v9942_v23 = vpop.f32.mrf.mxu0  ;;  %v9944_v24 = vpop.f32.mrf.mxu1 }
 0x1e3   : > { %v9946_v27 = vpop.f32.mrf.mxu0  ;;  %v9948_v28 = vpop.f32.mrf.mxu1 }
 0x1e5   : > { %v9950_v29 = vpop.f32.mrf.mxu0  ;;  %v9952_v30 = vpop.f32.mrf.mxu1 }
 0x1e7   : > { %v9954_v32 = vpop.f32.mrf.mxu0  ;;  %v9956_v33 = vpop.f32.mrf.mxu1  ;;  %8088 = vmatmul.mubr.msk.bf16.gmra.mxu0 %vm1158_vm4, %v936_v31  ;;  %8104 = vmatmul.mubr.msk.bf16.gmra.mxu1 %vm1158_vm4, %v936_v31  ;;  %v923_v31 = vld [vmem:[#allocation2 + $0x128] sm:$0xff] }
 0x1e8   : > { %12361 = vst [vmem:[#allocation21_spill] sm:$0xff] %v9954_v32  ;;  %12362 = vst [vmem:[#allocation22_spill] sm:$0xff] %v9956_v33  ;;  %1913 = vmatprep.mubr.bf16.mxu0 %v12329_v5  ;;  %2106 = vmatprep.mubr.bf16.mxu1 %v12329_v5  ;;  %v8714_v32 = vld [vmem:[#allocation10 + $0xd4] ss:$8 sps:$4 sm:$0xff]  }
 0x1e9   : > { %v9962_v34 = vpop.f32.mrf.mxu0  ;;  %v9964_v35 = vpop.f32.mrf.mxu1 }
 0x1ea   : > { %12363 = vst [vmem:[#allocation23_spill] sm:$0xff] %v9962_v34  ;;  %12364 = vst [vmem:[#allocation24_spill] sm:$0xff] %v9964_v35 }
 0x1eb   : > { %v9966_v38 = vpop.f32.mrf.mxu0  ;;  %v9968_v39 = vpop.f32.mrf.mxu1 }
 0x1ec   : > { %12365 = vst [vmem:[#allocation25_spill] sm:$0xff] %v9966_v38  ;;  %12366 = vst [vmem:[#allocation26_spill] sm:$0xff] %v9968_v39 }
 0x1ed   : > { %v9970_v40 = vpop.f32.mrf.mxu0  ;;  %v9972_v41 = vpop.f32.mrf.mxu1 }
 0x1ee   : > { %12367 = vst [vmem:[#allocation27_spill] sm:$0xff] %v9970_v40  ;;  %12368 = vst [vmem:[#allocation28_spill] sm:$0xff] %v9972_v41  ;;  %v8699_v41 = vld [vmem:[#allocation10 + $0x104] ss:$8 sps:$4 sm:$0xff]   ;;  %v8697_v40 = vld [vmem:[#allocation10 + $0x100] ss:$8 sps:$4 sm:$0xff]  }
 0x1ef   : > { %v9974_v43 = vpop.f32.mrf.mxu0  ;;  %v9976_v44 = vpop.f32.mrf.mxu1  ;;  %8089 = vmatmul.mubr.msk.bf16.gmra.mxu0 %vm1158_vm4, %v937_v42  ;;  %8105 = vmatmul.mubr.msk.bf16.gmra.mxu1 %vm1158_vm4, %v937_v42 }
 0x1f0   : > { %12369 = vst [vmem:[#allocation29_spill] sm:$0xff] %v9974_v43  ;;  %12370 = vst [vmem:[#allocation30_spill] sm:$0xff] %v9976_v44  ;;  %1923 = vmatprep.mubr.bf16.mxu0 %v12329_v5  ;;  %2116 = vmatprep.mubr.bf16.mxu1 %v12329_v5 }
 0x1f1   : > { %v9982_v45 = vpop.f32.mrf.mxu0  ;;  %v9984_v46 = vpop.f32.mrf.mxu1 }
 0x1f2   : > { %12371 = vst [vmem:[#allocation31_spill] sm:$0xff] %v9982_v45  ;;  %12372 = vst [vmem:[#allocation32_spill] sm:$0xff] %v9984_v46 }
 0x1f3   : > { %v9986_v49 = vpop.f32.mrf.mxu0  ;;  %v9988_v50 = vpop.f32.mrf.mxu1 }
 0x1f4   : > { %12373 = vst [vmem:[#allocation33_spill] sm:$0xff] %v9986_v49  ;;  %12374 = vst [vmem:[#allocation34_spill] sm:$0xff] %v9988_v50  ;;  %v8693_v50 = vld [vmem:[#allocation10 + $0x114] ss:$8 sps:$4 sm:$0xff]   ;;  %v8700_v49 = vld [vmem:[#allocation10 + $0xf0] ss:$8 sps:$4 sm:$0xff]  }
 0x1f5   : > { %v9990_v51 = vpop.f32.mrf.mxu0  ;;  %v9992_v52 = vpop.f32.mrf.mxu1 }
 0x1f6   : > { %12375 = vst [vmem:[#allocation35_spill] sm:$0xff] %v9990_v51  ;;  %12376 = vst [vmem:[#allocation36_spill] sm:$0xff] %v9992_v52 }
 0x1f7   : > { %v9994_v54 = vpop.f32.mrf.mxu0  ;;  %v9996_v55 = vpop.f32.mrf.mxu1  ;;  %8090 = vmatmul.mubr.msk.bf16.gmra.mxu0 %vm1158_vm4, %v938_v53  ;;  %8106 = vmatmul.mubr.msk.bf16.gmra.mxu1 %vm1158_vm4, %v938_v53  ;;  %v940_v53 = vpack.c.bf16 %v924_v36, %v923_v31  ;;  %v2147_v36 = vld [vmem:[#allocation2 + $0x2] sm:$0xff] }
 0x1f8   : > { %12377 = vst [vmem:[#allocation37_spill] sm:$0xff] %v9994_v54  ;;  %12378 = vst [vmem:[#allocation38_spill] sm:$0xff] %v9996_v55  ;;  %1933 = vmatprep.mubr.bf16.mxu0 %v12329_v5  ;;  %2126 = vmatprep.mubr.bf16.mxu1 %v12329_v5  ;;  %v2167_v55 = vld [vmem:[#allocation2 + $0xca] sm:$0xff] }
 0x1f9   : > { %v10002_v56 = vpop.f32.mrf.mxu0  ;;  %v10004_v57 = vpop.f32.mrf.mxu1 }
 0x1fa   : > { %12379 = vst [vmem:[#allocation39_spill] sm:$0xff] %v10002_v56  ;;  %12380 = vst [vmem:[#allocation40_spill] sm:$0xff] %v10004_v57 }
 0x1fb   : > { %v10006_v60 = vpop.f32.mrf.mxu0  ;;  %v10008_v2 = vpop.f32.mrf.mxu1 }
 0x1fc   : > { %12381 = vst [vmem:[#allocation41_spill] sm:$0xff] %v10006_v60  ;;  %12382 = vst [vmem:[#allocation42_spill] sm:$0xff] %v10008_v2  ;;  %v8688_v60 = vld [vmem:[#allocation10 + $0x10] ss:$8 sps:$4 sm:$0xff]  }
 0x1fd   : > { %v10010_v3 = vpop.f32.mrf.mxu0  ;;  %v10012_v9 = vpop.f32.mrf.mxu1 }
 0x1fe   : > { %12383 = vst [vmem:[#allocation43_spill] sm:$0xff] %v10010_v3  ;;  %12384 = vst [vmem:[#allocation44_spill] sm:$0xff] %v10012_v9 }
 0x1ff   : > { %v10014_v15 = vpop.f32.mrf.mxu0  ;;  %v10016_v20 = vpop.f32.mrf.mxu1  ;;  %8091 = vmatmul.mubr.msk.bf16.gmra.mxu0 %vm1158_vm4, %v939_v14  ;;  %8107 = vmatmul.mubr.msk.bf16.gmra.mxu1 %vm1158_vm4, %v939_v14 }
 0x200   : > { %12385 = vst [vmem:[#allocation45_spill] sm:$0xff] %v10014_v15  ;;  %12386 = vst [vmem:[#allocation46_spill] sm:$0xff] %v10016_v20  ;;  %1943 = vmatprep.mubr.bf16.mxu0 %v12329_v5  ;;  %2136 = vmatprep.mubr.bf16.mxu1 %v12329_v5  ;;  %v8658_v15 = vld [vmem:[#allocation10 + $0x160] ss:$8 sps:$4 sm:$0xff]  }
 0x201   : > { %v10022_v25 = vpop.f32.mrf.mxu0  ;;  %v10024_v26 = vpop.f32.mrf.mxu1 }
 0x202   : > { %12387 = vst [vmem:[#allocation47_spill] sm:$0xff] %v10022_v25  ;;  %12388 = vst [vmem:[#allocation48_spill] sm:$0xff] %v10024_v26 }
 0x203   : > { %v10026_v37 = vpop.f32.mrf.mxu0  ;;  %v10028_v42 = vpop.f32.mrf.mxu1 }
 0x204   : > { %12389 = vst [vmem:[#allocation49_spill] sm:$0xff] %v10026_v37  ;;  %12390 = vst [vmem:[#allocation50_spill] sm:$0xff] %v10028_v42 }
 0x205   : > { %v10030_v47 = vpop.f32.mrf.mxu0  ;;  %v10032_v48 = vpop.f32.mrf.mxu1 }
 0x206   : > { %12391 = vst [vmem:[#allocation51_spill] sm:$0xff] %v10030_v47  ;;  %12392 = vst [vmem:[#allocation52_spill] sm:$0xff] %v10032_v48  ;;  %v2148_v47 = vld [vmem:[#allocation2 + $0xa] sm:$0xff] }
 0x207   : > { %v10034_v58 = vpop.f32.mrf.mxu0  ;;  %v10036_v59 = vpop.f32.mrf.mxu1  ;;  %8092 = vmatmul.mubr.msk.bf16.gmra.mxu0 %vm1158_vm4, %v940_v53  ;;  %8108 = vmatmul.mubr.msk.bf16.gmra.mxu1 %vm1158_vm4, %v940_v53  ;;  %v2179_v48 = vpack.c.bf16 %v2148_v47, %v2147_v36 }
 0x208   : > { %12393 = vst [vmem:[#allocation53_spill] sm:$0xff] %v10034_v58  ;;  %12394 = vst [vmem:[#allocation54_spill] sm:$0xff] %v10036_v59  ;;  %2420 = vmatprep.mubr.bf16.mxu0 %v12329_v5  ;;  %2613 = vmatprep.mubr.bf16.mxu1 %v12329_v5 }
 0x209   : > { %v10042_v14 = vpop.f32.mrf.mxu0  ;;  %v10044_v0 = vpop.f32.mrf.mxu1 }
 0x20a   : > { %12395 = vst [vmem:[#allocation55_spill] sm:$0xff] %v10042_v14  ;;  %12396 = vst [vmem:[#allocation56_spill] sm:$0xff] %v10044_v0  ;;  %v2150_v0 = vld [vmem:[#allocation2 + $0x1a] sm:$0xff] }
 0x20b   : > { %v10046_v42 = vpop.f32.mrf.mxu0  ;;  %v10048_v31 = vpop.f32.mrf.mxu1 }
 0x20c   : > { %12397 = vst [vmem:[#allocation57_spill] sm:$0xff] %v10046_v42  ;;  %12398 = vst [vmem:[#allocation58_spill] sm:$0xff] %v10048_v31 }
 0x20d   : > { %v10050_v58 = vpop.f32.mrf.mxu0  ;;  %v10052_v59 = vpop.f32.mrf.mxu1 }
 0x20e   : > { %12399 = vst [vmem:[#allocation59_spill] sm:$0xff] %v10050_v58  ;;  %12400 = vst [vmem:[#allocation60_spill] sm:$0xff] %v10052_v59  ;;  %v2149_v58 = vld [vmem:[#allocation2 + $0x12] sm:$0xff] }
 0x20f   : > { %v10054_v53 = vpop.f32.mrf.mxu0  ;;  %v10056_v37 = vpop.f32.mrf.mxu1  ;;  %8133 = vmatmul.mubr.msk.bf16.vlgmr.msra.gmra.mxu0 %vm1158_vm4, %v2179_v48  ;;  %8149 = vmatmul.mubr.msk.bf16.vlgmr.msra.gmra.mxu1 %vm1158_vm4, %v2179_v48 }
 0x210   : > { %12401 = vst [vmem:[#allocation61_spill] sm:$0xff] %v10054_v53  ;;  %12402 = vst [vmem:[#allocation62_spill] sm:$0xff] %v10056_v37  ;;  %2430 = vmatprep.mubr.bf16.mxu0 %v12329_v5  ;;  %2623 = vmatprep.mubr.bf16.mxu1 %v12329_v5  ;;  %v2180_v53 = vpack.c.bf16 %v2150_v0, %v2149_v58  ;;  %v2151_v58 = vld [vmem:[#allocation2 + $0x2a] sm:$0xff] }
 0x211   : > { %v10062_v42 = vpop.f32.mrf.mxu0  ;;  %v10064_v31 = vpop.f32.mrf.mxu1 }
 0x212   : > { %12403 = vst [vmem:[#allocation63_spill] sm:$0xff] %v10062_v42  ;;  %12404 = vst [vmem:[#allocation64_spill] sm:$0xff] %v10064_v31 }
 0x213   : > { %v10066_v59 = vpop.f32.mrf.mxu0  ;;  %v10068_v47 = vpop.f32.mrf.mxu1 }
 0x214   : > { %12405 = vst [vmem:[#allocation65_spill] sm:$0xff] %v10066_v59  ;;  %12406 = vst [vmem:[#allocation66_spill] sm:$0xff] %v10068_v47 }
 0x215   : > { %v10070_v36 = vpop.f32.mrf.mxu0  ;;  %v10072_v37 = vpop.f32.mrf.mxu1 }
 0x216   : > { %12407 = vst [vmem:[#allocation67_spill] sm:$0xff] %v10070_v36  ;;  %12408 = vst [vmem:[#allocation68_spill] sm:$0xff] %v10072_v37  ;;  %v2152_v36 = vld [vmem:[#allocation2 + $0x32] sm:$0xff] }
 0x217   : > { %v10074_v48 = vpop.f32.mrf.mxu0  ;;  %v10076_v14 = vpop.f32.mrf.mxu1  ;;  %8134 = vmatmul.mubr.msk.bf16.gmra.mxu0 %vm1158_vm4, %v2180_v53  ;;  %8150 = vmatmul.mubr.msk.bf16.gmra.mxu1 %vm1158_vm4, %v2180_v53  ;;  %v2181_v37 = vpack.c.bf16 %v2152_v36, %v2151_v58 }
 0x218   : > { %12409 = vst [vmem:[#allocation69_spill] sm:$0xff] %v10074_v48  ;;  %12410 = vst [vmem:[#allocation70_spill] sm:$0xff] %v10076_v14  ;;  %2440 = vmatprep.mubr.bf16.mxu0 %v12329_v5  ;;  %2633 = vmatprep.mubr.bf16.mxu1 %v12329_v5 }
 0x219   : > { %v10082_v59 = vpop.f32.mrf.mxu0  ;;  %v10084_v47 = vpop.f32.mrf.mxu1 }
 0x21a   : > { %12411 = vst [vmem:[#allocation71_spill] sm:$0xff] %v10082_v59  ;;  %12412 = vst [vmem:[#allocation72_spill] sm:$0xff] %v10084_v47  ;;  %v2154_v47 = vld [vmem:[#allocation2 + $0x42] sm:$0xff] }
 0x21b   : > { %v10086_v31 = vpop.f32.mrf.mxu0  ;;  %v10088_v0 = vpop.f32.mrf.mxu1 }
 0x21c   : > { %12413 = vst [vmem:[#allocation73_spill] sm:$0xff] %v10086_v31  ;;  %12414 = vst [vmem:[#allocation74_spill] sm:$0xff] %v10088_v0 }
 0x21d   : > { %v10090_v48 = vpop.f32.mrf.mxu0  ;;  %v10092_v14 = vpop.f32.mrf.mxu1 }
 0x21e   : > { %12415 = vst [vmem:[#allocation75_spill] sm:$0xff] %v10090_v48  ;;  %12416 = vst [vmem:[#allocation76_spill] sm:$0xff] %v10092_v14  ;;  %v2153_v48 = vld [vmem:[#allocation2 + $0x3a] sm:$0xff] }
 0x21f   : > { %v10094_v53 = vpop.f32.mrf.mxu0  ;;  %v10096_v42 = vpop.f32.mrf.mxu1  ;;  %8135 = vmatmul.mubr.msk.bf16.gmra.mxu0 %vm1158_vm4, %v2181_v37  ;;  %8151 = vmatmul.mubr.msk.bf16.gmra.mxu1 %vm1158_vm4, %v2181_v37 }
 0x220   : > { %12417 = vst [vmem:[#allocation77_spill] sm:$0xff] %v10094_v53  ;;  %12418 = vst [vmem:[#allocation78_spill] sm:$0xff] %v10096_v42  ;;  %2450 = vmatprep.mubr.bf16.mxu0 %v12329_v5  ;;  %2643 = vmatprep.mubr.bf16.mxu1 %v12329_v5  ;;  %v2182_v53 = vpack.c.bf16 %v2154_v47, %v2153_v48  ;;  %v2155_v48 = vld [vmem:[#allocation2 + $0x52] sm:$0xff] }
 0x221   : > { %v10102_v31 = vpop.f32.mrf.mxu0  ;;  %v10104_v0 = vpop.f32.mrf.mxu1 }
 0x222   : > { %12419 = vst [vmem:[#allocation79_spill] sm:$0xff] %v10102_v31  ;;  %12420 = vst [vmem:[#allocation80_spill] sm:$0xff] %v10104_v0 }
 0x223   : > { %v10106_v14 = vpop.f32.mrf.mxu0  ;;  %v10108_v36 = vpop.f32.mrf.mxu1 }
 0x224   : > { %12421 = vst [vmem:[#allocation81_spill] sm:$0xff] %v10106_v14  ;;  %12422 = vst [vmem:[#allocation82_spill] sm:$0xff] %v10108_v36 }
 0x225   : > { %v10110_v58 = vpop.f32.mrf.mxu0  ;;  %v10112_v42 = vpop.f32.mrf.mxu1 }
 0x226   : > { %12423 = vst [vmem:[#allocation83_spill] sm:$0xff] %v10110_v58  ;;  %12424 = vst [vmem:[#allocation84_spill] sm:$0xff] %v10112_v42  ;;  %v2156_v58 = vld [vmem:[#allocation2 + $0x5a] sm:$0xff] }
 0x227   : > { %v10114_v37 = vpop.f32.mrf.mxu0  ;;  %v10116_v59 = vpop.f32.mrf.mxu1  ;;  %8136 = vmatmul.mubr.msk.bf16.gmra.mxu0 %vm1158_vm4, %v2182_v53  ;;  %8152 = vmatmul.mubr.msk.bf16.gmra.mxu1 %vm1158_vm4, %v2182_v53  ;;  %v2183_v42 = vpack.c.bf16 %v2156_v58, %v2155_v48 }
 0x228   : > { %12425 = vst [vmem:[#allocation85_spill] sm:$0xff] %v10114_v37  ;;  %12426 = vst [vmem:[#allocation86_spill] sm:$0xff] %v10116_v59  ;;  %2460 = vmatprep.mubr.bf16.mxu0 %v12329_v5  ;;  %2653 = vmatprep.mubr.bf16.mxu1 %v12329_v5 }
 0x229   : > { %v10122_v14 = vpop.f32.mrf.mxu0  ;;  %v10124_v36 = vpop.f32.mrf.mxu1 }
 0x22a   : > { %12427 = vst [vmem:[#allocation87_spill] sm:$0xff] %v10122_v14  ;;  %12428 = vst [vmem:[#allocation88_spill] sm:$0xff] %v10124_v36  ;;  %v2158_v36 = vld [vmem:[#allocation2 + $0x6a] sm:$0xff] }
 0x22b   : > { %v10126_v0 = vpop.f32.mrf.mxu0  ;;  %v10128_v47 = vpop.f32.mrf.mxu1 }
 0x22c   : > { %12429 = vst [vmem:[#allocation89_spill] sm:$0xff] %v10126_v0  ;;  %12430 = vst [vmem:[#allocation90_spill] sm:$0xff] %v10128_v47 }
 0x22d   : > { %v10130_v37 = vpop.f32.mrf.mxu0  ;;  %v10132_v59 = vpop.f32.mrf.mxu1 }
 0x22e   : > { %12431 = vst [vmem:[#allocation91_spill] sm:$0xff] %v10130_v37  ;;  %12432 = vst [vmem:[#allocation92_spill] sm:$0xff] %v10132_v59  ;;  %v2157_v37 = vld [vmem:[#allocation2 + $0x62] sm:$0xff] }
 0x22f   : > { %v10134_v53 = vpop.f32.mrf.mxu0  ;;  %v10136_v31 = vpop.f32.mrf.mxu1  ;;  %8137 = vmatmul.mubr.msk.bf16.gmra.mxu0 %vm1158_vm4, %v2183_v42  ;;  %8153 = vmatmul.mubr.msk.bf16.gmra.mxu1 %vm1158_vm4, %v2183_v42 }
 0x230   : > { %12433 = vst [vmem:[#allocation93_spill] sm:$0xff] %v10134_v53  ;;  %12434 = vst [vmem:[#allocation94_spill] sm:$0xff] %v10136_v31  ;;  %2470 = vmatprep.mubr.bf16.mxu0 %v12329_v5  ;;  %2663 = vmatprep.mubr.bf16.mxu1 %v12329_v5  ;;  %v2184_v53 = vpack.c.bf16 %v2158_v36, %v2157_v37  ;;  %v8655_v37 = vld [vmem:[#allocation10 + $0x70] ss:$8 sps:$4 sm:$0xff]  }
 0x231   : > { %v10142_v0 = vpop.f32.mrf.mxu0  ;;  %v10144_v47 = vpop.f32.mrf.mxu1 }
 0x232   : > { %12435 = vst [vmem:[#allocation95_spill] sm:$0xff] %v10142_v0  ;;  %12436 = vst [vmem:[#allocation96_spill] sm:$0xff] %v10144_v47  ;;  %v8657_v47 = vld [vmem:[#allocation10 + $0x74] ss:$8 sps:$4 sm:$0xff]  }
 0x233   : > { %v10146_v59 = vpop.f32.mrf.mxu0  ;;  %v10148_v58 = vpop.f32.mrf.mxu1  ;;  %5443 = vmatprep.subr.bf16.mxu1 %v8657_v47 }
 0x234   : > { %12437 = vst [vmem:[#allocation97_spill] sm:$0xff] %v10146_v59  ;;  %12438 = vst [vmem:[#allocation98_spill] sm:$0xff] %v10148_v58  ;;  %5444 = vmatpush1.bf16.msra.mxu1 %v8655_v37  ;;  %v8666_v37 = vld [vmem:[#allocation10 + $0x54] ss:$8 sps:$4 sm:$0xff]  }
 0x235   : > { %v10150_v48 = vpop.f32.mrf.mxu0  ;;  %v10152_v31 = vpop.f32.mrf.mxu1 }
 0x236   : > { %12439 = vst [vmem:[#allocation99_spill] sm:$0xff] %v10150_v48  ;;  %12440 = vst [vmem:[#allocation100_spill] sm:$0xff] %v10152_v31  ;;  %v2160_v48 = vld [vmem:[#allocation2 + $0x82] sm:$0xff] }
 0x237   : > { %v10154_v42 = vpop.f32.mrf.mxu0  ;;  %v10156_v14 = vpop.f32.mrf.mxu1  ;;  %8138 = vmatmul.mubr.msk.bf16.gmra.mxu0 %vm1158_vm4, %v2184_v53  ;;  %8154 = vmatmul.mubr.msk.bf16.gmra.mxu1 %vm1158_vm4, %v2184_v53 }
 0x238   : > { %12441 = vst [vmem:[#allocation101_spill] sm:$0xff] %v10154_v42  ;;  %12442 = vst [vmem:[#allocation102_spill] sm:$0xff] %v10156_v14  ;;  %2480 = vmatprep.mubr.bf16.mxu0 %v12329_v5  ;;  %2673 = vmatprep.mubr.bf16.mxu1 %v12329_v5  ;;  %v2159_v14 = vld [vmem:[#allocation2 + $0x7a] sm:$0xff] }
 0x239   : > { %v10162_v59 = vpop.f32.mrf.mxu0  ;;  %v10164_v58 = vpop.f32.mrf.mxu1  ;;  %v8654_v42 = vld [vmem:[#allocation10 + $0x174] ss:$8 sps:$4 sm:$0xff]   ;;  %v2185_v26 = vpack.c.bf16 %v2160_v48, %v2159_v14  ;;  %v8652_v5 = vld [vmem:[#allocation10 + $0x170] ss:$8 sps:$4 sm:$0xff]   ;;  %v2161_v48 = vld [vmem:[#allocation2 + $0x8a] sm:$0xff] }
 0x23a   : > { %12443 = vst [vmem:[#allocation103_spill] sm:$0xff] %v10162_v59  ;;  %12444 = vst [vmem:[#allocation104_spill] sm:$0xff] %v10164_v58  ;;  %5170 = vmatprep.subr.bf16.mxu0 %v8654_v42  ;;  %v8663_v59 = vld [vmem:[#allocation10 + $0x64] ss:$8 sps:$4 sm:$0xff]  }
 0x23b   : > { %v10166_v31 = vpop.f32.mrf.mxu0  ;;  %v10168_v36 = vpop.f32.mrf.mxu1  ;;  %5171 = vmatpush1.bf16.msra.mxu0 %v8652_v5  ;;  %5445 = vmatprep.subr.bf16.mxu1 %v8663_v59  ;;  %v2162_v42 = vld [vmem:[#allocation2 + $0x92] sm:$0xff] }
 0x23c   : > { %12445 = vst [vmem:[#allocation105_spill] sm:$0xff] %v10166_v31  ;;  %12446 = vst [vmem:[#allocation106_spill] sm:$0xff] %v10168_v36  ;;  %v8661_v36 = vld [vmem:[#allocation10 + $0x60] ss:$8 sps:$4 sm:$0xff]   ;;  %v12451_v31 = vmov 0  }
 0x23d   : > { %v10170_v0 = vpop.f32.mrf.mxu0  ;;  %v10172_v53 = vpop.f32.mrf.mxu1  ;;  %5446 = vmatpush1.bf16.msra.mxu1 %v8661_v36  ;;  %v8672_v5 = vld [vmem:[#allocation10 + $0x44] ss:$8 sps:$4 sm:$0xff]  }
 0x23e   : > { %12447 = vst [vmem:[#allocation107_spill] sm:$0xff] %v10170_v0  ;;  %12448 = vst [vmem:[#allocation108_spill] sm:$0xff] %v10172_v53  ;;  %v8660_v53 = vld [vmem:[#allocation10 + $0x164] ss:$8 sps:$4 sm:$0xff]   ;;  %5447 = vmatprep.subr.bf16.mxu1 %v8666_v37 }
 0x23f   : > { %v10174_v58 = vpop.f32.mrf.mxu0  ;;  %v10176_v25 = vpop.f32.mrf.mxu1  ;;  %8139 = vmatmul.mubr.msk.bf16.gmra.mxu0 %vm1158_vm4, %v2185_v26  ;;  %8155 = vmatmul.mubr.msk.bf16.gmra.mxu1 %vm1158_vm4, %v2185_v26  ;;  %v8664_v26 = vld [vmem:[#allocation10 + $0x50] ss:$8 sps:$4 sm:$0xff]  }
 0x240   : > { %12449 = vst [vmem:[#allocation109_spill] sm:$0xff] %v10174_v58  ;;  %12450 = vst [vmem:[#allocation110_spill] sm:$0xff] %v10176_v25  ;;  %2490 = vmatprep.mubr.bf16.mxu0 %v12451_v31  ;;  %2683 = vmatprep.mubr.bf16.mxu1 %v12451_v31 }
 0x241   : > { %v10182_v47 = vpop.f32.mrf.mxu0  ;;  %v10184_v14 = vpop.f32.mrf.mxu1  ;;  %5172 = vmatprep.subr.bf16.mxu0 %v8660_v53  ;;  %5448 = vmatpush1.bf16.msra.mxu1 %v8664_v26  ;;  %v2164_v53 = vld [vmem:[#allocation2 + $0xaa] sm:$0xff] }
 0x242   : > { %12452 = vst [vmem:[#allocation111_spill] sm:$0xff] %v10182_v47  ;;  %12453 = vst [vmem:[#allocation112_spill] sm:$0xff] %v10184_v14  ;;  %v2186_v47 = vpack.c.bf16 %v2162_v42, %v2161_v48  ;;  %5173 = vmatpush1.bf16.msra.mxu0 %v8658_v15  ;;  %5449 = vmatprep.subr.bf16.mxu1 %v8672_v5  ;;  %v8678_v42 = vld [vmem:[#allocation10 + $0x34] ss:$8 sps:$4 sm:$0xff]   ;;  %v8667_v14 = vld [vmem:[#allocation10 + $0x150] ss:$8 sps:$4 sm:$0xff]  }
 0x243   : > { %v10186_v25 = vpop.f32.mrf.mxu0  ;;  %v10188_v58 = vpop.f32.mrf.mxu1  ;;  %v8684_v15 = vld [vmem:[#allocation10 + $0x24] ss:$8 sps:$4 sm:$0xff]  }
 0x244   : > { %12454 = vst [vmem:[#allocation113_spill] sm:$0xff] %v10186_v25  ;;  %12455 = vst [vmem:[#allocation114_spill] sm:$0xff] %v10188_v58  ;;  %v8670_v58 = vld [vmem:[#allocation10 + $0x40] ss:$8 sps:$4 sm:$0xff]  }
 0x245   : > { %v10190_v0 = vpop.f32.mrf.mxu0  ;;  %v10192_v20 = vpop.f32.mrf.mxu1  ;;  %5450 = vmatpush1.bf16.msra.mxu1 %v8670_v58 }
 0x246   : > { %12456 = vst [vmem:[#allocation115_spill] sm:$0xff] %v10190_v0  ;;  %12457 = vst [vmem:[#allocation116_spill] sm:$0xff] %v10192_v20  ;;  %v8669_v20 = vld [vmem:[#allocation10 + $0x154] ss:$8 sps:$4 sm:$0xff]   ;;  %5451 = vmatprep.subr.bf16.mxu1 %v8678_v42  ;;  %v8675_v42 = vld [vmem:[#allocation10 + $0x144] ss:$8 sps:$4 sm:$0xff]  }
 0x247   : > { %v10194_v59 = vpop.f32.mrf.mxu0  ;;  %v10196_v36 = vpop.f32.mrf.mxu1  ;;  %8140 = vmatmul.mubr.msk.bf16.gmra.mxu0 %vm1158_vm4, %v2186_v47  ;;  %8156 = vmatmul.mubr.msk.bf16.gmra.mxu1 %vm1158_vm4, %v2186_v47  ;;  %v2163_v47 = vld [vmem:[#allocation2 + $0xa2] sm:$0xff] }
 0x248   : > { %12458 = vst [vmem:[#allocation117_spill] sm:$0xff] %v10194_v59  ;;  %12459 = vst [vmem:[#allocation118_spill] sm:$0xff] %v10196_v36  ;;  %2500 = vmatprep.mubr.bf16.mxu0 %v12451_v31  ;;  %2693 = vmatprep.mubr.bf16.mxu1 %v12451_v31  ;;  %v8676_v59 = vld [vmem:[#allocation10 + $0x30] ss:$8 sps:$4 sm:$0xff]  }
 0x249   : > { %v10202_v37 = vpop.f32.mrf.mxu0  ;;  %v10204_v48 = vpop.f32.mrf.mxu1  ;;  %5174 = vmatprep.subr.bf16.mxu0 %v8669_v20  ;;  %5452 = vmatpush1.bf16.msra.mxu1 %v8676_v59  ;;  %v8673_v20 = vld [vmem:[#allocation10 + $0x140] ss:$8 sps:$4 sm:$0xff]   ;;  %v2165_v59 = vld [vmem:[#allocation2 + $0xb2] sm:$0xff] }
 0x24a   : > { %12460 = vst [vmem:[#allocation119_spill] sm:$0xff] %v10202_v37  ;;  %12461 = vst [vmem:[#allocation120_spill] sm:$0xff] %v10204_v48  ;;  %v2187_v37 = vpack.c.bf16 %v2164_v53, %v2163_v47  ;;  %5175 = vmatpush1.bf16.msra.mxu0 %v8667_v14  ;;  %5453 = vmatprep.subr.bf16.mxu1 %v8684_v15  ;;  %v2166_v47 = vld [vmem:[#allocation2 + $0xba] sm:$0xff] }
 0x24b   : > { %v10206_v26 = vpop.f32.mrf.mxu0  ;;  %v10208_v36 = vpop.f32.mrf.mxu1  ;;  %5176 = vmatprep.subr.bf16.mxu0 %v8675_v42  ;;  %v8681_v48 = vld [vmem:[#allocation10 + $0x134] ss:$8 sps:$4 sm:$0xff]   ;;  %v2188_v2 = vpack.c.bf16 %v2166_v47, %v2165_v59  ;;  %v8679_v14 = vld [vmem:[#allocation10 + $0x130] ss:$8 sps:$4 sm:$0xff]   ;;  %v8694_v59 = vld [vmem:[#allocation10] ss:$8 sps:$4 sm:$0xff]  }
 0x24c   : > { %12462 = vst [vmem:[#allocation121_spill] sm:$0xff] %v10206_v26  ;;  %12463 = vst [vmem:[#allocation122_spill] sm:$0xff] %v10208_v36  ;;  %v8682_v36 = vld [vmem:[#allocation10 + $0x20] ss:$8 sps:$4 sm:$0xff]   ;;  %v2168_v47 = vld [vmem:[#allocation2 + $0xd2] sm:$0xff] }
 0x24d   : > { %v10210_v0 = vpop.f32.mrf.mxu0  ;;  %v10212_v25 = vpop.f32.mrf.mxu1  ;;  %5454 = vmatpush1.bf16.msra.mxu1 %v8682_v36  ;;  %v8696_v36 = vld [vmem:[#allocation10 + $0x4] ss:$8 sps:$4 sm:$0xff]   ;;  %v2189_v51 = vpack.c.bf16 %v2168_v47, %v2167_v55 }
 0x24e   : > { %12464 = vst [vmem:[#allocation123_spill] sm:$0xff] %v10210_v0  ;;  %12465 = vst [vmem:[#allocation124_spill] sm:$0xff] %v10212_v25  ;;  %v8690_v0 = vld [vmem:[#allocation10 + $0x14] ss:$8 sps:$4 sm:$0xff]   ;;  %5177 = vmatpush1.bf16.msra.mxu0 %v8673_v20 }
 0x24f   : > { %v10214_v5 = vpop.f32.mrf.mxu0  ;;  %v10216_v58 = vpop.f32.mrf.mxu1  ;;  %8141 = vmatmul.mubr.msk.bf16.gmra.mxu0 %vm1158_vm4, %v2187_v37  ;;  %8157 = vmatmul.mubr.msk.bf16.gmra.mxu1 %vm1158_vm4, %v2187_v37 }
 0x250   : > { %2510 = vmatprep.mubr.bf16.mxu0 %v12451_v31  ;;  %2703 = vmatprep.mubr.bf16.mxu1 %v12451_v31 }
 0x251   : > { %v10222_v25 = vpop.f32.mrf.mxu0  ;;  %v10224_v53 = vpop.f32.mrf.mxu1  ;;  %5455 = vmatprep.subr.bf16.mxu1 %v8690_v0  ;;  %5178 = vmatprep.subr.bf16.mxu0 %v8681_v48  ;;  %v8687_v0 = vld [vmem:[#allocation10 + $0x124] ss:$8 sps:$4 sm:$0xff]   ;;  %v8685_v48 = vld [vmem:[#allocation10 + $0x120] ss:$8 sps:$4 sm:$0xff]  }
 0x252   : > { %5179 = vmatpush1.bf16.msra.mxu0 %v8679_v14  ;;  %5456 = vmatpush1.bf16.msra.mxu1 %v8688_v60 }
 0x253   : > { %v10226_v26 = vpop.f32.mrf.mxu0  ;;  %v10228_v37 = vpop.f32.mrf.mxu1  ;;  %5180 = vmatprep.subr.bf16.mxu0 %v8687_v0  ;;  %5457 = vmatprep.subr.bf16.mxu1 %v8696_v36  ;;  %v8691_v0 = vld [vmem:[#allocation10 + $0x110] ss:$8 sps:$4 sm:$0xff]   ;;  %v8702_v36 = vld [vmem:[#allocation10 + $0xf4] ss:$8 sps:$4 sm:$0xff]  }
 0x255   : > { %v10230_v9 = vpop.f32.mrf.mxu0  ;;  %v10232_v3 = vpop.f32.mrf.mxu1 }
 0x256   : > { %5181 = vmatpush1.bf16.msra.mxu0 %v8685_v48  ;;  %5458 = vmatpush1.bf16.msra.mxu1 %v8694_v59  ;;  %v2169_v48 = vld [vmem:[#allocation2 + $0xda] sm:$0xff]  ;;  %v2170_v59 = vld [vmem:[#allocation2 + $0xe2] sm:$0xff] }
 0x257   : > { %v10234_v15 = vpop.f32.mrf.mxu0  ;;  %v10236_v42 = vpop.f32.mrf.mxu1  ;;  %8142 = vmatmul.mubr.msk.bf16.gmra.mxu0 %vm1158_vm4, %v2188_v2  ;;  %8158 = vmatmul.mubr.msk.bf16.gmra.mxu1 %vm1158_vm4, %v2188_v2  ;;  %v2190_v43 = vpack.c.bf16 %v2170_v59, %v2169_v48  ;;  %v2172_v48 = vld [vmem:[#allocation2 + $0xfa] sm:$0xff] }
 0x258   : > { %2520 = vmatprep.mubr.bf16.mxu0 %v12451_v31  ;;  %2713 = vmatprep.mubr.bf16.mxu1 %v12451_v31 }
 0x259   : > { %v10242_v57 = vpop.f32.mrf.mxu0  ;;  %v10244_v20 = vpop.f32.mrf.mxu1  ;;  %5182 = vmatprep.subr.bf16.mxu0 %v8693_v50  ;;  %5459 = vmatprep.subr.bf16.mxu1 %v8702_v36  ;;  %v8706_v50 = vld [vmem:[#allocation10 + $0xe0] ss:$8 sps:$4 sm:$0xff]  }
 0x25a   : > { %5183 = vmatpush1.bf16.msra.mxu0 %v8691_v0  ;;  %5460 = vmatpush2.bf16.msra.mxu1 %v8700_v49  ;;  %v8708_v49 = vld [vmem:[#allocation10 + $0xe4] ss:$8 sps:$4 sm:$0xff]  }
 0x25b   : > { %v10246_v56 = vpop.f32.mrf.mxu0  ;;  %v10248_v2 = vpop.f32.mrf.mxu1  ;;  %5184 = vmatprep.subr.bf16.mxu0 %v8699_v41  ;;  %5461 = vmatprep.subr.bf16.mxu1 %v8708_v49 }
 0x25d   : > { %v10250_v54 = vpop.f32.mrf.mxu0  ;;  %v10252_v52 = vpop.f32.mrf.mxu1 }
 0x25e   : > { %5185 = vmatpush1.bf16.msra.mxu0 %v8697_v40  ;;  %5462 = vmatpush2.bf16.msra.mxu1 %v8706_v50  ;;  %v2173_v50 = vld [vmem:[#allocation2 + $0x102] sm:$0xff] }
 0x25f   : > { %v10254_v14 = vpop.f32.mrf.mxu0  ;;  %v10256_v60 = vpop.f32.mrf.mxu1  ;;  %8143 = vmatmul.mubr.msk.bf16.gmra.mxu0 %vm1158_vm4, %v2189_v51  ;;  %8159 = vmatmul.mubr.msk.bf16.gmra.mxu1 %vm1158_vm4, %v2189_v51 }
 0x260   : > { %2530 = vmatprep.mubr.bf16.mxu0 %v12451_v31  ;;  %2723 = vmatprep.mubr.bf16.mxu1 %v12451_v31 }
 0x261   : > { %v10262_v46 = vpop.f32.mrf.mxu0  ;;  %v10264_v55 = vpop.f32.mrf.mxu1  ;;  %5463 = vmatprep.subr.bf16.mxu1 %v8714_v32 }
 0x263   : > { %v10266_v47 = vpop.f32.mrf.mxu0  ;;  %v10268_v51 = vpop.f32.mrf.mxu1 }
 0x265   : > { %v10270_v45 = vpop.f32.mrf.mxu0  ;;  %v10272_v44 = vpop.f32.mrf.mxu1 }
 0x266   : > { %12466 = vst [vmem:[#allocation125_spill] sm:$0xff] %v10272_v44  ;;  %v8712_v44 = vld [vmem:[#allocation10 + $0xd0] ss:$8 sps:$4 sm:$0xff]  }
 0x267   : > { %v10274_v39 = vpop.f32.mrf.mxu0  ;;  %v10276_v38 = vpop.f32.mrf.mxu1  ;;  %8144 = vmatmul.mubr.msk.bf16.gmra.mxu0 %vm1158_vm4, %v2190_v43  ;;  %8160 = vmatmul.mubr.msk.bf16.gmra.mxu1 %vm1158_vm4, %v2190_v43  ;;  %v2171_v43 = vld [vmem:[#allocation2 + $0xf2] sm:$0xff] }
 0x268   : > { %12467 = vst [vmem:[#allocation126_spill] sm:$0xff] %v10274_v39  ;;  %12468 = vst [vmem:[#allocation127_spill] sm:$0xff] %v10276_v38  ;;  %2540 = vmatprep.mubr.bf16.mxu0 %v12451_v31  ;;  %2733 = vmatprep.mubr.bf16.mxu1 %v12451_v31  ;;  %v2191_v33 = vpack.c.bf16 %v2172_v48, %v2171_v43  ;;  %v8705_v39 = vld [vmem:[#allocation10 + $0x1f4] ss:$8 sps:$4 sm:$0xff]   ;;  %v2174_v48 = vld [vmem:[#allocation2 + $0x10a] sm:$0xff] }
 0x269   : > { %v10282_v0 = vpop.f32.mrf.mxu0  ;;  %v10284_v36 = vpop.f32.mrf.mxu1  ;;  %5186 = vmatprep.subr.bf16.mxu0 %v8705_v39  ;;  %5464 = vmatpush2.bf16.msra.mxu1 %v8712_v44 }
 0x26a   : > { %12469 = vst [vmem:[#allocation128_spill] sm:$0xff] %v10282_v0  ;;  %12470 = vst [vmem:[#allocation129_spill] sm:$0xff] %v10284_v36  ;;  %v8703_v0 = vld [vmem:[#allocation10 + $0x1f0] ss:$8 sps:$4 sm:$0xff]  }
 0x26b   : > { %v10286_v59 = vpop.f32.mrf.mxu0  ;;  %v10288_v35 = vpop.f32.mrf.mxu1  ;;  %5187 = vmatpush2.bf16.msra.mxu0 %v8703_v0 }
 0x26c   : > { %12471 = vst [vmem:[#allocation130_spill] sm:$0xff] %v10288_v35 }
 0x26d   : > { %v10290_v34 = vpop.f32.mrf.mxu0  ;;  %v10292_v38 = vpop.f32.mrf.mxu1 }
 0x26e   : > { %12472 = vst [vmem:[#allocation131_spill] sm:$0xff] %v10290_v34  ;;  %12473 = vst [vmem:[#allocation132_spill] sm:$0xff] %v10292_v38  ;;  %v8720_v38 = vld [vmem:[#allocation10 + $0xc4] ss:$8 sps:$4 sm:$0xff]  }
 0x26f   : > { %v10294_v36 = vpop.f32.mrf.mxu0  ;;  %v10296_v41 = vpop.f32.mrf.mxu1  ;;  %8145 = vmatmul.mubr.msk.bf16.gmra.mxu0 %vm1158_vm4, %v2191_v33  ;;  %8161 = vmatmul.mubr.msk.bf16.gmra.mxu1 %vm1158_vm4, %v2191_v33  ;;  %v8709_v33 = vld [vmem:[#allocation10 + $0x1e0] ss:$8 sps:$4 sm:$0xff]  }
 0x270   : > { %12474 = vst [vmem:[#allocation133_spill] sm:$0xff] %v10294_v36  ;;  %12475 = vst [vmem:[#allocation134_spill] sm:$0xff] %v10296_v41  ;;  %2550 = vmatprep.mubr.bf16.mxu0 %v12451_v31  ;;  %2743 = vmatprep.mubr.bf16.mxu1 %v12451_v31  ;;  %v8711_v36 = vld [vmem:[#allocation10 + $0x1e4] ss:$8 sps:$4 sm:$0xff]  }
 0x271   : > { %v10302_v40 = vpop.f32.mrf.mxu0  ;;  %v10304_v49 = vpop.f32.mrf.mxu1  ;;  %5188 = vmatprep.subr.bf16.mxu0 %v8711_v36  ;;  %5465 = vmatprep.subr.bf16.mxu1 %v8720_v38  ;;  %v2176_v36 = vld [vmem:[#allocation2 + $0x122] sm:$0xff] }
 0x272   : > { %12476 = vst [vmem:[#allocation135_spill] sm:$0xff] %v10302_v40  ;;  %12477 = vst [vmem:[#allocation136_spill] sm:$0xff] %v10304_v49  ;;  %v2192_v40 = vpack.c.bf16 %v2174_v48, %v2173_v50  ;;  %v8718_v49 = vld [vmem:[#allocation10 + $0xc0] ss:$8 sps:$4 sm:$0xff]   ;;  %5189 = vmatpush2.bf16.msra.mxu0 %v8709_v33  ;;  %v8717_v50 = vld [vmem:[#allocation10 + $0x1d4] ss:$8 sps:$4 sm:$0xff]  }
 0x273   : > { %v10306_v43 = vpop.f32.mrf.mxu0  ;;  %v10308_v41 = vpop.f32.mrf.mxu1  ;;  %5466 = vmatpush2.bf16.msra.mxu1 %v8718_v49  ;;  %v8715_v33 = vld [vmem:[#allocation10 + $0x1d0] ss:$8 sps:$4 sm:$0xff]   ;;  %5190 = vmatprep.subr.bf16.mxu0 %v8717_v50  ;;  %v8732_v50 = vld [vmem:[#allocation10 + $0xa4] ss:$8 sps:$4 sm:$0xff]  }
 0x274   : > { %12478 = vst [vmem:[#allocation137_spill] sm:$0xff] %v10308_v41 }
 0x275   : > { %v10310_v34 = vpop.f32.mrf.mxu0  ;;  %v10312_v35 = vpop.f32.mrf.mxu1 }
 0x276   : > { %12479 = vst [vmem:[#allocation138_spill] sm:$0xff] %v10310_v34  ;;  %12480 = vst [vmem:[#allocation139_spill] sm:$0xff] %v10312_v35  ;;  %5191 = vmatpush2.bf16.msra.mxu0 %v8715_v33  ;;  %v2178_v33 = vld [vmem:[#allocation2 + $0x132] sm:$0xff] }
 0x277   : > { %v10314_v32 = vpop.f32.mrf.mxu0  ;;  %v10316_v39 = vpop.f32.mrf.mxu1  ;;  %8146 = vmatmul.mubr.msk.bf16.gmra.mxu0 %vm1158_vm4, %v2192_v40  ;;  %8162 = vmatmul.mubr.msk.bf16.gmra.mxu1 %vm1158_vm4, %v2192_v40  ;;  %v8724_v40 = vld [vmem:[#allocation10 + $0xb0] ss:$8 sps:$4 sm:$0xff]  }
 0x278   : > { %12481 = vst [vmem:[#allocation140_spill] sm:$0xff] %v10314_v32  ;;  %12482 = vst [vmem:[#allocation141_spill] sm:$0xff] %v10316_v39  ;;  %2560 = vmatprep.mubr.bf16.mxu0 %v12451_v31  ;;  %2753 = vmatprep.mubr.bf16.mxu1 %v12451_v31  ;;  %v8726_v39 = vld [vmem:[#allocation10 + $0xb4] ss:$8 sps:$4 sm:$0xff]  }
 0x279   : > { %v10322_v44 = vpop.f32.mrf.mxu0  ;;  %v10324_v0 = vpop.f32.mrf.mxu1  ;;  %v2175_v32 = vld [vmem:[#allocation2 + $0x11a] sm:$0xff]  ;;  %5467 = vmatprep.subr.bf16.mxu1 %v8726_v39  ;;  %v8730_v39 = vld [vmem:[#allocation10 + $0xa0] ss:$8 sps:$4 sm:$0xff]  }
 0x27a   : > { %12483 = vst [vmem:[#allocation142_spill] sm:$0xff] %v10322_v44  ;;  %12484 = vst [vmem:[#allocation143_spill] sm:$0xff] %v10324_v0  ;;  %v2193_v41 = vpack.c.bf16 %v2176_v36, %v2175_v32  ;;  %5468 = vmatpush2.bf16.msra.mxu1 %v8724_v40  ;;  %v8723_v32 = vld [vmem:[#allocation10 + $0x1c4] ss:$8 sps:$4 sm:$0xff]   ;;  %v8721_v40 = vld [vmem:[#allocation10 + $0x1c0] ss:$8 sps:$4 sm:$0xff]  }
 0x27b   : > { %v10326_v38 = vpop.f32.mrf.mxu0  ;;  %v10328_v48 = vpop.f32.mrf.mxu1  ;;  %v2177_v36 = vld [vmem:[#allocation2 + $0x12a] sm:$0xff]  ;;  %5469 = vmatprep.subr.bf16.mxu1 %v8732_v50  ;;  %5192 = vmatprep.subr.bf16.mxu0 %v8723_v32  ;;  %v8727_v50 = vld [vmem:[#allocation10 + $0x1b0] ss:$8 sps:$4 sm:$0xff]  }
 0x27c   : > { %12485 = vst [vmem:[#allocation144_spill] sm:$0xff] %v10326_v38  ;;  %12486 = vst [vmem:[#allocation145_spill] sm:$0xff] %v10328_v48  ;;  %5193 = vmatpush2.bf16.msra.mxu0 %v8721_v40  ;;  %v8729_v48 = vld [vmem:[#allocation10 + $0x1b4] ss:$8 sps:$4 sm:$0xff]   ;;  %v8736_v40 = vld [vmem:[#allocation10 + $0x90] ss:$8 sps:$4 sm:$0xff]  }
 0x27d   : > { %v10330_v35 = vpop.f32.mrf.mxu0  ;;  %v10332_v34 = vpop.f32.mrf.mxu1  ;;  %5194 = vmatprep.subr.bf16.mxu0 %v8729_v48  ;;  %v8735_v48 = vld [vmem:[#allocation10 + $0x1a4] ss:$8 sps:$4 sm:$0xff]  }
 0x27e   : > { %12487 = vst [vmem:[#allocation146_spill] sm:$0xff] %v10330_v35  ;;  %12488 = vst [vmem:[#allocation147_spill] sm:$0xff] %v10332_v34  ;;  %5470 = vmatpush2.bf16.msra.mxu1 %v8730_v39 }
 0x27f   : > { %v10334_v49 = vpop.f32.mrf.mxu0  ;;  %v10336_v0 = vpop.f32.mrf.mxu1  ;;  %8147 = vmatmul.mubr.msk.bf16.gmra.mxu0 %vm1158_vm4, %v2193_v41  ;;  %8163 = vmatmul.mubr.msk.bf16.gmra.mxu1 %vm1158_vm4, %v2193_v41 }
 0x280   : > { %12489 = vst [vmem:[#allocation148_spill] sm:$0xff] %v10334_v49  ;;  %12490 = vst [vmem:[#allocation149_spill] sm:$0xff] %v10336_v0  ;;  %2570 = vmatprep.mubr.bf16.mxu0 %v12451_v31  ;;  %2763 = vmatprep.mubr.bf16.mxu1 %v12451_v31 }
 0x281   : > { %v10342_v35 = vpop.f32.mrf.mxu0  ;;  %v10344_v34 = vpop.f32.mrf.mxu1  ;;  %5195 = vmatpush2.bf16.msra.mxu0 %v8727_v50  ;;  %v12507_v50 = vmov 0.0  }
 0x282   : > { %12491 = vst [vmem:[#allocation150_spill] sm:$0xff] %v10342_v35  ;;  %12492 = vst [vmem:[#allocation151_spill] sm:$0xff] %v10344_v34  ;;  %v2194_v35 = vpack.c.bf16 %v2178_v33, %v2177_v36  ;;  %5196 = vmatprep.subr.bf16.mxu0 %v8735_v48 }
 0x283   : > { %v10346_v0 = vpop.f32.mrf.mxu0  ;;  %v10348_v49 = vpop.f32.mrf.mxu1 }
 0x284   : > { %12493 = vst [vmem:[#allocation152_spill] sm:$0xff] %v10346_v0  ;;  %12494 = vst [vmem:[#allocation153_spill] sm:$0xff] %v10348_v49  ;;  %v8738_v49 = vld [vmem:[#allocation10 + $0x94] ss:$8 sps:$4 sm:$0xff]  }
 0x285   : > { %v10350_v41 = vpop.f32.mrf.mxu0  ;;  %v10352_v31 = vpop.f32.mrf.mxu1  ;;  %5471 = vmatprep.subr.bf16.mxu1 %v8738_v49 }
 0x286   : > { %12495 = vst [vmem:[#allocation154_spill] sm:$0xff] %v10350_v41  ;;  %12496 = vst [vmem:[#allocation155_spill] sm:$0xff] %v10352_v31  ;;  %5472 = vmatpush2.bf16.msra.mxu1 %v8736_v40 }
 0x287   : > { %v10354_v34 = vpop.f32.mrf.mxu0  ;;  %v10356_v38 = vpop.f32.mrf.mxu1  ;;  %8148 = vmatmul.mubr.msk.bf16.gmra.mxu0 %vm1158_vm4, %v2194_v35  ;;  %8164 = vmatmul.mubr.msk.bf16.gmra.mxu1 %vm1158_vm4, %v2194_v35  ;;  %v8741_v35 = vld [vmem:[#allocation10 + $0x194] ss:$8 sps:$4 sm:$0xff]  }
 0x288   : > { %12497 = vst [vmem:[#allocation156_spill] sm:$0xff] %v10354_v34  ;;  %12498 = vst [vmem:[#allocation157_spill] sm:$0xff] %v10356_v38  ;;  %v12332_v34 = vlaneseq }
 0x289   : > { %v10360_v32 = vpop.f32.mrf.mxu0  ;;  %v10362_v39 = vpop.f32.mrf.mxu1 }
 0x28a   : > { %12499 = vst [vmem:[#allocation158_spill] sm:$0xff] %v10360_v32  ;;  %12500 = vst [vmem:[#allocation159_spill] sm:$0xff] %v10362_v39  ;;  %vm10373_vm5 = vcmp.lt.s32.totalorder %v12332_v34, 256  ;;  %v8744_v39 = vld [vmem:[#allocation10 + $0x84] ss:$8 sps:$4 sm:$0xff]  }
 0x28b   : > { %v10364_v36 = vpop.f32.mrf.mxu0  ;;  %v10366_v33 = vpop.f32.mrf.mxu1  ;;  %4144 = vst.msk [vmem:[#allocation3] ss:$8 sm:$0x3] %vm10373_vm5, %v12507_v50  ;;  %4147 = vst.msk [vmem:[#allocation3 + $0x30] ss:$8 sm:$0x3] %vm10373_vm5, %v12507_v50  ;;  %5473 = vmatprep.subr.bf16.mxu1 %v8744_v39 }
 0x28c   : > { %12501 = vst [vmem:[#allocation160_spill] sm:$0xff] %v10364_v36  ;;  %12502 = vst [vmem:[#allocation161_spill] sm:$0xff] %v10366_v33  ;;  %v8733_v34 = vld [vmem:[#allocation10 + $0x1a0] ss:$8 sps:$4 sm:$0xff]  }
 0x28d   : > { %v10368_v38 = vpop.f32.mrf.mxu0  ;;  %v10370_v31 = vpop.f32.mrf.mxu1  ;;  %4150 = vst.msk [vmem:[#allocation3 + $0x60] ss:$8 sm:$0x3] %vm10373_vm5, %v12507_v50  ;;  %4153 = vst.msk [vmem:[#allocation3 + $0x90] ss:$8 sm:$0x3] %vm10373_vm5, %v12507_v50  ;;  %5197 = vmatpush2.bf16.msra.mxu0 %v8733_v34 }
 0x28e   : > { %12503 = vst [vmem:[#allocation162_spill] sm:$0xff] %v10368_v38  ;;  %12504 = vst [vmem:[#allocation163_spill] sm:$0xff] %v10370_v31  ;;  %v8742_v31 = vld [vmem:[#allocation10 + $0x80] ss:$8 sps:$4 sm:$0xff]   ;;  %5198 = vmatprep.subr.bf16.mxu0 %v8741_v35 }
 0x28f   : > { %4156 = vst.msk [vmem:[#allocation3 + $0xc0] ss:$8 sm:$0x3] %vm10373_vm5, %v12507_v50  ;;  %4159 = vst.msk [vmem:[#allocation3 + $0xf0] ss:$8 sm:$0x3] %vm10373_vm5, %v12507_v50  ;;  %v10425_v49 = vpop.f32.mrf.mxu0  ;;  %v10427_v40 = vpop.f32.mrf.mxu1  ;;  %5474 = vmatpush2.bf16.msra.mxu1 %v8742_v31 }
 0x290   : > { %4162 = vst.msk [vmem:[#allocation3 + $0x120] ss:$8 sm:$0x3] %vm10373_vm5, %v12507_v50  ;;  %4165 = vst.msk [vmem:[#allocation3 + $0x150] ss:$8 sm:$0x3] %vm10373_vm5, %v12507_v50 }
 0x291   : > { %4168 = vst.msk [vmem:[#allocation3 + $0x21] ss:$8 sm:$0x3] %vm10373_vm5, %v12507_v50  ;;  %4171 = vst.msk [vmem:[#allocation3 + $0x51] ss:$8 sm:$0x3] %vm10373_vm5, %v12507_v50  ;;  %v10429_v38 = vpop.f32.mrf.mxu0  ;;  %v10431_v33 = vpop.f32.mrf.mxu1 }
 0x292   : > { %4174 = vst.msk [vmem:[#allocation3 + $0x81] ss:$8 sm:$0x3] %vm10373_vm5, %v12507_v50  ;;  %4177 = vst.msk [vmem:[#allocation3 + $0xb1] ss:$8 sm:$0x3] %vm10373_vm5, %v12507_v50 }
 0x293   : > { %4180 = vst.msk [vmem:[#allocation3 + $0xe1] ss:$8 sm:$0x3] %vm10373_vm5, %v12507_v50  ;;  %4183 = vst.msk [vmem:[#allocation3 + $0x111] ss:$8 sm:$0x3] %vm10373_vm5, %v12507_v50  ;;  %v10433_v36 = vpop.f32.mrf.mxu0  ;;  %v10435_v32 = vpop.f32.mrf.mxu1 }
 0x294   : > { %4186 = vst.msk [vmem:[#allocation3 + $0x141] ss:$8 sm:$0x3] %vm10373_vm5, %v12507_v50  ;;  %4189 = vst.msk [vmem:[#allocation3 + $0x171] ss:$8 sm:$0x3] %vm10373_vm5, %v12507_v50 }
 0x295   : > { %12508 = vst [vmem:[#allocation164_spill] sm:$0xff] %v10425_v49  ;;  %12509 = vst [vmem:[#allocation165_spill] sm:$0xff] %v10427_v40  ;;  %v10437_v50 = vpop.f32.mrf.mxu0  ;;  %v10439_v49 = vpop.f32.mrf.mxu1  ;;  %v8739_v40 = vld [vmem:[#allocation10 + $0x190] ss:$8 sps:$4 sm:$0xff]  }
 0x296   : > { %12510 = vst [vmem:[#allocation166_spill] sm:$0xff] %v10429_v38  ;;  %12511 = vst [vmem:[#allocation167_spill] sm:$0xff] %v10431_v33  ;;  %5199 = vmatpush2.bf16.msra.mxu0 %v8739_v40 }
 0x297   : > { %12512 = vst [vmem:[#allocation168_spill] sm:$0xff] %v10433_v36  ;;  %12513 = vst [vmem:[#allocation169_spill] sm:$0xff] %v10435_v32  ;;  %v10441_v41 = vpop.f32.mrf.mxu0  ;;  %v10443_v39 = vpop.f32.mrf.mxu1 }
 0x298   : > { %12514 = vst [vmem:[#allocation170_spill] sm:$0xff] %v10437_v50  ;;  %12515 = vst [vmem:[#allocation171_spill] sm:$0xff] %v10439_v49  ;;  %v8747_v49 = vld [vmem:[#allocation10 + $0x184] ss:$8 sps:$4 sm:$0xff]  }
 0x299   : > { %12516 = vst [vmem:[#allocation172_spill] sm:$0xff] %v10441_v41  ;;  %12517 = vst [vmem:[#allocation173_spill] sm:$0xff] %v10443_v39  ;;  %v10445_v48 = vpop.f32.mrf.mxu0  ;;  %v10447_v34 = vpop.f32.mrf.mxu1  ;;  %v8745_v41 = vld [vmem:[#allocation10 + $0x180] ss:$8 sps:$4 sm:$0xff]   ;;  %5200 = vmatprep.subr.bf16.mxu0 %v8747_v49 }
 0x29a   : > { %12518 = vst [vmem:[#allocation174_spill] sm:$0xff] %v10445_v48  ;;  %12519 = vst [vmem:[#allocation175_spill] sm:$0xff] %v10447_v34  ;;  %5201 = vmatpush2.bf16.msra.mxu0 %v8745_v41 }
 0x29b   : > { %v10449_v31 = vpop.f32.mrf.mxu0  ;;  %v10451_v36 = vpop.f32.mrf.mxu1 }
 0x29c   : > { %12520 = vst [vmem:[#allocation176_spill] sm:$0xff] %v10449_v31  ;;  %12521 = vst [vmem:[#allocation177_spill] sm:$0xff] %v10451_v36 }
 0x29d   : > { %v10453_v32 = vpop.f32.mrf.mxu0  ;;  %v10455_v50 = vpop.f32.mrf.mxu1 }
 0x29e   : > { %12522 = vst [vmem:[#allocation178_spill] sm:$0xff] %v10453_v32  ;;  %12523 = vst [vmem:[#allocation179_spill] sm:$0xff] %v10455_v50 }
 0x29f   : > { %v10457_v33 = vpop.f32.mrf.mxu0  ;;  %v10459_v35 = vpop.f32.mrf.mxu1 }
 0x2a0   : > { %12524 = vst [vmem:[#allocation180_spill] sm:$0xff] %v10457_v33  ;;  %12525 = vst [vmem:[#allocation181_spill] sm:$0xff] %v10459_v35 }
 0x2a1   : > { %v10461_v40 = vpop.f32.mrf.mxu0  ;;  %v10463_v48 = vpop.f32.mrf.mxu1 }
 0x2a2   : > { %12526 = vst [vmem:[#allocation182_spill] sm:$0xff] %v10461_v40  ;;  %12527 = vst [vmem:[#allocation183_spill] sm:$0xff] %v10463_v48 }
 0x2a3   : > { %v10465_v34 = vpop.f32.mrf.mxu0  ;;  %v10467_v31 = vpop.f32.mrf.mxu1 }
 0x2a4   : > { %12528 = vst [vmem:[#allocation184_spill] sm:$0xff] %v10465_v34  ;;  %12529 = vst [vmem:[#allocation185_spill] sm:$0xff] %v10467_v31  ;;  %v12540_v31 = vlaneseq }
 0x2a5   : > { %v10469_v36 = vpop.f32.mrf.mxu0  ;;  %v10471_v32 = vpop.f32.mrf.mxu1 }
 0x2a6   : > { %12530 = vst [vmem:[#allocation186_spill] sm:$0xff] %v10469_v36  ;;  %12531 = vst [vmem:[#allocation187_spill] sm:$0xff] %v10471_v32  ;;  %v2905_v36 = vshrl.u32 %v12540_v31, 7 }
 0x2a7   : > { %v10473_v50 = vpop.f32.mrf.mxu0  ;;  %v10475_v33 = vpop.f32.mrf.mxu1 }
 0x2a8   : > { %12532 = vst [vmem:[#allocation188_spill] sm:$0xff] %v10473_v50  ;;  %12533 = vst [vmem:[#allocation189_spill] sm:$0xff] %v10475_v33  ;;  %v10500_v0 = vsub.s32 1, %v2905_v36 }
 0x2a9   : > { %v10477_v35 = vpop.f32.mrf.mxu0  ;;  %v10479_v49 = vpop.f32.mrf.mxu1 }
 0x2aa   : > { %12534 = vst [vmem:[#allocation190_spill] sm:$0xff] %v10477_v35  ;;  %12535 = vst [vmem:[#allocation191_spill] sm:$0xff] %v10479_v49  ;;  %v10498_v35 = vsub.s32 0, %v2905_v36  ;;  %v2914_v49 = vsub.s32 2, %v2905_v36 }
 0x2ab   : > { %v10481_v40 = vpop.f32.mrf.mxu0  ;;  %v10483_v48 = vpop.f32.mrf.mxu1  ;;  %12546 = vst [vmem:[#allocation201_spill] sm:$0xff] %v10500_v0 }
 0x2ac   : > { %12536 = vst [vmem:[#allocation192_spill] sm:$0xff] %v10481_v40  ;;  %12537 = vst [vmem:[#allocation193_spill] sm:$0xff] %v10483_v48  ;;  %v9266_v40 = vmov 1966171168   ;;  %v2902_v48 = vld [vmem:[#allocation9] sm:$0xf] }
 0x2ad   : > { %v10485_v41 = vpop.f32.mrf.mxu0  ;;  %v10487_v34 = vpop.f32.mrf.mxu1  ;;  %12545 = vst [vmem:[#allocation200_spill] sm:$0xff] %v10498_v35  ;;  %v3437_v38 = vunpack.c.l.s4 %v9266_v40  ;;  %v10516_v40 = vadd.f32 %v10222_v25, %v9902_v63  ;;  %v10537_v63 = vadd.f32 %v10228_v37, %v9908_v6 }
 0x2ae   : > { %12538 = vst [vmem:[#allocation194_spill] sm:$0xff] %v10485_v41  ;;  %12539 = vst [vmem:[#allocation195_spill] sm:$0xff] %v10487_v34  ;;  %v2918_v41 = vsub.s32 3, %v2905_v36 }
 0x2af   : > { %v10490_v39 = vpop.f32.mrf.mxu0  ;;  %v10492_v32 = vpop.f32.mrf.mxu1 }
 0x2b0   : > { %12541 = vst [vmem:[#allocation196_spill] sm:$0xff] %v10490_v39  ;;  %12542 = vst [vmem:[#allocation197_spill] sm:$0xff] %v10492_v32  ;;  %v9267_v39 = vmov 1983009808   ;;  %v10520_v32 = vadd.f32 %v10224_v53, %v9904_v1  ;;  %v10540_v1 = vrot.slane %v2902_v48, %v10500_v0  ;;  %v10542_v25 = vrot.slane %v2902_v48, %v2918_v41  ;;  %v12566_v41 = vld [vmem:[#allocation131_spill] sm:$0xff] }
 0x2b1   : > { %v10494_v50 = vpop.f32.mrf.mxu0  ;;  %v10496_v33 = vpop.f32.mrf.mxu1  ;;  %v4258_v44 = vunpack.c.l.s4 %v9267_v39  ;;  %v10527_v39 = vrot.slane %v2902_v48, %v10498_v35  ;;  %v10550_v53 = vadd.f32 %v10232_v3, %v9912_v8  ;;  %v10570_v8 = vadd.f32 %v10244_v20, %v9924_v13  ;;  %v12553_v20 = vld [vmem:[#allocation127_spill] sm:$0xff]  ;;  %v12583_v35 = vld [vmem:[#allocation33_spill] sm:$0xff] }
 0x2b2   : > { %12543 = vst [vmem:[#allocation198_spill] sm:$0xff] %v10494_v50  ;;  %12544 = vst [vmem:[#allocation199_spill] sm:$0xff] %v10496_v33  ;;  %v10508_v50 = vadd.f32 %v10214_v5, %v9894_v61  ;;  %v10512_v33 = vadd.f32 %v10216_v58, %v9896_v62  ;;  %v10529_v61 = vrot.slane %v2902_v48, %v2914_v49  ;;  %v3438_v5 = vunpack.c.0.s8 %v3437_v38  ;;  %v12565_v49 = vld [vmem:[#allocation27_spill] sm:$0xff] }
 0x2b3   : > { %v10502_v34 = vpop.f32.mrf.mxu0  ;;  %v10504_v31 = vpop.f32.mrf.mxu1  ;;  %v10533_v62 = vadd.f32 %v10226_v26, %v9906_v4  ;;  %v10546_v58 = vadd.f32 %v10230_v9, %v9910_v7  ;;  %v10554_v4 = vadd.f32 %v10234_v15, %v9914_v10  ;;  %v4259_v37 = vunpack.c.0.s8 %v4258_v44  ;;  %v12551_v15 = vld [vmem:[#allocation126_spill] sm:$0xff] }
 0x2b4   : > { %12547 = vst [vmem:[#allocation202_spill] sm:$0xff] %v10502_v34  ;;  %12548 = vst [vmem:[#allocation203_spill] sm:$0xff] %v10504_v31  ;;  %v10562_v38 = vadd.f32 %v10236_v42, %v9916_v11  ;;  %v10566_v7 = vadd.f32 %v10242_v57, %v9922_v12  ;;  %v10574_v10 = vadd.f32 %v10246_v56, %v9926_v16  ;;  %v12562_v44 = vld [vmem:[#allocation26_spill] sm:$0xff] }
 0x2b5   : > { %v10522_v34 = vpop.f32.mrf.mxu0  ;;  %v10524_v31 = vpop.f32.mrf.mxu1  ;;  %v10578_v3 = vadd.f32 %v10248_v2, %v9928_v17  ;;  %v10582_v11 = vadd.f32 %v10250_v54, %v9930_v18  ;;  %v10586_v12 = vadd.f32 %v10252_v52, %v9932_v19  ;;  %v10592_v9 = vsub.s32 %v3438_v5, %v2905_v36 }
 0x2b6   : > { %v10596_v16 = vadd.f32 %v10254_v14, %v9934_v21  ;;  %v10600_v17 = vadd.f32 %v10256_v60, %v9936_v22  ;;  %v10604_v18 = vadd.f32 %v10262_v46, %v9942_v23  ;;  %v10608_v19 = vadd.f32 %v10264_v55, %v9944_v24  ;;  %v12549_v24 = vld [vmem:[#allocation125_spill] sm:$0xff]  ;;  %v12557_v60 = vld [vmem:[#allocation24_spill] sm:$0xff] }
 0x2b7   : > { %v10556_v26 = vpop.f32.mrf.mxu0  ;;  %v10558_v6 = vpop.f32.mrf.mxu1  ;;  %v10612_v52 = vadd.f32 %v10266_v47, %v9946_v27  ;;  %v10616_v21 = vadd.f32 %v10268_v51, %v9948_v28  ;;  %v10620_v22 = vadd.f32 %v10270_v45, %v9950_v29  ;;  %v10626_v46 = vsub.s32 %v4259_v37, %v2905_v36  ;;  %v12550_v27 = vld [vmem:[#allocation21_spill] sm:$0xff]  ;;  %v12552_v28 = vld [vmem:[#allocation22_spill] sm:$0xff]  ;;  %v12554_v29 = vld [vmem:[#allocation23_spill] sm:$0xff] }
 0x2b8   : > { %v10630_v56 = vadd.f32 %v12549_v24, %v9952_v30  ;;  %v10634_v42 = vadd.f32 %v12551_v15, %v12550_v27  ;;  %v10638_v2 = vadd.f32 %v12553_v20, %v12552_v28  ;;  %v12555_v45 = vld [vmem:[#allocation128_spill] sm:$0xff]  ;;  %v12558_v55 = vld [vmem:[#allocation129_spill] sm:$0xff]  ;;  %v12563_v36 = vld [vmem:[#allocation130_spill] sm:$0xff]  ;;  %v10658_v5 = vadd.f32 %v12566_v41, %v12565_v49 }
 0x2b9   : > { %v10588_v57 = vpop.f32.mrf.mxu0  ;;  %v10590_v13 = vpop.f32.mrf.mxu1  ;;  %v10642_v14 = vadd.f32 %v12555_v45, %v12554_v29  ;;  %v10646_v47 = vadd.f32 %v12558_v55, %v12557_v60  ;;  %v12560_v51 = vld [vmem:[#allocation25_spill] sm:$0xff]  ;;  %v10654_v48 = vadd.f32 %v12563_v36, %v12562_v44  ;;  %v12568_v27 = vld [vmem:[#allocation28_spill] sm:$0xff]  ;;  %v12574_v45 = vld [vmem:[#allocation30_spill] sm:$0xff] }
 0x2ba   : > { %v10650_v30 = vadd.f32 %v10286_v59, %v12560_v51  ;;  %12567 = vst [vmem:[#allocation127_spill] sm:$0xff] %v10658_v5  ;;  %v12569_v15 = vld [vmem:[#allocation132_spill] sm:$0xff]  ;;  %v12571_v20 = vld [vmem:[#allocation29_spill] sm:$0xff]  ;;  %v12575_v60 = vld [vmem:[#allocation134_spill] sm:$0xff] }
 0x2bb   : > { %v10622_v54 = vpop.f32.mrf.mxu0  ;;  %v10624_v23 = vpop.f32.mrf.mxu1  ;;  %12556 = vst [vmem:[#allocation125_spill] sm:$0xff] %v10642_v14  ;;  %12559 = vst [vmem:[#allocation21_spill] sm:$0xff] %v10646_v47  ;;  %v10666_v28 = vadd.f32 %v12569_v15, %v12568_v27  ;;  %v12572_v29 = vld [vmem:[#allocation133_spill] sm:$0xff]  ;;  %v10674_v55 = vadd.f32 %v12575_v60, %v12574_v45  ;;  %v12577_v51 = vld [vmem:[#allocation31_spill] sm:$0xff]  ;;  %v10686_v27 = vadd.f32 %v10306_v43, %v12583_v35 }
 0x2bc   : > { %12561 = vst [vmem:[#allocation126_spill] sm:$0xff] %v10650_v30  ;;  %12564 = vst [vmem:[#allocation22_spill] sm:$0xff] %v10654_v48  ;;  %v10670_v59 = vadd.f32 %v12572_v29, %v12571_v20  ;;  %v12578_v44 = vld [vmem:[#allocation135_spill] sm:$0xff]  ;;  %v12580_v49 = vld [vmem:[#allocation32_spill] sm:$0xff] }
 0x2bd   : > { %v10660_v37 = vpop.f32.mrf.mxu0  ;;  %v10662_v24 = vpop.f32.mrf.mxu1  ;;  %12570 = vst [vmem:[#allocation23_spill] sm:$0xff] %v10666_v28  ;;  %12576 = vst [vmem:[#allocation24_spill] sm:$0xff] %v10674_v55  ;;  %v10678_v36 = vadd.f32 %v12578_v44, %v12577_v51  ;;  %v12581_v41 = vld [vmem:[#allocation136_spill] sm:$0xff]  ;;  %v12585_v15 = vld [vmem:[#allocation34_spill] sm:$0xff] }
 0x2be   : > { %12573 = vst [vmem:[#allocation128_spill] sm:$0xff] %v10670_v59  ;;  %v10682_v0 = vadd.f32 %v12581_v41, %v12580_v49  ;;  %12584 = vst [vmem:[#allocation26_spill] sm:$0xff] %v10686_v27  ;;  %v12586_v28 = vld [vmem:[#allocation137_spill] sm:$0xff]  ;;  %v12588_v29 = vld [vmem:[#allocation35_spill] sm:$0xff] }
 0x2bf   : > { %12579 = vst [vmem:[#allocation129_spill] sm:$0xff] %v10678_v36  ;;  %v10690_v20 = vadd.f32 %v12586_v28, %v12585_v15  ;;  %v12589_v59 = vld [vmem:[#allocation138_spill] sm:$0xff]  ;;  %v10696_v60 = vpop.f32.mrf.mxu0  ;;  %v10698_v51 = vpop.f32.mrf.mxu1  ;;  %v12591_v44 = vld [vmem:[#allocation36_spill] sm:$0xff]  ;;  %v12592_v36 = vld [vmem:[#allocation139_spill] sm:$0xff] }
 0x2c0   : > { %12582 = vst [vmem:[#allocation25_spill] sm:$0xff] %v10682_v0  ;;  %v10694_v45 = vadd.f32 %v12589_v59, %v12588_v29  ;;  %v10702_v49 = vadd.f32 %v12592_v36, %v12591_v44  ;;  %v12594_v41 = vld [vmem:[#allocation37_spill] sm:$0xff]  ;;  %v12595_v0 = vld [vmem:[#allocation140_spill] sm:$0xff]  ;;  %v12597_v35 = vld [vmem:[#allocation38_spill] sm:$0xff] }
 0x2c1   : > { %12587 = vst [vmem:[#allocation130_spill] sm:$0xff] %v10690_v20  ;;  %v10706_v43 = vadd.f32 %v12595_v0, %v12594_v41  ;;  %v12598_v27 = vld [vmem:[#allocation141_spill] sm:$0xff]  ;;  %v12600_v15 = vld [vmem:[#allocation39_spill] sm:$0xff]  ;;  %v12601_v20 = vld [vmem:[#allocation142_spill] sm:$0xff] }
 0x2c2   : > { %12590 = vst [vmem:[#allocation27_spill] sm:$0xff] %v10694_v45  ;;  %12593 = vst [vmem:[#allocation131_spill] sm:$0xff] %v10702_v49  ;;  %v10710_v28 = vadd.f32 %v12598_v27, %v12597_v35  ;;  %v10714_v59 = vadd.f32 %v12601_v20, %v12600_v15  ;;  %v12603_v29 = vld [vmem:[#allocation40_spill] sm:$0xff]  ;;  %v12604_v45 = vld [vmem:[#allocation143_spill] sm:$0xff]  ;;  %v10732_v35 = vpop.f32.mrf.mxu0  ;;  %v10734_v20 = vpop.f32.mrf.mxu1 }
 0x2c3   : > { %12596 = vst [vmem:[#allocation28_spill] sm:$0xff] %v10706_v43  ;;  %v10718_v55 = vadd.f32 %v12604_v45, %v12603_v29  ;;  %v12606_v5 = vld [vmem:[#allocation41_spill] sm:$0xff]  ;;  %v12607_v48 = vld [vmem:[#allocation144_spill] sm:$0xff]  ;;  %v12609_v44 = vld [vmem:[#allocation42_spill] sm:$0xff] }
 0x2c4   : > { %12599 = vst [vmem:[#allocation132_spill] sm:$0xff] %v10710_v28  ;;  %12602 = vst [vmem:[#allocation29_spill] sm:$0xff] %v10714_v59  ;;  %v10722_v36 = vadd.f32 %v12607_v48, %v12606_v5  ;;  %v12610_v49 = vld [vmem:[#allocation145_spill] sm:$0xff]  ;;  %v12612_v41 = vld [vmem:[#allocation43_spill] sm:$0xff] }
 0x2c5   : > { %12605 = vst [vmem:[#allocation133_spill] sm:$0xff] %v10718_v55  ;;  %v10726_v0 = vadd.f32 %v12610_v49, %v12609_v44  ;;  %v12613_v43 = vld [vmem:[#allocation146_spill] sm:$0xff]  ;;  %v12615_v15 = vld [vmem:[#allocation44_spill] sm:$0xff]  ;;  %v12616_v59 = vld [vmem:[#allocation147_spill] sm:$0xff] }
 0x2c6   : > { %12608 = vst [vmem:[#allocation30_spill] sm:$0xff] %v10722_v36  ;;  %v10730_v27 = vadd.f32 %v12613_v43, %v12612_v41  ;;  %v10738_v45 = vadd.f32 %v12616_v59, %v12615_v15  ;;  %v12618_v29 = vld [vmem:[#allocation45_spill] sm:$0xff]  ;;  %v12619_v55 = vld [vmem:[#allocation148_spill] sm:$0xff]  ;;  %v12621_v5 = vld [vmem:[#allocation46_spill] sm:$0xff] }
 0x2c7   : > { %12611 = vst [vmem:[#allocation134_spill] sm:$0xff] %v10726_v0  ;;  %v10742_v48 = vadd.f32 %v12619_v55, %v12618_v29  ;;  %v12622_v36 = vld [vmem:[#allocation149_spill] sm:$0xff]  ;;  %v12624_v44 = vld [vmem:[#allocation47_spill] sm:$0xff]  ;;  %v12625_v0 = vld [vmem:[#allocation150_spill] sm:$0xff] }
 0x2c8   : > { %12614 = vst [vmem:[#allocation31_spill] sm:$0xff] %v10730_v27  ;;  %12617 = vst [vmem:[#allocation135_spill] sm:$0xff] %v10738_v45  ;;  %v10746_v49 = vadd.f32 %v12622_v36, %v12621_v5  ;;  %v10750_v43 = vadd.f32 %v12625_v0, %v12624_v44  ;;  %v12627_v41 = vld [vmem:[#allocation48_spill] sm:$0xff]  ;;  %v12628_v27 = vld [vmem:[#allocation151_spill] sm:$0xff]  ;;  %v10768_v5 = vpop.f32.mrf.mxu0  ;;  %v10770_v0 = vpop.f32.mrf.mxu1 }
 0x2c9   : > { %12620 = vst [vmem:[#allocation32_spill] sm:$0xff] %v10742_v48  ;;  %v10754_v28 = vadd.f32 %v12628_v27, %v12627_v41  ;;  %v12630_v30 = vld [vmem:[#allocation49_spill] sm:$0xff]  ;;  %v12631_v47 = vld [vmem:[#allocation152_spill] sm:$0xff]  ;;  %v12633_v15 = vld [vmem:[#allocation50_spill] sm:$0xff] }
 0x2ca   : > { %12623 = vst [vmem:[#allocation136_spill] sm:$0xff] %v10746_v49  ;;  %12626 = vst [vmem:[#allocation33_spill] sm:$0xff] %v10750_v43  ;;  %v10758_v59 = vadd.f32 %v12631_v47, %v12630_v30  ;;  %v12634_v45 = vld [vmem:[#allocation153_spill] sm:$0xff]  ;;  %v12636_v29 = vld [vmem:[#allocation51_spill] sm:$0xff] }
 0x2cb   : > { %12629 = vst [vmem:[#allocation34_spill] sm:$0xff] %v10754_v28  ;;  %v10762_v55 = vadd.f32 %v12634_v45, %v12633_v15  ;;  %v12637_v48 = vld [vmem:[#allocation154_spill] sm:$0xff]  ;;  %12639 = vst [vmem:[#allocation36_spill] sm:$0xff] %v10770_v0  ;;  %v12640_v44 = vld [vmem:[#allocation52_spill] sm:$0xff] }
 0x2cc   : > { %12632 = vst [vmem:[#allocation137_spill] sm:$0xff] %v10758_v59  ;;  %v10766_v36 = vadd.f32 %v12637_v48, %v12636_v29  ;;  %v12641_v43 = vld [vmem:[#allocation155_spill] sm:$0xff]  ;;  %v12643_v41 = vld [vmem:[#allocation53_spill] sm:$0xff]  ;;  %v12644_v28 = vld [vmem:[#allocation156_spill] sm:$0xff] }
 0x2cd   : > { %12635 = vst [vmem:[#allocation35_spill] sm:$0xff] %v10762_v55  ;;  %v10774_v27 = vadd.f32 %v12641_v43, %v12640_v44  ;;  %v10778_v47 = vadd.f32 %v12644_v28, %v12643_v41  ;;  %v12646_v30 = vld [vmem:[#allocation54_spill] sm:$0xff]  ;;  %v12647_v59 = vld [vmem:[#allocation157_spill] sm:$0xff]  ;;  %v12649_v15 = vld [vmem:[#allocation55_spill] sm:$0xff] }
 0x2ce   : > { %12638 = vst [vmem:[#allocation138_spill] sm:$0xff] %v10766_v36  ;;  %v10782_v45 = vadd.f32 %v12647_v59, %v12646_v30  ;;  %v12650_v55 = vld [vmem:[#allocation158_spill] sm:$0xff]  ;;  %v12652_v29 = vld [vmem:[#allocation56_spill] sm:$0xff]  ;;  %v12653_v36 = vld [vmem:[#allocation159_spill] sm:$0xff]  ;;  %v10804_v30 = vpop.f32.mrf.mxu0 }
 0x2cf   : > { %12642 = vst [vmem:[#allocation139_spill] sm:$0xff] %v10774_v27  ;;  %12645 = vst [vmem:[#allocation37_spill] sm:$0xff] %v10778_v47  ;;  %v10786_v48 = vadd.f32 %v12650_v55, %v12649_v15  ;;  %v10790_v49 = vadd.f32 %v12653_v36, %v12652_v29  ;;  %v12655_v0 = vld [vmem:[#allocation57_spill] sm:$0xff]  ;;  %v12656_v14 = vld [vmem:[#allocation160_spill] sm:$0xff]  ;;  %v10806_v55 = vpop.f32.mrf.mxu1 }
 0x2d0   : > { %12648 = vst [vmem:[#allocation140_spill] sm:$0xff] %v10782_v45  ;;  %v10794_v43 = vadd.f32 %v12656_v14, %v12655_v0  ;;  %v12658_v44 = vld [vmem:[#allocation58_spill] sm:$0xff]  ;;  %v12659_v27 = vld [vmem:[#allocation161_spill] sm:$0xff]  ;;  %v12661_v41 = vld [vmem:[#allocation59_spill] sm:$0xff] }
 0x2d1   : > { %12651 = vst [vmem:[#allocation38_spill] sm:$0xff] %v10786_v48  ;;  %12654 = vst [vmem:[#allocation141_spill] sm:$0xff] %v10790_v49  ;;  %v10798_v28 = vadd.f32 %v12659_v27, %v12658_v44  ;;  %v12662_v47 = vld [vmem:[#allocation162_spill] sm:$0xff]  ;;  %v12666_v15 = vld [vmem:[#allocation60_spill] sm:$0xff] }
 0x2d2   : > { %12657 = vst [vmem:[#allocation39_spill] sm:$0xff] %v10794_v43  ;;  %v10802_v59 = vadd.f32 %v12662_v47, %v12661_v41  ;;  %12664 = vst [vmem:[#allocation143_spill] sm:$0xff] %v10804_v30  ;;  %v12667_v48 = vld [vmem:[#allocation163_spill] sm:$0xff]  ;;  %v12669_v29 = vld [vmem:[#allocation61_spill] sm:$0xff] }
 0x2d3   : > { %12660 = vst [vmem:[#allocation142_spill] sm:$0xff] %v10798_v28  ;;  %12665 = vst [vmem:[#allocation41_spill] sm:$0xff] %v10806_v55  ;;  %v10810_v36 = vadd.f32 %v12667_v48, %v12666_v15  ;;  %v12670_v49 = vld [vmem:[#allocation164_spill] sm:$0xff]  ;;  %v12672_v0 = vld [vmem:[#allocation62_spill] sm:$0xff] }
 0x2d4   : > { %12663 = vst [vmem:[#allocation40_spill] sm:$0xff] %v10802_v59  ;;  %v10814_v14 = vadd.f32 %v12670_v49, %v12669_v29  ;;  %v12673_v43 = vld [vmem:[#allocation165_spill] sm:$0xff]  ;;  %v12675_v44 = vld [vmem:[#allocation63_spill] sm:$0xff]  ;;  %v12676_v28 = vld [vmem:[#allocation166_spill] sm:$0xff] }
 0x2d5   : > { %12668 = vst [vmem:[#allocation144_spill] sm:$0xff] %v10810_v36  ;;  %v10818_v27 = vadd.f32 %v12673_v43, %v12672_v0  ;;  %v10822_v47 = vadd.f32 %v12676_v28, %v12675_v44  ;;  %v12678_v41 = vld [vmem:[#allocation64_spill] sm:$0xff]  ;;  %v12679_v59 = vld [vmem:[#allocation167_spill] sm:$0xff]  ;;  %v12681_v55 = vld [vmem:[#allocation65_spill] sm:$0xff]  ;;  %v10840_v0 = vpop.f32.mrf.mxu0  ;;  %v10842_v28 = vpop.f32.mrf.mxu1 }
 0x2d6   : > { %12671 = vst [vmem:[#allocation42_spill] sm:$0xff] %v10814_v14  ;;  %v10826_v45 = vadd.f32 %v12679_v59, %v12678_v41  ;;  %v12682_v30 = vld [vmem:[#allocation168_spill] sm:$0xff]  ;;  %v12684_v15 = vld [vmem:[#allocation66_spill] sm:$0xff]  ;;  %v12685_v36 = vld [vmem:[#allocation169_spill] sm:$0xff] }
 0x2d7   : > { %12674 = vst [vmem:[#allocation145_spill] sm:$0xff] %v10818_v27  ;;  %12677 = vst [vmem:[#allocation43_spill] sm:$0xff] %v10822_v47  ;;  %v10830_v48 = vadd.f32 %v12682_v30, %v12681_v55  ;;  %v10834_v49 = vadd.f32 %v12685_v36, %v12684_v15  ;;  %v12687_v29 = vld [vmem:[#allocation67_spill] sm:$0xff]  ;;  %v12688_v14 = vld [vmem:[#allocation170_spill] sm:$0xff] }
 0x2d8   : > { %12680 = vst [vmem:[#allocation146_spill] sm:$0xff] %v10826_v45  ;;  %v10838_v43 = vadd.f32 %v12688_v14, %v12687_v29  ;;  %12690 = vst [vmem:[#allocation148_spill] sm:$0xff] %v10840_v0  ;;  %v12692_v44 = vld [vmem:[#allocation68_spill] sm:$0xff]  ;;  %v12693_v47 = vld [vmem:[#allocation171_spill] sm:$0xff] }
 0x2d9   : > { %12683 = vst [vmem:[#allocation44_spill] sm:$0xff] %v10830_v48  ;;  %12686 = vst [vmem:[#allocation147_spill] sm:$0xff] %v10834_v49  ;;  %v10846_v59 = vadd.f32 %v12693_v47, %v12692_v44  ;;  %v12695_v41 = vld [vmem:[#allocation69_spill] sm:$0xff]  ;;  %v12696_v45 = vld [vmem:[#allocation172_spill] sm:$0xff] }
 0x2da   : > { %12689 = vst [vmem:[#allocation45_spill] sm:$0xff] %v10838_v43  ;;  %12691 = vst [vmem:[#allocation46_spill] sm:$0xff] %v10842_v28  ;;  %v10850_v30 = vadd.f32 %v12696_v45, %v12695_v41  ;;  %v12698_v55 = vld [vmem:[#allocation70_spill] sm:$0xff]  ;;  %v12699_v48 = vld [vmem:[#allocation173_spill] sm:$0xff] }
 0x2db   : > { %12694 = vst [vmem:[#allocation149_spill] sm:$0xff] %v10846_v59  ;;  %v10854_v36 = vadd.f32 %v12699_v48, %v12698_v55  ;;  %v12701_v15 = vld [vmem:[#allocation71_spill] sm:$0xff]  ;;  %v12702_v49 = vld [vmem:[#allocation174_spill] sm:$0xff]  ;;  %v12704_v29 = vld [vmem:[#allocation72_spill] sm:$0xff]  ;;  %v10876_v55 = vpop.f32.mrf.mxu0 }
 0x2dc   : > { %12697 = vst [vmem:[#allocation47_spill] sm:$0xff] %v10850_v30  ;;  %v10858_v14 = vadd.f32 %v12702_v49, %v12701_v15  ;;  %v12705_v43 = vld [vmem:[#allocation175_spill] sm:$0xff]  ;;  %v12707_v28 = vld [vmem:[#allocation73_spill] sm:$0xff]  ;;  %v12708_v27 = vld [vmem:[#allocation176_spill] sm:$0xff]  ;;  %v10878_v49 = vpop.f32.mrf.mxu1 }
 0x2dd   : > { %12700 = vst [vmem:[#allocation150_spill] sm:$0xff] %v10854_v36  ;;  %v10862_v0 = vadd.f32 %v12705_v43, %v12704_v29  ;;  %v10866_v47 = vadd.f32 %v12708_v27, %v12707_v28  ;;  %v12710_v44 = vld [vmem:[#allocation74_spill] sm:$0xff]  ;;  %v12711_v59 = vld [vmem:[#allocation177_spill] sm:$0xff]  ;;  %v12713_v41 = vld [vmem:[#allocation75_spill] sm:$0xff] }
 0x2de   : > { %12703 = vst [vmem:[#allocation48_spill] sm:$0xff] %v10858_v14  ;;  %v10870_v45 = vadd.f32 %v12711_v59, %v12710_v44  ;;  %v12714_v30 = vld [vmem:[#allocation178_spill] sm:$0xff]  ;;  %12716 = vst [vmem:[#allocation153_spill] sm:$0xff] %v10876_v55  ;;  %v12718_v15 = vld [vmem:[#allocation76_spill] sm:$0xff] }
 0x2df   : > { %12706 = vst [vmem:[#allocation151_spill] sm:$0xff] %v10862_v0  ;;  %12709 = vst [vmem:[#allocation49_spill] sm:$0xff] %v10866_v47  ;;  %v10874_v48 = vadd.f32 %v12714_v30, %v12713_v41  ;;  %v12719_v14 = vld [vmem:[#allocation179_spill] sm:$0xff]  ;;  %v12721_v29 = vld [vmem:[#allocation77_spill] sm:$0xff] }
 0x2e0   : > { %12712 = vst [vmem:[#allocation152_spill] sm:$0xff] %v10870_v45  ;;  %12717 = vst [vmem:[#allocation51_spill] sm:$0xff] %v10878_v49  ;;  %v10882_v43 = vadd.f32 %v12719_v14, %v12718_v15  ;;  %v12722_v0 = vld [vmem:[#allocation180_spill] sm:$0xff]  ;;  %v12724_v28 = vld [vmem:[#allocation78_spill] sm:$0xff] }
 0x2e1   : > { %12715 = vst [vmem:[#allocation50_spill] sm:$0xff] %v10874_v48  ;;  %v10886_v27 = vadd.f32 %v12722_v0, %v12721_v29  ;;  %v12725_v47 = vld [vmem:[#allocation181_spill] sm:$0xff]  ;;  %v12727_v44 = vld [vmem:[#allocation79_spill] sm:$0xff]  ;;  %v12728_v45 = vld [vmem:[#allocation182_spill] sm:$0xff] }
 0x2e2   : > { %12720 = vst [vmem:[#allocation154_spill] sm:$0xff] %v10882_v43  ;;  %v10890_v59 = vadd.f32 %v12725_v47, %v12724_v28  ;;  %v10894_v30 = vadd.f32 %v12728_v45, %v12727_v44  ;;  %v12730_v41 = vld [vmem:[#allocation80_spill] sm:$0xff]  ;;  %v12731_v55 = vld [vmem:[#allocation183_spill] sm:$0xff]  ;;  %v12733_v49 = vld [vmem:[#allocation81_spill] sm:$0xff]  ;;  %v10912_v28 = vpop.f32.mrf.mxu0  ;;  %v10914_v45 = vpop.f32.mrf.mxu1 }
 0x2e3   : > { %12723 = vst [vmem:[#allocation52_spill] sm:$0xff] %v10886_v27  ;;  %v10898_v48 = vadd.f32 %v12731_v55, %v12730_v41  ;;  %v12734_v36 = vld [vmem:[#allocation184_spill] sm:$0xff]  ;;  %v12736_v15 = vld [vmem:[#allocation82_spill] sm:$0xff]  ;;  %v12737_v43 = vld [vmem:[#allocation185_spill] sm:$0xff] }
 0x2e4   : > { %12726 = vst [vmem:[#allocation155_spill] sm:$0xff] %v10890_v59  ;;  %12729 = vst [vmem:[#allocation53_spill] sm:$0xff] %v10894_v30  ;;  %v10902_v14 = vadd.f32 %v12734_v36, %v12733_v49  ;;  %v10906_v0 = vadd.f32 %v12737_v43, %v12736_v15  ;;  %v12739_v29 = vld [vmem:[#allocation83_spill] sm:$0xff]  ;;  %v12740_v27 = vld [vmem:[#allocation186_spill] sm:$0xff] }
 0x2e5   : > { %12732 = vst [vmem:[#allocation156_spill] sm:$0xff] %v10898_v48  ;;  %v10910_v47 = vadd.f32 %v12740_v27, %v12739_v29  ;;  %12742 = vst [vmem:[#allocation158_spill] sm:$0xff] %v10912_v28  ;;  %v12744_v44 = vld [vmem:[#allocation84_spill] sm:$0xff]  ;;  %v12745_v30 = vld [vmem:[#allocation187_spill] sm:$0xff] }
 0x2e6   : > { %12735 = vst [vmem:[#allocation54_spill] sm:$0xff] %v10902_v14  ;;  %12738 = vst [vmem:[#allocation157_spill] sm:$0xff] %v10906_v0  ;;  %v10918_v55 = vadd.f32 %v12745_v30, %v12744_v44  ;;  %v12747_v41 = vld [vmem:[#allocation85_spill] sm:$0xff]  ;;  %v12748_v48 = vld [vmem:[#allocation188_spill] sm:$0xff] }
 0x2e7   : > { %12741 = vst [vmem:[#allocation55_spill] sm:$0xff] %v10910_v47  ;;  %12743 = vst [vmem:[#allocation56_spill] sm:$0xff] %v10914_v45  ;;  %v10922_v36 = vadd.f32 %v12748_v48, %v12747_v41  ;;  %v12750_v49 = vld [vmem:[#allocation86_spill] sm:$0xff]  ;;  %v12751_v14 = vld [vmem:[#allocation189_spill] sm:$0xff] }
 0x2e8   : > { %12746 = vst [vmem:[#allocation159_spill] sm:$0xff] %v10918_v55  ;;  %v10926_v43 = vadd.f32 %v12751_v14, %v12750_v49  ;;  %v12753_v15 = vld [vmem:[#allocation87_spill] sm:$0xff]  ;;  %v12754_v0 = vld [vmem:[#allocation190_spill] sm:$0xff]  ;;  %v12756_v29 = vld [vmem:[#allocation88_spill] sm:$0xff]  ;;  %v10948_v49 = vpop.f32.mrf.mxu0 }
 0x2e9   : > { %12749 = vst [vmem:[#allocation57_spill] sm:$0xff] %v10922_v36  ;;  %v10930_v27 = vadd.f32 %v12754_v0, %v12753_v15  ;;  %v12757_v28 = vld [vmem:[#allocation191_spill] sm:$0xff]  ;;  %v12759_v45 = vld [vmem:[#allocation89_spill] sm:$0xff]  ;;  %v12760_v59 = vld [vmem:[#allocation192_spill] sm:$0xff]  ;;  %v10950_v0 = vpop.f32.mrf.mxu1 }
 0x2ea   : > { %12752 = vst [vmem:[#allocation160_spill] sm:$0xff] %v10926_v43  ;;  %v10934_v47 = vadd.f32 %v12757_v28, %v12756_v29  ;;  %v10938_v30 = vadd.f32 %v12760_v59, %v12759_v45  ;;  %v12762_v44 = vld [vmem:[#allocation90_spill] sm:$0xff]  ;;  %v12763_v55 = vld [vmem:[#allocation193_spill] sm:$0xff]  ;;  %v12765_v41 = vld [vmem:[#allocation91_spill] sm:$0xff] }
 0x2eb   : > { %12755 = vst [vmem:[#allocation58_spill] sm:$0xff] %v10930_v27  ;;  %v10942_v48 = vadd.f32 %v12763_v55, %v12762_v44  ;;  %v12766_v36 = vld [vmem:[#allocation194_spill] sm:$0xff]  ;;  %12768 = vst [vmem:[#allocation163_spill] sm:$0xff] %v10948_v49  ;;  %v12770_v15 = vld [vmem:[#allocation92_spill] sm:$0xff] }
 0x2ec   : > { %12758 = vst [vmem:[#allocation161_spill] sm:$0xff] %v10934_v47  ;;  %12761 = vst [vmem:[#allocation59_spill] sm:$0xff] %v10938_v30  ;;  %v10946_v14 = vadd.f32 %v12766_v36, %v12765_v41  ;;  %v12771_v27 = vld [vmem:[#allocation195_spill] sm:$0xff]  ;;  %v12773_v29 = vld [vmem:[#allocation93_spill] sm:$0xff] }
 0x2ed   : > { %12764 = vst [vmem:[#allocation162_spill] sm:$0xff] %v10942_v48  ;;  %12769 = vst [vmem:[#allocation61_spill] sm:$0xff] %v10950_v0  ;;  %v10954_v28 = vadd.f32 %v12771_v27, %v12770_v15  ;;  %v12774_v47 = vld [vmem:[#allocation196_spill] sm:$0xff]  ;;  %v12775_v45 = vld [vmem:[#allocation94_spill] sm:$0xff] }
 0x2ee   : > { %12767 = vst [vmem:[#allocation60_spill] sm:$0xff] %v10946_v14  ;;  %v10958_v59 = vadd.f32 %v12774_v47, %v12773_v29  ;;  %v12776_v30 = vld [vmem:[#allocation197_spill] sm:$0xff]  ;;  %v12778_v44 = vld [vmem:[#allocation95_spill] sm:$0xff]  ;;  %v12779_v48 = vld [vmem:[#allocation198_spill] sm:$0xff] }
 0x2ef   : > { %12772 = vst [vmem:[#allocation164_spill] sm:$0xff] %v10954_v28  ;;  %v10962_v55 = vadd.f32 %v12776_v30, %v12775_v45  ;;  %v10966_v36 = vadd.f32 %v12779_v48, %v12778_v44  ;;  %v12780_v41 = vld [vmem:[#allocation96_spill] sm:$0xff]  ;;  %v12781_v49 = vld [vmem:[#allocation199_spill] sm:$0xff]  ;;  %v12782_v0 = vld [vmem:[#allocation97_spill] sm:$0xff]  ;;  %v2422_v45 = vpop.f32.mrf.mxu0 }
 0x2f0   : > { %v10970_v14 = vadd.f32 %v12781_v49, %v12780_v41  ;;  %v12783_v43 = vld [vmem:[#allocation202_spill] sm:$0xff]  ;;  %v12785_v28 = vld [vmem:[#allocation203_spill] sm:$0xff]  ;;  %v12788_v48 = vld [vmem:[#allocation100_spill] sm:$0xff] }
 0x2f1   : > { %12777 = vst [vmem:[#allocation62_spill] sm:$0xff] %v10962_v55  ;;  %v10974_v27 = vadd.f32 %v12783_v43, %v12782_v0  ;;  %v12784_v15 = vld [vmem:[#allocation98_spill] sm:$0xff]  ;;  %v12786_v29 = vld [vmem:[#allocation99_spill] sm:$0xff]  ;;  %v2615_v55 = vpop.f32.mrf.mxu1  ;;  %v10986_v44 = vadd.f32 %v10524_v31, %v12788_v48  ;;  %v12789_v49 = vld [vmem:[#allocation101_spill] sm:$0xff]  ;;  %v2774_v43 = vadd.f32 %v2422_v45, %v10508_v50 }
 0x2f2   : > { %v10978_v47 = vadd.f32 %v12785_v28, %v12784_v15  ;;  %v10982_v30 = vadd.f32 %v10522_v34, %v12786_v29  ;;  %v10990_v41 = vadd.f32 %v10556_v26, %v12789_v49  ;;  %v2776_v0 = vadd.f32 %v2615_v55, %v10512_v33  ;;  %v12790_v28 = vld [vmem:[#allocation102_spill] sm:$0xff]  ;;  %v12791_v34 = vld [vmem:[#allocation103_spill] sm:$0xff]  ;;  %v12793_v48 = vld [vmem:[#allocation105_spill] sm:$0xff]  ;;  %v2424_v49 = vpop.f32.mrf.mxu0 }
 0x2f3   : > { %v10996_v15 = vadd.f32 %v10558_v6, %v12790_v28  ;;  %v11000_v29 = vadd.f32 %v10588_v57, %v12791_v34  ;;  %v11008_v26 = vadd.f32 %v10622_v54, %v12793_v48  ;;  %v2617_v50 = vpop.f32.mrf.mxu1  ;;  %v2924_v33 = vadd.f32 %v10527_v39, %v2774_v43  ;;  %v12794_v57 = vld [vmem:[#allocation106_spill] sm:$0xff]  ;;  %v12797_v54 = vld [vmem:[#allocation108_spill] sm:$0xff]  ;;  %v12799_v48 = vld [vmem:[#allocation109_spill] sm:$0xff] }
 0x2f4   : > { %12787 = vst [vmem:[#allocation165_spill] sm:$0xff] %v10982_v30  ;;  %v12792_v30 = vld [vmem:[#allocation104_spill] sm:$0xff]  ;;  %v2926_v55 = vadd.f32 %v10529_v61, %v2776_v0  ;;  %v2775_v6 = vadd.f32 %v2424_v49, %v10516_v40  ;;  %v2777_v45 = vadd.f32 %v2617_v50, %v10520_v32  ;;  %v11016_v28 = vadd.f32 %v10624_v23, %v12794_v57  ;;  %v2426_v0 = vpop.f32.mrf.mxu0  ;;  %v12801_v57 = vld [vmem:[#allocation110_spill] sm:$0xff] }
 0x2f5   : > { %v11004_v31 = vadd.f32 %v10590_v13, %v12792_v30  ;;  %v12795_v13 = vld [vmem:[#allocation107_spill] sm:$0xff]  ;;  %v11024_v34 = vadd.f32 %v10662_v24, %v12797_v54  ;;  %v11028_v43 = vadd.f32 %v10696_v60, %v12799_v48  ;;  %v2619_v40 = vpop.f32.mrf.mxu1  ;;  %v3052_v49 = vmax.f32 %v2924_v33, 0.0 }
 0x2f6   : > { %v11020_v30 = vadd.f32 %v10660_v37, %v12795_v13  ;;  %v3054_v32 = vmax.f32 %v2926_v55, 0.0  ;;  %v2925_v50 = vadd.f32 %v10540_v1, %v2775_v6  ;;  %v2927_v23 = vadd.f32 %v10542_v25, %v2777_v45  ;;  %v12802_v13 = vld [vmem:[#allocation111_spill] sm:$0xff]  ;;  %v2428_v48 = vpop.f32.mrf.mxu0  ;;  %v12803_v45 = vld [vmem:[#allocation112_spill] sm:$0xff] }
 0x2f7   : > { %12798 = vst [vmem:[#allocation166_spill] sm:$0xff] %v11024_v34  ;;  %12800 = vst [vmem:[#allocation64_spill] sm:$0xff] %v11028_v43  ;;  %v11034_v37 = vadd.f32 %v10698_v51, %v12801_v57  ;;  %v11038_v24 = vadd.f32 %v10732_v35, %v12802_v13  ;;  %v2778_v54 = vadd.f32 %v2426_v0, %v10533_v62  ;;  %v2621_v43 = vpop.f32.mrf.mxu1 }
 0x2f8   : > { %12796 = vst [vmem:[#allocation63_spill] sm:$0xff] %v11020_v30  ;;  %v2780_v60 = vadd.f32 %v2619_v40, %v10537_v63  ;;  %v3180_v33 = vmax.f32 %v3052_v49, %v3054_v32  ;;  %v3053_v55 = vmax.f32 %v2925_v50, 0.0  ;;  %v3055_v34 = vmax.f32 %v2927_v23, 0.0  ;;  %v2432_v62 = vpop.f32.mrf.mxu0 }
 0x2f9   : > { %v2779_v6 = vadd.f32 %v2428_v48, %v10546_v58  ;;  %v11045_v30 = vadd.f32 %v10734_v20, %v12803_v45  ;;  %v2928_v51 = vadd.f32 %v10527_v39, %v2778_v54  ;;  %v2781_v57 = vadd.f32 %v2621_v43, %v10550_v53  ;;  %v2625_v0 = vpop.f32.mrf.mxu1  ;;  %v12804_v58 = vld [vmem:[#allocation113_spill] sm:$0xff] }
 0x2fa   : > { %v2930_v35 = vadd.f32 %v10529_v61, %v2780_v60  ;;  %v3181_v63 = vmax.f32 %v3053_v55, %v3055_v34  ;;  %v2782_v49 = vadd.f32 %v2432_v62, %v10554_v4  ;;  %v2784_v32 = vadd.f32 %v2625_v0, %v10562_v38  ;;  %v2434_v54 = vpop.f32.mrf.mxu0 }
 0x2fb   : > { %v2929_v40 = vadd.f32 %v10540_v1, %v2779_v6  ;;  %v11055_v50 = vadd.f32 %v10768_v5, %v12804_v58  ;;  %v3056_v20 = vmax.f32 %v2928_v51, 0.0  ;;  %v2931_v13 = vadd.f32 %v10542_v25, %v2781_v57  ;;  %v2627_v60 = vpop.f32.mrf.mxu1 }
 0x2fc   : > { %v3058_v23 = vmax.f32 %v2930_v35, 0.0  ;;  %v3308_v53 = vcombine.low %v3180_v33, %v3181_v63  ;;  %v3309_v43 = vcombine.high %v3180_v33, %v3181_v63  ;;  %v2932_v34 = vadd.f32 %v10527_v39, %v2782_v49  ;;  %v2436_v45 = vpop.f32.mrf.mxu0 }
 0x2fd   : > { %v3057_v48 = vmax.f32 %v2929_v40, 0.0  ;;  %v3059_v6 = vmax.f32 %v2931_v13, 0.0  ;;  %v2934_v4 = vadd.f32 %v10529_v61, %v2784_v32  ;;  %v2783_v38 = vadd.f32 %v2434_v54, %v10566_v7  ;;  %v2629_v5 = vpop.f32.mrf.mxu1 }
 0x2fe   : > { %v3182_v55 = vmax.f32 %v3056_v20, %v3058_v23  ;;  %v3442_v51 = vrot.slane %v3308_v53, %v10592_v9  ;;  %v3449_v35 = vrot.slane %v3309_v43, %v10592_v9  ;;  %v3060_v57 = vmax.f32 %v2932_v34, 0.0  ;;  %v2438_v49 = vpop.f32.mrf.mxu0 }
 0x2ff   : > { %v2785_v62 = vadd.f32 %v2627_v60, %v10570_v8  ;;  %v3183_v0 = vmax.f32 %v3057_v48, %v3059_v6  ;;  %v3062_v33 = vmax.f32 %v2934_v4, 0.0  ;;  %v2933_v63 = vadd.f32 %v10540_v1, %v2783_v38  ;;  %v2631_v58 = vpop.f32.mrf.mxu1 }
 0x300   : > { %v2786_v40 = vadd.f32 %v2436_v45, %v10574_v10  ;;  %v3948_v32 = vrot.slane %v3442_v51, 4  ;;  %v3949_v20 = vrot.slane %v3449_v35, 4  ;;  %v2788_v23 = vadd.f32 %v2629_v5, %v10578_v3  ;;  %v2442_v34 = vpop.f32.mrf.mxu0 }
 0x301   : > { %v2935_v7 = vadd.f32 %v10542_v25, %v2785_v62  ;;  %v3310_v13 = vcombine.low %v3182_v55, %v3183_v0  ;;  %v3311_v54 = vcombine.high %v3182_v55, %v3183_v0  ;;  %v3184_v53 = vmax.f32 %v3060_v57, %v3062_v33  ;;  %v2635_v8 = vpop.f32.mrf.mxu1 }
 0x302   : > { %v3061_v43 = vmax.f32 %v2933_v63, 0.0  ;;  %v4076_v60 = vmax.f32 %v3442_v51, %v3948_v32  ;;  %v4077_v48 = vmax.f32 %v3449_v35, %v3949_v20  ;;  %v2936_v4 = vadd.f32 %v10527_v39, %v2786_v40  ;;  %v2444_v3 = vpop.f32.mrf.mxu0 }
 0x303   : > { %v3063_v6 = vmax.f32 %v2935_v7, 0.0  ;;  %v3456_v10 = vrot.slane %v3310_v13, %v10592_v9  ;;  %v3463_v38 = vrot.slane %v3311_v54, %v10592_v9  ;;  %v2938_v45 = vadd.f32 %v10529_v61, %v2788_v23  ;;  %v2637_v5 = vpop.f32.mrf.mxu1 }
 0x304   : > { %v2787_v62 = vadd.f32 %v2438_v49, %v10582_v11  ;;  %v4255_v55 = vcombine.low %v4076_v60, %v4077_v48  ;;  %v3064_v0 = vmax.f32 %v2936_v4, 0.0  ;;  %v2789_v33 = vadd.f32 %v2631_v58, %v10586_v12  ;;  %v2446_v32 = vpop.f32.mrf.mxu0 }
 0x305   : > { %v3185_v57 = vmax.f32 %v3061_v43, %v3063_v6  ;;  %v3950_v51 = vrot.slane %v3456_v10, 4  ;;  %v3951_v35 = vrot.slane %v3463_v38, 4  ;;  %v3066_v63 = vmax.f32 %v2938_v45, 0.0  ;;  %v2639_v20 = vpop.f32.mrf.mxu1 }
 0x306   : > { %v2937_v40 = vadd.f32 %v10540_v1, %v2787_v62  ;;  %v4263_v7 = vrot.slane %v4255_v55, %v10626_v46  ;;  %v2939_v11 = vadd.f32 %v10542_v25, %v2789_v33  ;;  %v2448_v48 = vpop.f32.mrf.mxu0  ;;  %v2790_v45 = vadd.f32 %v2442_v34, %v10596_v16 }
 0x307   : > { %v3312_v13 = vcombine.low %v3184_v53, %v3185_v57  ;;  %v3313_v23 = vcombine.high %v3184_v53, %v3185_v57  ;;  %v4078_v49 = vmax.f32 %v3456_v10, %v3950_v51  ;;  %v4079_v54 = vmax.f32 %v3463_v38, %v3951_v35  ;;  %v2641_v6 = vpop.f32.mrf.mxu1 }
 0x308   : > { %v3186_v60 = vmax.f32 %v3064_v0, %v3066_v63  ;;  %v3065_v43 = vmax.f32 %v2937_v40, 0.0  ;;  %v3067_v4 = vmax.f32 %v2939_v11, 0.0  ;;  %v2792_v55 = vadd.f32 %v2635_v8, %v10600_v17  ;;  %v2452_v10 = vpop.f32.mrf.mxu0 }
 0x309   : > { %v3470_v12 = vrot.slane %v3312_v13, %v10592_v9  ;;  %v3477_v58 = vrot.slane %v3313_v23, %v10592_v9  ;;  %v4256_v62 = vcombine.low %v4078_v49, %v4079_v54  ;;  %v2791_v53 = vadd.f32 %v2444_v3, %v10604_v18  ;;  %v11083_v38 = vpop.f32.mrf.mxu1 }
 0x30a   : > { %v2793_v57 = vadd.f32 %v2637_v5, %v10608_v19  ;;  %v3187_v51 = vmax.f32 %v3065_v43, %v3067_v4  ;;  %v2940_v35 = vadd.f32 %v10527_v39, %v2790_v45  ;;  %v2942_v40 = vadd.f32 %v10529_v61, %v2792_v55  ;;  %v2454_v34 = vpop.f32.mrf.mxu0 }
 0x30b   : > { %v3952_v0 = vrot.slane %v3470_v12, 4  ;;  %v3953_v33 = vrot.slane %v3477_v58, 4  ;;  %v4270_v63 = vrot.slane %v4256_v62, %v10626_v46  ;;  %v2941_v16 = vadd.f32 %v10540_v1, %v2791_v53  ;;  %v11090_v18 = vpop.f32.mrf.mxu1 }
 0x30c   : > { %v2943_v17 = vadd.f32 %v10542_v25, %v2793_v57  ;;  %v3314_v3 = vcombine.low %v3186_v60, %v3187_v51  ;;  %v3315_v5 = vcombine.high %v3186_v60, %v3187_v51  ;;  %v3068_v11 = vmax.f32 %v2940_v35, 0.0  ;;  %v11092_v54 = vpop.f32.mrf.mxu0 }
 0x30d   : > { %v4080_v19 = vmax.f32 %v3470_v12, %v3952_v0  ;;  %v4081_v8 = vmax.f32 %v3477_v58, %v3953_v33  ;;  %v4271_v13 = vcombine.low %v4263_v7, %v4270_v63  ;;  %v4272_v23 = vcombine.high %v4263_v7, %v4270_v63  ;;  %v11094_v43 = vpop.f32.mrf.mxu1 }
 0x30e   : > { %v3070_v49 = vmax.f32 %v2942_v40, 0.0  ;;  %v3484_v45 = vrot.slane %v3314_v3, %v10592_v9  ;;  %v3491_v62 = vrot.slane %v3315_v5, %v10592_v9  ;;  %v3069_v55 = vmax.f32 %v2941_v16, 0.0  ;;  %v11102_v57 = vpop.f32.mrf.mxu0 }
 0x30f   : > { %v4273_v4 = vcombine.low %v4080_v19, %v4081_v8  ;;  %v11098_v53 = vrot.slane %v4271_v13, 7  ;;  %v11100_v12 = vrot.slane %v4272_v23, 7  ;;  %v3071_v60 = vmax.f32 %v2943_v17, 0.0  ;;  %v11104_v7 = vpop.f32.mrf.mxu1 }
 0x310   : > { %v3188_v58 = vmax.f32 %v3068_v11, %v3070_v49  ;;  %v3954_v33 = vrot.slane %v3484_v45, 4  ;;  %v3955_v51 = vrot.slane %v3491_v62, 4  ;;  %v2794_v35 = vadd.f32 %v2446_v32, %v10612_v52  ;;  %v11113_v19 = vpop.f32.mrf.mxu0 }
 0x311   : > { %v4281_v0 = vrot.slane %v4273_v4, %v10626_v46  ;;  %4640 = vst [vmem:[#allocation3] sm:$0xfe] %v11098_v53  ;;  %4641 = vst [vmem:[#allocation3 + $0x8] sm:$0xfe] %v11100_v12  ;;  %v3189_v63 = vmax.f32 %v3069_v55, %v3071_v60  ;;  %v2796_v40 = vadd.f32 %v2639_v20, %v10616_v21  ;;  %v11115_v8 = vpop.f32.mrf.mxu1 }
 0x312   : > { %v2795_v16 = vadd.f32 %v2448_v48, %v10620_v22  ;;  %v2797_v17 = vadd.f32 %v2641_v6, %v10630_v56  ;;  %v4082_v3 = vmax.f32 %v3484_v45, %v3954_v33  ;;  %v4083_v5 = vmax.f32 %v3491_v62, %v3955_v51  ;;  %v11121_v20 = vpop.f32.mrf.mxu0 }
 0x313   : > { %v2944_v52 = vadd.f32 %v10527_v39, %v2794_v35  ;;  %v2798_v32 = vadd.f32 %v2452_v10, %v10634_v42  ;;  %v3316_v13 = vcombine.low %v3188_v58, %v3189_v63  ;;  %v3317_v23 = vcombine.high %v3188_v58, %v3189_v63  ;;  %v11127_v10 = vpop.f32.mrf.mxu1  ;;  %v12805_v63 = vld [vmem:[#allocation125_spill] sm:$0xff] }
 0x314   : > { %v2946_v11 = vadd.f32 %v10529_v61, %v2796_v40  ;;  %v2945_v21 = vadd.f32 %v10540_v1, %v2795_v16  ;;  %v4274_v22 = vcombine.low %v4082_v3, %v4083_v5  ;;  %v2947_v48 = vadd.f32 %v10542_v25, %v2797_v17  ;;  %v11133_v16 = vpop.f32.mrf.mxu0 }
 0x315   : > { %v3072_v56 = vmax.f32 %v2944_v52, 0.0  ;;  %v2948_v6 = vadd.f32 %v10527_v39, %v2798_v32  ;;  %v3498_v49 = vrot.slane %v3316_v13, %v10592_v9  ;;  %v3505_v4 = vrot.slane %v3317_v23, %v10592_v9 }
 0x316   : > { %v3074_v45 = vmax.f32 %v2946_v11, 0.0  ;;  %v3073_v42 = vmax.f32 %v2945_v21, 0.0  ;;  %v4288_v62 = vrot.slane %v4274_v22, %v10626_v46  ;;  %v3075_v55 = vmax.f32 %v2947_v48, 0.0  ;;  %v12806_v11 = vld [vmem:[#allocation21_spill] sm:$0xff] }
 0x317   : > { %v3076_v58 = vmax.f32 %v2948_v6, 0.0  ;;  %v2800_v60 = vadd.f32 %v11083_v38, %v10638_v2  ;;  %v3956_v33 = vrot.slane %v3498_v49, 4  ;;  %v3957_v51 = vrot.slane %v3505_v4, 4  ;;  %v11139_v2 = vpop.f32.mrf.mxu1 }
 0x318   : > { %v3190_v35 = vmax.f32 %v3072_v56, %v3074_v45  ;;  %v2799_v40 = vadd.f32 %v2454_v34, %v12805_v63  ;;  %v4289_v17 = vcombine.low %v4281_v0, %v4288_v62  ;;  %v4290_v3 = vcombine.high %v4281_v0, %v4288_v62 }
 0x319   : > { %v3191_v5 = vmax.f32 %v3073_v42, %v3075_v55  ;;  %v2950_v52 = vadd.f32 %v10529_v61, %v2800_v60  ;;  %v4084_v32 = vmax.f32 %v3498_v49, %v3956_v33  ;;  %v4085_v13 = vmax.f32 %v3505_v4, %v3957_v51  ;;  %v11142_v42 = vpop.f32.mrf.mxu0 }
 0x31a   : > { %v2949_v23 = vadd.f32 %v10540_v1, %v2799_v40  ;;  %v2801_v21 = vadd.f32 %v11090_v18, %v12806_v11  ;;  %v4546_v38 = vrot.slane %v4289_v17, 7  ;;  %v4548_v22 = vrot.slane %v4290_v3, 7  ;;  %v12808_v40 = vld [vmem:[#allocation22_spill] sm:$0xff]  ;;  %v12809_v3 = vld [vmem:[#allocation127_spill] sm:$0xff] }
 0x31b   : > { %v3318_v56 = vcombine.low %v3190_v35, %v3191_v5  ;;  %v3319_v34 = vcombine.high %v3190_v35, %v3191_v5  ;;  %v4291_v48 = vcombine.low %v4084_v32, %v4085_v13  ;;  %v3078_v6 = vmax.f32 %v2950_v52, 0.0  ;;  %v11159_v35 = vpop.f32.mrf.mxu1  ;;  %v12810_v13 = vld [vmem:[#allocation23_spill] sm:$0xff] }
 0x31c   : > { %v3077_v45 = vmax.f32 %v2949_v23, 0.0  ;;  %v2951_v0 = vadd.f32 %v10542_v25, %v2801_v21  ;;  %v11146_v49 = vsel %vm4543_vm6, %v11098_v53, %v4546_v38  ;;  %v11150_v18 = vsel %vm4543_vm6, %v11100_v12, %v4548_v22  ;;  %4644 = vst [vmem:[#allocation3 + $0x20] sm:$0x1] %v4546_v38  ;;  %4645 = vst [vmem:[#allocation3 + $0x28] sm:$0x1] %v4548_v22  ;;  %v12807_v53 = vld [vmem:[#allocation126_spill] sm:$0xff] }
 0x31d   : > { %v3512_v4 = vrot.slane %v3318_v56, %v10592_v9  ;;  %v3519_v62 = vrot.slane %v3319_v34, %v10592_v9  ;;  %4642 = vst [vmem:[#allocation3 + $0x10] sm:$0xff] %v11146_v49  ;;  %4643 = vst [vmem:[#allocation3 + $0x18] sm:$0xff] %v11150_v18  ;;  %v4299_v55 = vrot.slane %v4291_v48, %v10626_v46  ;;  %v12811_v23 = vld [vmem:[#allocation128_spill] sm:$0xff] }
 0x31e   : > { %v3192_v60 = vmax.f32 %v3076_v58, %v3078_v6  ;;  %v3079_v33 = vmax.f32 %v2951_v0, 0.0  ;;  %v2802_v51 = vadd.f32 %v11092_v54, %v12807_v53  ;;  %v2804_v17 = vadd.f32 %v11094_v43, %v12808_v40  ;;  %v11170_v54 = vpop.f32.mrf.mxu0  ;;  %v11175_v6 = vpop.f32.mrf.mxu1  ;;  %v12812_v53 = vld [vmem:[#allocation24_spill] sm:$0xff] }
 0x31f   : > { %v3958_v12 = vrot.slane %v3512_v4, 4  ;;  %v3959_v63 = vrot.slane %v3519_v62, 4  ;;  %v2803_v5 = vadd.f32 %v11102_v57, %v12809_v3  ;;  %v2805_v58 = vadd.f32 %v11104_v7, %v12810_v13 }
 0x320   : > { %v3193_v52 = vmax.f32 %v3077_v45, %v3079_v33  ;;  %v2952_v32 = vadd.f32 %v10527_v39, %v2802_v51  ;;  %v2806_v11 = vadd.f32 %v11113_v19, %v12811_v23  ;;  %v2954_v22 = vadd.f32 %v10529_v61, %v2804_v17  ;;  %v12813_v17 = vld [vmem:[#allocation129_spill] sm:$0xff] }
 0x321   : > { %v4086_v21 = vmax.f32 %v3512_v4, %v3958_v12  ;;  %v4087_v38 = vmax.f32 %v3519_v62, %v3959_v63  ;;  %v2953_v43 = vadd.f32 %v10540_v1, %v2803_v5  ;;  %v2955_v48 = vadd.f32 %v10542_v25, %v2805_v58  ;;  %v2474_v12 = vpop.f32.mrf.mxu0  ;;  %v2667_v58 = vpop.f32.mrf.mxu1 }
 0x322   : > { %v3320_v56 = vcombine.low %v3192_v60, %v3193_v52  ;;  %v3321_v34 = vcombine.high %v3192_v60, %v3193_v52  ;;  %v3080_v57 = vmax.f32 %v2952_v32, 0.0  ;;  %v3082_v7 = vmax.f32 %v2954_v22, 0.0 }
 0x323   : > { %v4292_v45 = vcombine.low %v4086_v21, %v4087_v38  ;;  %v3081_v0 = vmax.f32 %v2953_v43, 0.0  ;;  %v2956_v19 = vadd.f32 %v10527_v39, %v2806_v11  ;;  %v3083_v62 = vmax.f32 %v2955_v48, 0.0  ;;  %v12814_v38 = vld [vmem:[#allocation25_spill] sm:$0xff] }
 0x324   : > { %v3526_v33 = vrot.slane %v3320_v56, %v10592_v9  ;;  %v3533_v4 = vrot.slane %v3321_v34, %v10592_v9  ;;  %v2808_v51 = vadd.f32 %v11115_v8, %v12812_v53  ;;  %v3194_v63 = vmax.f32 %v3080_v57, %v3082_v7  ;;  %v11189_v57 = vpop.f32.mrf.mxu0 }
 0x325   : > { %v4306_v60 = vrot.slane %v4292_v45, %v10626_v46  ;;  %v3084_v40 = vmax.f32 %v2956_v19, 0.0  ;;  %v2807_v3 = vadd.f32 %v11121_v20, %v12813_v17  ;;  %v3195_v32 = vmax.f32 %v3081_v0, %v3083_v62 }
 0x326   : > { %v3960_v5 = vrot.slane %v3526_v33, 4  ;;  %v3961_v52 = vrot.slane %v3533_v4, 4  ;;  %v2958_v13 = vadd.f32 %v10529_v61, %v2808_v51  ;;  %v2809_v8 = vadd.f32 %v11127_v10, %v12814_v38  ;;  %v11198_v10 = vpop.f32.mrf.mxu1  ;;  %v12816_v51 = vld [vmem:[#allocation130_spill] sm:$0xff] }
 0x327   : > { %v4307_v23 = vcombine.low %v4299_v55, %v4306_v60  ;;  %v4308_v11 = vcombine.high %v4299_v55, %v4306_v60  ;;  %v2957_v21 = vadd.f32 %v10540_v1, %v2807_v3  ;;  %v3322_v56 = vcombine.low %v3194_v63, %v3195_v32 }
 0x328   : > { %v4088_v22 = vmax.f32 %v3526_v33, %v3960_v5  ;;  %v4089_v43 = vmax.f32 %v3533_v4, %v3961_v52  ;;  %v3323_v34 = vcombine.high %v3194_v63, %v3195_v32  ;;  %v3086_v45 = vmax.f32 %v2958_v13, 0.0  ;;  %v12815_v4 = vld [vmem:[#allocation26_spill] sm:$0xff]  ;;  %v12817_v63 = vld [vmem:[#allocation27_spill] sm:$0xff]  ;;  %v11209_v13 = vpop.f32.mrf.mxu0 }
 0x329   : > { %v11191_v20 = vrot.slane %v4307_v23, 7  ;;  %v11193_v48 = vrot.slane %v4308_v11, 7  ;;  %v3085_v7 = vmax.f32 %v2957_v21, 0.0  ;;  %v3540_v55 = vrot.slane %v3322_v56, %v10592_v9 }
 0x32a   : > { %v4309_v0 = vcombine.low %v4088_v22, %v4089_v43  ;;  %v3547_v19 = vrot.slane %v3323_v34, %v10592_v9  ;;  %v2959_v62 = vadd.f32 %v10542_v25, %v2809_v8  ;;  %v3196_v33 = vmax.f32 %v3084_v40, %v3086_v45  ;;  %v2671_v43 = vpop.f32.mrf.mxu1 }
 0x32b   : > { %4646 = vst [vmem:[#allocation3 + $0x30] sm:$0xfe] %v11191_v20  ;;  %4647 = vst [vmem:[#allocation3 + $0x38] sm:$0xfe] %v11193_v48  ;;  %v2810_v53 = vadd.f32 %v11133_v16, %v12815_v4  ;;  %v2812_v60 = vadd.f32 %v11139_v2, %v12816_v51  ;;  %v2811_v17 = vadd.f32 %v11142_v42, %v12817_v63  ;;  %v3962_v5 = vrot.slane %v3540_v55, 4  ;;  %v12818_v16 = vld [vmem:[#allocation131_spill] sm:$0xff] }
 0x32c   : > { %v4317_v3 = vrot.slane %v4309_v0, %v10626_v46  ;;  %v3963_v52 = vrot.slane %v3547_v19, 4  ;;  %v3087_v32 = vmax.f32 %v2959_v62, 0.0  ;;  %v2813_v21 = vadd.f32 %v11159_v35, %v12818_v16  ;;  %v12819_v42 = vld [vmem:[#allocation28_spill] sm:$0xff]  ;;  %v12822_v16 = vld [vmem:[#allocation133_spill] sm:$0xff] }
 0x32d   : > { %v2960_v23 = vadd.f32 %v10527_v39, %v2810_v53  ;;  %v2962_v40 = vadd.f32 %v10529_v61, %v2812_v60  ;;  %v2961_v11 = vadd.f32 %v10540_v1, %v2811_v17  ;;  %v4090_v2 = vmax.f32 %v3540_v55, %v3962_v5  ;;  %v2482_v60 = vpop.f32.mrf.mxu0  ;;  %v12820_v55 = vld [vmem:[#allocation132_spill] sm:$0xff] }
 0x32e   : > { %v4091_v38 = vmax.f32 %v3547_v19, %v3963_v52  ;;  %v3197_v8 = vmax.f32 %v3085_v7, %v3087_v32  ;;  %v2814_v22 = vadd.f32 %v11170_v54, %v12819_v42  ;;  %v2963_v0 = vadd.f32 %v10542_v25, %v2813_v21  ;;  %v12821_v19 = vld [vmem:[#allocation29_spill] sm:$0xff] }
 0x32f   : > { %v3088_v56 = vmax.f32 %v2960_v23, 0.0  ;;  %v3090_v34 = vmax.f32 %v2962_v40, 0.0  ;;  %v3089_v45 = vmax.f32 %v2961_v11, 0.0  ;;  %v2816_v7 = vadd.f32 %v11175_v6, %v12820_v55  ;;  %v2675_v23 = vpop.f32.mrf.mxu1 }
 0x330   : > { %v4310_v62 = vcombine.low %v4090_v2, %v4091_v38  ;;  %v3324_v4 = vcombine.low %v3196_v33, %v3197_v8  ;;  %v3325_v53 = vcombine.high %v3196_v33, %v3197_v8  ;;  %v2964_v51 = vadd.f32 %v10527_v39, %v2814_v22 }
 0x331   : > { %v3198_v63 = vmax.f32 %v3088_v56, %v3090_v34  ;;  %v3091_v35 = vmax.f32 %v2963_v0, 0.0  ;;  %v2815_v17 = vadd.f32 %v2474_v12, %v12821_v19  ;;  %v2966_v33 = vadd.f32 %v10529_v61, %v2816_v7  ;;  %v2484_v12 = vpop.f32.mrf.mxu0  ;;  %v12823_v19 = vld [vmem:[#allocation30_spill] sm:$0xff] }
 0x332   : > { %v4324_v54 = vrot.slane %v4310_v62, %v10626_v46  ;;  %v3554_v5 = vrot.slane %v3324_v4, %v10592_v9  ;;  %v3561_v52 = vrot.slane %v3325_v53, %v10592_v9  ;;  %v3092_v32 = vmax.f32 %v2964_v51, 0.0 }
 0x333   : > { %v3199_v40 = vmax.f32 %v3089_v45, %v3091_v35  ;;  %v2965_v11 = vadd.f32 %v10540_v1, %v2815_v17  ;;  %v2817_v21 = vadd.f32 %v2667_v58, %v12822_v16  ;;  %v3094_v56 = vmax.f32 %v2966_v33, 0.0  ;;  %v11229_v45 = vpop.f32.mrf.mxu1 }
 0x334   : > { %v4325_v2 = vcombine.low %v4317_v3, %v4324_v54  ;;  %v4326_v38 = vcombine.high %v4317_v3, %v4324_v54  ;;  %v3964_v6 = vrot.slane %v3554_v5, 4  ;;  %v3965_v8 = vrot.slane %v3561_v52, 4  ;;  %v11244_v54 = vpop.f32.mrf.mxu0 }
 0x335   : > { %v3326_v42 = vcombine.low %v3198_v63, %v3199_v40  ;;  %v3327_v22 = vcombine.high %v3198_v63, %v3199_v40  ;;  %v3093_v34 = vmax.f32 %v2965_v11, 0.0  ;;  %v3200_v58 = vmax.f32 %v3092_v32, %v3094_v56  ;;  %v12824_v32 = vld [vmem:[#allocation134_spill] sm:$0xff]  ;;  %v12825_v11 = vld [vmem:[#allocation31_spill] sm:$0xff] }
 0x336   : > { %v4552_v0 = vrot.slane %v4325_v2, 7  ;;  %v4554_v62 = vrot.slane %v4326_v38, 7  ;;  %v4092_v4 = vmax.f32 %v3554_v5, %v3964_v6  ;;  %v4093_v53 = vmax.f32 %v3561_v52, %v3965_v8  ;;  %v11255_v2 = vpop.f32.mrf.mxu1 }
 0x337   : > { %v3568_v51 = vrot.slane %v3326_v42, %v10592_v9  ;;  %v3575_v35 = vrot.slane %v3327_v22, %v10592_v9  ;;  %v2967_v3 = vadd.f32 %v10542_v25, %v2817_v21  ;;  %v2818_v17 = vadd.f32 %v11189_v57, %v12823_v19  ;;  %v12826_v57 = vld [vmem:[#allocation135_spill] sm:$0xff] }
 0x338   : > { %v11236_v55 = vsel %vm4543_vm6, %v11191_v20, %v4552_v0  ;;  %v11240_v63 = vsel %vm4543_vm6, %v11193_v48, %v4554_v62  ;;  %4650 = vst [vmem:[#allocation3 + $0x50] sm:$0x1] %v4552_v0  ;;  %4651 = vst [vmem:[#allocation3 + $0x58] sm:$0x1] %v4554_v62  ;;  %v4327_v7 = vcombine.low %v4092_v4, %v4093_v53  ;;  %v12827_v0 = vld [vmem:[#allocation32_spill] sm:$0xff]  ;;  %v11261_v4 = vpop.f32.mrf.mxu0 }
 0x339   : > { %4648 = vst [vmem:[#allocation3 + $0x40] sm:$0xff] %v11236_v55  ;;  %4649 = vst [vmem:[#allocation3 + $0x48] sm:$0xff] %v11240_v63  ;;  %v3966_v5 = vrot.slane %v3568_v51, 4  ;;  %v3967_v52 = vrot.slane %v3575_v35, 4  ;;  %v3095_v20 = vmax.f32 %v2967_v3, 0.0  ;;  %v2820_v40 = vadd.f32 %v11198_v10, %v12824_v32 }
 0x33a   : > { %v4335_v48 = vrot.slane %v4327_v7, %v10626_v46  ;;  %v2968_v33 = vadd.f32 %v10527_v39, %v2818_v17  ;;  %v2819_v16 = vadd.f32 %v11209_v13, %v12825_v11  ;;  %v2821_v21 = vadd.f32 %v2671_v43, %v12826_v57  ;;  %v11265_v17 = vpop.f32.mrf.mxu1  ;;  %v12829_v11 = vld [vmem:[#allocation33_spill] sm:$0xff]  ;;  %v11272_v57 = vpop.f32.mrf.mxu0 }
 0x33b   : > { %v4094_v38 = vmax.f32 %v3568_v51, %v3966_v5  ;;  %v4095_v6 = vmax.f32 %v3575_v35, %v3967_v52  ;;  %v3201_v8 = vmax.f32 %v3093_v34, %v3095_v20  ;;  %v2970_v42 = vadd.f32 %v10529_v61, %v2820_v40  ;;  %v12828_v34 = vld [vmem:[#allocation136_spill] sm:$0xff]  ;;  %v8750_v5 = vld [vmem:[#allocation10 + $0x274] ss:$8 sps:$4 sm:$0xff]  }
 0x33c   : > { %v3096_v22 = vmax.f32 %v2968_v33, 0.0  ;;  %v2969_v56 = vadd.f32 %v10540_v1, %v2819_v16  ;;  %v2971_v10 = vadd.f32 %v10542_v25, %v2821_v21  ;;  %v2822_v62 = vadd.f32 %v2482_v60, %v12827_v0  ;;  %5942 = vmatprep.subr.bf16.mxu0 %v8750_v5  ;;  %v11275_v0 = vpop.f32.mrf.mxu1  ;;  %v12833_v5 = vld [vmem:[#allocation115_spill] sm:$0xff] }
 0x33d   : > { %v4328_v53 = vcombine.low %v4094_v38, %v4095_v6  ;;  %v3328_v13 = vcombine.low %v3200_v58, %v3201_v8  ;;  %v3329_v3 = vcombine.high %v3200_v58, %v3201_v8  ;;  %v3098_v43 = vmax.f32 %v2970_v42, 0.0 }
 0x33e   : > { %v3097_v7 = vmax.f32 %v2969_v56, 0.0  ;;  %v3099_v19 = vmax.f32 %v2971_v10, 0.0  ;;  %v2972_v51 = vadd.f32 %v10527_v39, %v2822_v62  ;;  %v2824_v35 = vadd.f32 %v2675_v23, %v12828_v34 }
 0x33f   : > { %v4342_v52 = vrot.slane %v4328_v53, %v10626_v46  ;;  %v3582_v20 = vrot.slane %v3328_v13, %v10592_v9  ;;  %v3589_v60 = vrot.slane %v3329_v3, %v10592_v9  ;;  %v3202_v32 = vmax.f32 %v3096_v22, %v3098_v43  ;;  %v4689_v22 = vld [vmem:[#allocation3 + $0x8] sm:$0xff]  ;;  %v4688_v3 = vld [vmem:[#allocation3] sm:$0xff] }
 0x340   : > { %v3203_v40 = vmax.f32 %v3097_v7, %v3099_v19  ;;  %v3100_v33 = vmax.f32 %v2972_v51, 0.0  ;;  %v2974_v58 = vadd.f32 %v10529_v61, %v2824_v35  ;;  %v2823_v16 = vadd.f32 %v2484_v12, %v12829_v11  ;;  %v12830_v43 = vld [vmem:[#allocation114_spill] sm:$0xff]  ;;  %v12831_v7 = vld [vmem:[#allocation36_spill] sm:$0xff]  ;;  %v11287_v35 = vpop.f32.mrf.mxu0 }
 0x341   : > { %v4343_v23 = vcombine.low %v4335_v48, %v4342_v52  ;;  %v4344_v21 = vcombine.high %v4335_v48, %v4342_v52  ;;  %v3968_v38 = vrot.slane %v3582_v20, 4  ;;  %v3969_v6 = vrot.slane %v3589_v60, 4  ;;  %v12834_v52 = vld [vmem:[#allocation143_spill] sm:$0xff] }
 0x342   : > { %v3330_v8 = vcombine.low %v3202_v32, %v3203_v40  ;;  %v3331_v42 = vcombine.high %v3202_v32, %v3203_v40  ;;  %v3102_v56 = vmax.f32 %v2974_v58, 0.0  ;;  %v2973_v10 = vadd.f32 %v10540_v1, %v2823_v16  ;;  %v4769_v11 = vld [vmem:[#allocation3 + $0x8] sm:$0xfe] }
 0x343   : > { %v11277_v62 = vrot.slane %v4343_v23, 7  ;;  %v11279_v53 = vrot.slane %v4344_v21, 7  ;;  %v4096_v12 = vmax.f32 %v3582_v20, %v3968_v38  ;;  %v4097_v13 = vmax.f32 %v3589_v60, %v3969_v6  ;;  %v12836_v60 = vld [vmem:[#allocation34_spill] sm:$0xff]  ;;  %v4771_v38 = vld [vmem:[#allocation3 + $0x28] sm:$0x1]  ;;  %v11299_v6 = vpop.f32.mrf.mxu1 }
 0x344   : > { %v11283_v48 = vadd.f32 %v12831_v7, %v12830_v43  ;;  %v3596_v19 = vrot.slane %v3330_v8, %v10592_v9  ;;  %v3603_v51 = vrot.slane %v3331_v42, %v10592_v9  ;;  %v3204_v34 = vmax.f32 %v3100_v33, %v3102_v56  ;;  %v12838_v43 = vld [vmem:[#allocation35_spill] sm:$0xff]  ;;  %v11309_v7 = vpop.f32.mrf.mxu0 }
 0x345   : > { %v11291_v32 = vadd.f32 %v12834_v52, %v12833_v5  ;;  %4652 = vst [vmem:[#allocation3 + $0x60] sm:$0xfe] %v11277_v62  ;;  %4653 = vst [vmem:[#allocation3 + $0x68] sm:$0xfe] %v11279_v53  ;;  %v4345_v20 = vcombine.low %v4096_v12, %v4097_v13  ;;  %v2825_v40 = vadd.f32 %v11229_v45, %v12836_v60  ;;  %v3101_v33 = vmax.f32 %v2973_v10, 0.0  ;;  %v12837_v13 = vld [vmem:[#allocation137_spill] sm:$0xff] }
 0x346   : > { %12832 = vst [vmem:[#allocation167_spill] sm:$0xff] %v11283_v48  ;;  %v4721_v58 = vpack.c.bf16 %v11150_v18, %v4689_v22  ;;  %v3970_v16 = vrot.slane %v3596_v19, 4  ;;  %v3971_v23 = vrot.slane %v3603_v51, 4  ;;  %v4720_v21 = vpack.c.bf16 %v11146_v49, %v4688_v3  ;;  %v12839_v60 = vld [vmem:[#allocation138_spill] sm:$0xff] }
 0x347   : > { %12835 = vst [vmem:[#allocation65_spill] sm:$0xff] %v11291_v32  ;;  %v4353_v8 = vrot.slane %v4345_v20, %v10626_v46  ;;  %v2975_v42 = vadd.f32 %v10542_v25, %v2825_v40  ;;  %v4853_v56 = vrot.slane %v11150_v18, 1  ;;  %v4850_v45 = vrot.slane %v11146_v49, 1 }
 0x348   : > { %5475 = vmatprep.mubr.bf16.mxu1 %v4721_v58  ;;  %v4098_v12 = vmax.f32 %v3596_v19, %v3970_v16  ;;  %v4099_v22 = vmax.f32 %v3603_v51, %v3971_v23  ;;  %v2826_v10 = vadd.f32 %v11244_v54, %v12837_v13  ;;  %v2828_v3 = vadd.f32 %v11255_v2, %v12838_v43  ;;  %v12840_v51 = vld [vmem:[#allocation139_spill] sm:$0xff]  ;;  %v11317_v54 = vpop.f32.mrf.mxu1  ;;  %v11323_v13 = vpop.f32.mrf.mxu0 }
 0x349   : > { %5476 = vmatmul.mubr.bf16.vlgmr.msra.gmra.mxu1 %v4720_v21  ;;  %v3103_v5 = vmax.f32 %v2975_v42, 0.0  ;;  %v4852_v52 = vrot.slane %v4769_v11, 1  ;;  %v4857_v20 = vrot.slane %v4771_v38, 1  ;;  %v2827_v18 = vadd.f32 %v11261_v4, %v12839_v60  ;;  %v4768_v21 = vld [vmem:[#allocation3] sm:$0xfe] }
 0x34a   : > { %v4346_v40 = vcombine.low %v4098_v12, %v4099_v22  ;;  %v2976_v49 = vadd.f32 %v10527_v39, %v2826_v10  ;;  %v2978_v19 = vadd.f32 %v10529_v61, %v2828_v3  ;;  %v2829_v58 = vadd.f32 %v11265_v17, %v12840_v51  ;;  %v4770_v22 = vld [vmem:[#allocation3 + $0x20] sm:$0x1] }
 0x34b   : > { %v3205_v16 = vmax.f32 %v3101_v33, %v3103_v5  ;;  %v4854_v2 = vsel %vm4848_vm7, %v4852_v52, %v4853_v56  ;;  %v4858_v23 = vsel %vm4848_vm7, %v4853_v56, %v4857_v20  ;;  %v2977_v11 = vadd.f32 %v10540_v1, %v2827_v18  ;;  %v11326_v20 = vpop.f32.mrf.mxu1 }
 0x34c   : > { %v4360_v4 = vrot.slane %v4346_v40, %v10626_v46  ;;  %v3104_v38 = vmax.f32 %v2976_v49, 0.0  ;;  %v3106_v42 = vmax.f32 %v2978_v19, 0.0  ;;  %v4962_v12 = vpack.c.bf16 %v4858_v23, %v4854_v2  ;;  %v11333_v2 = vpop.f32.mrf.mxu0 }
 0x34d   : > { %v3332_v10 = vcombine.low %v3204_v34, %v3205_v16  ;;  %v3333_v17 = vcombine.high %v3204_v34, %v3205_v16  ;;  %v3105_v43 = vmax.f32 %v2977_v11, 0.0  ;;  %v2979_v33 = vadd.f32 %v10542_v25, %v2829_v58  ;;  %v12841_v16 = vld [vmem:[#allocation37_spill] sm:$0xff] }
 0x34e   : > { %v4361_v3 = vcombine.low %v4353_v8, %v4360_v4  ;;  %v4362_v5 = vcombine.high %v4353_v8, %v4360_v4  ;;  %v3206_v52 = vmax.f32 %v3104_v38, %v3106_v42  ;;  %5202 = vmatprep.mubr.bf16.mxu0 %v4962_v12  ;;  %v4849_v56 = vrot.slane %v4768_v21, 1  ;;  %v8748_v4 = vld [vmem:[#allocation10 + $0x270] ss:$8 sps:$4 sm:$0xff]  }
 0x34f   : > { %v3610_v60 = vrot.slane %v3332_v10, %v10592_v9  ;;  %v3617_v18 = vrot.slane %v3333_v17, %v10592_v9  ;;  %v3107_v40 = vmax.f32 %v2979_v33, 0.0  ;;  %v4855_v49 = vrot.slane %v4770_v22, 1  ;;  %v2695_v22 = vpop.f32.mrf.mxu1  ;;  %v8753_v10 = vld [vmem:[#allocation10 + $0x264] ss:$8 sps:$4 sm:$0xff]  }
 0x350   : > { %v4558_v19 = vrot.slane %v4361_v3, 7  ;;  %v4560_v51 = vrot.slane %v4362_v5, 7  ;;  %v4851_v34 = vsel %vm4848_vm7, %v4849_v56, %v4850_v45  ;;  %v2830_v58 = vadd.f32 %v11272_v57, %v12841_v16  ;;  %v12842_v3 = vld [vmem:[#allocation140_spill] sm:$0xff]  ;;  %v12843_v5 = vld [vmem:[#allocation38_spill] sm:$0xff] }
 0x351   : > { %v3972_v8 = vrot.slane %v3610_v60, 4  ;;  %v3973_v23 = vrot.slane %v3617_v18, 4  ;;  %v3207_v11 = vmax.f32 %v3105_v43, %v3107_v40  ;;  %v4856_v21 = vsel %vm4848_vm7, %v4850_v45, %v4855_v49  ;;  %v12844_v40 = vld [vmem:[#allocation141_spill] sm:$0xff]  ;;  %v8751_v16 = vld [vmem:[#allocation10 + $0x260] ss:$8 sps:$4 sm:$0xff]  }
 0x352   : > { %v11338_v38 = vsel %vm4543_vm6, %v11277_v62, %v4558_v19  ;;  %v11342_v42 = vsel %vm4543_vm6, %v11279_v53, %v4560_v51  ;;  %4656 = vst [vmem:[#allocation3 + $0x80] sm:$0x1] %v4558_v19  ;;  %4657 = vst [vmem:[#allocation3 + $0x88] sm:$0x1] %v4560_v51  ;;  %v4961_v12 = vpack.c.bf16 %v4856_v21, %v4851_v34  ;;  %v2504_v19 = vpop.f32.mrf.mxu0 }
 0x353   : > { %v2980_v57 = vadd.f32 %v10527_v39, %v2830_v58  ;;  %4654 = vst [vmem:[#allocation3 + $0x70] sm:$0xff] %v11338_v38  ;;  %4655 = vst [vmem:[#allocation3 + $0x78] sm:$0xff] %v11342_v42  ;;  %v4100_v45 = vmax.f32 %v3610_v60, %v3972_v8  ;;  %v4101_v17 = vmax.f32 %v3617_v18, %v3973_v23  ;;  %v12845_v18 = vld [vmem:[#allocation39_spill] sm:$0xff]  ;;  %v12846_v8 = vld [vmem:[#allocation142_spill] sm:$0xff]  ;;  %v2697_v23 = vpop.f32.mrf.mxu1 }
 0x354   : > { %v3334_v43 = vcombine.low %v3206_v52, %v3207_v11  ;;  %v3335_v62 = vcombine.high %v3206_v52, %v3207_v11  ;;  %5203 = vmatmul.mubr.bf16.vlgmr.msra.gmra.mxu0 %v4961_v12  ;;  %v2832_v53 = vadd.f32 %v11275_v0, %v12842_v3  ;;  %v2831_v56 = vadd.f32 %v11287_v35, %v12843_v5  ;;  %v8756_v11 = vld [vmem:[#allocation10 + $0x254] ss:$8 sps:$4 sm:$0xff]  }
 0x355   : > { %v3108_v33 = vmax.f32 %v2980_v57, 0.0  ;;  %v2833_v49 = vadd.f32 %v11299_v6, %v12844_v40  ;;  %v4363_v51 = vcombine.low %v4100_v45, %v4101_v17  ;;  %v2834_v52 = vadd.f32 %v11309_v7, %v12845_v18  ;;  %5943 = vmatpush1.bf16.msra.mxu0 %v8748_v4  ;;  %v12848_v18 = vld [vmem:[#allocation144_spill] sm:$0xff] }
 0x356   : > { %v3624_v34 = vrot.slane %v3334_v43, %v10592_v9  ;;  %v3631_v60 = vrot.slane %v3335_v62, %v10592_v9  ;;  %v2982_v58 = vadd.f32 %v10529_v61, %v2832_v53  ;;  %v2981_v0 = vadd.f32 %v10540_v1, %v2831_v56  ;;  %5944 = vmatprep.subr.bf16.mxu0 %v8753_v10  ;;  %v11365_v62 = vpop.f32.mrf.mxu0  ;;  %v8754_v56 = vld [vmem:[#allocation10 + $0x250] ss:$8 sps:$4 sm:$0xff]  }
 0x357   : > { %v2983_v35 = vadd.f32 %v10542_v25, %v2833_v49  ;;  %v2836_v6 = vadd.f32 %v11317_v54, %v12846_v8  ;;  %v4371_v21 = vrot.slane %v4363_v51, %v10626_v46  ;;  %v2984_v7 = vadd.f32 %v10527_v39, %v2834_v52  ;;  %v12847_v54 = vld [vmem:[#allocation40_spill] sm:$0xff] }
 0x358   : > { %v3974_v12 = vrot.slane %v3624_v34, 4  ;;  %v3975_v57 = vrot.slane %v3631_v60, 4  ;;  %v3110_v4 = vmax.f32 %v2982_v58, 0.0  ;;  %v3109_v45 = vmax.f32 %v2981_v0, 0.0  ;;  %v11371_v58 = vpop.f32.mrf.mxu1  ;;  %v8759_v0 = vld [vmem:[#allocation10 + $0x244] ss:$8 sps:$4 sm:$0xff]  }
 0x359   : > { %v3111_v17 = vmax.f32 %v2983_v35, 0.0  ;;  %v2986_v43 = vadd.f32 %v10529_v61, %v2836_v6  ;;  %v3112_v5 = vmax.f32 %v2984_v7, 0.0  ;;  %v2835_v10 = vadd.f32 %v11323_v13, %v12847_v54  ;;  %5945 = vmatpush1.bf16.msra.mxu0 %v8751_v16  ;;  %v12850_v6 = vld [vmem:[#allocation145_spill] sm:$0xff]  ;;  %v11378_v7 = vpop.f32.mrf.mxu0 }
 0x35a   : > { %v4102_v3 = vmax.f32 %v3624_v34, %v3974_v12  ;;  %v4103_v53 = vmax.f32 %v3631_v60, %v3975_v57  ;;  %v3208_v40 = vmax.f32 %v3108_v33, %v3110_v4  ;;  %v2837_v52 = vadd.f32 %v11326_v20, %v12848_v18  ;;  %5946 = vmatprep.subr.bf16.mxu0 %v8756_v11  ;;  %v12849_v60 = vld [vmem:[#allocation42_spill] sm:$0xff] }
 0x35b   : > { %v3209_v49 = vmax.f32 %v3109_v45, %v3111_v17  ;;  %v3114_v51 = vmax.f32 %v2986_v43, 0.0  ;;  %v2985_v34 = vadd.f32 %v10540_v1, %v2835_v10  ;;  %v2838_v8 = vadd.f32 %v11333_v2, %v12849_v60  ;;  %v8757_v17 = vld [vmem:[#allocation10 + $0x240] ss:$8 sps:$4 sm:$0xff]   ;;  %v8762_v54 = vld [vmem:[#allocation10 + $0x234] ss:$8 sps:$4 sm:$0xff]   ;;  %v11389_v60 = vpop.f32.mrf.mxu0 }
 0x35c   : > { %v4364_v35 = vcombine.low %v4102_v3, %v4103_v53  ;;  %v2840_v13 = vadd.f32 %v2695_v22, %v12850_v6  ;;  %v2987_v57 = vadd.f32 %v10542_v25, %v2837_v52  ;;  %v12851_v3 = vld [vmem:[#allocation43_spill] sm:$0xff] }
 0x35d   : > { %v3336_v16 = vcombine.low %v3208_v40, %v3209_v49  ;;  %v3337_v12 = vcombine.high %v3208_v40, %v3209_v49  ;;  %v3210_v33 = vmax.f32 %v3112_v5, %v3114_v51  ;;  %v3113_v4 = vmax.f32 %v2985_v34, 0.0  ;;  %5947 = vmatpush1.bf16.msra.mxu0 %v8754_v56  ;;  %v11386_v5 = vpop.f32.mrf.mxu1  ;;  %v4693_v34 = vld [vmem:[#allocation3 + $0x38] sm:$0xff] }
 0x35e   : > { %v4378_v20 = vrot.slane %v4364_v35, %v10626_v46  ;;  %v2988_v11 = vadd.f32 %v10527_v39, %v2838_v8  ;;  %v2990_v45 = vadd.f32 %v10529_v61, %v2840_v13  ;;  %v3115_v43 = vmax.f32 %v2987_v57, 0.0  ;;  %5948 = vmatprep.subr.bf16.mxu0 %v8759_v0  ;;  %v12852_v0 = vld [vmem:[#allocation146_spill] sm:$0xff] }
 0x35f   : > { %v3638_v2 = vrot.slane %v3336_v16, %v10592_v9  ;;  %v3645_v22 = vrot.slane %v3337_v12, %v10592_v9  ;;  %v2839_v53 = vadd.f32 %v2504_v19, %v12851_v3  ;;  %v2841_v13 = vadd.f32 %v2697_v23, %v12852_v0  ;;  %v12854_v3 = vld [vmem:[#allocation41_spill] sm:$0xff] }
 0x360   : > { %v4379_v10 = vcombine.low %v4371_v21, %v4378_v20  ;;  %v4380_v40 = vcombine.high %v4371_v21, %v4378_v20  ;;  %v3116_v49 = vmax.f32 %v2988_v11, 0.0  ;;  %v3118_v51 = vmax.f32 %v2990_v45, 0.0  ;;  %v8760_v21 = vld [vmem:[#allocation10 + $0x230] ss:$8 sps:$4 sm:$0xff]   ;;  %v11398_v11 = vpop.f32.mrf.mxu1  ;;  %v8765_v45 = vld [vmem:[#allocation10 + $0x224] ss:$8 sps:$4 sm:$0xff]  }
 0x361   : > { %v3976_v18 = vrot.slane %v3638_v2, 4  ;;  %v3977_v52 = vrot.slane %v3645_v22, 4  ;;  %v3211_v35 = vmax.f32 %v3113_v4, %v3115_v43  ;;  %v2989_v56 = vadd.f32 %v10540_v1, %v2839_v53  ;;  %5949 = vmatpush1.bf16.msra.mxu0 %v8757_v17  ;;  %v4692_v4 = vld [vmem:[#allocation3 + $0x30] sm:$0xff] }
 0x362   : > { %v11391_v8 = vrot.slane %v4379_v10, 7  ;;  %v11393_v6 = vrot.slane %v4380_v40, 7  ;;  %v11395_v19 = vmax.f32 %v3116_v49, %v3118_v51  ;;  %5950 = vmatprep.subr.bf16.mxu0 %v8762_v54  ;;  %v12853_v43 = vld [vmem:[#allocation116_spill] sm:$0xff]  ;;  %v2991_v17 = vadd.f32 %v10542_v25, %v2841_v13  ;;  %v4773_v51 = vld [vmem:[#allocation3 + $0x38] sm:$0xfe] }
 0x363   : > { %v4104_v16 = vmax.f32 %v3638_v2, %v3976_v18  ;;  %v4105_v12 = vmax.f32 %v3645_v22, %v3977_v52  ;;  %v3338_v57 = vcombine.low %v3210_v33, %v3211_v35  ;;  %v3339_v20 = vcombine.high %v3210_v33, %v3211_v35  ;;  %v12856_v22 = vld [vmem:[#allocation117_spill] sm:$0xff]  ;;  %v12857_v33 = vld [vmem:[#allocation148_spill] sm:$0xff]  ;;  %v11414_v52 = vpop.f32.mrf.mxu0 }
 0x364   : > { %v11402_v53 = vadd.f32 %v12854_v3, %v12853_v43  ;;  %4658 = vst [vmem:[#allocation3 + $0x90] sm:$0xfe] %v11391_v8  ;;  %4659 = vst [vmem:[#allocation3 + $0x98] sm:$0xfe] %v11393_v6  ;;  %v3117_v23 = vmax.f32 %v2989_v56, 0.0  ;;  %v4723_v2 = vpack.c.bf16 %v11240_v63, %v4693_v34  ;;  %v11410_v10 = vadd.f32 %v12857_v33, %v12856_v22  ;;  %v12859_v43 = vld [vmem:[#allocation44_spill] sm:$0xff]  ;;  %v11422_v3 = vpop.f32.mrf.mxu1 }
 0x365   : > { %v4381_v40 = vcombine.low %v4104_v16, %v4105_v12  ;;  %v3652_v54 = vrot.slane %v3338_v57, %v10592_v9  ;;  %v3659_v49 = vrot.slane %v3339_v20, %v10592_v9  ;;  %v4775_v18 = vld [vmem:[#allocation3 + $0x58] sm:$0x1]  ;;  %v3119_v35 = vmax.f32 %v2991_v17, 0.0  ;;  %5951 = vmatpush1.bf16.msra.mxu0 %v8760_v21  ;;  %v8763_v13 = vld [vmem:[#allocation10 + $0x220] ss:$8 sps:$4 sm:$0xff]   ;;  %v11429_v32 = vpop.f32.mrf.mxu0 }
 0x366   : > { %12855 = vst [vmem:[#allocation168_spill] sm:$0xff] %v11402_v53  ;;  %12858 = vst [vmem:[#allocation66_spill] sm:$0xff] %v11410_v10  ;;  %v4863_v56 = vrot.slane %v11240_v63, 1  ;;  %5485 = vmatprep.mubr.bf16.mxu1 %v4723_v2  ;;  %v4722_v0 = vpack.c.bf16 %v11236_v55, %v4692_v4  ;;  %v4860_v34 = vrot.slane %v11236_v55, 1  ;;  %v2842_v20 = vadd.f32 %v11365_v62, %v12859_v43  ;;  %v8768_v17 = vld [vmem:[#allocation10 + $0x214] ss:$8 sps:$4 sm:$0xff]  }
 0x367   : > { %v4389_v16 = vrot.slane %v4381_v40, %v10626_v46  ;;  %v3978_v12 = vrot.slane %v3652_v54, 4  ;;  %v3979_v57 = vrot.slane %v3659_v49, 4  ;;  %5952 = vmatprep.subr.bf16.mxu0 %v8765_v45  ;;  %v3213_v22 = vmax.f32 %v3117_v23, %v3119_v35  ;;  %v12860_v63 = vld [vmem:[#allocation147_spill] sm:$0xff]  ;;  %v12861_v10 = vld [vmem:[#allocation45_spill] sm:$0xff] }
 0x368   : > { %5486 = vmatmul.mubr.bf16.gmra.mxu1 %v4722_v0  ;;  %v2844_v4 = vadd.f32 %v11371_v58, %v12860_v63  ;;  %v4862_v2 = vrot.slane %v4773_v51, 1  ;;  %v4867_v55 = vrot.slane %v4775_v18, 1  ;;  %v2992_v40 = vadd.f32 %v10527_v39, %v2842_v20  ;;  %v4772_v58 = vld [vmem:[#allocation3 + $0x30] sm:$0xfe] }
 0x369   : > { %v4106_v21 = vmax.f32 %v3652_v54, %v3978_v12  ;;  %v4107_v33 = vmax.f32 %v3659_v49, %v3979_v57  ;;  %v2843_v53 = vadd.f32 %v11378_v7, %v12861_v10  ;;  %v3340_v62 = vcombine.low %v11395_v19, %v3213_v22  ;;  %5953 = vmatpush1.bf16.msra.mxu0 %v8763_v13  ;;  %v8766_v51 = vld [vmem:[#allocation10 + $0x210] ss:$8 sps:$4 sm:$0xff]   ;;  %v4774_v7 = vld [vmem:[#allocation3 + $0x50] sm:$0x1]  ;;  %v11437_v10 = vpop.f32.mrf.mxu1 }
 0x36a   : > { %v3341_v45 = vcombine.high %v11395_v19, %v3213_v22  ;;  %v2994_v23 = vadd.f32 %v10529_v61, %v2844_v4  ;;  %v4864_v35 = vsel %vm4848_vm7, %v4862_v2, %v4863_v56  ;;  %v3120_v49 = vmax.f32 %v2992_v40, 0.0  ;;  %5954 = vmatprep.subr.bf16.mxu0 %v8768_v17  ;;  %v12862_v22 = vld [vmem:[#allocation149_spill] sm:$0xff]  ;;  %v8771_v2 = vld [vmem:[#allocation10 + $0x204] ss:$8 sps:$4 sm:$0xff]  }
 0x36b   : > { %v4382_v54 = vcombine.low %v4106_v21, %v4107_v33  ;;  %v4868_v18 = vsel %vm4848_vm7, %v4863_v56, %v4867_v55  ;;  %v2993_v0 = vadd.f32 %v10540_v1, %v2843_v53  ;;  %v3666_v12 = vrot.slane %v3340_v62, %v10592_v9  ;;  %v2518_v56 = vpop.f32.mrf.mxu0  ;;  %v8769_v33 = vld [vmem:[#allocation10 + $0x200] ss:$8 sps:$4 sm:$0xff]  }
 0x36c   : > { %v3673_v19 = vrot.slane %v3341_v45, %v10592_v9  ;;  %v3122_v57 = vmax.f32 %v2994_v23, 0.0  ;;  %v4964_v43 = vpack.c.bf16 %v4868_v18, %v4864_v35  ;;  %v2845_v63 = vadd.f32 %v11386_v5, %v12862_v22  ;;  %v2711_v35 = vpop.f32.mrf.mxu1  ;;  %v12863_v18 = vld [vmem:[#allocation47_spill] sm:$0xff] }
 0x36d   : > { %v4396_v20 = vrot.slane %v4382_v54, %v10626_v46  ;;  %v3121_v13 = vmax.f32 %v2993_v0, 0.0  ;;  %v4859_v4 = vrot.slane %v4772_v58, 1  ;;  %v3980_v53 = vrot.slane %v3666_v12, 4  ;;  %5955 = vmatpush1.bf16.msra.mxu0 %v8766_v51  ;;  %v2522_v22 = vpop.f32.mrf.mxu0 }
 0x36e   : > { %v3981_v55 = vrot.slane %v3673_v19, 4  ;;  %v3214_v21 = vmax.f32 %v3120_v49, %v3122_v57  ;;  %5212 = vmatprep.mubr.bf16.mxu0 %v4964_v43  ;;  %v4865_v17 = vrot.slane %v4774_v7, 1  ;;  %v2995_v45 = vadd.f32 %v10542_v25, %v2845_v63  ;;  %5956 = vmatprep.subr.bf16.mxu0 %v8771_v2  ;;  %v8774_v49 = vld [vmem:[#allocation10 + $0x2f4] ss:$8 sps:$4 sm:$0xff]   ;;  %v12865_v2 = vld [vmem:[#allocation48_spill] sm:$0xff] }
 0x36f   : > { %v4397_v40 = vcombine.low %v4389_v16, %v4396_v20  ;;  %v4398_v62 = vcombine.high %v4389_v16, %v4396_v20  ;;  %v4861_v23 = vsel %vm4848_vm7, %v4859_v4, %v4860_v34  ;;  %v4108_v54 = vmax.f32 %v3666_v12, %v3980_v53  ;;  %v12864_v63 = vld [vmem:[#allocation150_spill] sm:$0xff] }
 0x370   : > { %v4109_v5 = vmax.f32 %v3673_v19, %v3981_v55  ;;  %v4866_v58 = vsel %vm4848_vm7, %v4860_v34, %v4865_v17  ;;  %v2846_v0 = vadd.f32 %v11389_v60, %v12863_v18  ;;  %v3123_v51 = vmax.f32 %v2995_v45, 0.0  ;;  %v8772_v34 = vld [vmem:[#allocation10 + $0x2f0] ss:$8 sps:$4 sm:$0xff]   ;;  %v12866_v55 = vld [vmem:[#allocation151_spill] sm:$0xff]  ;;  %v2715_v17 = vpop.f32.mrf.mxu1  ;;  %v12868_v18 = vld [vmem:[#allocation152_spill] sm:$0xff] }
 0x371   : > { %v4564_v57 = vrot.slane %v4397_v40, 7  ;;  %v4566_v7 = vrot.slane %v4398_v62, 7  ;;  %v4963_v43 = vpack.c.bf16 %v4866_v58, %v4861_v23  ;;  %v2848_v4 = vadd.f32 %v11398_v11, %v12864_v63  ;;  %5957 = vmatpush1.bf16.msra.mxu0 %v8769_v33  ;;  %v8777_v40 = vld [vmem:[#allocation10 + $0x2e4] ss:$8 sps:$4 sm:$0xff]  }
 0x372   : > { %v4399_v16 = vcombine.low %v4108_v54, %v4109_v5  ;;  %v2996_v20 = vadd.f32 %v10527_v39, %v2846_v0  ;;  %v2847_v12 = vadd.f32 %v11414_v52, %v12865_v2  ;;  %v3215_v53 = vmax.f32 %v3121_v13, %v3123_v51  ;;  %5958 = vmatprep.subr.bf16.mxu0 %v8774_v49  ;;  %v2524_v54 = vpop.f32.mrf.mxu0  ;;  %v8775_v51 = vld [vmem:[#allocation10 + $0x2e0] ss:$8 sps:$4 sm:$0xff]  }
 0x373   : > { %v11456_v60 = vsel %vm4543_vm6, %v11391_v8, %v4564_v57  ;;  %v11460_v19 = vsel %vm4543_vm6, %v11393_v6, %v4566_v7  ;;  %4662 = vst [vmem:[#allocation3 + $0xb0] sm:$0x1] %v4564_v57  ;;  %4663 = vst [vmem:[#allocation3 + $0xb8] sm:$0x1] %v4566_v7  ;;  %5213 = vmatmul.mubr.bf16.gmra.mxu0 %v4963_v43  ;;  %v2849_v11 = vadd.f32 %v11422_v3, %v12866_v55  ;;  %v12867_v3 = vld [vmem:[#allocation49_spill] sm:$0xff]  ;;  %v12869_v57 = vld [vmem:[#allocation50_spill] sm:$0xff] }
 0x374   : > { %4660 = vst [vmem:[#allocation3 + $0xa0] sm:$0xff] %v11456_v60  ;;  %4661 = vst [vmem:[#allocation3 + $0xa8] sm:$0xff] %v11460_v19  ;;  %v11467_v8 = vrot.slane %v4399_v16, %v10626_v46  ;;  %v3124_v52 = vmax.f32 %v2996_v20, 0.0  ;;  %v2998_v6 = vadd.f32 %v10529_v61, %v2848_v4  ;;  %v2997_v33 = vadd.f32 %v10540_v1, %v2847_v12  ;;  %v2717_v20 = vpop.f32.mrf.mxu1 }
 0x375   : > { %v3342_v13 = vcombine.low %v3214_v21, %v3215_v53  ;;  %v3343_v62 = vcombine.high %v3214_v21, %v3215_v53  ;;  %v2999_v45 = vadd.f32 %v10542_v25, %v2849_v11  ;;  %v2850_v23 = vadd.f32 %v11429_v32, %v12867_v3  ;;  %5959 = vmatpush2.bf16.msra.mxu0 %v8772_v34  ;;  %v8780_v32 = vld [vmem:[#allocation10 + $0x2d4] ss:$8 sps:$4 sm:$0xff]   ;;  %v11483_v11 = vpop.f32.mrf.mxu0 }
 0x376   : > { %v3126_v5 = vmax.f32 %v2998_v6, 0.0  ;;  %v3125_v58 = vmax.f32 %v2997_v33, 0.0  ;;  %v2852_v0 = vadd.f32 %v11437_v10, %v12868_v18  ;;  %v2851_v7 = vadd.f32 %v2518_v56, %v12869_v57  ;;  %5960 = vmatprep.subr.bf16.mxu0 %v8777_v40  ;;  %v12870_v10 = vld [vmem:[#allocation154_spill] sm:$0xff]  ;;  %v11487_v18 = vpop.f32.mrf.mxu1 }
 0x377   : > { %v3680_v43 = vrot.slane %v3342_v13, %v10592_v9  ;;  %v3687_v49 = vrot.slane %v3343_v62, %v10592_v9  ;;  %v3127_v21 = vmax.f32 %v2999_v45, 0.0  ;;  %v3000_v16 = vadd.f32 %v10527_v39, %v2850_v23  ;;  %v12871_v62 = vld [vmem:[#allocation52_spill] sm:$0xff] }
 0x378   : > { %v3216_v63 = vmax.f32 %v3124_v52, %v3126_v5  ;;  %v3002_v4 = vadd.f32 %v10529_v61, %v2852_v0  ;;  %v3001_v2 = vadd.f32 %v10540_v1, %v2851_v7  ;;  %v2853_v12 = vadd.f32 %v2711_v35, %v12870_v10  ;;  %v8778_v52 = vld [vmem:[#allocation10 + $0x2d0] ss:$8 sps:$4 sm:$0xff]   ;;  %v8783_v35 = vld [vmem:[#allocation10 + $0x2c4] ss:$8 sps:$4 sm:$0xff]  }
 0x379   : > { %v3982_v56 = vrot.slane %v3680_v43, 4  ;;  %v3983_v34 = vrot.slane %v3687_v49, 4  ;;  %v3217_v53 = vmax.f32 %v3125_v58, %v3127_v21  ;;  %v3128_v55 = vmax.f32 %v3000_v16, 0.0  ;;  %5961 = vmatpush2.bf16.msra.mxu0 %v8775_v51  ;;  %v12872_v7 = vld [vmem:[#allocation155_spill] sm:$0xff]  ;;  %v12873_v51 = vld [vmem:[#allocation53_spill] sm:$0xff]  ;;  %v12874_v10 = vld [vmem:[#allocation156_spill] sm:$0xff] }
 0x37a   : > { %v3130_v6 = vmax.f32 %v3002_v4, 0.0  ;;  %v3129_v33 = vmax.f32 %v3001_v2, 0.0  ;;  %v3003_v13 = vadd.f32 %v10542_v25, %v2853_v12  ;;  %v2854_v40 = vadd.f32 %v2522_v22, %v12871_v62  ;;  %5962 = vmatprep.subr.bf16.mxu0 %v8780_v32 }
 0x37b   : > { %v4110_v45 = vmax.f32 %v3680_v43, %v3982_v56  ;;  %v4111_v3 = vmax.f32 %v3687_v49, %v3983_v34  ;;  %v3344_v23 = vcombine.low %v3216_v63, %v3217_v53  ;;  %v3345_v5 = vcombine.high %v3216_v63, %v3217_v53  ;;  %v11494_v49 = vpop.f32.mrf.mxu0  ;;  %v8781_v56 = vld [vmem:[#allocation10 + $0x2c0] ss:$8 sps:$4 sm:$0xff]  }
 0x37c   : > { %v3218_v58 = vmax.f32 %v3128_v55, %v3130_v6  ;;  %v3131_v0 = vmax.f32 %v3003_v13, 0.0  ;;  %v3004_v57 = vadd.f32 %v10527_v39, %v2854_v40  ;;  %v2856_v21 = vadd.f32 %v2715_v17, %v12872_v7  ;;  %v11500_v6 = vpop.f32.mrf.mxu1 }
 0x37d   : > { %v4400_v16 = vcombine.low %v4110_v45, %v4111_v3  ;;  %v3694_v4 = vrot.slane %v3344_v23, %v10592_v9  ;;  %v3701_v22 = vrot.slane %v3345_v5, %v10592_v9  ;;  %v2855_v43 = vadd.f32 %v2524_v54, %v12873_v51  ;;  %5963 = vmatpush2.bf16.msra.mxu0 %v8778_v52  ;;  %v8786_v54 = vld [vmem:[#allocation10 + $0x2b4] ss:$8 sps:$4 sm:$0xff]   ;;  %v4697_v23 = vld [vmem:[#allocation3 + $0x68] sm:$0xff]  ;;  %v11505_v5 = vpop.f32.mrf.mxu0 }
 0x37e   : > { %v3219_v63 = vmax.f32 %v3129_v33, %v3131_v0  ;;  %v3132_v2 = vmax.f32 %v3004_v57, 0.0  ;;  %v3006_v32 = vadd.f32 %v10529_v61, %v2856_v21  ;;  %v2857_v12 = vadd.f32 %v2717_v20, %v12874_v10  ;;  %5964 = vmatprep.subr.bf16.mxu0 %v8783_v35  ;;  %v4696_v21 = vld [vmem:[#allocation3 + $0x60] sm:$0xff] }
 0x37f   : > { %v4414_v34 = vrot.slane %v4400_v16, %v10626_v46  ;;  %v3984_v17 = vrot.slane %v3694_v4, 4  ;;  %v3985_v53 = vrot.slane %v3701_v22, 4  ;;  %v3005_v55 = vadd.f32 %v10540_v1, %v2855_v43 }
 0x380   : > { %v3346_v13 = vcombine.low %v3218_v58, %v3219_v63  ;;  %v3347_v62 = vcombine.high %v3218_v58, %v3219_v63  ;;  %v3134_v33 = vmax.f32 %v3006_v32, 0.0  ;;  %v3007_v40 = vadd.f32 %v10542_v25, %v2857_v12  ;;  %v8784_v58 = vld [vmem:[#allocation10 + $0x2b0] ss:$8 sps:$4 sm:$0xff]  }
 0x381   : > { %v4415_v45 = vcombine.low %v11467_v8, %v4414_v34  ;;  %v4416_v20 = vcombine.high %v11467_v8, %v4414_v34  ;;  %v4112_v52 = vmax.f32 %v3694_v4, %v3984_v17  ;;  %v4113_v3 = vmax.f32 %v3701_v22, %v3985_v53  ;;  %5965 = vmatpush2.bf16.msra.mxu0 %v8781_v56  ;;  %v11513_v4 = vpop.f32.mrf.mxu1  ;;  %v12875_v22 = vld [vmem:[#allocation118_spill] sm:$0xff]  ;;  %v8789_v34 = vld [vmem:[#allocation10 + $0x2a4] ss:$8 sps:$4 sm:$0xff]   ;;  %v12879_v17 = vld [vmem:[#allocation153_spill] sm:$0xff] }
 0x382   : > { %v3708_v0 = vrot.slane %v3346_v13, %v10592_v9  ;;  %v3715_v57 = vrot.slane %v3347_v62, %v10592_v9  ;;  %v3220_v35 = vmax.f32 %v3132_v2, %v3134_v33  ;;  %v3133_v7 = vmax.f32 %v3005_v55, 0.0  ;;  %5966 = vmatprep.subr.bf16.mxu0 %v8786_v54  ;;  %v12876_v63 = vld [vmem:[#allocation46_spill] sm:$0xff]  ;;  %v12878_v56 = vld [vmem:[#allocation119_spill] sm:$0xff] }
 0x383   : > { %v11509_v16 = vrot.slane %v4415_v45, 7  ;;  %v11511_v51 = vrot.slane %v4416_v20, 7  ;;  %v4417_v43 = vcombine.low %v4112_v52, %v4113_v3  ;;  %v3135_v8 = vmax.f32 %v3007_v40, 0.0  ;;  %v4777_v62 = vld [vmem:[#allocation3 + $0x68] sm:$0xfe]  ;;  %v11528_v40 = vpop.f32.mrf.mxu0 }
 0x384   : > { %v11517_v32 = vadd.f32 %v12876_v63, %v12875_v22  ;;  %v3986_v10 = vrot.slane %v3708_v0, 4  ;;  %v3987_v12 = vrot.slane %v3715_v57, 4  ;;  %v4725_v2 = vpack.c.bf16 %v11342_v42, %v4697_v23  ;;  %v4779_v33 = vld [vmem:[#allocation3 + $0x88] sm:$0x1]  ;;  %v8787_v23 = vld [vmem:[#allocation10 + $0x2a0] ss:$8 sps:$4 sm:$0xff]  }
 0x385   : > { %v11522_v53 = vadd.f32 %v12879_v17, %v12878_v56  ;;  %4664 = vst [vmem:[#allocation3 + $0xc0] sm:$0xfe] %v11509_v16  ;;  %4665 = vst [vmem:[#allocation3 + $0xc8] sm:$0xfe] %v11511_v51  ;;  %v3221_v55 = vmax.f32 %v3133_v7, %v3135_v8  ;;  %v4873_v54 = vrot.slane %v11342_v42, 1  ;;  %v4724_v13 = vpack.c.bf16 %v11338_v38, %v4696_v21  ;;  %v12881_v7 = vld [vmem:[#allocation54_spill] sm:$0xff]  ;;  %v11536_v56 = vpop.f32.mrf.mxu1 }
 0x386   : > { %12877 = vst [vmem:[#allocation169_spill] sm:$0xff] %v11517_v32  ;;  %v4425_v45 = vrot.slane %v4417_v43, %v10626_v46  ;;  %v4114_v20 = vmax.f32 %v3708_v0, %v3986_v10  ;;  %v4115_v52 = vmax.f32 %v3715_v57, %v3987_v12  ;;  %5495 = vmatprep.mubr.bf16.mxu1 %v4725_v2  ;;  %v12882_v21 = vld [vmem:[#allocation157_spill] sm:$0xff]  ;;  %v4872_v0 = vrot.slane %v4777_v62, 1  ;;  %v12883_v10 = vld [vmem:[#allocation55_spill] sm:$0xff] }
 0x387   : > { %12880 = vst [vmem:[#allocation67_spill] sm:$0xff] %v11522_v53  ;;  %5967 = vmatpush2.bf16.msra.mxu0 %v8784_v58  ;;  %v3348_v22 = vcombine.low %v3220_v35, %v3221_v55  ;;  %v3349_v63 = vcombine.high %v3220_v35, %v3221_v55  ;;  %5496 = vmatmul.mubr.bf16.gmra.mxu1 %v4724_v13  ;;  %v8792_v17 = vld [vmem:[#allocation10 + $0x294] ss:$8 sps:$4 sm:$0xff]   ;;  %v4877_v57 = vrot.slane %v4779_v33, 1  ;;  %v2536_v55 = vpop.f32.mrf.mxu0 }
 0x388   : > { %v2858_v42 = vadd.f32 %v11483_v11, %v12881_v7  ;;  %v2860_v8 = vadd.f32 %v11487_v18, %v12882_v21  ;;  %v4418_v43 = vcombine.low %v4114_v20, %v4115_v52  ;;  %v2859_v12 = vadd.f32 %v11494_v49, %v12883_v10  ;;  %5968 = vmatprep.subr.bf16.mxu0 %v8789_v34  ;;  %v4776_v20 = vld [vmem:[#allocation3 + $0x60] sm:$0xfe]  ;;  %v4778_v49 = vld [vmem:[#allocation3 + $0x80] sm:$0x1]  ;;  %v8790_v34 = vld [vmem:[#allocation10 + $0x290] ss:$8 sps:$4 sm:$0xff]  }
 0x389   : > { %v3722_v58 = vrot.slane %v3348_v22, %v10592_v9  ;;  %v3729_v35 = vrot.slane %v3349_v63, %v10592_v9  ;;  %v4874_v13 = vsel %vm4848_vm7, %v4872_v0, %v4873_v54  ;;  %v4878_v62 = vsel %vm4848_vm7, %v4873_v54, %v4877_v57  ;;  %v8795_v21 = vld [vmem:[#allocation10 + $0x284] ss:$8 sps:$4 sm:$0xff]   ;;  %v2538_v53 = vpop.f32.mrf.mxu0 }
 0x38a   : > { %v3008_v2 = vadd.f32 %v10527_v39, %v2858_v42  ;;  %v3010_v11 = vadd.f32 %v10529_v61, %v2860_v8  ;;  %v4432_v18 = vrot.slane %v4418_v43, %v10626_v46  ;;  %v3009_v33 = vadd.f32 %v10540_v1, %v2859_v12  ;;  %v2729_v42 = vpop.f32.mrf.mxu1  ;;  %v12884_v12 = vld [vmem:[#allocation159_spill] sm:$0xff] }
 0x38b   : > { %5969 = vmatpush2.bf16.msra.mxu0 %v8787_v23  ;;  %v3988_v52 = vrot.slane %v3722_v58, 4  ;;  %v3989_v22 = vrot.slane %v3729_v35, 4  ;;  %v4966_v43 = vpack.c.bf16 %v4878_v62, %v4874_v13  ;;  %v2861_v23 = vadd.f32 %v11500_v6, %v12884_v12  ;;  %v12886_v13 = vld [vmem:[#allocation160_spill] sm:$0xff] }
 0x38c   : > { %v3136_v63 = vmax.f32 %v3008_v2, 0.0  ;;  %v3138_v7 = vmax.f32 %v3010_v11, 0.0  ;;  %5970 = vmatprep.subr.bf16.mxu0 %v8792_v17  ;;  %v4433_v8 = vcombine.low %v4425_v45, %v4432_v18  ;;  %v4434_v10 = vcombine.high %v4425_v45, %v4432_v18  ;;  %v8793_v17 = vld [vmem:[#allocation10 + $0x280] ss:$8 sps:$4 sm:$0xff]   ;;  %v12885_v18 = vld [vmem:[#allocation57_spill] sm:$0xff]  ;;  %v2731_v6 = vpop.f32.mrf.mxu1 }
 0x38d   : > { %v3137_v3 = vmax.f32 %v3009_v33, 0.0  ;;  %v11548_v0 = vmax.f32 %v3722_v58, %v3988_v52  ;;  %v11550_v54 = vmax.f32 %v3729_v35, %v3989_v22  ;;  %5222 = vmatprep.mubr.bf16.mxu0 %v4966_v43  ;;  %v4869_v2 = vrot.slane %v4776_v20, 1  ;;  %v12889_v52 = vld [vmem:[#allocation120_spill] sm:$0xff]  ;;  %v12890_v22 = vld [vmem:[#allocation51_spill] sm:$0xff] }
 0x38e   : > { %v3222_v57 = vmax.f32 %v3136_v63, %v3138_v7  ;;  %v4570_v32 = vrot.slane %v4433_v8, 7  ;;  %v4572_v48 = vrot.slane %v4434_v10, 7  ;;  %v4875_v11 = vrot.slane %v4778_v49, 1  ;;  %v12892_v8 = vld [vmem:[#allocation161_spill] sm:$0xff]  ;;  %v12893_v43 = vld [vmem:[#allocation59_spill] sm:$0xff] }
 0x38f   : > { %5971 = vmatpush2.bf16.msra.mxu0 %v8790_v34  ;;  %v4435_v45 = vcombine.low %v11548_v0, %v11550_v54  ;;  %v3011_v58 = vadd.f32 %v10542_v25, %v2861_v23  ;;  %v2862_v35 = vadd.f32 %v11505_v5, %v12885_v18  ;;  %v2864_v62 = vadd.f32 %v11513_v4, %v12886_v13  ;;  %v12895_v18 = vld [vmem:[#allocation60_spill] sm:$0xff] }
 0x390   : > { %5972 = vmatprep.subr.bf16.mxu0 %v8795_v21  ;;  %v11563_v33 = vsel %vm4543_vm6, %v11509_v16, %v4570_v32  ;;  %v11567_v20 = vsel %vm4543_vm6, %v11511_v51, %v4572_v48  ;;  %4668 = vst [vmem:[#allocation3 + $0xe0] sm:$0x1] %v4570_v32  ;;  %4669 = vst [vmem:[#allocation3 + $0xe8] sm:$0x1] %v4572_v48  ;;  %v12887_v49 = vrot.slane %v11338_v38, 1  ;;  %v2542_v32 = vpop.f32.mrf.mxu0  ;;  %v12891_v21 = vld [vmem:[#allocation58_spill] sm:$0xff] }
 0x391   : > { %v11577_v63 = vadd.f32 %v12890_v22, %v12889_v52  ;;  %4666 = vst [vmem:[#allocation3 + $0xd0] sm:$0xff] %v11563_v33  ;;  %4667 = vst [vmem:[#allocation3 + $0xd8] sm:$0xff] %v11567_v20  ;;  %v3139_v16 = vmax.f32 %v3011_v58, 0.0  ;;  %v3012_v48 = vadd.f32 %v10527_v39, %v2862_v35  ;;  %v3014_v7 = vadd.f32 %v10529_v61, %v2864_v62  ;;  %v2735_v35 = vpop.f32.mrf.mxu1 }
 0x392   : > { %v4871_v34 = vsel %vm4848_vm7, %v4869_v2, %v12887_v49  ;;  %v12888_v5 = vmov %v12887_v49  ;;  %v2863_v38 = vadd.f32 %v11528_v40, %v12891_v21  ;;  %v2865_v10 = vadd.f32 %v11536_v56, %v12892_v8 }
 0x393   : > { %v4876_v4 = vsel %vm4848_vm7, %v12888_v5, %v4875_v11  ;;  %v2866_v12 = vadd.f32 %v2536_v55, %v12893_v43  ;;  %5973 = vmatpush2.bf16.msra.mxu0 %v8793_v17  ;;  %v3223_v23 = vmax.f32 %v3137_v3, %v3139_v16  ;;  %v3140_v2 = vmax.f32 %v3012_v48, 0.0  ;;  %v12894_v11 = vld [vmem:[#allocation162_spill] sm:$0xff]  ;;  %v2544_v17 = vpop.f32.mrf.mxu0 }
 0x394   : > { %v4965_v51 = vpack.c.bf16 %v4876_v4, %v4871_v34  ;;  %v2868_v58 = vadd.f32 %v2729_v42, %v12894_v11  ;;  %v2867_v13 = vadd.f32 %v2538_v53, %v12895_v18  ;;  %v3142_v49 = vmax.f32 %v3014_v7, 0.0  ;;  %v2737_v7 = vpop.f32.mrf.mxu1 }
 0x395   : > { %v3013_v62 = vadd.f32 %v10540_v1, %v2863_v38  ;;  %v3015_v34 = vadd.f32 %v10542_v25, %v2865_v10  ;;  %v3016_v40 = vadd.f32 %v10527_v39, %v2866_v12  ;;  %v3350_v5 = vcombine.low %v3222_v57, %v3223_v23  ;;  %v12896_v38 = vld [vmem:[#allocation164_spill] sm:$0xff]  ;;  %v12897_v10 = vld [vmem:[#allocation62_spill] sm:$0xff] }
 0x396   : > { %5223 = vmatmul.mubr.bf16.gmra.mxu0 %v4965_v51  ;;  %v3351_v56 = vcombine.high %v3222_v57, %v3223_v23  ;;  %v3018_v55 = vadd.f32 %v10529_v61, %v2868_v58  ;;  %v3017_v3 = vadd.f32 %v10540_v1, %v2867_v13  ;;  %v3224_v4 = vmax.f32 %v3140_v2, %v3142_v49  ;;  %v2546_v58 = vpop.f32.mrf.mxu0 }
 0x397   : > { %v3141_v52 = vmax.f32 %v3013_v62, 0.0  ;;  %v3143_v42 = vmax.f32 %v3015_v34, 0.0  ;;  %v3144_v22 = vmax.f32 %v3016_v40, 0.0  ;;  %v3736_v53 = vrot.slane %v3350_v5, %v10592_v9 }
 0x398   : > { %v3743_v16 = vrot.slane %v3351_v56, %v10592_v9  ;;  %v3146_v51 = vmax.f32 %v3018_v55, 0.0  ;;  %v3145_v48 = vmax.f32 %v3017_v3, 0.0  ;;  %v2869_v8 = vadd.f32 %v2731_v6, %v12896_v38 }
 0x399   : > { %v3225_v21 = vmax.f32 %v3141_v52, %v3143_v42  ;;  %v2870_v57 = vadd.f32 %v2542_v32, %v10958_v59  ;;  %v2872_v43 = vadd.f32 %v2735_v35, %v12897_v10  ;;  %v3990_v12 = vrot.slane %v3736_v53, 4  ;;  %v4701_v32 = vld [vmem:[#allocation3 + $0x98] sm:$0xff]  ;;  %v2739_v35 = vpop.f32.mrf.mxu1  ;;  %v2548_v42 = vpop.f32.mrf.mxu0  ;;  %v4700_v10 = vld [vmem:[#allocation3 + $0x90] sm:$0xff] }
 0x39a   : > { %v3991_v23 = vrot.slane %v3743_v16, 4  ;;  %v3226_v2 = vmax.f32 %v3144_v22, %v3146_v51  ;;  %v2871_v11 = vadd.f32 %v2544_v17, %v10966_v36  ;;  %v3019_v49 = vadd.f32 %v10542_v25, %v2869_v8 }
 0x39b   : > { %v3352_v18 = vcombine.low %v3224_v4, %v3225_v21  ;;  %v3353_v13 = vcombine.high %v3224_v4, %v3225_v21  ;;  %v3020_v62 = vadd.f32 %v10527_v39, %v2870_v57  ;;  %v4118_v34 = vmax.f32 %v3736_v53, %v3990_v12 }
 0x39c   : > { %v4119_v40 = vmax.f32 %v3743_v16, %v3991_v23  ;;  %v3022_v6 = vadd.f32 %v10529_v61, %v2872_v43  ;;  %v3021_v59 = vadd.f32 %v10540_v1, %v2871_v11  ;;  %v3147_v36 = vmax.f32 %v3019_v49, 0.0  ;;  %v2741_v43 = vpop.f32.mrf.mxu1 }
 0x39d   : > { %v3750_v5 = vrot.slane %v3352_v18, %v10592_v9  ;;  %v3757_v56 = vrot.slane %v3353_v13, %v10592_v9  ;;  %v3148_v55 = vmax.f32 %v3020_v62, 0.0  ;;  %v4443_v3 = vrot.slane %v4435_v45, %v10626_v46  ;;  %v2552_v13 = vpop.f32.mrf.mxu0 }
 0x39e   : > { %v4436_v17 = vcombine.low %v4118_v34, %v4119_v40  ;;  %v3150_v4 = vmax.f32 %v3022_v6, 0.0  ;;  %v2873_v52 = vadd.f32 %v2737_v7, %v10970_v14  ;;  %v3227_v16 = vmax.f32 %v3145_v48, %v3147_v36  ;;  %v12898_v14 = vld [vmem:[#allocation121_spill] sm:$0xff]  ;;  %v12899_v7 = vld [vmem:[#allocation158_spill] sm:$0xff]  ;;  %v2745_v36 = vpop.f32.mrf.mxu1 }
 0x39f   : > { %v3992_v22 = vrot.slane %v3750_v5, 4  ;;  %v3993_v53 = vrot.slane %v3757_v56, 4  ;;  %v4727_v51 = vpack.c.bf16 %v11460_v19, %v4701_v32  ;;  %v3149_v8 = vmax.f32 %v3021_v59, 0.0  ;;  %v4781_v6 = vld [vmem:[#allocation3 + $0x98] sm:$0xfe] }
 0x3a0   : > { %v4450_v21 = vrot.slane %v4436_v17, %v10626_v46  ;;  %v3228_v38 = vmax.f32 %v3148_v55, %v3150_v4  ;;  %v3023_v57 = vadd.f32 %v10542_v25, %v2873_v52  ;;  %v3354_v45 = vcombine.low %v3226_v2, %v3227_v16 }
 0x3a1   : > { %v4120_v0 = vmax.f32 %v3750_v5, %v3992_v22  ;;  %v4121_v54 = vmax.f32 %v3757_v56, %v3993_v53  ;;  %v3355_v12 = vcombine.high %v3226_v2, %v3227_v16  ;;  %5505 = vmatprep.mubr.bf16.mxu1 %v4727_v51  ;;  %v11617_v23 = vadd.f32 %v12899_v7, %v12898_v14  ;;  %v4783_v56 = vld [vmem:[#allocation3 + $0xb8] sm:$0x1] }
 0x3a2   : > { %v4451_v48 = vcombine.low %v4443_v3, %v4450_v21  ;;  %v4452_v11 = vcombine.high %v4443_v3, %v4450_v21  ;;  %v3151_v18 = vmax.f32 %v3023_v57, 0.0  ;;  %v3764_v62 = vrot.slane %v3354_v45, %v10592_v9  ;;  %v2747_v45 = vpop.f32.mrf.mxu1 }
 0x3a3   : > { %v4453_v49 = vcombine.low %v4120_v0, %v4121_v54  ;;  %v3771_v34 = vrot.slane %v3355_v12, %v10592_v9  ;;  %v4726_v40 = vpack.c.bf16 %v11456_v60, %v4700_v10  ;;  %v4883_v5 = vrot.slane %v11460_v19, 1  ;;  %v2554_v19 = vpop.f32.mrf.mxu0 }
 0x3a4   : > { %v11622_v59 = vrot.slane %v4451_v48, 7  ;;  %v11624_v2 = vrot.slane %v4452_v11, 7  ;;  %v3229_v32 = vmax.f32 %v3149_v8, %v3151_v18  ;;  %v3994_v3 = vrot.slane %v3764_v62, 4 }
 0x3a5   : > { %v4461_v55 = vrot.slane %v4453_v49, %v10626_v46  ;;  %v3995_v17 = vrot.slane %v3771_v34, 4  ;;  %v4880_v4 = vrot.slane %v11456_v60, 1  ;;  %5506 = vmatmul.mubr.bf16.gmra.mxu1 %v4726_v40  ;;  %v2874_v53 = vadd.f32 %v2546_v58, %v10974_v27  ;;  %v2556_v18 = vpop.f32.mrf.mxu0 }
 0x3a6   : > { %4670 = vst [vmem:[#allocation3 + $0xf0] sm:$0xfe] %v11622_v59  ;;  %4671 = vst [vmem:[#allocation3 + $0xf8] sm:$0xfe] %v11624_v2  ;;  %v3356_v52 = vcombine.low %v3228_v38, %v3229_v32  ;;  %v3357_v22 = vcombine.high %v3228_v38, %v3229_v32  ;;  %v2876_v16 = vadd.f32 %v2739_v35, %v10978_v47  ;;  %v4882_v8 = vrot.slane %v4781_v6, 1  ;;  %v12900_v47 = vld [vmem:[#allocation165_spill] sm:$0xff] }
 0x3a7   : > { %v4122_v51 = vmax.f32 %v3764_v62, %v3994_v3  ;;  %v4123_v21 = vmax.f32 %v3771_v34, %v3995_v17  ;;  %v4887_v57 = vrot.slane %v4783_v56, 1  ;;  %v3024_v0 = vadd.f32 %v10527_v39, %v2874_v53  ;;  %v4780_v35 = vld [vmem:[#allocation3 + $0x90] sm:$0xfe]  ;;  %v4782_v6 = vld [vmem:[#allocation3 + $0xb0] sm:$0x1]  ;;  %v2749_v17 = vpop.f32.mrf.mxu1 }
 0x3a8   : > { %v3778_v10 = vrot.slane %v3356_v52, %v10592_v9  ;;  %v3785_v60 = vrot.slane %v3357_v22, %v10592_v9  ;;  %v3026_v54 = vadd.f32 %v10529_v61, %v2876_v16  ;;  %v4884_v38 = vsel %vm4848_vm7, %v4882_v8, %v4883_v5 }
 0x3a9   : > { %v4454_v12 = vcombine.low %v4122_v51, %v4123_v21  ;;  %v4888_v27 = vsel %vm4848_vm7, %v4883_v5, %v4887_v57  ;;  %v2875_v58 = vadd.f32 %v2548_v42, %v12900_v47  ;;  %v3152_v48 = vmax.f32 %v3024_v0, 0.0  ;;  %v2558_v57 = vpop.f32.mrf.mxu0 }
 0x3aa   : > { %v3996_v14 = vrot.slane %v3778_v10, 4  ;;  %v3997_v7 = vrot.slane %v3785_v60, 4  ;;  %v3154_v11 = vmax.f32 %v3026_v54, 0.0  ;;  %v4968_v62 = vpack.c.bf16 %v4888_v27, %v4884_v38  ;;  %v2751_v38 = vpop.f32.mrf.mxu1 }
 0x3ab   : > { %v4468_v49 = vrot.slane %v4454_v12, %v10626_v46  ;;  %v3025_v34 = vadd.f32 %v10540_v1, %v2875_v58  ;;  %v2877_v40 = vadd.f32 %v2741_v43, %v10986_v44  ;;  %v4879_v5 = vrot.slane %v4780_v35, 1 }
 0x3ac   : > { %v4124_v32 = vmax.f32 %v3778_v10, %v3996_v14  ;;  %v4125_v56 = vmax.f32 %v3785_v60, %v3997_v7  ;;  %v3230_v3 = vmax.f32 %v3152_v48, %v3154_v11  ;;  %5232 = vmatprep.mubr.bf16.mxu0 %v4968_v62  ;;  %v4885_v21 = vrot.slane %v4782_v6, 1  ;;  %v12901_v11 = vld [vmem:[#allocation63_spill] sm:$0xff]  ;;  %v2755_v62 = vpop.f32.mrf.mxu1 }
 0x3ad   : > { %v4469_v42 = vcombine.low %v4461_v55, %v4468_v49  ;;  %v4470_v52 = vcombine.high %v4461_v55, %v4468_v49  ;;  %v3153_v22 = vmax.f32 %v3025_v34, 0.0  ;;  %v3027_v53 = vadd.f32 %v10542_v25, %v2877_v40 }
 0x3ae   : > { %v4471_v16 = vcombine.low %v4124_v32, %v4125_v56  ;;  %v4881_v51 = vsel %vm4848_vm7, %v4879_v5, %v4880_v4  ;;  %v2878_v8 = vadd.f32 %v2552_v13, %v10990_v41  ;;  %v2880_v60 = vadd.f32 %v2745_v36, %v10996_v15 }
 0x3af   : > { %v4576_v44 = vrot.slane %v4469_v42, 7  ;;  %v4578_v43 = vrot.slane %v4470_v52, 7  ;;  %v3155_v10 = vmax.f32 %v3027_v53, 0.0  ;;  %v4886_v55 = vsel %vm4848_vm7, %v4880_v4, %v4885_v21  ;;  %v2757_v21 = vpop.f32.mrf.mxu1 }
 0x3b0   : > { %v11648_v0 = vrot.slane %v4471_v16, %v10626_v46  ;;  %v3028_v54 = vadd.f32 %v10527_v39, %v2878_v8  ;;  %v2879_v12 = vadd.f32 %v2554_v19, %v11000_v29  ;;  %v4967_v13 = vpack.c.bf16 %v4886_v55, %v4881_v51  ;;  %v2562_v19 = vpop.f32.mrf.mxu0  ;;  %v12903_v16 = vld [vmem:[#allocation64_spill] sm:$0xff] }
 0x3b1   : > { %v11655_v27 = vsel %vm4543_vm6, %v11622_v59, %v4576_v44  ;;  %v11659_v41 = vsel %vm4543_vm6, %v11624_v2, %v4578_v43  ;;  %4674 = vst [vmem:[#allocation3 + $0x110] sm:$0x1] %v4576_v44  ;;  %4675 = vst [vmem:[#allocation3 + $0x118] sm:$0x1] %v4578_v43  ;;  %v3231_v15 = vmax.f32 %v3153_v22, %v3155_v10 }
 0x3b2   : > { %v3156_v36 = vmax.f32 %v3028_v54, 0.0  ;;  %v3030_v4 = vadd.f32 %v10529_v61, %v2880_v60  ;;  %v3029_v47 = vadd.f32 %v10540_v1, %v2879_v12  ;;  %v2881_v29 = vadd.f32 %v2747_v45, %v11004_v31  ;;  %5233 = vmatmul.mubr.bf16.gmra.mxu0 %v4967_v13  ;;  %v2564_v56 = vpop.f32.mrf.mxu0 }
 0x3b3   : > { %v3358_v58 = vcombine.low %v3230_v3, %v3231_v15  ;;  %v3359_v35 = vcombine.high %v3230_v3, %v3231_v15  ;;  %v2882_v59 = vadd.f32 %v2556_v18, %v11008_v26  ;;  %v2884_v2 = vadd.f32 %v2749_v17, %v11016_v28  ;;  %v12902_v28 = vld [vmem:[#allocation166_spill] sm:$0xff] }
 0x3b4   : > { %v3158_v14 = vmax.f32 %v3030_v4, 0.0  ;;  %v3157_v7 = vmax.f32 %v3029_v47, 0.0  ;;  %v3031_v48 = vadd.f32 %v10542_v25, %v2881_v29  ;;  %v2883_v49 = vadd.f32 %v2558_v57, %v12901_v11  ;;  %v2566_v12 = vpop.f32.mrf.mxu0  ;;  %v2759_v11 = vpop.f32.mrf.mxu1 }
 0x3b5   : > { %v3792_v34 = vrot.slane %v3358_v58, %v10592_v9  ;;  %v3799_v40 = vrot.slane %v3359_v35, %v10592_v9  ;;  %v3032_v31 = vadd.f32 %v10527_v39, %v2882_v59  ;;  %v3034_v45 = vadd.f32 %v10529_v61, %v2884_v2 }
 0x3b6   : > { %v3232_v6 = vmax.f32 %v3156_v36, %v3158_v14  ;;  %v3159_v32 = vmax.f32 %v3031_v48, 0.0  ;;  %v3033_v26 = vadd.f32 %v10540_v1, %v2883_v49  ;;  %v2885_v18 = vadd.f32 %v2751_v38, %v12902_v28 }
 0x3b7   : > { %v3998_v3 = vrot.slane %v3792_v34, 4  ;;  %v3999_v5 = vrot.slane %v3799_v40, 4  ;;  %v3160_v17 = vmax.f32 %v3032_v31, 0.0  ;;  %v3162_v42 = vmax.f32 %v3034_v45, 0.0 }
 0x3b8   : > { %v3233_v52 = vmax.f32 %v3157_v7, %v3159_v32  ;;  %v3161_v22 = vmax.f32 %v3033_v26, 0.0  ;;  %v3035_v53 = vadd.f32 %v10542_v25, %v2885_v18  ;;  %v2886_v51 = vadd.f32 %v2562_v19, %v12903_v16  ;;  %v4704_v26 = vld [vmem:[#allocation3 + $0xc0] sm:$0xff] }
 0x3b9   : > { %v4126_v8 = vmax.f32 %v3792_v34, %v3998_v3  ;;  %v4127_v57 = vmax.f32 %v3799_v40, %v3999_v5  ;;  %v3234_v44 = vmax.f32 %v3160_v17, %v3162_v42  ;;  %v2888_v43 = vadd.f32 %v2755_v62, %v11034_v37  ;;  %v12904_v5 = vld [vmem:[#allocation122_spill] sm:$0xff]  ;;  %v12905_v17 = vld [vmem:[#allocation56_spill] sm:$0xff] }
 0x3ba   : > { %v3360_v10 = vcombine.low %v3232_v6, %v3233_v52  ;;  %v3361_v60 = vcombine.high %v3232_v6, %v3233_v52  ;;  %v3163_v55 = vmax.f32 %v3035_v53, 0.0  ;;  %v3036_v54 = vadd.f32 %v10527_v39, %v2886_v51  ;;  %v2761_v53 = vpop.f32.mrf.mxu1  ;;  %v12906_v51 = vld [vmem:[#allocation123_spill] sm:$0xff] }
 0x3bb   : > { %v4472_v38 = vcombine.low %v4126_v8, %v4127_v57  ;;  %v3038_v15 = vadd.f32 %v10529_v61, %v2888_v43  ;;  %v2887_v13 = vadd.f32 %v2564_v56, %v11038_v24  ;;  %v2889_v36 = vadd.f32 %v2757_v21, %v11045_v30  ;;  %v4705_v24 = vld [vmem:[#allocation3 + $0xc8] sm:$0xff]  ;;  %v2568_v30 = vpop.f32.mrf.mxu0 }
 0x3bc   : > { %v3806_v4 = vrot.slane %v3360_v10, %v10592_v9  ;;  %v3813_v47 = vrot.slane %v3361_v60, %v10592_v9  ;;  %v3235_v29 = vmax.f32 %v3161_v22, %v3163_v55  ;;  %v3164_v19 = vmax.f32 %v3036_v54, 0.0  ;;  %v12907_v21 = vld [vmem:[#allocation163_spill] sm:$0xff] }
 0x3bd   : > { %v4486_v37 = vrot.slane %v4472_v38, %v10626_v46  ;;  %v3166_v58 = vmax.f32 %v3038_v15, 0.0  ;;  %v3037_v35 = vadd.f32 %v10540_v1, %v2887_v13  ;;  %v3039_v59 = vadd.f32 %v10542_v25, %v2889_v36  ;;  %v2572_v16 = vpop.f32.mrf.mxu0  ;;  %v4785_v10 = vld [vmem:[#allocation3 + $0xc8] sm:$0xfe]  ;;  %v4787_v60 = vld [vmem:[#allocation3 + $0xe8] sm:$0x1] }
 0x3be   : > { %v4000_v2 = vrot.slane %v3806_v4, 4  ;;  %v4001_v14 = vrot.slane %v3813_v47, 4  ;;  %v3362_v7 = vcombine.low %v3234_v44, %v3235_v29  ;;  %v3363_v48 = vcombine.high %v3234_v44, %v3235_v29 }
 0x3bf   : > { %v4487_v49 = vcombine.low %v11648_v0, %v4486_v37  ;;  %v4488_v62 = vcombine.high %v11648_v0, %v4486_v37  ;;  %v3236_v34 = vmax.f32 %v3164_v19, %v3166_v58  ;;  %v3165_v40 = vmax.f32 %v3037_v35, 0.0  ;;  %v12909_v58 = vld [vmem:[#allocation65_spill] sm:$0xff] }
 0x3c0   : > { %v4128_v31 = vmax.f32 %v3806_v4, %v4000_v2  ;;  %v4129_v45 = vmax.f32 %v3813_v47, %v4001_v14  ;;  %v3820_v6 = vrot.slane %v3362_v7, %v10592_v9  ;;  %v3827_v32 = vrot.slane %v3363_v48, %v10592_v9  ;;  %v12908_v47 = vld [vmem:[#allocation167_spill] sm:$0xff]  ;;  %v2574_v2 = vpop.f32.mrf.mxu0 }
 0x3c1   : > { %v11690_v28 = vrot.slane %v4487_v49, 7  ;;  %v11692_v18 = vrot.slane %v4488_v62, 7  ;;  %v3167_v56 = vmax.f32 %v3039_v59, 0.0  ;;  %v4729_v3 = vpack.c.bf16 %v11567_v20, %v4705_v24  ;;  %v2765_v59 = vpop.f32.mrf.mxu1  ;;  %v4784_v49 = vld [vmem:[#allocation3 + $0xc0] sm:$0xfe] }
 0x3c2   : > { %v11697_v42 = vadd.f32 %v12905_v17, %v12904_v5  ;;  %v4489_v0 = vcombine.low %v4128_v31, %v4129_v45  ;;  %v4002_v52 = vrot.slane %v3820_v6, 4  ;;  %v4003_v22 = vrot.slane %v3827_v32, 4  ;;  %v4786_v31 = vld [vmem:[#allocation3 + $0xe0] sm:$0x1] }
 0x3c3   : > { %v11701_v8 = vadd.f32 %v12907_v21, %v12906_v51  ;;  %4676 = vst [vmem:[#allocation3 + $0x120] sm:$0xfe] %v11690_v28  ;;  %4677 = vst [vmem:[#allocation3 + $0x128] sm:$0xfe] %v11692_v18  ;;  %v3237_v57 = vmax.f32 %v3165_v40, %v3167_v56  ;;  %v4893_v44 = vrot.slane %v11567_v20, 1  ;;  %5515 = vmatprep.mubr.bf16.mxu1 %v4729_v3  ;;  %v4890_v15 = vrot.slane %v11563_v33, 1  ;;  %v2767_v56 = vpop.f32.mrf.mxu1  ;;  %v2576_v3 = vpop.f32.mrf.mxu0 }
 0x3c4   : > { %v4728_v43 = vpack.c.bf16 %v11563_v33, %v4704_v26  ;;  %v4497_v55 = vrot.slane %v4489_v0, %v10626_v46  ;;  %v4130_v54 = vmax.f32 %v3820_v6, %v4002_v52  ;;  %v4131_v38 = vmax.f32 %v3827_v32, %v4003_v22  ;;  %v12910_v52 = vld [vmem:[#allocation168_spill] sm:$0xff] }
 0x3c5   : > { %v3364_v13 = vcombine.low %v3236_v34, %v3237_v57  ;;  %v3365_v36 = vcombine.high %v3236_v34, %v3237_v57  ;;  %v2890_v4 = vadd.f32 %v2566_v12, %v11055_v50  ;;  %v2892_v29 = vadd.f32 %v2759_v11, %v12908_v47  ;;  %v2769_v47 = vpop.f32.mrf.mxu1 }
 0x3c6   : > { %5516 = vmatmul.mubr.bf16.gmra.mxu1 %v4728_v43  ;;  %v4490_v19 = vcombine.low %v4130_v54, %v4131_v38  ;;  %v4892_v20 = vrot.slane %v4785_v10, 1  ;;  %v4897_v37 = vrot.slane %v4787_v60, 1  ;;  %v2891_v35 = vadd.f32 %v2568_v30, %v12909_v58  ;;  %v12911_v60 = vld [vmem:[#allocation66_spill] sm:$0xff]  ;;  %v12912_v54 = vld [vmem:[#allocation169_spill] sm:$0xff] }
 0x3c7   : > { %v3834_v14 = vrot.slane %v3364_v13, %v10592_v9  ;;  %v3841_v7 = vrot.slane %v3365_v36, %v10592_v9  ;;  %v3040_v33 = vadd.f32 %v10527_v39, %v2890_v4  ;;  %v3042_v48 = vadd.f32 %v10529_v61, %v2892_v29  ;;  %v2578_v29 = vpop.f32.mrf.mxu0 }
 0x3c8   : > { %v4504_v24 = vrot.slane %v4490_v19, %v10626_v46  ;;  %v4894_v50 = vsel %vm4848_vm7, %v4892_v20, %v4893_v44  ;;  %v4898_v12 = vsel %vm4848_vm7, %v4893_v44, %v4897_v37  ;;  %v3041_v11 = vadd.f32 %v10540_v1, %v2891_v35  ;;  %v12913_v19 = vld [vmem:[#allocation124_spill] sm:$0xff] }
 0x3c9   : > { %v4004_v30 = vrot.slane %v3834_v14, 4  ;;  %v4005_v62 = vrot.slane %v3841_v7, 4  ;;  %v3168_v34 = vmax.f32 %v3040_v33, 0.0  ;;  %v3170_v40 = vmax.f32 %v3042_v48, 0.0 }
 0x3ca   : > { %v4505_v45 = vcombine.low %v4497_v55, %v4504_v24  ;;  %v4506_v6 = vcombine.high %v4497_v55, %v4504_v24  ;;  %v4970_v32 = vpack.c.bf16 %v4898_v12, %v4894_v50  ;;  %v3169_v26 = vmax.f32 %v3041_v11, 0.0 }
 0x3cb   : > { %v11720_v5 = vmax.f32 %v3834_v14, %v4004_v30  ;;  %v11722_v17 = vmax.f32 %v3841_v7, %v4005_v62  ;;  %v3238_v0 = vmax.f32 %v3168_v34, %v3170_v40  ;;  %v2893_v22 = vadd.f32 %v2761_v53, %v12910_v52  ;;  %v2771_v62 = vpop.f32.mrf.mxu1  ;;  %v4709_v34 = vld [vmem:[#allocation3 + $0xf8] sm:$0xff] }
 0x3cc   : > { %v4582_v51 = vrot.slane %v4505_v45, 7  ;;  %v4584_v21 = vrot.slane %v4506_v6, 7  ;;  %5242 = vmatprep.mubr.bf16.mxu0 %v4970_v32  ;;  %v4889_v57 = vrot.slane %v4784_v49, 1  ;;  %v4895_v44 = vrot.slane %v4786_v31, 1  ;;  %v4789_v52 = vld [vmem:[#allocation3 + $0xf8] sm:$0xfe] }
 0x3cd   : > { %v4507_v43 = vcombine.low %v11720_v5, %v11722_v17  ;;  %v3043_v10 = vadd.f32 %v10542_v25, %v2893_v22  ;;  %v2894_v55 = vadd.f32 %v2572_v16, %v12911_v60  ;;  %v2896_v38 = vadd.f32 %v2765_v59, %v12912_v54  ;;  %v12914_v16 = vld [vmem:[#allocation61_spill] sm:$0xff]  ;;  %v12915_v59 = vld [vmem:[#allocation67_spill] sm:$0xff]  ;;  %v4790_v60 = vld [vmem:[#allocation3 + $0x110] sm:$0x1] }
 0x3ce   : > { %v11732_v13 = vsel %vm4543_vm6, %v11690_v28, %v4582_v51  ;;  %v11736_v53 = vsel %vm4543_vm6, %v11692_v18, %v4584_v21  ;;  %4680 = vst [vmem:[#allocation3 + $0x140] sm:$0x1] %v4582_v51  ;;  %4681 = vst [vmem:[#allocation3 + $0x148] sm:$0x1] %v4584_v21  ;;  %v4891_v36 = vsel %vm4848_vm7, %v4889_v57, %v4890_v15 }
 0x3cf   : > { %v4896_v4 = vsel %vm4848_vm7, %v4890_v15, %v4895_v44  ;;  %v2145_v20 = vadd.f32 %v12914_v16, %v12913_v19  ;;  %v3171_v37 = vmax.f32 %v3043_v10, 0.0  ;;  %v3044_v28 = vadd.f32 %v10527_v39, %v2894_v55  ;;  %v4791_v44 = vld [vmem:[#allocation3 + $0x118] sm:$0x1]  ;;  %v4788_v10 = vld [vmem:[#allocation3 + $0xf0] sm:$0xfe] }
 0x3d0   : > { %v4969_v58 = vpack.c.bf16 %v4896_v4, %v4891_v36  ;;  %v3046_v35 = vadd.f32 %v10529_v61, %v2896_v38  ;;  %v2895_v18 = vadd.f32 %v2574_v2, %v12915_v59  ;;  %v2897_v14 = vadd.f32 %v2767_v56, %v11577_v63 }
 0x3d1   : > { %v2898_v7 = vadd.f32 %v2576_v3, %v11617_v23  ;;  %v3239_v33 = vmax.f32 %v3169_v26, %v3171_v37  ;;  %v3172_v15 = vmax.f32 %v3044_v28, 0.0  ;;  %v2900_v48 = vadd.f32 %v2769_v47, %v11697_v42  ;;  %v4708_v26 = vld [vmem:[#allocation3 + $0xf0] sm:$0xff] }
 0x3d2   : > { %5243 = vmatmul.mubr.bf16.gmra.mxu0 %v4969_v58  ;;  %v2899_v24 = vadd.f32 %v2578_v29, %v11701_v8  ;;  %v3174_v50 = vmax.f32 %v3046_v35, 0.0  ;;  %v3045_v12 = vadd.f32 %v10540_v1, %v2895_v18  ;;  %v3047_v11 = vadd.f32 %v10542_v25, %v2897_v14 }
 0x3d3   : > { %v3048_v49 = vadd.f32 %v10527_v39, %v2898_v7  ;;  %v3366_v30 = vcombine.low %v3238_v0, %v3239_v33  ;;  %v3367_v2 = vcombine.high %v3238_v0, %v3239_v33  ;;  %v3050_v63 = vadd.f32 %v10529_v61, %v2900_v48  ;;  %v4713_v33 = vld [vmem:[#allocation3 + $0x128] sm:$0xff] }
 0x3d4   : > { %v3049_v23 = vadd.f32 %v10540_v1, %v2899_v24  ;;  %v3240_v40 = vmax.f32 %v3172_v15, %v3174_v50  ;;  %v3173_v31 = vmax.f32 %v3045_v12, 0.0  ;;  %v3175_v42 = vmax.f32 %v3047_v11, 0.0 }
 0x3d5   : > { %v3176_v45 = vmax.f32 %v3048_v49, 0.0  ;;  %v3848_v8 = vrot.slane %v3366_v30, %v10592_v9  ;;  %v3855_v6 = vrot.slane %v3367_v2, %v10592_v9  ;;  %v3178_v32 = vmax.f32 %v3050_v63, 0.0  ;;  %v4712_v2 = vld [vmem:[#allocation3 + $0x120] sm:$0xff] }
 0x3d6   : > { %v3241_v56 = vmax.f32 %v3173_v31, %v3175_v42  ;;  %v3177_v39 = vmax.f32 %v3049_v23, 0.0  ;;  %v2901_v3 = vadd.f32 %v2771_v62, %v2145_v20  ;;  %v4731_v5 = vpack.c.bf16 %v11659_v41, %v4709_v34  ;;  %v4795_v31 = vld [vmem:[#allocation3 + $0x148] sm:$0x1]  ;;  %v4792_v42 = vld [vmem:[#allocation3 + $0x120] sm:$0xfe] }
 0x3d7   : > { %v4006_v61 = vrot.slane %v3848_v8, 4  ;;  %v4007_v17 = vrot.slane %v3855_v6, 4  ;;  %v3242_v1 = vmax.f32 %v3176_v45, %v3178_v32  ;;  %v4903_v0 = vrot.slane %v11659_v41, 1  ;;  %v4794_v32 = vld [vmem:[#allocation3 + $0x140] sm:$0x1] }
 0x3d8   : > { %v3368_v22 = vcombine.low %v3240_v40, %v3241_v56  ;;  %v3369_v51 = vcombine.high %v3240_v40, %v3241_v56  ;;  %v3051_v21 = vadd.f32 %v10542_v25, %v2901_v3  ;;  %5525 = vmatprep.mubr.bf16.mxu1 %v4731_v5  ;;  %v4730_v57 = vpack.c.bf16 %v11655_v27, %v4708_v26  ;;  %v4793_v40 = vld [vmem:[#allocation3 + $0x128] sm:$0xfe] }
 0x3d9   : > { %v4515_v55 = vrot.slane %v4507_v43, %v10626_v46  ;;  %v4134_v54 = vmax.f32 %v3848_v8, %v4006_v61  ;;  %v4135_v38 = vmax.f32 %v3855_v6, %v4007_v17  ;;  %v4900_v36 = vrot.slane %v11655_v27, 1 }
 0x3da   : > { %v3862_v4 = vrot.slane %v3368_v22, %v10592_v9  ;;  %v3869_v47 = vrot.slane %v3369_v51, %v10592_v9  ;;  %v3179_v29 = vmax.f32 %v3051_v21, 0.0  ;;  %5526 = vmatmul.mubr.bf16.gmra.mxu1 %v4730_v57  ;;  %v4902_v19 = vrot.slane %v4789_v52, 1 }
 0x3db   : > { %v4508_v25 = vcombine.low %v4134_v54, %v4135_v38  ;;  %v4907_v16 = vrot.slane %v4791_v44, 1  ;;  %v4899_v20 = vrot.slane %v4788_v10, 1  ;;  %v4905_v37 = vrot.slane %v4790_v60, 1 }
 0x3dc   : > { %v4008_v58 = vrot.slane %v3862_v4, 4  ;;  %v4009_v28 = vrot.slane %v3869_v47, 4  ;;  %v3243_v35 = vmax.f32 %v3177_v39, %v3179_v29  ;;  %v4904_v43 = vsel %vm4848_vm7, %v4902_v19, %v4903_v0 }
 0x3dd   : > { %v4522_v59 = vrot.slane %v4508_v25, %v10626_v46  ;;  %v4908_v18 = vsel %vm4848_vm7, %v4903_v0, %v4907_v16  ;;  %v4901_v14 = vsel %vm4848_vm7, %v4899_v20, %v4900_v36  ;;  %v4906_v7 = vsel %vm4848_vm7, %v4900_v36, %v4905_v37  ;;  %v5559_v37 = vld [vmem:[#allocation3 + $0x28] sm:$0x3] }
 0x3de   : > { %v4136_v15 = vmax.f32 %v3862_v4, %v4008_v58  ;;  %v4137_v48 = vmax.f32 %v3869_v47, %v4009_v28  ;;  %v3370_v24 = vcombine.low %v3242_v1, %v3243_v35  ;;  %v3371_v50 = vcombine.high %v3242_v1, %v3243_v35  ;;  %v5557_v35 = vld [vmem:[#allocation3 + $0x8] sm:$0xfc] }
 0x3df   : > { %v4523_v12 = vcombine.low %v4515_v55, %v4522_v59  ;;  %v4524_v11 = vcombine.high %v4515_v55, %v4522_v59  ;;  %v4972_v49 = vpack.c.bf16 %v4908_v18, %v4904_v43  ;;  %v4971_v30 = vpack.c.bf16 %v4906_v7, %v4901_v14 }
 0x3e0   : > { %v4525_v63 = vcombine.low %v4136_v15, %v4137_v48  ;;  %v3876_v23 = vrot.slane %v3370_v24, %v10592_v9  ;;  %v3883_v62 = vrot.slane %v3371_v50, %v10592_v9  ;;  %v4733_v34 = vpack.c.bf16 %v11736_v53, %v4713_v33  ;;  %v9004_v15 = vld [vmem:[#allocation3 + $0x18] sm:$0xff] }
 0x3e1   : > { %v4586_v45 = vrot.slane %v4523_v12, 7  ;;  %v4587_v8 = vrot.slane %v4524_v11, 7  ;;  %5252 = vmatprep.mubr.bf16.mxu0 %v4972_v49  ;;  %v4913_v6 = vrot.slane %v11736_v53, 1  ;;  %v4732_v39 = vpack.c.bf16 %v11732_v13, %v4712_v2 }
 0x3e2   : > { %v4010_v26 = vrot.slane %v3876_v23, 4  ;;  %v4011_v56 = vrot.slane %v3883_v62, 4  ;;  %5253 = vmatmul.mubr.bf16.gmra.mxu0 %v4971_v30  ;;  %5535 = vmatprep.mubr.bf16.mxu1 %v4733_v34  ;;  %v4910_v3 = vrot.slane %v11732_v13, 1  ;;  %v4912_v5 = vrot.slane %v4793_v40, 1  ;;  %v5558_v34 = vld [vmem:[#allocation3 + $0x20] sm:$0x3] }
 0x3e3   : > { %4682 = vst [vmem:[#allocation3 + $0x150] sm:$0xfe] %v4586_v45  ;;  %4683 = vst [vmem:[#allocation3 + $0x158] sm:$0xfe] %v4587_v8  ;;  %v4917_v61 = vrot.slane %v4795_v31, 1  ;;  %5536 = vmatmul.mubr.bf16.gmra.mxu1 %v4732_v39  ;;  %v4909_v0 = vrot.slane %v4792_v42, 1  ;;  %v4533_v55 = vrot.slane %v4525_v63, %v10626_v46 }
 0x3e4   : > { %v4138_v17 = vmax.f32 %v3876_v23, %v4010_v26  ;;  %v4139_v1 = vmax.f32 %v3883_v62, %v4011_v56  ;;  %v4915_v52 = vrot.slane %v4794_v32, 1  ;;  %v4914_v22 = vsel %vm4848_vm7, %v4912_v5, %v4913_v6  ;;  %v5563_v42 = vld [vmem:[#allocation3 + $0x58] sm:$0x3]  ;;  %v5561_v26 = vld [vmem:[#allocation3 + $0x38] sm:$0xfc]  ;;  %v9005_v39 = vld [vmem:[#allocation3 + $0x10] sm:$0xff] }
 0x3e5   : > { %v4918_v51 = vsel %vm4848_vm7, %v4913_v6, %v4917_v61  ;;  %v4911_v44 = vsel %vm4848_vm7, %v4909_v0, %v4910_v3  ;;  %v5629_v43 = vrot.slane %v5559_v37, 2  ;;  %v12916_v59 = vmov 0   ;;  %v9006_v61 = vld [vmem:[#allocation3 + $0x48] sm:$0xff] }
 0x3e6   : > { %v4526_v21 = vcombine.low %v4138_v17, %v4139_v1  ;;  %v4974_v57 = vpack.c.bf16 %v4918_v51, %v4914_v22  ;;  %v4916_v10 = vsel %vm4848_vm7, %v4910_v3, %v4915_v52  ;;  %v5625_v48 = vrot.slane %v9004_v15, 2  ;;  %v5562_v22 = vld [vmem:[#allocation3 + $0x50] sm:$0x3]  ;;  %v5569_v15 = vld [vmem:[#allocation3 + $0x98] sm:$0xfc] }
 0x3e7   : > { %v4973_v60 = vpack.c.bf16 %v4916_v10, %v4911_v44  ;;  %v5624_v49 = vrot.slane %v5557_v35, 2  ;;  %v5627_v32 = vrot.slane %v5558_v34, 2  ;;  %v5639_v56 = vrot.slane %v5563_v42, 2  ;;  %v5560_v10 = vld [vmem:[#allocation3 + $0x30] sm:$0xfc] }
 0x3e8   : > { %v4540_v54 = vrot.slane %v4526_v21, %v10626_v46  ;;  %5262 = vmatprep.mubr.bf16.mxu0 %v4974_v57  ;;  %v5630_v30 = vsel %vm5620_vm8, %v5625_v48, %v5629_v43  ;;  %v5622_v3 = vrot.slane %v9005_v39, 2  ;;  %v5635_v17 = vrot.slane %v9006_v61, 2  ;;  %v5567_v21 = vld [vmem:[#allocation3 + $0x88] sm:$0x3]  ;;  %v5571_v35 = vld [vmem:[#allocation3 + $0xb8] sm:$0x3] }
 0x3e9   : > { %v5634_v1 = vrot.slane %v5561_v26, 2  ;;  %v9011_v39 = vld [vmem:[#allocation3 + $0xa0] sm:$0xff]  ;;  %v9012_v61 = vld [vmem:[#allocation3 + $0xd8] sm:$0xff] }
 0x3ea   : > { %v4541_v38 = vcombine.low %v4533_v55, %v4540_v54  ;;  %v4542_v36 = vcombine.high %v4533_v55, %v4540_v54  ;;  %5263 = vmatmul.mubr.bf16.gmra.mxu0 %v4973_v60  ;;  %v4717_v29 = vld [vmem:[#allocation3 + $0x158] sm:$0xff]  ;;  %v4716_v19 = vld [vmem:[#allocation3 + $0x150] sm:$0xff]  ;;  %v5628_v0 = vsel %vm5620_vm8, %v5622_v3, %v5627_v32  ;;  %v5640_v52 = vsel %vm5620_vm8, %v5635_v17, %v5639_v56  ;;  %v5565_v54 = vld [vmem:[#allocation3 + $0x68] sm:$0xfc] }
 0x3eb   : > { %v4797_v58 = vld [vmem:[#allocation3 + $0x158] sm:$0xfe]  ;;  %v4796_v28 = vld [vmem:[#allocation3 + $0x150] sm:$0xfe]  ;;  %v5636_v44 = vsel %vm5620_vm8, %v5634_v1, %v5635_v17  ;;  %v5637_v55 = vrot.slane %v5562_v22, 2  ;;  %v5665_v17 = vrot.slane %v9012_v61, 2 }
 0x3ec   : > { %v4588_v4 = vrot.slane %v4541_v38, 7  ;;  %v4590_v47 = vrot.slane %v4542_v36, 7  ;;  %v4922_v7 = vrot.slane %v4797_v58, 1  ;;  %v4919_v33 = vrot.slane %v4796_v28, 1  ;;  %v9007_v36 = vld [vmem:[#allocation3 + $0x40] sm:$0xff] }
 0x3ed   : > { %v5736_v60 = vpack.c.bf16 %v5640_v52, %v5636_v44  ;;  %v5649_v38 = vrot.slane %v5567_v21, 2  ;;  %v5566_v58 = vld [vmem:[#allocation3 + $0x80] sm:$0x3]  ;;  %v5573_v32 = vld [vmem:[#allocation3 + $0xc8] sm:$0xfc] }
 0x3ee   : > { %v11782_v25 = vsel %vm4543_vm6, %v4586_v45, %v4588_v4  ;;  %v11785_v16 = vsel %vm4543_vm6, %v4587_v8, %v4590_v47  ;;  %4686 = vst [vmem:[#allocation3 + $0x170] sm:$0x1] %v4588_v4  ;;  %4687 = vst [vmem:[#allocation3 + $0x178] sm:$0x1] %v4590_v47  ;;  %v5626_v45 = vsel %vm5620_vm8, %v5624_v49, %v5625_v48  ;;  %v5556_v8 = vld [vmem:[#allocation3] sm:$0xfc] }
 0x3ef   : > { %v4735_v20 = vpack.c.bf16 %v11785_v16, %v4717_v29  ;;  %v4734_v46 = vpack.c.bf16 %v11782_v25, %v4716_v19  ;;  %v4923_v18 = vrot.slane %v11785_v16, 1  ;;  %v4920_v14 = vrot.slane %v11782_v25, 1  ;;  %v9008_v29 = vld [vmem:[#allocation3 + $0x78] sm:$0xff] }
 0x3f0   : > { %v5734_v6 = vpack.c.bf16 %v5630_v30, %v5626_v45  ;;  %v5621_v5 = vrot.slane %v5556_v8, 2  ;;  %v5632_v4 = vrot.slane %v9007_v36, 2  ;;  %v5631_v47 = vrot.slane %v5560_v10, 2  ;;  %v5568_v45 = vld [vmem:[#allocation3 + $0x90] sm:$0xfc] }
 0x3f1   : > { %5545 = vmatprep.mubr.bf16.mxu1 %v4735_v20  ;;  %v4924_v2 = vsel %vm4848_vm7, %v4922_v7, %v4923_v18  ;;  %v4921_v23 = vsel %vm4848_vm7, %v4919_v33, %v4920_v14  ;;  %v5645_v19 = vrot.slane %v9008_v29, 2  ;;  %v5644_v20 = vrot.slane %v5565_v54, 2  ;;  %v5579_v10 = vld [vmem:[#allocation3 + $0x118] sm:$0x3]  ;;  %v5572_v54 = vld [vmem:[#allocation3 + $0xc0] sm:$0xfc] }
 0x3f2   : > { %5546 = vmatmul.mubr.bf16.gmra.mxu1 %v4734_v46  ;;  %v5623_v51 = vsel %vm5620_vm8, %v5621_v5, %v5622_v3  ;;  %v5638_v46 = vsel %vm5620_vm8, %v5632_v4, %v5637_v55  ;;  %v5633_v28 = vsel %vm5620_vm8, %v5631_v47, %v5632_v4  ;;  %v5647_v33 = vrot.slane %v5566_v58, 2  ;;  %v5577_v47 = vld [vmem:[#allocation3 + $0xf8] sm:$0xfc] }
 0x3f3   : > { %6547 = vmatprep.mubr.bf16.mxu1 %v12916_v59  ;;  %v5733_v57 = vpack.c.bf16 %v5628_v0, %v5623_v51  ;;  %v5650_v37 = vsel %vm5620_vm8, %v5645_v19, %v5649_v38  ;;  %v5735_v43 = vpack.c.bf16 %v5638_v46, %v5633_v28  ;;  %v5659_v48 = vrot.slane %v5571_v35, 2  ;;  %v5574_v51 = vld [vmem:[#allocation3 + $0xe0] sm:$0x3] }
 0x3f4   : > { %v5654_v30 = vrot.slane %v5569_v15, 2  ;;  %v5652_v3 = vrot.slane %v9011_v39, 2  ;;  %v5651_v5 = vrot.slane %v5568_v45, 2  ;;  %v5664_v1 = vrot.slane %v5573_v32, 2 }
 0x3f5   : > { %v4799_v24 = vld [vmem:[#allocation3 + $0x178] sm:$0x1]  ;;  %v4798_v50 = vld [vmem:[#allocation3 + $0x170] sm:$0x1]  ;;  %v5667_v4 = vrot.slane %v5574_v51, 2  ;;  %v5661_v28 = vrot.slane %v5572_v54, 2 }
 0x3f6   : > { %v4927_v12 = vrot.slane %v4799_v24, 1  ;;  %v4925_v11 = vrot.slane %v4798_v50, 1  ;;  %v9009_v24 = vld [vmem:[#allocation3 + $0x70] sm:$0xff]  ;;  %v5653_v44 = vsel %vm5620_vm8, %v5651_v5, %v5652_v3  ;;  %v5666_v55 = vsel %vm5620_vm8, %v5664_v1, %v5665_v17 }
 0x3f7   : > { %v5642_v50 = vrot.slane %v9009_v24, 2 }
 0x3f8   : > { %v4928_v63 = vsel %vm4848_vm7, %v4923_v18, %v4927_v12  ;;  %v4926_v62 = vsel %vm4848_vm7, %v4920_v14, %v4925_v11  ;;  %v5646_v18 = vsel %vm5620_vm8, %v5644_v20, %v5645_v19  ;;  %v5564_v14 = vld [vmem:[#allocation3 + $0x60] sm:$0xfc]  ;;  %v9010_v11 = vld [vmem:[#allocation3 + $0xa8] sm:$0xff]  ;;  %v5679_v19 = vrot.slane %v5579_v10, 2 }
 0x3f9   : > { %v4976_v40 = vpack.c.bf16 %v4928_v63, %v4924_v2  ;;  %v4975_v31 = vpack.c.bf16 %v4926_v62, %v4921_v23  ;;  %v5738_v7 = vpack.c.bf16 %v5650_v37, %v5646_v18  ;;  %v5641_v12 = vrot.slane %v5564_v14, 2  ;;  %v5570_v23 = vld [vmem:[#allocation3 + $0xb0] sm:$0x3] }
 0x3fa   : > { %v5655_v49 = vrot.slane %v9010_v11, 2  ;;  %v5648_v2 = vsel %vm5620_vm8, %v5642_v50, %v5647_v33  ;;  %v9013_v37 = vld [vmem:[#allocation3 + $0xd0] sm:$0xff]  ;;  %v5674_v18 = vrot.slane %v5577_v47, 2 }
 0x3fb   : > { %5272 = vmatprep.mubr.bf16.mxu0 %v4976_v40  ;;  %v5643_v34 = vsel %vm5620_vm8, %v5641_v12, %v5642_v50  ;;  %v5575_v40 = vld [vmem:[#allocation3 + $0xe8] sm:$0x3]  ;;  %v5662_v58 = vrot.slane %v9013_v37, 2  ;;  %v5578_v33 = vld [vmem:[#allocation3 + $0x110] sm:$0x3] }
 0x3fc   : > { %5273 = vmatmul.mubr.bf16.gmra.mxu0 %v4975_v31  ;;  %v5660_v63 = vsel %vm5620_vm8, %v5655_v49, %v5659_v48  ;;  %v5737_v31 = vpack.c.bf16 %v5648_v2, %v5643_v34  ;;  %v5656_v42 = vsel %vm5620_vm8, %v5654_v30, %v5655_v49  ;;  %v5669_v26 = vrot.slane %v5575_v40, 2  ;;  %v5583_v48 = vld [vmem:[#allocation3 + $0x148] sm:$0x3]  ;;  %v5576_v12 = vld [vmem:[#allocation3 + $0xf0] sm:$0xfc] }
 0x3fd   : > { %5974 = vmatprep.mubr.bf16.mxu0 %v5734_v6  ;;  %v5740_v8 = vpack.c.bf16 %v5660_v63, %v5656_v42  ;;  %v5657_v6 = vrot.slane %v5570_v23, 2  ;;  %v5668_v14 = vsel %vm5620_vm8, %v5662_v58, %v5667_v4  ;;  %v5663_v15 = vsel %vm5620_vm8, %v5661_v28, %v5662_v58  ;;  %v5581_v30 = vld [vmem:[#allocation3 + $0x128] sm:$0xfc]  ;;  %v5582_v42 = vld [vmem:[#allocation3 + $0x140] sm:$0x3] }
 0x3fe   : > { %v5670_v22 = vsel %vm5620_vm8, %v5665_v17, %v5669_v26  ;;  %v5741_v24 = vpack.c.bf16 %v5668_v14, %v5663_v15  ;;  %v5677_v49 = vrot.slane %v5578_v33, 2  ;;  %v5689_v2 = vrot.slane %v5583_v48, 2  ;;  %v5580_v26 = vld [vmem:[#allocation3 + $0x120] sm:$0xfc] }
 0x3ff   : > { %v5658_v52 = vsel %vm5620_vm8, %v5652_v3, %v5657_v6  ;;  %v5742_v36 = vpack.c.bf16 %v5670_v22, %v5666_v55  ;;  %v5671_v63 = vrot.slane %v5576_v12, 2  ;;  %v5685_v23 = vrot.slane %v11736_v53, 2  ;;  %v5584_v55 = vld [vmem:[#allocation3 + $0x150] sm:$0xfc] }
 0x400   : > { %v5684_v34 = vrot.slane %v5581_v30, 2  ;;  %v5687_v3 = vrot.slane %v5582_v42, 2  ;;  %v5682_v53 = vrot.slane %v11732_v13, 2  ;;  %v5681_v61 = vrot.slane %v5580_v26, 2  ;;  %v8796_v12 = vld [vmem:[#allocation12 + $0xf0] ss:$8 sps:$4 sm:$0xff]  }
 0x401   : > { %v5695_v17 = vrot.slane %v11785_v16, 2  ;;  %v5691_v4 = vrot.slane %v5584_v55, 2  ;;  %v8801_v30 = vld [vmem:[#allocation12 + $0xe4] ss:$8 sps:$4 sm:$0xff]   ;;  %v8808_v42 = vld [vmem:[#allocation12 + $0xb0] ss:$8 sps:$4 sm:$0xff]  }
 0x402   : > { %v5686_v32 = vsel %vm5620_vm8, %v5684_v34, %v5685_v23  ;;  %v5688_v22 = vsel %vm5620_vm8, %v5682_v53, %v5687_v3  ;;  %v8816_v26 = vld [vmem:[#allocation12 + $0x164] ss:$8 sps:$4 sm:$0xff]   ;;  %v8828_v55 = vld [vmem:[#allocation12 + $0x94] ss:$8 sps:$4 sm:$0xff]  }
 0x404   : > { %5975 = vmatmul.mubr.bf16.vlgmr.msra.gmra.mxu0 %v5733_v57 }
 0x405   : > { %5984 = vmatprep.mubr.bf16.mxu0 %v5736_v60  ;;  %v5739_v60 = vpack.c.bf16 %v5658_v52, %v5653_v44  ;;  %v5683_v44 = vsel %vm5620_vm8, %v5681_v61, %v5682_v53 }
 0x406   : > { %v5745_v10 = vpack.c.bf16 %v5688_v22, %v5683_v44  ;;  %v8823_v44 = vld [vmem:[#allocation12 + $0x140] ss:$8 sps:$4 sm:$0xff]  }
 0x409   : > { %v11808_v62 = vpop.f32.mrf.mxu1 }
 0x40b   : > { %v11812_v56 = vpop.f32.mrf.mxu1 }
 0x40c   : > { %5985 = vmatmul.mubr.bf16.gmra.mxu0 %v5735_v43  ;;  %v5675_v43 = vrot.slane %v11659_v41, 2  ;;  %v5672_v41 = vrot.slane %v11655_v27, 2  ;;  %v5585_v27 = vld [vmem:[#allocation3 + $0x158] sm:$0xfc] }
 0x40d   : > { %5994 = vmatprep.mubr.bf16.mxu0 %v5738_v7  ;;  %v5481_v21 = vpop.f32.mrf.mxu1  ;;  %v5694_v1 = vrot.slane %v5585_v27, 2  ;;  %v8817_v27 = vld [vmem:[#allocation12 + $0xa0] ss:$8 sps:$4 sm:$0xff]  }
 0x40e   : > { %v5680_v7 = vsel %vm5620_vm8, %v5675_v43, %v5679_v19  ;;  %v5676_v50 = vsel %vm5620_vm8, %v5674_v18, %v5675_v43  ;;  %v5678_v40 = vsel %vm5620_vm8, %v5672_v41, %v5677_v49  ;;  %v5673_v45 = vsel %vm5620_vm8, %v5671_v63, %v5672_v41  ;;  %v8799_v49 = vld [vmem:[#allocation12 + $0xe0] ss:$8 sps:$4 sm:$0xff]   ;;  %v8804_v41 = vld [vmem:[#allocation12 + $0xd4] ss:$8 sps:$4 sm:$0xff]  }
 0x40f   : > { %v5483_v20 = vpop.f32.mrf.mxu1  ;;  %v5744_v11 = vpack.c.bf16 %v5680_v7, %v5676_v50  ;;  %v5743_v6 = vpack.c.bf16 %v5678_v40, %v5673_v45  ;;  %v8805_v63 = vld [vmem:[#allocation12 + $0xc0] ss:$8 sps:$4 sm:$0xff]   ;;  %v8810_v45 = vld [vmem:[#allocation12 + $0xb4] ss:$8 sps:$4 sm:$0xff]  }
 0x414   : > { %5995 = vmatmul.mubr.bf16.gmra.mxu0 %v5737_v31  ;;  %v11814_v0 = vpop.f32.mrf.mxu0  ;;  %v5690_v31 = vsel %vm5620_vm8, %v5685_v23, %v5689_v2  ;;  %v8802_v2 = vld [vmem:[#allocation12 + $0xd0] ss:$8 sps:$4 sm:$0xff]   ;;  %v8807_v23 = vld [vmem:[#allocation12 + $0xc4] ss:$8 sps:$4 sm:$0xff]  }
 0x415   : > { %6004 = vmatprep.mubr.bf16.mxu0 %v5740_v8  ;;  %v5587_v8 = vld [vmem:[#allocation3 + $0x178] sm:$0x3]  ;;  %v5746_v39 = vpack.c.bf16 %v5690_v31, %v5686_v32 }
 0x416   : > { %v11818_v57 = vpop.f32.mrf.mxu0  ;;  %v5699_v5 = vrot.slane %v5587_v8, 2  ;;  %v8811_v8 = vld [vmem:[#allocation12 + $0x170] ss:$8 sps:$4 sm:$0xff]   ;;  %v8813_v32 = vld [vmem:[#allocation12 + $0x174] ss:$8 sps:$4 sm:$0xff]  }
 0x417   : > { %6806 = vmatprep.subr.bf16.mxu0 %v8813_v32 }
 0x418   : > { %v5208_v38 = vpop.f32.mrf.mxu0  ;;  %v5700_v51 = vsel %vm5620_vm8, %v5695_v17, %v5699_v5  ;;  %6807 = vmatpush1.bf16.msra.mxu0 %v8811_v8  ;;  %v8819_v5 = vld [vmem:[#allocation12 + $0xa4] ss:$8 sps:$4 sm:$0xff]  }
 0x419   : > { %v11822_v29 = vadd.f32 %v5481_v21, %v5208_v38  ;;  %v5586_v21 = vld [vmem:[#allocation3 + $0x170] sm:$0x3]  ;;  %6808 = vmatprep.subr.bf16.mxu0 %v8816_v26 }
 0x41a   : > { %v5210_v46 = vpop.f32.mrf.mxu0  ;;  %v5697_v38 = vrot.slane %v5586_v21, 2 }
 0x41b   : > { %v11824_v35 = vadd.f32 %v5483_v20, %v5210_v46 }
 0x41c   : > { %6005 = vmatmul.mubr.bf16.gmra.mxu0 %v5739_v60  ;;  %v5696_v60 = vsel %vm5620_vm8, %v5694_v1, %v5695_v17  ;;  %v8822_v17 = vld [vmem:[#allocation12 + $0x154] ss:$8 sps:$4 sm:$0xff]   ;;  %v8820_v1 = vld [vmem:[#allocation12 + $0x150] ss:$8 sps:$4 sm:$0xff]  }
 0x41d   : > { %6014 = vmatprep.mubr.bf16.mxu0 %v5742_v36  ;;  %v5748_v13 = vpack.c.bf16 %v5700_v51, %v5696_v60  ;;  %v5692_v36 = vrot.slane %v11782_v25, 2  ;;  %v8826_v60 = vld [vmem:[#allocation12 + $0x90] ss:$8 sps:$4 sm:$0xff]  }
 0x41f   : > { %v5698_v20 = vsel %vm5620_vm8, %v5692_v36, %v5697_v38  ;;  %v5693_v37 = vsel %vm5620_vm8, %v5691_v4, %v5692_v36  ;;  %v8829_v36 = vld [vmem:[#allocation12 + $0x130] ss:$8 sps:$4 sm:$0xff]   ;;  %v8837_v4 = vld [vmem:[#allocation12 + $0x84] ss:$8 sps:$4 sm:$0xff]  }
 0x420   : > { %v5747_v28 = vpack.c.bf16 %v5698_v20, %v5693_v37  ;;  %v8834_v20 = vld [vmem:[#allocation12 + $0x124] ss:$8 sps:$4 sm:$0xff]   ;;  %v8846_v37 = vld [vmem:[#allocation12 + $0x74] ss:$8 sps:$4 sm:$0xff]  }
 0x424   : > { %6015 = vmatmul.mubr.bf16.gmra.mxu0 %v5741_v24 }
 0x425   : > { %6024 = vmatprep.mubr.bf16.mxu0 %v5744_v11  ;;  %v8798_v11 = vld [vmem:[#allocation12 + $0xf4] ss:$8 sps:$4 sm:$0xff]  }
 0x426   : > { %6515 = vmatprep.subr.bf16.mxu1 %v8798_v11 }
 0x427   : > { %6516 = vmatpush1.bf16.msra.mxu1 %v8796_v12 }
 0x428   : > { %v11839_v52 = vpop.f32.mrf.mxu1  ;;  %6517 = vmatprep.subr.bf16.mxu1 %v8801_v30  ;;  %v8843_v30 = vld [vmem:[#allocation12 + $0x104] ss:$8 sps:$4 sm:$0xff]  }
 0x42a   : > { %v11845_v54 = vpop.f32.mrf.mxu1 }
 0x42b   : > { %6518 = vmatpush1.bf16.msra.mxu1 %v8799_v49  ;;  %v8838_v49 = vld [vmem:[#allocation12 + $0x110] ss:$8 sps:$4 sm:$0xff]  }
 0x42c   : > { %6025 = vmatmul.mubr.bf16.gmra.mxu0 %v5743_v6  ;;  %v5491_v47 = vpop.f32.mrf.mxu1  ;;  %6519 = vmatprep.subr.bf16.mxu1 %v8804_v41 }
 0x42d   : > { %6034 = vmatprep.mubr.bf16.mxu0 %v5746_v39  ;;  %v8814_v39 = vld [vmem:[#allocation12 + $0x160] ss:$8 sps:$4 sm:$0xff]  }
 0x42e   : > { %v5493_v43 = vpop.f32.mrf.mxu1  ;;  %6809 = vmatpush1.bf16.msra.mxu0 %v8814_v39 }
 0x42f   : > { %6520 = vmatpush1.bf16.msra.mxu1 %v8802_v2  ;;  %6810 = vmatprep.subr.bf16.mxu0 %v8822_v17 }
 0x430   : > { %6521 = vmatprep.subr.bf16.mxu1 %v8807_v23  ;;  %v8849_v23 = vld [vmem:[#allocation12 + $0x274] ss:$8 sps:$4 sm:$0xff]  }
 0x432   : > { %6811 = vmatpush1.bf16.msra.mxu0 %v8820_v1 }
 0x433   : > { %v11847_v16 = vpop.f32.mrf.mxu0  ;;  %6522 = vmatpush1.bf16.msra.mxu1 %v8805_v63  ;;  %v8841_v63 = vld [vmem:[#allocation12 + $0x100] ss:$8 sps:$4 sm:$0xff]  }
 0x434   : > { %6035 = vmatmul.mubr.bf16.gmra.mxu0 %v5745_v10  ;;  %6523 = vmatprep.subr.bf16.mxu1 %v8810_v45  ;;  %v8825_v10 = vld [vmem:[#allocation12 + $0x144] ss:$8 sps:$4 sm:$0xff]  }
 0x435   : > { %6044 = vmatprep.mubr.bf16.mxu0 %v5748_v13  ;;  %v11850_v19 = vpop.f32.mrf.mxu0  ;;  %v8831_v13 = vld [vmem:[#allocation12 + $0x134] ss:$8 sps:$4 sm:$0xff]   ;;  %6812 = vmatprep.subr.bf16.mxu0 %v8825_v10 }
 0x436   : > { %6813 = vmatpush1.bf16.msra.mxu0 %v8823_v44 }
 0x437   : > { %v5218_v46 = vpop.f32.mrf.mxu0  ;;  %6524 = vmatpush1.bf16.msra.mxu1 %v8808_v42  ;;  %6814 = vmatprep.subr.bf16.mxu0 %v8831_v13 }
 0x438   : > { %v11854_v58 = vadd.f32 %v5491_v47, %v5218_v46  ;;  %6525 = vmatprep.subr.bf16.mxu1 %v8819_v5  ;;  %v8835_v46 = vld [vmem:[#allocation12 + $0x80] ss:$8 sps:$4 sm:$0xff]  }
 0x439   : > { %v5220_v18 = vpop.f32.mrf.mxu0 }
 0x43a   : > { %v11856_v14 = vadd.f32 %v5493_v43, %v5220_v18  ;;  %6815 = vmatpush1.bf16.msra.mxu0 %v8829_v36  ;;  %v8832_v43 = vld [vmem:[#allocation12 + $0x120] ss:$8 sps:$4 sm:$0xff]  }
 0x43b   : > { %6526 = vmatpush1.bf16.msra.mxu1 %v8817_v27  ;;  %6816 = vmatprep.subr.bf16.mxu0 %v8834_v20  ;;  %v12923_v20 = vld [vmem:[#allocation200_spill] sm:$0xff] }
 0x43c   : > { %6045 = vmatmul.mubr.bf16.gmra.mxu0 %v5747_v28  ;;  %6527 = vmatprep.subr.bf16.mxu1 %v8828_v55  ;;  %v6087_v55 = vld [vmem:[%s12315_s4] sm:$0x3] }
 0x43d   : > { %6838 = vmatprep.mubr.bf16.mxu0 %v12916_v59 }
 0x43e   : > { %6817 = vmatpush1.bf16.msra.mxu0 %v8832_v43 }
 0x43f   : > { %6528 = vmatpush1.bf16.msra.mxu1 %v8826_v60 }
 0x440   : > { %6529 = vmatprep.subr.bf16.mxu1 %v8837_v4 }
 0x443   : > { %6530 = vmatpush1.bf16.msra.mxu1 %v8835_v46  ;;  %v11941_v46 = vrot.slane %v6087_v55, %v12923_v20 }
 0x444   : > { %6652 = vmatprep.subr.bf16.mxu1 %v8846_v37  ;;  %v5478_v37 = vadd.f32 %v11808_v62, %v11814_v0  ;;  %v5488_v0 = vadd.f32 %v11839_v52, %v11847_v16 }
 0x447   : > { %v11859_v25 = vpop.f32.mrf.mxu1 }
 0x449   : > { %v11861_v7 = vpop.f32.mrf.mxu1 }
 0x44b   : > { %v5501_v48 = vpop.f32.mrf.mxu1 }
 0x44d   : > { %v11879_v53 = vpop.f32.mrf.mxu1 }
 0x456   : > { %v11863_v33 = vpop.f32.mrf.mxu0 }
 0x458   : > { %v11865_v15 = vpop.f32.mrf.mxu0 }
 0x459   : > { %v5500_v52 = vadd.f32 %v11861_v7, %v11865_v15 }
 0x45a   : > { %v5228_v24 = vpop.f32.mrf.mxu0 }
 0x45b   : > { %v11867_v50 = vadd.f32 %v5501_v48, %v5228_v24  ;;  %v8840_v24 = vld [vmem:[#allocation12 + $0x114] ss:$8 sps:$4 sm:$0xff]  }
 0x45c   : > { %v11869_v34 = vpop.f32.mrf.mxu0  ;;  %6818 = vmatprep.subr.bf16.mxu0 %v8840_v24 }
 0x45d   : > { %12917 = vst [vmem:[#allocation170_spill] sm:$0xff] %v11867_v50  ;;  %6819 = vmatpush1.bf16.msra.mxu0 %v8838_v49  ;;  %v12924_v49 = vld [vmem:[#allocation201_spill] sm:$0xff]  ;;  %v11968_v16 = vadd.f32 %v11879_v53, %v11869_v34 }
 0x45e   : > { %6820 = vmatprep.subr.bf16.mxu0 %v8843_v30  ;;  %v11948_v30 = vrot.slane %v6087_v55, %v12924_v49 }
 0x461   : > { %6821 = vmatpush1.bf16.msra.mxu0 %v8841_v63  ;;  %v5480_v63 = vadd.f32 %v11812_v56, %v11818_v57  ;;  %v5490_v57 = vadd.f32 %v11845_v54, %v11850_v19 }
 0x462   : > { %7142 = vmatprep.subr.bf16.mxu0 %v8849_v23 }
 0x465   : > { %v11883_v22 = vpop.f32.mrf.mxu1 }
 0x467   : > { %v11887_v21 = vpop.f32.mrf.mxu1 }
 0x469   : > { %v11891_v47 = vpop.f32.mrf.mxu1 }
 0x46b   : > { %v11895_v18 = vpop.f32.mrf.mxu1 }
 0x472   : > { %v11871_v40 = vpop.f32.mrf.mxu0 }
 0x474   : > { %v11873_v31 = vpop.f32.mrf.mxu0 }
 0x475   : > { %v11978_v7 = vadd.f32 %v11887_v21, %v11873_v31 }
 0x476   : > { %v11875_v6 = vpop.f32.mrf.mxu0 }
 0x477   : > { %v11982_v15 = vadd.f32 %v11891_v47, %v11875_v6 }
 0x478   : > { %v11877_v3 = vpop.f32.mrf.mxu0 }
 0x479   : > { %v11986_v34 = vadd.f32 %v11895_v18, %v11877_v3 }
 0x486   : > { %v11899_v12 = vpop.f32.mrf.mxu1 }
 0x488   : > { %v11903_v2 = vpop.f32.mrf.mxu1 }
 0x48a   : > { %v11907_v42 = vpop.f32.mrf.mxu1 }
 0x48c   : > { %v5523_v32 = vpop.f32.mrf.mxu1 }
 0x492   : > { %v11881_v61 = vpop.f32.mrf.mxu0 }
 0x494   : > { %v11885_v51 = vpop.f32.mrf.mxu0 }
 0x496   : > { %v11889_v38 = vpop.f32.mrf.mxu0 }
 0x497   : > { %v11999_v6 = vadd.f32 %v11907_v42, %v11889_v38 }
 0x498   : > { %v11893_v28 = vpop.f32.mrf.mxu0 }
 0x499   : > { %v12002_v3 = vadd.f32 %v5523_v32, %v11893_v28 }
 0x49a   : > { %v11913_v26 = vpop.f32.mrf.mxu1 }
 0x49c   : > { %v11917_v27 = vpop.f32.mrf.mxu1 }
 0x49e   : > { %v11921_v17 = vpop.f32.mrf.mxu1 }
 0x4a0   : > { %v11927_v10 = vpop.f32.mrf.mxu1 }
 0x4a2   : > { %v11897_v48 = vpop.f32.mrf.mxu0 }
 0x4a3   : > { %v11934_v13 = vpop.f32.mrf.mxu1 }
 0x4a4   : > { %v11901_v11 = vpop.f32.mrf.mxu0 }
 0x4a5   : > { %v11945_v43 = vpop.f32.mrf.mxu1  ;;  %v12013_v38 = vadd.f32 %v11917_v27, %v11901_v11 }
 0x4a6   : > { %v11905_v41 = vpop.f32.mrf.mxu0 }
 0x4a7   : > { %v12017_v28 = vadd.f32 %v11921_v17, %v11905_v41 }
 0x4a8   : > { %v11909_v45 = vpop.f32.mrf.mxu0 }
 0x4aa   : > { %v11911_v8 = vpop.f32.mrf.mxu0 }
 0x4ab   : > { %v12027_v11 = vadd.f32 %v11934_v13, %v11911_v8 }
 0x4ac   : > { %v11915_v39 = vpop.f32.mrf.mxu0 }
 0x4ad   : > { %v12031_v41 = vadd.f32 %v11945_v43, %v11915_v39 }
 0x4ae   : > { %v11919_v5 = vpop.f32.mrf.mxu0 }
 0x4b0   : > { %v11923_v1 = vpop.f32.mrf.mxu0 }
 0x4b1   : > { %12918 = vst [vmem:[#allocation68_spill] sm:$0xff] %v11923_v1 }
 0x4bc   : > { %v11925_v44 = vpop.f32.mrf.mxu0 }
 0x4bd   : > { %12919 = vst [vmem:[#allocation171_spill] sm:$0xff] %v11925_v44 }
 0x4be   : > { %v11929_v60 = vpop.f32.mrf.mxu0 }
 0x4bf   : > { %12920 = vst [vmem:[#allocation69_spill] sm:$0xff] %v11929_v60 }
 0x4c0   : > { %v11936_v36 = vpop.f32.mrf.mxu0 }
 0x4c1   : > { %12921 = vst [vmem:[#allocation172_spill] sm:$0xff] %v11936_v36  ;;  %v5541_v36 = vpop.f32.mrf.mxu1 }
 0x4c2   : > { %v11938_v4 = vpop.f32.mrf.mxu0 }
 0x4c3   : > { %12922 = vst [vmem:[#allocation70_spill] sm:$0xff] %v11938_v4 }
 0x4c4   : > { %v5976_v24 = vpop.f32.mrf.mxu0  ;;  %v12926_v43 = vld [vmem:[#allocation171_spill] sm:$0xff] }
 0x4c5   : > { %v6055_v23 = vadd.f32 %v5976_v24, %v5478_v37 }
 0x4c6   : > { %v5978_v59 = vpop.f32.mrf.mxu0 }
 0x4c7   : > { %v6099_v50 = vadd.f32 %v11941_v46, %v6055_v23  ;;  %v6056_v4 = vadd.f32 %v5978_v59, %v5480_v63  ;;  %v5543_v59 = vpop.f32.mrf.mxu1  ;;  %v12009_v23 = vadd.f32 %v11913_v26, %v11897_v48  ;;  %v12023_v48 = vadd.f32 %v11927_v10, %v11909_v45  ;;  %v12925_v10 = vld [vmem:[#allocation68_spill] sm:$0xff] }
 0x4c8   : > { %v5980_v20 = vpop.f32.mrf.mxu0 }
 0x4c9   : > { %v6100_v60 = vadd.f32 %v11948_v30, %v6056_v4  ;;  %v6057_v62 = vadd.f32 %v5980_v20, %v11822_v29  ;;  %v6131_v55 = vmax.f32 %v6099_v50, 0.0  ;;  %v5498_v4 = vadd.f32 %v11859_v25, %v11863_v33  ;;  %v5547_v54 = vpop.f32.mrf.mxu1 }
 0x4ca   : > { %v5982_v44 = vpop.f32.mrf.mxu0 }
 0x4cb   : > { %v6132_v49 = vmax.f32 %v6100_v60, 0.0  ;;  %v6101_v1 = vadd.f32 %v11941_v46, %v6057_v62  ;;  %v6058_v56 = vadd.f32 %v5982_v44, %v11824_v35  ;;  %v11972_v35 = vadd.f32 %v11883_v22, %v11871_v40  ;;  %v5549_v47 = vpop.f32.mrf.mxu1 }
 0x4cc   : > { %v5986_v37 = vpop.f32.mrf.mxu0  ;;  %v11990_v40 = vadd.f32 %v11899_v12, %v11881_v61  ;;  %v11994_v22 = vadd.f32 %v11903_v2, %v11885_v51 }
 0x4cd   : > { %v6163_v24 = vmax.f32 %v6131_v55, %v6132_v49  ;;  %v6102_v29 = vadd.f32 %v11948_v30, %v6058_v56  ;;  %v6059_v20 = vadd.f32 %v5986_v37, %v5488_v0  ;;  %v6133_v19 = vmax.f32 %v6101_v1, 0.0  ;;  %v5551_v26 = vpop.f32.mrf.mxu1 }
 0x4ce   : > { %v5988_v50 = vpop.f32.mrf.mxu0  ;;  %v12034_v55 = vadd.f32 %v5541_v36, %v11919_v5  ;;  %v12038_v37 = vadd.f32 %v5543_v59, %v12925_v10 }
 0x4cf   : > { %v6185_v25 = vrot.slane %v6163_v24, %v10592_v9  ;;  %v6134_v33 = vmax.f32 %v6102_v29, 0.0  ;;  %v6103_v44 = vadd.f32 %v11941_v46, %v6059_v20  ;;  %v6060_v60 = vadd.f32 %v5988_v50, %v5490_v57  ;;  %v12928_v50 = vld [vmem:[#allocation172_spill] sm:$0xff] }
 0x4d0   : > { %v5990_v53 = vpop.f32.mrf.mxu0  ;;  %v12042_v29 = vadd.f32 %v5547_v54, %v12926_v43  ;;  %v12930_v54 = vld [vmem:[#allocation170_spill] sm:$0xff] }
 0x4d1   : > { %v6307_v1 = vrot.slane %v6185_v25, 4  ;;  %v6164_v31 = vmax.f32 %v6133_v19, %v6134_v33  ;;  %v6104_v21 = vadd.f32 %v11948_v30, %v6060_v60  ;;  %v6135_v18 = vmax.f32 %v6103_v44, 0.0  ;;  %v5553_v19 = vpop.f32.mrf.mxu1 }
 0x4d2   : > { %v6061_v61 = vadd.f32 %v5990_v53, %v11854_v58  ;;  %v5992_v12 = vpop.f32.mrf.mxu0  ;;  %v12929_v53 = vld [vmem:[#allocation70_spill] sm:$0xff] }
 0x4d3   : > { %v6339_v49 = vmax.f32 %v6185_v25, %v6307_v1  ;;  %v6192_v51 = vrot.slane %v6164_v31, %v10592_v9  ;;  %v6136_v2 = vmax.f32 %v6104_v21, 0.0  ;;  %v6062_v63 = vadd.f32 %v5992_v12, %v11856_v14 }
 0x4d4   : > { %v6105_v58 = vadd.f32 %v11941_v46, %v6061_v61  ;;  %v5996_v42 = vpop.f32.mrf.mxu0  ;;  %v12048_v25 = vadd.f32 %v5551_v26, %v12928_v50 }
 0x4d5   : > { %v6355_v32 = vpack.c.bf16 %v6339_v49, %v6339_v49  ;;  %v6308_v62 = vrot.slane %v6192_v51, 4  ;;  %v6165_v0 = vmax.f32 %v6135_v18, %v6136_v2  ;;  %v6106_v14 = vadd.f32 %v11948_v30, %v6062_v63 }
 0x4d6   : > { %v6063_v27 = vadd.f32 %v5996_v42, %v5498_v4  ;;  %v5998_v17 = vpop.f32.mrf.mxu0  ;;  %v6137_v8 = vmax.f32 %v6105_v58, 0.0  ;;  %v12927_v4 = vld [vmem:[#allocation69_spill] sm:$0xff] }
 0x4d7   : > { %v6340_v56 = vmax.f32 %v6192_v51, %v6308_v62  ;;  %v6199_v57 = vrot.slane %v6165_v0, %v10592_v9  ;;  %v6138_v45 = vmax.f32 %v6106_v14, 0.0  ;;  %v6064_v24 = vadd.f32 %v5998_v17, %v5500_v52 }
 0x4d8   : > { %v6107_v13 = vadd.f32 %v11941_v46, %v6063_v27  ;;  %v6000_v39 = vpop.f32.mrf.mxu0  ;;  %v12045_v20 = vadd.f32 %v5549_v47, %v12927_v4  ;;  %v6404_v5 = vunpack.c.l.b16 %v6355_v32  ;;  %v12052_v52 = vadd.f32 %v5553_v19, %v12929_v53 }
 0x4d9   : > { %v7005_v36 = vpack.c.bf16 %v6340_v56, %v6340_v56  ;;  %v6309_v33 = vrot.slane %v6199_v57, 4  ;;  %v6166_v59 = vmax.f32 %v6137_v8, %v6138_v45  ;;  %v6108_v44 = vadd.f32 %v11948_v30, %v6064_v24 }
 0x4da   : > { %v6002_v60 = vpop.f32.mrf.mxu0  ;;  %v6065_v31 = vadd.f32 %v6000_v39, %v12930_v54  ;;  %v6139_v61 = vmax.f32 %v6107_v13, 0.0  ;;  %v6412_v51 = vrot.slane %v6404_v5, 1  ;;  %v6710_v2 = vrot.slane %v6404_v5, 2 }
 0x4db   : > { %v12054_v1 = vunpack.c.l.b16 %v7005_v36  ;;  %v6066_v21 = vadd.f32 %v6002_v60, %v11968_v16  ;;  %v6341_v47 = vmax.f32 %v6199_v57, %v6309_v33  ;;  %v6206_v18 = vrot.slane %v6166_v59, %v10592_v9 }
 0x4dc   : > { %v6140_v12 = vmax.f32 %v6108_v44, 0.0  ;;  %v6006_v49 = vpop.f32.mrf.mxu0  ;;  %v6866_v63 = vrot.slane %v6404_v5, 3  ;;  %v6109_v58 = vadd.f32 %v11941_v46, %v6065_v31 }
 0x4dd   : > { %v6356_v42 = vpack.c.bf16 %v6341_v47, %v6341_v47  ;;  %v6310_v32 = vrot.slane %v6206_v18, 4  ;;  %v6110_v0 = vadd.f32 %v11948_v30, %v6066_v21  ;;  %v7202_v26 = vrot.slane %v12054_v1, 1 }
 0x4de   : > { %v6167_v62 = vmax.f32 %v6139_v61, %v6140_v12  ;;  %v6008_v14 = vpop.f32.mrf.mxu0  ;;  %v7358_v16 = vrot.slane %v12054_v1, 2  ;;  %v6067_v27 = vadd.f32 %v6006_v49, %v11972_v35  ;;  %v6141_v13 = vmax.f32 %v6109_v58, 0.0 }
 0x4df   : > { %v6068_v17 = vadd.f32 %v6008_v14, %v11978_v7  ;;  %v6405_v56 = vunpack.c.l.b16 %v6356_v42  ;;  %v6342_v57 = vmax.f32 %v6206_v18, %v6310_v32  ;;  %v6142_v10 = vmax.f32 %v6110_v0, 0.0 }
 0x4e0   : > { %v6213_v45 = vrot.slane %v6167_v62, %v10592_v9  ;;  %v6010_v8 = vpop.f32.mrf.mxu0  ;;  %v6111_v24 = vadd.f32 %v11941_v46, %v6067_v27  ;;  %v7514_v12 = vrot.slane %v12054_v1, 3 }
 0x4e1   : > { %v6112_v39 = vadd.f32 %v11948_v30, %v6068_v17  ;;  %v6069_v43 = vadd.f32 %v6010_v8, %v11982_v15  ;;  %v6414_v4 = vsel %vm6413_vm9, %v6405_v56, %v6412_v51  ;;  %v6556_v36 = vrot.slane %v6405_v56, 7 }
 0x4e2   : > { %v6711_v35 = vrot.slane %v6405_v56, 1  ;;  %v6867_v19 = vrot.slane %v6405_v56, 2  ;;  %v6012_v7 = vpop.f32.mrf.mxu0  ;;  %v7006_v50 = vpack.c.bf16 %v6342_v57, %v6342_v57  ;;  %v6311_v33 = vrot.slane %v6213_v45, 4 }
 0x4e3   : > { %v6168_v59 = vmax.f32 %v6141_v13, %v6142_v10  ;;  %v6143_v44 = vmax.f32 %v6111_v24, 0.0  ;;  %v6557_v60 = vsel %vm6413_vm9, %v6556_v36, %v6404_v5  ;;  %v6144_v54 = vmax.f32 %v6112_v39, 0.0 }
 0x4e4   : > { %v6712_v53 = vsel %vm6413_vm9, %v6711_v35, %v6710_v2  ;;  %v6868_v31 = vsel %vm6413_vm9, %v6867_v19, %v6866_v63  ;;  %v6016_v21 = vpop.f32.mrf.mxu0  ;;  %v7039_v47 = vunpack.c.l.b16 %v7006_v50  ;;  %v6343_v15 = vmax.f32 %v6213_v45, %v6311_v33 }
 0x4e5   : > { %v6220_v18 = vrot.slane %v6168_v59, %v10592_v9  ;;  %v6113_v61 = vadd.f32 %v11941_v46, %v6069_v43  ;;  %v6169_v49 = vmax.f32 %v6143_v44, %v6144_v54  ;;  %v6070_v51 = vadd.f32 %v6012_v7, %v11986_v34 }
 0x4e6   : > { %v6071_v58 = vadd.f32 %v6016_v21, %v11990_v40  ;;  %v6018_v5 = vpop.f32.mrf.mxu0  ;;  %v7046_v42 = vrot.slane %v7039_v47, 7  ;;  %v7203_v2 = vsel %vm6413_vm9, %v7039_v47, %v7202_v26  ;;  %v7359_v32 = vrot.slane %v7039_v47, 1 }
 0x4e7   : > { %v7515_v63 = vrot.slane %v7039_v47, 2  ;;  %v6357_v62 = vpack.c.bf16 %v6343_v15, %v6343_v15  ;;  %v6312_v0 = vrot.slane %v6220_v18, 4  ;;  %v6227_v14 = vrot.slane %v6169_v49, %v10592_v9 }
 0x4e8   : > { %v6145_v27 = vmax.f32 %v6113_v61, 0.0  ;;  %v6020_v17 = vpop.f32.mrf.mxu0  ;;  %v7047_v56 = vsel %vm6413_vm9, %v7046_v42, %v12054_v1  ;;  %v7360_v57 = vsel %vm6413_vm9, %v7359_v32, %v7358_v16  ;;  %v6114_v34 = vadd.f32 %v11948_v30, %v6070_v51 }
 0x4e9   : > { %v7516_v40 = vsel %vm6413_vm9, %v7515_v63, %v7514_v12  ;;  %v6406_v45 = vunpack.c.l.b16 %v6357_v62  ;;  %v6344_v26 = vmax.f32 %v6220_v18, %v6312_v0  ;;  %v6313_v10 = vrot.slane %v6227_v14, 4 }
 0x4ea   : > { %v6115_v8 = vadd.f32 %v11941_v46, %v6071_v58  ;;  %v6022_v13 = vpop.f32.mrf.mxu0  ;;  %v6146_v24 = vmax.f32 %v6114_v34, 0.0  ;;  %v6072_v39 = vadd.f32 %v6018_v5, %v11994_v22  ;;  %v6073_v43 = vadd.f32 %v6020_v17, %v11999_v6 }
 0x4eb   : > { %v6074_v1 = vadd.f32 %v6022_v13, %v12002_v3  ;;  %v6415_v36 = vrot.slane %v6406_v45, 7  ;;  %v6558_v16 = vrot.slane %v6406_v45, 6  ;;  %v6713_v35 = vsel %vm6416_vm10, %v6406_v45, %v6712_v53 }
 0x4ec   : > { %v6869_v19 = vrot.slane %v6406_v45, 1  ;;  %v6026_v7 = vpop.f32.mrf.mxu0  ;;  %v7007_v50 = vpack.c.bf16 %v6344_v26, %v6344_v26  ;;  %v6345_v33 = vmax.f32 %v6227_v14, %v6313_v10  ;;  %v6170_v59 = vmax.f32 %v6145_v27, %v6146_v24 }
 0x4ed   : > { %v6147_v44 = vmax.f32 %v6115_v8, 0.0  ;;  %v6417_v54 = vsel %vm6416_vm10, %v6415_v36, %v6414_v4  ;;  %v12092_v21 = vsel %vm6416_vm10, %v6558_v16, %v6557_v60  ;;  %v6116_v6 = vadd.f32 %v11948_v30, %v6072_v39 }
 0x4ee   : > { %v6870_v22 = vsel %vm6416_vm10, %v6869_v19, %v6868_v31  ;;  %v6028_v3 = vpop.f32.mrf.mxu0  ;;  %v7040_v47 = vunpack.c.l.b16 %v7007_v50  ;;  %v6358_v15 = vpack.c.bf16 %v6345_v33, %v6345_v33  ;;  %v6234_v53 = vrot.slane %v6170_v59, %v10592_v9 }
 0x4ef   : > { %v6117_v18 = vadd.f32 %v11941_v46, %v6073_v43  ;;  %v6148_v61 = vmax.f32 %v6116_v6, 0.0  ;;  %v6118_v12 = vadd.f32 %v11948_v30, %v6074_v1  ;;  %v6075_v49 = vadd.f32 %v6026_v7, %v12009_v23 }
 0x4f0   : > { %v6076_v4 = vadd.f32 %v6028_v3, %v12013_v38  ;;  %v6030_v60 = vpop.f32.mrf.mxu0  ;;  %v7048_v51 = vrot.slane %v7040_v47, 6  ;;  %v7204_v58 = vrot.slane %v7040_v47, 7  ;;  %v12102_v31 = vsel %vm6416_vm10, %v7040_v47, %v7360_v57 }
 0x4f1   : > { %v7517_v5 = vrot.slane %v7040_v47, 1  ;;  %v12104_v42 = vunpack.c.l.b16 %v6358_v15  ;;  %v6314_v32 = vrot.slane %v6234_v53, 4  ;;  %v6171_v63 = vmax.f32 %v6147_v44, %v6148_v61 }
 0x4f2   : > { %v6149_v62 = vmax.f32 %v6117_v18, 0.0  ;;  %v6032_v0 = vpop.f32.mrf.mxu0  ;;  %v12107_v14 = vsel %vm6416_vm10, %v7048_v51, %v7047_v56  ;;  %v12110_v23 = vsel %vm6416_vm10, %v7204_v58, %v7203_v2  ;;  %v6150_v27 = vmax.f32 %v6118_v12, 0.0 }
 0x4f3   : > { %v7518_v38 = vsel %vm6416_vm10, %v7517_v5, %v7516_v40  ;;  %v6418_v17 = vrot.slane %v12104_v42, 6  ;;  %v6560_v57 = vrot.slane %v12104_v42, 5  ;;  %v6714_v34 = vrot.slane %v12104_v42, 7 }
 0x4f4   : > { %v12118_v45 = vsel %vm6419_vm11, %v12104_v42, %v6870_v22  ;;  %v6036_v26 = vpop.f32.mrf.mxu0  ;;  %v6346_v10 = vmax.f32 %v6234_v53, %v6314_v32  ;;  %v6241_v56 = vrot.slane %v6171_v63, %v10592_v9  ;;  %v6172_v8 = vmax.f32 %v6149_v62, %v6150_v27 }
 0x4f5   : > { %v6119_v2 = vadd.f32 %v11941_v46, %v6075_v49  ;;  %v6420_v40 = vsel %vm6419_vm11, %v6418_v17, %v6417_v54  ;;  %v6715_v13 = vsel %vm6419_vm11, %v6714_v34, %v6713_v35  ;;  %v6120_v24 = vadd.f32 %v11948_v30, %v6076_v4 }
 0x4f6   : > { %v6077_v39 = vadd.f32 %v6030_v60, %v12017_v28  ;;  %v6038_v43 = vpop.f32.mrf.mxu0  ;;  %v7008_v1 = vpack.c.bf16 %v6346_v10, %v6346_v10  ;;  %v6315_v36 = vrot.slane %v6241_v56, 4  ;;  %v6248_v16 = vrot.slane %v6172_v8, %v10592_v9 }
 0x4f7   : > { %v6151_v19 = vmax.f32 %v6119_v2, 0.0  ;;  %v6152_v7 = vmax.f32 %v6120_v24, 0.0  ;;  %v6078_v33 = vadd.f32 %v6032_v0, %v12023_v48  ;;  %v6079_v59 = vadd.f32 %v6036_v26, %v12027_v11 }
 0x4f8   : > { %v6121_v50 = vadd.f32 %v11941_v46, %v6077_v39  ;;  %v6040_v44 = vpop.f32.mrf.mxu0  ;;  %v12130_v35 = vunpack.c.l.b16 %v7008_v1  ;;  %v6347_v54 = vmax.f32 %v6241_v56, %v6315_v36  ;;  %v6316_v22 = vrot.slane %v6248_v16, 4 }
 0x4f9   : > { %v6080_v28 = vadd.f32 %v6038_v43, %v12031_v41  ;;  %v6173_v6 = vmax.f32 %v6151_v19, %v6152_v7  ;;  %v6122_v47 = vadd.f32 %v11948_v30, %v6078_v33  ;;  %v6123_v15 = vadd.f32 %v11941_v46, %v6079_v59 }
 0x4fa   : > { %v6153_v3 = vmax.f32 %v6121_v50, 0.0  ;;  %v6042_v53 = vpop.f32.mrf.mxu0  ;;  %v7050_v18 = vrot.slane %v12130_v35, 5  ;;  %v7206_v48 = vrot.slane %v12130_v35, 6  ;;  %v7362_v11 = vrot.slane %v12130_v35, 7 }
 0x4fb   : > { %v12140_v61 = vsel %vm6419_vm11, %v12130_v35, %v7518_v38  ;;  %v6359_v12 = vpack.c.bf16 %v6347_v54, %v6347_v54  ;;  %v6348_v49 = vmax.f32 %v6248_v16, %v6316_v22  ;;  %v6255_v41 = vrot.slane %v6173_v6, %v10592_v9 }
 0x4fc   : > { %v6154_v4 = vmax.f32 %v6122_v47, 0.0  ;;  %v6046_v60 = vpop.f32.mrf.mxu0  ;;  %v6155_v51 = vmax.f32 %v6123_v15, 0.0  ;;  %v6124_v58 = vadd.f32 %v11948_v30, %v6080_v28  ;;  %v6081_v5 = vadd.f32 %v6040_v44, %v12034_v55 }
 0x4fd   : > { %v6082_v32 = vadd.f32 %v6042_v53, %v12038_v37  ;;  %v12146_v63 = vunpack.c.l.b16 %v6359_v12  ;;  %v7009_v62 = vpack.c.bf16 %v6348_v49, %v6348_v49  ;;  %v6317_v0 = vrot.slane %v6255_v41, 4 }
 0x4fe   : > { %v6174_v27 = vmax.f32 %v6153_v3, %v6154_v4  ;;  %v6048_v38 = vpop.f32.mrf.mxu0  ;;  %v6156_v17 = vmax.f32 %v6124_v58, 0.0  ;;  %v6125_v34 = vadd.f32 %v11941_v46, %v6081_v5  ;;  %v6083_v10 = vadd.f32 %v6046_v60, %v12042_v29 }
 0x4ff   : > { %v6126_v26 = vadd.f32 %v11948_v30, %v6082_v32  ;;  %v6421_v56 = vrot.slane %v12146_v63, 5  ;;  %v6562_v55 = vrot.slane %v12146_v63, 4  ;;  %v6716_v37 = vrot.slane %v12146_v63, 6 }
 0x500   : > { %v6872_v8 = vrot.slane %v12146_v63, 7  ;;  %v6050_v2 = vpop.f32.mrf.mxu0  ;;  %v12155_v24 = vunpack.c.l.b16 %v7009_v62  ;;  %v6349_v39 = vmax.f32 %v6255_v41, %v6317_v0  ;;  %v6262_v43 = vrot.slane %v6174_v27, %v10592_v9 }
 0x501   : > { %v6175_v1 = vmax.f32 %v6155_v51, %v6156_v17  ;;  %v6423_v36 = vsel %vm6422_vm12, %v6421_v56, %v6420_v40  ;;  %v6717_v29 = vsel %vm6422_vm12, %v6716_v37, %v6715_v13  ;;  %v6157_v16 = vmax.f32 %v6125_v34, 0.0 }
 0x502   : > { %v6158_v19 = vmax.f32 %v6126_v26, 0.0  ;;  %v6052_v7 = vpop.f32.mrf.mxu0  ;;  %v7052_v50 = vrot.slane %v12155_v24, 4  ;;  %v7208_v33 = vrot.slane %v12155_v24, 5  ;;  %v7364_v59 = vrot.slane %v12155_v24, 6 }
 0x503   : > { %v7520_v44 = vrot.slane %v12155_v24, 7  ;;  %v6360_v54 = vpack.c.bf16 %v6349_v39, %v6349_v39  ;;  %v6318_v22 = vrot.slane %v6262_v43, 4  ;;  %v6269_v28 = vrot.slane %v6175_v1, %v10592_v9 }
 0x504   : > { %v6176_v6 = vmax.f32 %v6157_v16, %v6158_v19  ;;  %v6127_v40 = vadd.f32 %v11941_v46, %v6083_v10  ;;  %v6084_v13 = vadd.f32 %v6048_v38, %v12045_v20  ;;  %v6085_v3 = vadd.f32 %v6050_v2, %v12048_v25 }
 0x505   : > { %v6086_v47 = vadd.f32 %v6052_v7, %v12052_v52  ;;  %v6409_v15 = vunpack.c.l.b16 %v6360_v54  ;;  %v6350_v53 = vmax.f32 %v6262_v43, %v6318_v22  ;;  %v6319_v12 = vrot.slane %v6269_v28, 4 }
 0x506   : > { %v6276_v49 = vrot.slane %v6176_v6, %v10592_v9  ;;  %v6159_v41 = vmax.f32 %v6127_v40, 0.0  ;;  %v6128_v4 = vadd.f32 %v11948_v30, %v6084_v13  ;;  %v6129_v60 = vadd.f32 %v11941_v46, %v6085_v3 }
 0x507   : > { %v6130_v51 = vadd.f32 %v11948_v30, %v6086_v47  ;;  %v6424_v58 = vrot.slane %v6409_v15, 4  ;;  %v6564_v5 = vrot.slane %v6409_v15, 3  ;;  %v6718_v20 = vrot.slane %v6409_v15, 5 }
 0x508   : > { %v6874_v32 = vrot.slane %v6409_v15, 6  ;;  %v7010_v25 = vpack.c.bf16 %v6350_v53, %v6350_v53  ;;  %v6351_v62 = vmax.f32 %v6269_v28, %v6319_v12  ;;  %v6320_v52 = vrot.slane %v6276_v49, 4 }
 0x509   : > { %v6160_v0 = vmax.f32 %v6128_v4, 0.0  ;;  %v6161_v27 = vmax.f32 %v6129_v60, 0.0  ;;  %v6162_v38 = vmax.f32 %v6130_v51, 0.0  ;;  %v6426_v17 = vsel %vm6425_vm13, %v6424_v58, %v6423_v36 }
 0x50a   : > { %v6719_v34 = vsel %vm6425_vm13, %v6718_v20, %v6717_v29  ;;  %v7043_v26 = vunpack.c.l.b16 %v7010_v25  ;;  %v6361_v10 = vpack.c.bf16 %v6351_v62, %v6351_v62  ;;  %v6352_v46 = vmax.f32 %v6276_v49, %v6320_v52 }
 0x50b   : > { %v6177_v56 = vmax.f32 %v6159_v41, %v6160_v0  ;;  %v6178_v30 = vmax.f32 %v6161_v27, %v6162_v38  ;;  %v6561_v37 = vsel %vm6419_vm11, %v6560_v57, %v12092_v21  ;;  %v7051_v2 = vsel %vm6419_vm11, %v7050_v18, %v12107_v14 }
 0x50c   : > { %v6873_v39 = vsel %vm6422_vm12, %v6872_v8, %v12118_v45  ;;  %v7054_v43 = vrot.slane %v7043_v26, 3  ;;  %v7210_v1 = vrot.slane %v7043_v26, 4  ;;  %v7366_v36 = vrot.slane %v7043_v26, 5 }
 0x50d   : > { %v7522_v29 = vrot.slane %v7043_v26, 6  ;;  %v6410_v16 = vunpack.c.l.b16 %v6361_v10  ;;  %v7011_v19 = vpack.c.bf16 %v6352_v46, %v6352_v46  ;;  %v6283_v7 = vrot.slane %v6177_v56, %v10592_v9 }
 0x50e   : > { %v6290_v42 = vrot.slane %v6178_v30, %v10592_v9  ;;  %v6563_v21 = vsel %vm6422_vm12, %v6562_v55, %v6561_v37  ;;  %v7053_v57 = vsel %vm6422_vm12, %v7052_v50, %v7051_v2  ;;  %v6875_v14 = vsel %vm6425_vm13, %v6874_v32, %v6873_v39  ;;  %v8852_v2 = vld [vmem:[#allocation12 + $0x64] ss:$8 sps:$4 sm:$0xff]  }
 0x50f   : > { %v7363_v45 = vsel %vm6419_vm11, %v7362_v11, %v12102_v31  ;;  %v6427_v18 = vrot.slane %v6410_v16, 3  ;;  %v6566_v8 = vrot.slane %v6410_v16, 2  ;;  %v6720_v54 = vrot.slane %v6410_v16, 4  ;;  %v8855_v39 = vld [vmem:[#allocation12 + $0x264] ss:$8 sps:$4 sm:$0xff]  }
 0x510   : > { %v6876_v22 = vrot.slane %v6410_v16, 5  ;;  %v7044_v28 = vunpack.c.l.b16 %v7011_v19  ;;  %v6321_v6 = vrot.slane %v6283_v7, 4  ;;  %v6322_v9 = vrot.slane %v6290_v42, 4  ;;  %v8850_v16 = vld [vmem:[#allocation12 + $0x60] ss:$8 sps:$4 sm:$0xff]  }
 0x511   : > { %v6565_v63 = vsel %vm6425_vm13, %v6564_v5, %v6563_v21  ;;  %v6429_v55 = vsel %vm6428_vm14, %v6427_v18, %v6426_v17  ;;  %v6721_v50 = vsel %vm6428_vm14, %v6720_v54, %v6719_v34  ;;  %v7055_v13 = vsel %vm6425_vm13, %v7054_v43, %v7053_v57  ;;  %v8847_v34 = vld [vmem:[#allocation12 + $0x270] ss:$8 sps:$4 sm:$0xff]   ;;  %v8853_v19 = vld [vmem:[#allocation12 + $0x260] ss:$8 sps:$4 sm:$0xff]   ;;  %v8867_v18 = vld [vmem:[#allocation12 + $0x244] ss:$8 sps:$4 sm:$0xff]  }
 0x512   : > { %v6567_v40 = vsel %vm6428_vm14, %v6566_v8, %v6565_v63  ;;  %v7056_v3 = vrot.slane %v7044_v28, 2  ;;  %v7212_v47 = vrot.slane %v7044_v28, 3  ;;  %v7368_v31 = vrot.slane %v7044_v28, 4  ;;  %v8856_v57 = vld [vmem:[#allocation12 + $0x50] ss:$8 sps:$4 sm:$0xff]  }
 0x513   : > { %v7524_v11 = vrot.slane %v7044_v28, 5  ;;  %v6353_v15 = vmax.f32 %v6283_v7, %v6321_v6  ;;  %v6354_v53 = vmax.f32 %v6290_v42, %v6322_v9  ;;  %v6877_v12 = vsel %vm6428_vm14, %v6876_v22, %v6875_v14  ;;  %v8858_v7 = vld [vmem:[#allocation12 + $0x54] ss:$8 sps:$4 sm:$0xff]   ;;  %v8859_v14 = vld [vmem:[#allocation12 + $0x250] ss:$8 sps:$4 sm:$0xff]  }
 0x514   : > { %v7365_v49 = vsel %vm6422_vm12, %v7364_v59, %v7363_v45  ;;  %v7057_v41 = vsel %vm6428_vm14, %v7056_v3, %v7055_v13  ;;  %v7207_v60 = vsel %vm6419_vm11, %v7206_v48, %v12110_v23  ;;  %v7521_v51 = vsel %vm6422_vm12, %v7520_v44, %v12140_v61  ;;  %v8861_v42 = vld [vmem:[#allocation12 + $0x254] ss:$8 sps:$4 sm:$0xff]   ;;  %v8864_v45 = vld [vmem:[#allocation12 + $0x44] ss:$8 sps:$4 sm:$0xff]   ;;  %v8862_v8 = vld [vmem:[#allocation12 + $0x40] ss:$8 sps:$4 sm:$0xff]  }
 0x515   : > { %v7367_v4 = vsel %vm6425_vm13, %v7366_v36, %v7365_v49  ;;  %v6362_v58 = vpack.c.bf16 %v6353_v15, %v6353_v15  ;;  %v7012_v5 = vpack.c.bf16 %v6354_v53, %v6354_v53  ;;  %v7209_v59 = vsel %vm6422_vm12, %v7208_v33, %v7207_v60  ;;  %v8844_v33 = vld [vmem:[#allocation12 + $0x70] ss:$8 sps:$4 sm:$0xff]   ;;  %v8865_v54 = vld [vmem:[#allocation12 + $0x240] ss:$8 sps:$4 sm:$0xff]   ;;  %v8870_v22 = vld [vmem:[#allocation12 + $0x34] ss:$8 sps:$4 sm:$0xff]  }
 0x516   : > { %v7369_v20 = vsel %vm6428_vm14, %v7368_v31, %v7367_v4  ;;  %v7211_v32 = vsel %vm6425_vm13, %v7210_v1, %v7209_v59  ;;  %v7523_v25 = vsel %vm6425_vm13, %v7522_v29, %v7521_v51  ;;  %v12931_v21 = vmov 0   ;;  %v8873_v28 = vld [vmem:[#allocation12 + $0x234] ss:$8 sps:$4 sm:$0xff]   ;;  %v8868_v6 = vld [vmem:[#allocation12 + $0x30] ss:$8 sps:$4 sm:$0xff]  }
 0x517   : > { %v6411_v35 = vunpack.c.l.b16 %v6362_v58  ;;  %v7045_v62 = vunpack.c.l.b16 %v7012_v5  ;;  %v7213_v23 = vsel %vm6428_vm14, %v7212_v47, %v7211_v32  ;;  %v7525_v48 = vsel %vm6428_vm14, %v7524_v11, %v7523_v25  ;;  %v8871_v9 = vld [vmem:[#allocation12 + $0x230] ss:$8 sps:$4 sm:$0xff]   ;;  %v8876_v63 = vld [vmem:[#allocation12 + $0x24] ss:$8 sps:$4 sm:$0xff]   ;;  %v8882_v13 = vld [vmem:[#allocation12 + $0x14] ss:$8 sps:$4 sm:$0xff]  }
 0x518   : > { %v8885_v3 = vld [vmem:[#allocation12 + $0x214] ss:$8 sps:$4 sm:$0xff]   ;;  %v8880_v47 = vld [vmem:[#allocation12 + $0x10] ss:$8 sps:$4 sm:$0xff]   ;;  %v8888_v11 = vld [vmem:[#allocation12 + $0x4] ss:$8 sps:$4 sm:$0xff]  }
 0x519   : > { %v6430_v61 = vrot.slane %v6411_v35, 2  ;;  %v6722_v44 = vrot.slane %v6411_v35, 3  ;;  %v6568_v52 = vrot.slane %v6411_v35, 1  ;;  %v7058_v0 = vrot.slane %v7045_v62, 1  ;;  %v8883_v31 = vld [vmem:[#allocation12 + $0x210] ss:$8 sps:$4 sm:$0xff]  }
 0x51a   : > { %v6878_v27 = vrot.slane %v6411_v35, 4  ;;  %v7370_v38 = vrot.slane %v7045_v62, 3  ;;  %v7214_v24 = vrot.slane %v7045_v62, 2  ;;  %v7526_v17 = vrot.slane %v7045_v62, 4  ;;  %v8891_v15 = vld [vmem:[#allocation12 + $0x204] ss:$8 sps:$4 sm:$0xff]  }
 0x51b   : > { %v6432_v26 = vsel %vm6431_vm15, %v6430_v61, %v6429_v55  ;;  %v6723_v10 = vsel %vm6431_vm15, %v6722_v44, %v6721_v50  ;;  %v12226_v46 = vsel %vm6431_vm15, %v6568_v52, %v6567_v40  ;;  %v12229_v56 = vsel %vm6431_vm15, %v7058_v0, %v7057_v41  ;;  %v8879_v55 = vld [vmem:[#allocation12 + $0x224] ss:$8 sps:$4 sm:$0xff]   ;;  %v8874_v50 = vld [vmem:[#allocation12 + $0x20] ss:$8 sps:$4 sm:$0xff]   ;;  %v8894_v49 = vld [vmem:[#allocation12 + $0x1f4] ss:$8 sps:$4 sm:$0xff]  }
 0x51c   : > { %v6433_v30 = vpack.c.b16 %v6432_v26, %v6432_v26  ;;  %v6724_v37 = vpack.c.b16 %v6723_v10, %v6723_v10  ;;  %v12232_v43 = vsel %vm6431_vm15, %v6878_v27, %v6877_v12  ;;  %v12235_v1 = vsel %vm6431_vm15, %v7370_v38, %v7369_v20  ;;  %v8877_v40 = vld [vmem:[#allocation12 + $0x220] ss:$8 sps:$4 sm:$0xff]   ;;  %v8897_v41 = vld [vmem:[#allocation12 + $0x374] ss:$8 sps:$4 sm:$0xff]   ;;  %v8892_v4 = vld [vmem:[#allocation12 + $0x1f0] ss:$8 sps:$4 sm:$0xff]  }
 0x51d   : > { %v12238_v36 = vsel %vm6431_vm15, %v7214_v24, %v7213_v23  ;;  %v12241_v29 = vsel %vm6431_vm15, %v7526_v17, %v7525_v48  ;;  %v8886_v53 = vld [vmem:[#allocation12] ss:$8 sps:$4 sm:$0xff]   ;;  %v8895_v60 = vld [vmem:[#allocation12 + $0x370] ss:$8 sps:$4 sm:$0xff]   ;;  %v6570_v51 = vpack.c.b16 %v12226_v46, %v12226_v46  ;;  %v7060_v58 = vpack.c.b16 %v12229_v56, %v12229_v56  ;;  %v8900_v5 = vld [vmem:[#allocation12 + $0x1e4] ss:$8 sps:$4 sm:$0xff]  }
 0x51e   : > { %6548 = vmatmul.mubr.bf16.vlgmr.msra.gmra.mxu1 %v6433_v30  ;;  %6839 = vmatmul.mubr.bf16.vlgmr.msra.gmra.mxu0 %v6724_v37  ;;  %v8889_v12 = vld [vmem:[#allocation12 + $0x200] ss:$8 sps:$4 sm:$0xff]   ;;  %v8903_v20 = vld [vmem:[#allocation12 + $0x364] ss:$8 sps:$4 sm:$0xff]   ;;  %v8906_v25 = vld [vmem:[#allocation12 + $0x1d4] ss:$8 sps:$4 sm:$0xff]  }
 0x51f   : > { %6653 = vmatpush1.bf16.msra.mxu1 %v8844_v33  ;;  %7143 = vmatpush1.bf16.msra.mxu0 %v8847_v34  ;;  %v8898_v59 = vld [vmem:[#allocation12 + $0x1e0] ss:$8 sps:$4 sm:$0xff]   ;;  %v8909_v35 = vld [vmem:[#allocation12 + $0x354] ss:$8 sps:$4 sm:$0xff]   ;;  %v8904_v62 = vld [vmem:[#allocation12 + $0x1d0] ss:$8 sps:$4 sm:$0xff]  }
 0x520   : > { %6654 = vmatprep.subr.bf16.mxu1 %v8852_v2  ;;  %7144 = vmatprep.subr.bf16.mxu0 %v8855_v39  ;;  %v8901_v32 = vld [vmem:[#allocation12 + $0x360] ss:$8 sps:$4 sm:$0xff]   ;;  %v8907_v23 = vld [vmem:[#allocation12 + $0x350] ss:$8 sps:$4 sm:$0xff]   ;;  %v8912_v48 = vld [vmem:[#allocation12 + $0x1c4] ss:$8 sps:$4 sm:$0xff]  }
 0x521   : > { %6684 = vmatprep.mubr.bf16.mxu1 %v12931_v21  ;;  %7174 = vmatprep.mubr.bf16.mxu0 %v12931_v21  ;;  %v8915_v61 = vld [vmem:[#allocation12 + $0x344] ss:$8 sps:$4 sm:$0xff]   ;;  %v8910_v44 = vld [vmem:[#allocation12 + $0x1c0] ss:$8 sps:$4 sm:$0xff]   ;;  %v8918_v0 = vld [vmem:[#allocation12 + $0x1b4] ss:$8 sps:$4 sm:$0xff]  }
 0x522   : > { %v8913_v52 = vld [vmem:[#allocation12 + $0x340] ss:$8 sps:$4 sm:$0xff]   ;;  %v8921_v27 = vld [vmem:[#allocation12 + $0x334] ss:$8 sps:$4 sm:$0xff]   ;;  %v8916_v38 = vld [vmem:[#allocation12 + $0x1b0] ss:$8 sps:$4 sm:$0xff]  }
 0x523   : > { %6655 = vmatpush1.bf16.msra.mxu1 %v8850_v16  ;;  %7145 = vmatpush1.bf16.msra.mxu0 %v8853_v19  ;;  %v8919_v24 = vld [vmem:[#allocation12 + $0x330] ss:$8 sps:$4 sm:$0xff]   ;;  %v8924_v17 = vld [vmem:[#allocation12 + $0x1a4] ss:$8 sps:$4 sm:$0xff]   ;;  %v8922_v34 = vld [vmem:[#allocation12 + $0x1a0] ss:$8 sps:$4 sm:$0xff]  }
 0x524   : > { %6656 = vmatprep.subr.bf16.mxu1 %v8858_v7  ;;  %7146 = vmatprep.subr.bf16.mxu0 %v8861_v42  ;;  %v8927_v33 = vld [vmem:[#allocation12 + $0x324] ss:$8 sps:$4 sm:$0xff]   ;;  %v8925_v26 = vld [vmem:[#allocation12 + $0x320] ss:$8 sps:$4 sm:$0xff]   ;;  %v8930_v10 = vld [vmem:[#allocation12 + $0x194] ss:$8 sps:$4 sm:$0xff]   ;;  %v6880_v42 = vpack.c.b16 %v12232_v43, %v12232_v43 }
 0x525   : > { %v8933_v46 = vld [vmem:[#allocation12 + $0x314] ss:$8 sps:$4 sm:$0xff]   ;;  %v8928_v56 = vld [vmem:[#allocation12 + $0x190] ss:$8 sps:$4 sm:$0xff]   ;;  %v8936_v37 = vld [vmem:[#allocation12 + $0x184] ss:$8 sps:$4 sm:$0xff]  }
 0x526   : > { %v8931_v30 = vld [vmem:[#allocation12 + $0x310] ss:$8 sps:$4 sm:$0xff]   ;;  %v8939_v2 = vld [vmem:[#allocation12 + $0x304] ss:$8 sps:$4 sm:$0xff]   ;;  %v8934_v39 = vld [vmem:[#allocation12 + $0x180] ss:$8 sps:$4 sm:$0xff]  }
 0x527   : > { %6657 = vmatpush1.bf16.msra.mxu1 %v8856_v57  ;;  %7147 = vmatpush1.bf16.msra.mxu0 %v8859_v14  ;;  %v8937_v16 = vld [vmem:[#allocation12 + $0x300] ss:$8 sps:$4 sm:$0xff]   ;;  %v8942_v19 = vld [vmem:[#allocation12 + $0x2f4] ss:$8 sps:$4 sm:$0xff]   ;;  %v8940_v7 = vld [vmem:[#allocation12 + $0x2f0] ss:$8 sps:$4 sm:$0xff]   ;;  %v7372_v57 = vpack.c.b16 %v12235_v1, %v12235_v1 }
 0x528   : > { %6658 = vmatprep.subr.bf16.mxu1 %v8864_v45  ;;  %7148 = vmatprep.subr.bf16.mxu0 %v8867_v18  ;;  %v8945_v14 = vld [vmem:[#allocation12 + $0x2e4] ss:$8 sps:$4 sm:$0xff]   ;;  %v8943_v45 = vld [vmem:[#allocation12 + $0x2e0] ss:$8 sps:$4 sm:$0xff]   ;;  %v8948_v18 = vld [vmem:[#allocation12 + $0x2d4] ss:$8 sps:$4 sm:$0xff]  }
 0x529   : > { %v8954_v43 = vld [vmem:[#allocation12 + $0x2b4] ss:$8 sps:$4 sm:$0xff]   ;;  %v8957_v1 = vld [vmem:[#allocation12 + $0x2a4] ss:$8 sps:$4 sm:$0xff]  }
 0x52b   : > { %6659 = vmatpush1.bf16.msra.mxu1 %v8862_v8  ;;  %7149 = vmatpush1.bf16.msra.mxu0 %v8865_v54  ;;  %v8946_v8 = vld [vmem:[#allocation12 + $0x2d0] ss:$8 sps:$4 sm:$0xff]   ;;  %v8951_v54 = vld [vmem:[#allocation12 + $0x2c4] ss:$8 sps:$4 sm:$0xff]  }
 0x52c   : > { %6660 = vmatprep.subr.bf16.mxu1 %v8870_v22  ;;  %7150 = vmatprep.subr.bf16.mxu0 %v8873_v28  ;;  %v8949_v22 = vld [vmem:[#allocation12 + $0x2c0] ss:$8 sps:$4 sm:$0xff]   ;;  %v8952_v28 = vld [vmem:[#allocation12 + $0x2b0] ss:$8 sps:$4 sm:$0xff]  }
 0x52f   : > { %6661 = vmatpush1.bf16.msra.mxu1 %v8868_v6  ;;  %7151 = vmatpush1.bf16.msra.mxu0 %v8871_v9  ;;  %v8955_v6 = vld [vmem:[#allocation12 + $0x2a0] ss:$8 sps:$4 sm:$0xff]   ;;  %v8960_v9 = vld [vmem:[#allocation12 + $0x294] ss:$8 sps:$4 sm:$0xff]  }
 0x530   : > { %6662 = vmatprep.subr.bf16.mxu1 %v8876_v63  ;;  %7152 = vmatprep.subr.bf16.mxu0 %v8879_v55  ;;  %v8958_v63 = vld [vmem:[#allocation12 + $0x290] ss:$8 sps:$4 sm:$0xff]   ;;  %v8963_v55 = vld [vmem:[#allocation12 + $0x284] ss:$8 sps:$4 sm:$0xff]  }
 0x533   : > { %6663 = vmatpush1.bf16.msra.mxu1 %v8874_v50  ;;  %7153 = vmatpush1.bf16.msra.mxu0 %v8877_v40  ;;  %v8961_v50 = vld [vmem:[#allocation12 + $0x280] ss:$8 sps:$4 sm:$0xff]   ;;  %v8966_v40 = vld [vmem:[#allocation12 + $0x3f4] ss:$8 sps:$4 sm:$0xff]  }
 0x534   : > { %6664 = vmatprep.subr.bf16.mxu1 %v8882_v13  ;;  %7154 = vmatprep.subr.bf16.mxu0 %v8885_v3  ;;  %v8964_v13 = vld [vmem:[#allocation12 + $0x3f0] ss:$8 sps:$4 sm:$0xff]   ;;  %v7216_v3 = vpack.c.b16 %v12238_v36, %v12238_v36  ;;  %v8981_v36 = vld [vmem:[#allocation12 + $0x3a4] ss:$8 sps:$4 sm:$0xff]  }
 0x537   : > { %6665 = vmatpush1.bf16.msra.mxu1 %v8880_v47  ;;  %7155 = vmatpush1.bf16.msra.mxu0 %v8883_v31  ;;  %v8969_v47 = vld [vmem:[#allocation12 + $0x3e4] ss:$8 sps:$4 sm:$0xff]   ;;  %v8967_v31 = vld [vmem:[#allocation12 + $0x3e0] ss:$8 sps:$4 sm:$0xff]  }
 0x538   : > { %6666 = vmatprep.subr.bf16.mxu1 %v8888_v11  ;;  %7156 = vmatprep.subr.bf16.mxu0 %v8891_v15  ;;  %v8972_v11 = vld [vmem:[#allocation12 + $0x3d4] ss:$8 sps:$4 sm:$0xff]   ;;  %v8970_v15 = vld [vmem:[#allocation12 + $0x3d0] ss:$8 sps:$4 sm:$0xff]  }
 0x53b   : > { %6667 = vmatpush1.bf16.msra.mxu1 %v8886_v53  ;;  %7157 = vmatpush1.bf16.msra.mxu0 %v8889_v12  ;;  %v8975_v53 = vld [vmem:[#allocation12 + $0x3c4] ss:$8 sps:$4 sm:$0xff]   ;;  %v8973_v12 = vld [vmem:[#allocation12 + $0x3c0] ss:$8 sps:$4 sm:$0xff]  }
 0x53c   : > { %6962 = vmatprep.subr.bf16.mxu1 %v8894_v49  ;;  %7454 = vmatprep.subr.bf16.mxu0 %v8897_v41  ;;  %v8978_v49 = vld [vmem:[#allocation12 + $0x3b4] ss:$8 sps:$4 sm:$0xff]   ;;  %v8976_v41 = vld [vmem:[#allocation12 + $0x3b0] ss:$8 sps:$4 sm:$0xff]  }
 0x53e   : > { %6685 = vmatmul.mubr.bf16.vlgmr.msra.gmra.mxu1 %v6570_v51  ;;  %7175 = vmatmul.mubr.bf16.vlgmr.msra.gmra.mxu0 %v7060_v58  ;;  %v8987_v51 = vld [vmem:[#allocation12 + $0x384] ss:$8 sps:$4 sm:$0xff]   ;;  %v8985_v58 = vld [vmem:[#allocation12 + $0x380] ss:$8 sps:$4 sm:$0xff]  }
 0x53f   : > { %6963 = vmatpush1.bf16.msra.mxu1 %v8892_v4  ;;  %7455 = vmatpush1.bf16.msra.mxu0 %v8895_v60  ;;  %v8979_v4 = vld [vmem:[#allocation12 + $0x3a0] ss:$8 sps:$4 sm:$0xff]   ;;  %v8984_v60 = vld [vmem:[#allocation12 + $0x394] ss:$8 sps:$4 sm:$0xff]  }
 0x540   : > { %6964 = vmatprep.subr.bf16.mxu1 %v8900_v5  ;;  %7456 = vmatprep.subr.bf16.mxu0 %v8903_v20  ;;  %v7528_v5 = vpack.c.b16 %v12241_v29, %v12241_v29  ;;  %v8988_v20 = vld [vmem:[#allocation13 + $0x78] sm:$0xff]  }
 0x541   : > { %6994 = vmatprep.mubr.bf16.mxu1 %v12931_v21  ;;  %7486 = vmatprep.mubr.bf16.mxu0 %v12931_v21 }
 0x543   : > { %6965 = vmatpush1.bf16.msra.mxu1 %v8898_v59  ;;  %7457 = vmatpush1.bf16.msra.mxu0 %v8901_v32  ;;  %v8989_v59 = vld [vmem:[#allocation13 + $0x38] sm:$0xff]   ;;  %v8990_v32 = vld [vmem:[#allocation13 + $0x70] sm:$0xff]  }
 0x544   : > { %6966 = vmatprep.subr.bf16.mxu1 %v8906_v25  ;;  %7458 = vmatprep.subr.bf16.mxu0 %v8909_v35  ;;  %v8991_v25 = vld [vmem:[#allocation13 + $0x30] sm:$0xff]   ;;  %v8992_v35 = vld [vmem:[#allocation13 + $0x68] sm:$0xff]  }
 0x547   : > { %6967 = vmatpush1.bf16.msra.mxu1 %v8904_v62  ;;  %7459 = vmatpush1.bf16.msra.mxu0 %v8907_v23  ;;  %v8993_v62 = vld [vmem:[#allocation13 + $0x28] sm:$0xff]   ;;  %v8994_v23 = vld [vmem:[#allocation13 + $0x60] sm:$0xff]  }
 0x548   : > { %6968 = vmatprep.subr.bf16.mxu1 %v8912_v48  ;;  %7460 = vmatprep.subr.bf16.mxu0 %v8915_v61  ;;  %v8995_v48 = vld [vmem:[#allocation13 + $0x20] sm:$0xff]   ;;  %v8996_v61 = vld [vmem:[#allocation13 + $0x58] sm:$0xff]  }
 0x54b   : > { %6969 = vmatpush1.bf16.msra.mxu1 %v8910_v44  ;;  %7461 = vmatpush1.bf16.msra.mxu0 %v8913_v52  ;;  %v8997_v44 = vld [vmem:[#allocation13 + $0x18] sm:$0xff]  }
 0x54c   : > { %6970 = vmatprep.subr.bf16.mxu1 %v8918_v0  ;;  %7462 = vmatprep.subr.bf16.mxu0 %v8921_v27 }
 0x54f   : > { %6971 = vmatpush1.bf16.msra.mxu1 %v8916_v38  ;;  %7463 = vmatpush1.bf16.msra.mxu0 %v8919_v24 }
 0x550   : > { %6972 = vmatprep.subr.bf16.mxu1 %v8924_v17  ;;  %7464 = vmatprep.subr.bf16.mxu0 %v8927_v33 }
 0x553   : > { %6973 = vmatpush1.bf16.msra.mxu1 %v8922_v34  ;;  %7465 = vmatpush1.bf16.msra.mxu0 %v8925_v26  ;;  %v8998_v34 = vld [vmem:[#allocation13 + $0x50] sm:$0xff]  }
 0x554   : > { %6974 = vmatprep.subr.bf16.mxu1 %v8930_v10  ;;  %7466 = vmatprep.subr.bf16.mxu0 %v8933_v46  ;;  %v8999_v26 = vld [vmem:[#allocation13 + $0x10] sm:$0xff]   ;;  %v9000_v10 = vld [vmem:[#allocation13 + $0x48] sm:$0xff]  }
 0x555   : > { %v9001_v46 = vld [vmem:[#allocation13 + $0x8] sm:$0xff]  }
 0x557   : > { %6975 = vmatpush1.bf16.msra.mxu1 %v8928_v56  ;;  %7467 = vmatpush1.bf16.msra.mxu0 %v8931_v30  ;;  %v9002_v56 = vld [vmem:[#allocation13 + $0x40] sm:$0xff]  }
 0x558   : > { %6976 = vmatprep.subr.bf16.mxu1 %v8936_v37  ;;  %7468 = vmatprep.subr.bf16.mxu0 %v8939_v2  ;;  %v9003_v30 = vld [vmem:[#allocation13] sm:$0xff]  }
 0x55b   : > { %6977 = vmatpush1.bf16.msra.mxu1 %v8934_v39  ;;  %7469 = vmatpush1.bf16.msra.mxu0 %v8937_v16 }
 0x55c   : > { %7298 = vmatprep.subr.bf16.mxu1 %v8942_v19  ;;  %8410 = vmatprep.subr.bf16.mxu0 %v8988_v20 }
 0x55e   : > { %6995 = vmatmul.mubr.bf16.vlgmr.msra.gmra.mxu1 %v6880_v42  ;;  %7487 = vmatmul.mubr.bf16.vlgmr.msra.gmra.mxu0 %v7372_v57 }
 0x55f   : > { %7299 = vmatpush1.bf16.msra.mxu1 %v8940_v7  ;;  %7330 = vmatprep.mubr.bf16.mxu1 %v12931_v21 }
 0x560   : > { %7300 = vmatprep.subr.bf16.mxu1 %v8945_v14  ;;  %8411 = vmatpush3.bf16.msra.mxu0 %v8989_v59 }
 0x561   : > { %8412 = vmatprep.subr.bf16.mxu0 %v8990_v32 }
 0x563   : > { %7301 = vmatpush1.bf16.msra.mxu1 %v8943_v45 }
 0x564   : > { %7302 = vmatprep.subr.bf16.mxu1 %v8948_v18  ;;  %8413 = vmatpush3.bf16.msra.mxu0 %v8991_v25 }
 0x565   : > { %8414 = vmatprep.subr.bf16.mxu0 %v8992_v35 }
 0x567   : > { %7303 = vmatpush1.bf16.msra.mxu1 %v8946_v8 }
 0x568   : > { %7304 = vmatprep.subr.bf16.mxu1 %v8951_v54  ;;  %8415 = vmatpush3.bf16.msra.mxu0 %v8993_v62 }
 0x569   : > { %8416 = vmatprep.subr.bf16.mxu0 %v8994_v23 }
 0x56b   : > { %7305 = vmatpush1.bf16.msra.mxu1 %v8949_v22 }
 0x56c   : > { %7306 = vmatprep.subr.bf16.mxu1 %v8954_v43  ;;  %8417 = vmatpush3.bf16.msra.mxu0 %v8995_v48 }
 0x56d   : > { %8418 = vmatprep.subr.bf16.mxu0 %v8996_v61 }
 0x56f   : > { %7307 = vmatpush1.bf16.msra.mxu1 %v8952_v28 }
 0x570   : > { %7308 = vmatprep.subr.bf16.mxu1 %v8957_v1  ;;  %8419 = vmatpush3.bf16.msra.mxu0 %v8997_v44 }
 0x571   : > { %8420 = vmatprep.subr.bf16.mxu0 %v8998_v34 }
 0x573   : > { %7309 = vmatpush1.bf16.msra.mxu1 %v8955_v6 }
 0x574   : > { %7310 = vmatprep.subr.bf16.mxu1 %v8960_v9  ;;  %8421 = vmatpush3.bf16.msra.mxu0 %v8999_v26 }
 0x575   : > { %8422 = vmatprep.subr.bf16.mxu0 %v9000_v10 }
 0x577   : > { %7311 = vmatpush1.bf16.msra.mxu1 %v8958_v63 }
 0x578   : > { %7312 = vmatprep.subr.bf16.mxu1 %v8963_v55  ;;  %8423 = vmatpush3.bf16.msra.mxu0 %v9001_v46 }
 0x579   : > { %8424 = vmatprep.subr.bf16.mxu0 %v9002_v56 }
 0x57b   : > { %7313 = vmatpush1.bf16.msra.mxu1 %v8961_v50 }
 0x57c   : > { %7610 = vmatprep.subr.bf16.mxu1 %v8966_v40  ;;  %8425 = vmatpush3.bf16.msra.mxu0 %v9003_v30 }
 0x57e   : > { %7331 = vmatmul.mubr.bf16.vlgmr.msra.gmra.mxu1 %v7216_v3 }
 0x57f   : > { %7611 = vmatpush1.bf16.msra.mxu1 %v8964_v13  ;;  %7642 = vmatprep.mubr.bf16.mxu1 %v12931_v21  ;;  %v8982_v21 = vld [vmem:[#allocation12 + $0x390] ss:$8 sps:$4 sm:$0xff]  }
 0x580   : > { %7612 = vmatprep.subr.bf16.mxu1 %v8969_v47 }
 0x583   : > { %7613 = vmatpush1.bf16.msra.mxu1 %v8967_v31 }
 0x584   : > { %7614 = vmatprep.subr.bf16.mxu1 %v8972_v11 }
 0x587   : > { %7615 = vmatpush1.bf16.msra.mxu1 %v8970_v15 }
 0x588   : > { %7616 = vmatprep.subr.bf16.mxu1 %v8975_v53 }
 0x58b   : > { %7617 = vmatpush1.bf16.msra.mxu1 %v8973_v12  ;;  %v7653_v12 = vld [vmem:[%s12317_s6] sm:$0x3] }
 0x58c   : > { %7618 = vmatprep.subr.bf16.mxu1 %v8978_v49 }
 0x58f   : > { %7619 = vmatpush1.bf16.msra.mxu1 %v8976_v41  ;;  %v12932_v41 = vld [vmem:[#allocation200_spill] sm:$0xff] }
 0x590   : > { %7620 = vmatprep.subr.bf16.mxu1 %v8981_v36  ;;  %v7658_v36 = vrot.slane %v7653_v12, %v12932_v41 }
 0x593   : > { %7621 = vmatpush1.bf16.msra.mxu1 %v8979_v4 }
 0x594   : > { %7622 = vmatprep.subr.bf16.mxu1 %v8984_v60 }
 0x597   : > { %7623 = vmatpush1.bf16.msra.mxu1 %v8982_v21 }
 0x598   : > { %7624 = vmatprep.subr.bf16.mxu1 %v8987_v51  ;;  %v12933_v51 = vld [vmem:[#allocation201_spill] sm:$0xff] }
 0x59b   : > { %7625 = vmatpush1.bf16.msra.mxu1 %v8985_v58  ;;  %v7662_v58 = vrot.slane %v7653_v12, %v12933_v51 }
 0x59e   : > { %7643 = vmatmul.mubr.bf16.vlgmr.msra.gmra.mxu1 %v7528_v5 }
 0x5de   : > { %v6549_v29 = vpop.f32.mrf.mxu1  ;;  %v6840_v52 = vpop.f32.mrf.mxu0 }
 0x5e0   : > { %v6551_v0 = vpop.f32.mrf.mxu1  ;;  %v6842_v27 = vpop.f32.mrf.mxu0 }
 0x5e2   : > { %v6553_v38 = vpop.f32.mrf.mxu1  ;;  %v6844_v24 = vpop.f32.mrf.mxu0 }
 0x5e4   : > { %v6554_v17 = vpop.f32.mrf.mxu1  ;;  %v6845_v33 = vpop.f32.mrf.mxu0 }
 0x5fe   : > { %v6686_v37 = vpop.f32.mrf.mxu1  ;;  %v7176_v2 = vpop.f32.mrf.mxu0 }
 0x5ff   : > { %v6687_v39 = vadd.f32 %v6686_v37, %v6549_v29  ;;  %v8389_v29 = vld [vmem:[%s12319_s8] ss:$0 sm:$0xff] }
 0x600   : > { %v6688_v16 = vpop.f32.mrf.mxu1  ;;  %v7178_v19 = vpop.f32.mrf.mxu0 }
 0x601   : > { %v6689_v7 = vadd.f32 %v6688_v16, %v6551_v0  ;;  %v6847_v42 = vadd.f32 %v6840_v52, %v6687_v39 }
 0x602   : > { %v6690_v57 = vpop.f32.mrf.mxu1  ;;  %v7180_v14 = vpop.f32.mrf.mxu0 }
 0x603   : > { %v6848_v45 = vadd.f32 %v6842_v27, %v6689_v7 }
 0x604   : > { %v6691_v18 = vpop.f32.mrf.mxu1  ;;  %v7181_v8 = vpop.f32.mrf.mxu0 }
 0x61e   : > { %v6996_v54 = vpop.f32.mrf.mxu1  ;;  %v7488_v22 = vpop.f32.mrf.mxu0 }
 0x61f   : > { %v7003_v43 = vadd.f32 %v6996_v54, %v6847_v42 }
 0x620   : > { %v6998_v28 = vpop.f32.mrf.mxu1  ;;  %v7490_v1 = vpop.f32.mrf.mxu0 }
 0x621   : > { %v7004_v6 = vadd.f32 %v6998_v28, %v6848_v45  ;;  %v7183_v9 = vadd.f32 %v7176_v2, %v7003_v43 }
 0x622   : > { %v7000_v63 = vpop.f32.mrf.mxu1  ;;  %v7492_v55 = vpop.f32.mrf.mxu0 }
 0x623   : > { %v7184_v50 = vadd.f32 %v7178_v19, %v7004_v6 }
 0x624   : > { %v7001_v40 = vpop.f32.mrf.mxu1  ;;  %v7493_v13 = vpop.f32.mrf.mxu0 }
 0x63e   : > { %v7332_v3 = vpop.f32.mrf.mxu1 }
 0x63f   : > { %v7339_v47 = vadd.f32 %v7332_v3, %v7183_v9 }
 0x640   : > { %v7334_v31 = vpop.f32.mrf.mxu1 }
 0x641   : > { %v7495_v11 = vadd.f32 %v7488_v22, %v7339_v47  ;;  %v7340_v49 = vadd.f32 %v7334_v31, %v7184_v50 }
 0x642   : > { %v7336_v15 = vpop.f32.mrf.mxu1 }
 0x643   : > { %v7496_v21 = vadd.f32 %v7490_v1, %v7340_v49 }
 0x644   : > { %v7337_v53 = vpop.f32.mrf.mxu1 }
 0x65e   : > { %v7644_v4 = vpop.f32.mrf.mxu1 }
 0x65f   : > { %v7651_v60 = vadd.f32 %v7644_v4, %v7495_v11 }
 0x660   : > { %v7646_v5 = vpop.f32.mrf.mxu1 }
 0x661   : > { %v7665_v20 = vadd.f32 %v7658_v36, %v7651_v60  ;;  %v7652_v59 = vadd.f32 %v7646_v5, %v7496_v21 }
 0x662   : > { %v7648_v32 = vpop.f32.mrf.mxu1 }
 0x663   : > { %v7666_v25 = vadd.f32 %v7662_v58, %v7652_v59  ;;  %v7667_v35 = vmax.f32 %v7665_v20, 0.0 }
 0x664   : > { %v7649_v62 = vpop.f32.mrf.mxu1 }
 0x665   : > { %v7668_v23 = vmax.f32 %v7666_v25, 0.0  ;;  %v7669_v61 = vpack.c.bf16 %v7667_v35, %v7667_v35 }
 0x667   : > { %v7670_v48 = vpack.c.bf16 %v7668_v23, %v7668_v23 }
 0x669   : > { %7838 = vmatprep.mubr.bf16.mxu0 %v7670_v48 }
 0x66a   : > { %7839 = vmatmul.mubr.bf16.vlgmr.msra.gmra.mxu0 %v7669_v61 }
 0x72a   : > { %v8426_v44 = vpop.f32.mrf.mxu0 }
 0x72c   : > { %v8427_v52 = vpop.f32.mrf.mxu0 }
 0x72d   : > { %v8428_v0 = vadd.f32 %v8427_v52, %v8426_v44 }
 0x72e   : > { %v8429_v27 = vpop.f32.mrf.mxu0 }
 0x72f   : > { %v7841_v38 = vadd.f32 %v8428_v0, %v8389_v29 }
 0x730   : > { %v8430_v24 = vpop.f32.mrf.mxu0 }
 0x731   : > { %7846 = vst [vmem:[%s422_s3] sm:$0xff] %v7841_v38 }
 0x732   : > { %9185 = shalt.err (!%p9182_p3)
}
 0x733   : > { %s9186_s28 = scalar_lea.hbm %s12274_s16, 128  ;;  %s9190_s25 = scalar_lea.hbm %s12320_s9, 256 }
 0x734   : > { %p9187_p4 = scmp.ne.s32.totalorder %s12274_s16, %s9186_s28  ;;  %p9191_p2 = scmp.lt.s32.totalorder %s12274_s16, %s12320_s9 }
 0x735   : > { %p9192_p5 = scmp.lt.s32.totalorder %s9190_s25, %s9186_s28 }
 0x736   : > { %p9188_p12 = pnand %p9187_p4, %p12934_p11 }
 0x737   : > { %p9193_p8 = por %p9192_p5, %p9191_p2 }
 0x738   : > { %p9189_p6 = pneg %p9188_p12 }
 0x73a   : > { %p9194_p10 = pnand %p9193_p8, %p9189_p6 }
 0x73c   : > { %9197 = shalt.err (!%p9194_p10)
}
 0x73d   : > { %8457 = dma.vmem_to_hbm [thread:$0]  (%p12934_p11), %s7862_s24, 128, %s12274_s16, %s7848_s29  }
 0x73e PF: > { %s7873_s3 = sand.u32 1, %s9236_s30   ;;  %p12935_p0 = scmp.ne.s32.totalorder %s12349_s17, 0 }
 0x73f   : > { %p12936_p13 = scmp.ge.s32.totalorder %s9248_s12, 2  ;;  %s7874_s26 = scalar_lea.sflag [#allocation6], %s7873_s3 }
 0x741   : > { %p8480_p7 = pnand %p12936_p13, %p12935_p0 }
 0x743   : > { %p8481_p9 = pneg %p8480_p7 }
 0x745   : > { %9231 = dma.done.wait (%p8481_p9), %s7874_s26, 128  }
 0x746   : > { %9233 = vsyncadd (%p8481_p9), %s7874_s26, 4294967168  ;;  %p25_p1 = scmp.ge.s32.totalorder %s9417_s18, 4   ;;  %s12937_s30 = smov %s9240_s10 }
 0x747   : > { %s12938_s10 = smov %s9244_s11  ;;  %s12939_s11 = smov %s9429_s21 }
 0x748   : > { %s12940_s12 = smov %s9417_s18  ;;  %27 = sbr.rel (!%p25_p1) target bundleno = 12 (0xc), region = 147 }
 0x74d   :  { %7879 = vsyncpa [#allocation5], 1 }
 0x74e   :  { %7881 = vsyncpa [#allocation5 + $0x1], 1 }
 0x74f   :  { %7882 = vsyncpa [#allocation8], 1 }
 0x750   :  { %7883 = vsyncpa [#allocation11], 1 }
 0x751   :  { %7884 = vsyncpa [#allocation14], 1 }
 0x752   :  { %7885 = vsyncpa [#allocation6], 1 }
 0x753   :  { %7887 = vsyncpa [#allocation6 + $0x1], 1 }

</bundles_post_ra>
